<compile_context>
chip_gen: v7x
topology: tpu7x:2x2x1
jax: 0.10.0
libtpu: 0.0.40
codegen_flags: <defaults>
</compile_context>

<pallas_src>
import functools

import jax
import jax.numpy as jnp
from jax.experimental import pallas as pl
from jax.experimental.pallas import tpu as pltpu

# ----------------------------- config ---------------------------------------
HIDDEN = 32
HEADS = 4
HEAD_DIM = HIDDEN // HEADS
D_FF = 64
NUM_PATCHES = 16              # 4 x 4 patch grid
PATCH_PIXEL_DIM = 18
PATCH_DIM = 2 + PATCH_PIXEL_DIM   # [row_id, col_id, pixels...] like Pix2Struct
VOCAB = 64
VOCAB_PAD = 128               # lane-dense LM head / logits
ENC_LAYERS = 2
DEC_LAYERS = 2
MAX_POS = 32
PAD_ID = 0                    # decoder_start_token_id == pad in Pix2Struct
EOS_ID = 1
NEG_INF = -1e9


# ----------------------------- in-kernel helpers -----------------------------
def _rms(x, w):
    """Pix2StructLayerNorm == T5 RMSNorm (statistics kept in f32)."""
    var = jnp.mean(x * x, axis=-1, keepdims=True)
    return x * jax.lax.rsqrt(var + 1e-6) * w


def _mha_enc(q, k, v, bias, wo):
    """Encoder self-attention.  q,k,v:(P,D) f32, bias:(P,P) f32, wo:(D,D) bf16.

    T5/Pix2Struct attention (no 1/sqrt(d) scale).  Heads are static lane
    slices; the output projection is folded in per head.
    TODO(synk): at real head_dim (>=64) fold heads into one batched
    contraction instead of the per-head loop (HEAD_DIM=8 here).
    """
    out = jnp.zeros((q.shape[0], HIDDEN), jnp.float32)
    qb = q.astype(jnp.bfloat16)
    kb = k.astype(jnp.bfloat16)
    vb = v.astype(jnp.bfloat16)
    for h in range(HEADS):
        sl = slice(h * HEAD_DIM, (h + 1) * HEAD_DIM)
        s = jnp.einsum('qd,kd->qk', qb[:, sl], kb[:, sl],
                       preferred_element_type=jnp.float32) + bias
        m = jnp.max(s, axis=-1, keepdims=True)
        p = jnp.exp(s - m)
        p = p * pl.reciprocal(jnp.sum(p, axis=-1, keepdims=True), approx=True)
        ctx = jnp.dot(p.astype(jnp.bfloat16), vb[:, sl],
                      preferred_element_type=jnp.float32)
        out = out + jnp.dot(ctx.astype(jnp.bfloat16), wo[sl, :],
                            preferred_element_type=jnp.float32)
    return out


def _mha_dec(q, k, v, bias, wo):
    """Decode-step attention, batch folded.  q:(B,1,D) f32, k,v:(B,Tk,D),
    bias:(B,1,Tk) f32, wo:(D,D) bf16 -> (B,D) f32.  Batched einsums, no .T."""
    out = jnp.zeros((q.shape[0], HIDDEN), jnp.float32)
    qb = q.astype(jnp.bfloat16)
    kb = k.astype(jnp.bfloat16)
    vb = v.astype(jnp.bfloat16)
    for h in range(HEADS):
        sl = slice(h * HEAD_DIM, (h + 1) * HEAD_DIM)
        s = jnp.einsum('bqd,bkd->bqk', qb[:, :, sl], kb[:, :, sl],
                       preferred_element_type=jnp.float32) + bias     # (B,1,Tk)
        m = jnp.max(s, axis=-1, keepdims=True)
        p = jnp.exp(s - m)
        p = p * pl.reciprocal(jnp.sum(p, axis=-1, keepdims=True), approx=True)
        ctx = jnp.einsum('bqk,bkd->bqd', p.astype(jnp.bfloat16), vb[:, :, sl],
                         preferred_element_type=jnp.float32)          # (B,1,hd)
        out = out + jnp.dot(ctx[:, 0, :].astype(jnp.bfloat16), wo[sl, :],
                            preferred_element_type=jnp.float32)
    return out


def _geglu(h, wi0, wi1, wom):
    """Gated-GELU MLP; gelu pinned to the tanh approximation (HF gelu_new)."""
    hb = h.astype(jnp.bfloat16)
    h0 = jnp.dot(hb, wi0, preferred_element_type=jnp.float32)
    h1 = jnp.dot(hb, wi1, preferred_element_type=jnp.float32)
    g = jax.nn.gelu(h0, approximate=True) * h1
    return jnp.dot(g.astype(jnp.bfloat16), wom,
                   preferred_element_type=jnp.float32)


def _w(arr):
    """Full-array (un-tiled) BlockSpec for a weight, same block every step."""
    nd = arr.ndim
    return pl.BlockSpec(arr.shape, lambda i, nd=nd: (0,) * nd)


# ----------------------------- encoder kernel --------------------------------
def _encoder_kernel(pix_ref, pos_ref, kbias_ref, pproj_ref,
                    ln1_ref, wqkv_ref, wo_ref, ln2_ref,
                    wi0_ref, wi1_ref, wom_ref, lnf_ref, out_ref):
    # Patch projection + (row/col) position embeddings.
    x = jnp.dot(pix_ref[0].astype(jnp.bfloat16), pproj_ref[...],
                preferred_element_type=jnp.float32) + pos_ref[0]
    P = x.shape[0]
    bias = jnp.broadcast_to(kbias_ref[0], (P, P))     # hoisted key-mask bias
    for l in range(ENC_LAYERS):
        h = _rms(x, ln1_ref[l])
        qkv = jnp.dot(h.astype(jnp.bfloat16), wqkv_ref[l],
                      preferred_element_type=jnp.float32)          # (P, 3D)
        x = x + _mha_enc(qkv[:, :HIDDEN], qkv[:, HIDDEN:2 * HIDDEN],
                         qkv[:, 2 * HIDDEN:], bias, wo_ref[l])
        h = _rms(x, ln2_ref[l])
        x = x + _geglu(h, wi0_ref[l], wi1_ref[l], wom_ref[l])
    out_ref[0] = _rms(x, lnf_ref[...]).astype(out_ref.dtype)


def pallas_encode(params, patches, mask):
    """patches:(B,P,PATCH_DIM)  mask:(B,P) -> (B,P,HIDDEN) bf16."""
    B, P, _ = patches.shape
    row_ids = jnp.clip(patches[:, :, 0].astype(jnp.int32), 0, MAX_POS - 1)
    col_ids = jnp.clip(patches[:, :, 1].astype(jnp.int32), 0, MAX_POS - 1)
    pos_emb = params["row_emb"][row_ids] + params["col_emb"][col_ids]
    key_bias = ((1.0 - mask.astype(jnp.float32)) * NEG_INF).reshape(B, 1, P)
    pix = patches[:, :, 2:]
    e = params["enc"]
    # Encoder runs once per generate() call, so grid=(B,) overhead is noise;
    # the hot decode path below folds B into M instead.
    return pl.pallas_call(
        _encoder_kernel,
        out_shape=jax.ShapeDtypeStruct((B, P, HIDDEN), jnp.bfloat16),
        grid=(B,),
        in_specs=[
            pl.BlockSpec((1, P, PATCH_PIXEL_DIM), lambda b: (b, 0, 0)),
            pl.BlockSpec((1, P, HIDDEN), lambda b: (b, 0, 0)),
            pl.BlockSpec((1, 1, P), lambda b: (b, 0, 0)),
            _w(params["patch_proj"]),
            _w(e["ln1"]), _w(e["wqkv"]), _w(e["wo"]), _w(e["ln2"]),
            _w(e["wi0"]), _w(e["wi1"]), _w(e["wom"]),
            _w(params["enc_final_ln"]),
        ],
        out_specs=pl.BlockSpec((1, P, HIDDEN), lambda b: (b, 0, 0)),
        compiler_params=pltpu.CompilerParams(
            dimension_semantics=("parallel",)),
    )(pix, pos_emb, key_bias, params["patch_proj"],
      e["ln1"], e["wqkv"], e["wo"], e["ln2"],
      e["wi0"], e["wi1"], e["wom"], params["enc_final_ln"])


# ----------------------- cross-attention K/V precompute ----------------------
def _cross_kv_kernel(enc_ref, wkv_ref, ck_ref, cv_ref):
    e = enc_ref[0].astype(jnp.bfloat16)                       # (P, D)
    for l in range(DEC_LAYERS):
        kv = jnp.dot(e, wkv_ref[l], preferred_element_type=jnp.float32)
        ck_ref[l, 0] = kv[:, :HIDDEN].astype(ck_ref.dtype)
        cv_ref[l, 0] = kv[:, HIDDEN:].astype(cv_ref.dtype)


def pallas_cross_kv(params, enc_out):
    B, P, _ = enc_out.shape
    d = params["dec"]
    ckv_spec = pl.BlockSpec((DEC_LAYERS, 1, P, HIDDEN), lambda b: (0, b, 0, 0))
    return pl.pallas_call(
        _cross_kv_kernel,
        out_shape=(jax.ShapeDtypeStruct((DEC_LAYERS, B, P, HIDDEN), jnp.bfloat16),
                   jax.ShapeDtypeStruct((DEC_LAYERS, B, P, HIDDEN), jnp.bfloat16)),
        grid=(B,),
        in_specs=[pl.BlockSpec((1, P, HIDDEN), lambda b: (b, 0, 0)),
                  _w(d["wkv_cross"])],
        out_specs=(ckv_spec, ckv_spec),
        compiler_params=pltpu.CompilerParams(
            dimension_semantics=("parallel",)),
    )(enc_out, d["wkv_cross"])


# ---------------------- fused greedy-generation kernel -----------------------
def _generate_kernel(ck_ref, cv_ref, ekb_ref, temb_ref,
                     ln1_ref, wqkv_ref, wos_ref,
                     ln2_ref, wqc_ref, woc_ref,
                     ln3_ref, wi0_ref, wi1_ref, wom_ref,
                     lnf_ref, lmh_ref,
                     tok_ref,
                     kc_ref, vc_ref, x_ref, done_ref):
    """One grid step == one greedy decode step (weights stay resident in VMEM,
    KV cache / next-token embedding / done-flags persist in VMEM scratch)."""
    t = pl.program_id(0)
    B = x_ref.shape[0]
    Lmax = kc_ref.shape[2]

    @pl.when(t == 0)
    def _():
        kc_ref[...] = jnp.zeros_like(kc_ref)
        vc_ref[...] = jnp.zeros_like(vc_ref)
        done_ref[...] = jnp.zeros_like(done_ref)
        # decoder_start_token_id == PAD
        x_ref[...] = jnp.broadcast_to(temb_ref[PAD_ID:PAD_ID + 1, :],
                                      (B, HIDDEN))

    x = x_ref[...]                                            # (B, D) f32
    ekb = ekb_ref[...]                                        # (B, 1, P) f32
    # Causal bias over the KV cache (hoisted out of the layer/head loops).
    # TODO(synk): at real Lmax (512+) bound work by t with KV tiles + pl.when
    # instead of masking the full cache.
    pos = jax.lax.broadcasted_iota(jnp.int32, (1, 1, Lmax), 2)
    self_bias = jnp.broadcast_to(
        jnp.where(pos <= t, 0.0, NEG_INF).astype(jnp.float32), (B, 1, Lmax))
    # TODO(synk): T5-style relative position bias in decoder self-attention is
    # omitted (plain causal mask only), as in the previous version.

    for l in range(DEC_LAYERS):
        # ---- causal self-attention, single-row KV-cache update at position t
        h = _rms(x, ln1_ref[l])
        qkv = jnp.dot(h.astype(jnp.bfloat16), wqkv_ref[l],
                      preferred_element_type=jnp.float32)     # (B, 3D)
        q = qkv[:, :HIDDEN][:, None, :]                       # (B, 1, D)
        k_new = qkv[:, HIDDEN:2 * HIDDEN]                     # (B, D)
        v_new = qkv[:, 2 * HIDDEN:]
        for b in range(B):
            kc_ref[l, b, pl.ds(t, 1), :] = k_new[b:b + 1, :]
            vc_ref[l, b, pl.ds(t, 1), :] = v_new[b:b + 1, :]
        x = x + _mha_dec(q, kc_ref[l], vc_ref[l], self_bias, wos_ref[l])
        # ---- cross-attention over precomputed encoder K/V ----
        h = _rms(x, ln2_ref[l])
        qc = jnp.dot(h.astype(jnp.bfloat16), wqc_ref[l],
                     preferred_element_type=jnp.float32)[:, None, :]
        x = x + _mha_dec(qc, ck_ref[l], cv_ref[l], ekb, woc_ref[l])
        # ---- gated-GELU MLP ----
        h = _rms(x, ln3_ref[l])
        x = x + _geglu(h, wi0_ref[l], wi1_ref[l], wom_ref[l])

    # ---- tied LM head + in-kernel greedy argmax + EOS freeze ----
    # TODO(synk): verify Pix2Struct applies the hidden**-0.5 rescale with tied
    # embeddings; kept here to match the previous synthetic implementation.
    # TODO(synk): at real vocab (~50k) tile the LM head over the vocab axis.
    xf = _rms(x, lnf_ref[...]) * (HIDDEN ** -0.5)
    logits = jnp.dot(xf.astype(jnp.bfloat16), lmh_ref[...],
                     preferred_element_type=jnp.float32)      # (B, VOCAB_PAD)
    lane = jax.lax.broadcasted_iota(jnp.int32, (B, VOCAB_PAD), 1)
    logits = jnp.where(lane < VOCAB, logits, NEG_INF)
    mx = jnp.max(logits, axis=-1, keepdims=True)
    idx = jnp.min(jnp.where(logits == mx, lane.astype(jnp.float32),
                            float(VOCAB_PAD)),
                  axis=-1, keepdims=True).astype(jnp.int32)   # first argmax
    was_done = done_ref[...] > 0.5                            # (B, 1) bool
    nxt = jnp.where(was_done, PAD_ID, idx)                    # frozen rows: PAD
    done_ref[...] = jnp.logical_or(was_done, nxt == EOS_ID).astype(jnp.float32)
    tok_ref[...] = nxt[None, :, :]                            # (1, B, 1) int32
    # Next-step input embedding via one-hot matmul (stays on-chip).
    onehot = (lane == nxt).astype(jnp.float32)                # (B, VOCAB_PAD)
    x_ref[...] = jnp.dot(onehot, temb_ref[...],
                         preferred_element_type=jnp.float32)


def pallas_generate(params, cross_k, cross_v, enc_key_bias, max_new_tokens):
    _, B, P, _ = cross_k.shape
    d = params["dec"]
    full4 = lambda arr: pl.BlockSpec(arr.shape, lambda t: (0, 0, 0, 0))
    # TODO(synk): at real sizes the KV cache should be bf16 (u32-packed row
    # writes) and weights streamed per layer; at toy size f32 scratch is fine.
    return pl.pallas_call(
        _generate_kernel,
        out_shape=jax.ShapeDtypeStruct((max_new_tokens, B, 1), jnp.int32),
        grid=(max_new_tokens,),
        in_specs=[
            full4(cross_k), full4(cross_v),
            pl.BlockSpec((B, 1, P), lambda t: (0, 0, 0)),
            _w(params["tok_emb_pad"]),
            _w(d["ln1"]), _w(d["wqkv_self"]), _w(d["wo_self"]),
            _w(d["ln2"]), _w(d["wq_cross"]), _w(d["wo_cross"]),
            _w(d["ln3"]), _w(d["wi0"]), _w(d["wi1"]), _w(d["wom"]),
            _w(params["dec_final_ln"]), _w(params["lm_head"]),
        ],
        out_specs=pl.BlockSpec((1, B, 1), lambda t: (t, 0, 0)),
        scratch_shapes=[
            pltpu.VMEM((DEC_LAYERS, B, max_new_tokens, HIDDEN), jnp.float32),
            pltpu.VMEM((DEC_LAYERS, B, max_new_tokens, HIDDEN), jnp.float32),
            pltpu.VMEM((B, HIDDEN), jnp.float32),
            pltpu.VMEM((B, 1), jnp.float32),
        ],
        compiler_params=pltpu.CompilerParams(
            dimension_semantics=("arbitrary",)),
    )(cross_k, cross_v, enc_key_bias, params["tok_emb_pad"],
      d["ln1"], d["wqkv_self"], d["wo_self"],
      d["ln2"], d["wq_cross"], d["wo_cross"],
      d["ln3"], d["wi0"], d["wi1"], d["wom"],
      params["dec_final_ln"], params["lm_head"])


# ----------------------------- greedy generate --------------------------------
@functools.partial(jax.jit, static_argnames=("max_new_tokens",))
def deplot_generate(params, flattened_patches, attention_mask, max_new_tokens):
    """Mirrors HF .generate greedy decoding (freeze-after-EOS), fully on-device."""
    B, P, _ = flattened_patches.shape
    enc_out = pallas_encode(params, flattened_patches, attention_mask)
    cross_k, cross_v = pallas_cross_kv(params, enc_out)
    enc_key_bias = ((1.0 - attention_mask.astype(jnp.float32)) * NEG_INF
                    ).reshape(B, 1, P)
    new_toks = pallas_generate(params, cross_k, cross_v, enc_key_bias,
                               max_new_tokens)                 # (T, B, 1)
    gen = jnp.transpose(new_toks[:, :, 0], (1, 0))             # (B, T)
    start = jnp.full((B, 1), PAD_ID, jnp.int32)
    return jnp.concatenate([start, gen], axis=1)               # (B, T+1)


def deplot_forward(params, inputs, max_new_tokens=512):
    return deplot_generate(params, inputs["flattened_patches"],
                           inputs["attention_mask"], max_new_tokens)


# ----------------------------- params ----------------------------------------
def init_params(seed=42):
    keys = iter(jax.random.split(jax.random.PRNGKey(seed), 256))

    def nrm(shape, scale=0.02, dtype=jnp.bfloat16):
        return (jax.random.normal(next(keys), shape, jnp.float32) * scale
                ).astype(dtype)

    def ln(nl):
        return jnp.ones((nl, 1, HIDDEN), jnp.float32)

    enc = {
        "ln1": ln(ENC_LAYERS),
        "wqkv": nrm((ENC_LAYERS, HIDDEN, 3 * HIDDEN)),
        "wo": nrm((ENC_LAYERS, HIDDEN, HIDDEN)),
        "ln2": ln(ENC_LAYERS),
        "wi0": nrm((ENC_LAYERS, HIDDEN, D_FF)),
        "wi1": nrm((ENC_LAYERS, HIDDEN, D_FF)),
        "wom": nrm((ENC_LAYERS, D_FF, HIDDEN)),
    }
    dec = {
        "ln1": ln(DEC_LAYERS),
        "wqkv_self": nrm((DEC_LAYERS, HIDDEN, 3 * HIDDEN)),
        "wo_self": nrm((DEC_LAYERS, HIDDEN, HIDDEN)),
        "ln2": ln(DEC_LAYERS),
        "wq_cross": nrm((DEC_LAYERS, HIDDEN, HIDDEN)),
        "wkv_cross": nrm((DEC_LAYERS, HIDDEN, 2 * HIDDEN)),
        "wo_cross": nrm((DEC_LAYERS, HIDDEN, HIDDEN)),
        "ln3": ln(DEC_LAYERS),
        "wi0": nrm((DEC_LAYERS, HIDDEN, D_FF)),
        "wi1": nrm((DEC_LAYERS, HIDDEN, D_FF)),
        "wom": nrm((DEC_LAYERS, D_FF, HIDDEN)),
    }
    tok_emb = nrm((VOCAB, HIDDEN), dtype=jnp.float32)
    # Padded embedding table (one-hot gather in-kernel) + tied, lane-dense head.
    tok_emb_pad = jnp.zeros((VOCAB_PAD, HIDDEN), jnp.float32).at[:VOCAB].set(tok_emb)
    lm_head = tok_emb_pad.T.astype(jnp.bfloat16)               # (D, VOCAB_PAD)
    return {
        "patch_proj": nrm((PATCH_PIXEL_DIM, HIDDEN)),
        "row_emb": nrm((MAX_POS, HIDDEN), dtype=jnp.float32),
        "col_emb": nrm((MAX_POS, HIDDEN), dtype=jnp.float32),
        "enc": enc,
        "enc_final_ln": jnp.ones((1, HIDDEN), jnp.float32),
        "tok_emb_pad": tok_emb_pad,
        "lm_head": lm_head,
        "dec": dec,
        "dec_final_ln": jnp.ones((1, HIDDEN), jnp.float32),
    }


# ----------------------------- main -------------------------------------------
if __name__ == "__main__":
    B = 2
    key = jax.random.PRNGKey(0)
    k_pix, _ = jax.random.split(key)

    # flattened_patches = [row_id, col_id, pixels...] per patch (Pix2Struct style)
    pixels = jax.random.normal(k_pix, (B, NUM_PATCHES, PATCH_PIXEL_DIM),
                               jnp.float32)
    rows = jnp.repeat(jnp.arange(4, dtype=jnp.float32), 4)[None, :, None]
    cols = jnp.tile(jnp.arange(4, dtype=jnp.float32), 4)[None, :, None]
    rows = jnp.broadcast_to(rows, (B, NUM_PATCHES, 1))
    cols = jnp.broadcast_to(cols, (B, NUM_PATCHES, 1))
    flattened_patches = jnp.concatenate([rows, cols, pixels], axis=-1)
    attention_mask = jnp.ones((B, NUM_PATCHES), jnp.float32)

    inputs = {"flattened_patches": flattened_patches,
              "attention_mask": attention_mask}

    params = init_params(seed=42)
    max_new = 8
    out_ids = deplot_forward(params, inputs, max_new_tokens=max_new)
    jax.block_until_ready(out_ids)
    assert out_ids.shape == (B, max_new + 1) and out_ids.dtype == jnp.int32
    print("KERNEL_OK")
</pallas_src>

<mosaic_0001>
module attributes {stable_mosaic.version = 11 : i64} {
  func.func @_cross_kv_kernel(%arg0: i32, %arg1: memref<1x16x32xbf16, #tpu.memory_space<vmem>>, %arg2: memref<2x32x64xbf16, #tpu.memory_space<vmem>>, %arg3: memref<2x1x16x32xbf16, #tpu.memory_space<vmem>>, %arg4: memref<2x1x16x32xbf16, #tpu.memory_space<vmem>>) attributes {dimension_semantics = [#tpu.dimension_semantics<parallel>], iteration_bounds = array<i64: 2>, scalar_prefetch = 0 : i64, scratch_operands = 0 : i64, tpu.core_type = #tpu.core_type<tc>, window_params = [{transform_indices = @transform_0, window_bounds = array<i64: 1, 16, 32>}, {pipeline_mode = #tpu.pipeline_mode<synchronous>, transform_indices = @transform_1, window_bounds = array<i64: 2, 32, 64>}, {transform_indices = @transform_2, window_bounds = array<i64: 2, 1, 16, 32>}, {transform_indices = @transform_3, window_bounds = array<i64: 2, 1, 16, 32>}]} {
    %c0 = arith.constant 0 : index
    %c0_0 = arith.constant 0 : index
    %c0_1 = arith.constant 0 : index
    %0 = vector.load %arg1[%c0, %c0_0, %c0_1] : memref<1x16x32xbf16, #tpu.memory_space<vmem>>, vector<1x16x32xbf16>
    %1 = vector.shape_cast %0 : vector<1x16x32xbf16> to vector<16x32xbf16>
    %c0_2 = arith.constant 0 : index
    %c0_3 = arith.constant 0 : index
    %c0_4 = arith.constant 0 : index
    %2 = vector.load %arg2[%c0_2, %c0_3, %c0_4] : memref<2x32x64xbf16, #tpu.memory_space<vmem>>, vector<1x32x64xbf16>
    %3 = vector.shape_cast %2 : vector<1x32x64xbf16> to vector<32x64xbf16>
    %cst = arith.constant dense<0.000000e+00> : vector<16x64xf32>
    %4 = tpu.matmul %1, %3, %cst {dimension_numbers = #tpu.dot_dimension_numbers<[1], [0], [0], [1], [0, 0, 1, 1], [], []>} : vector<16x32xbf16>, vector<32x64xbf16>, vector<16x64xf32> -> vector<16x64xf32>
    %5 = vector.extract_strided_slice %4 {offsets = [0, 0], sizes = [16, 32], strides = [1, 1]} : vector<16x64xf32> to vector<16x32xf32>
    %6 = arith.truncf %5 : vector<16x32xf32> to vector<16x32xbf16>
    %c0_5 = arith.constant 0 : index
    %c0_6 = arith.constant 0 : index
    %c0_7 = arith.constant 0 : index
    %c0_8 = arith.constant 0 : index
    %7 = vector.load %arg3[%c0_5, %c0_6, %c0_7, %c0_8] : memref<2x1x16x32xbf16, #tpu.memory_space<vmem>>, vector<1x1x16x32xbf16>
    %8 = vector.shape_cast %7 : vector<1x1x16x32xbf16> to vector<16x32xbf16>
    %9 = vector.shape_cast %6 : vector<16x32xbf16> to vector<1x1x16x32xbf16>
    tpu.vector_store %arg3[%c0_5, %c0_6, %c0_7, %c0_8], %9 {strides = array<i32>} : memref<2x1x16x32xbf16, #tpu.memory_space<vmem>>, vector<1x1x16x32xbf16>,
    %10 = vector.extract_strided_slice %4 {offsets = [0, 32], sizes = [16, 32], strides = [1, 1]} : vector<16x64xf32> to vector<16x32xf32>
    %11 = arith.truncf %10 : vector<16x32xf32> to vector<16x32xbf16>
    %c0_9 = arith.constant 0 : index
    %c0_10 = arith.constant 0 : index
    %c0_11 = arith.constant 0 : index
    %c0_12 = arith.constant 0 : index
    %12 = vector.load %arg4[%c0_9, %c0_10, %c0_11, %c0_12] : memref<2x1x16x32xbf16, #tpu.memory_space<vmem>>, vector<1x1x16x32xbf16>
    %13 = vector.shape_cast %12 : vector<1x1x16x32xbf16> to vector<16x32xbf16>
    %14 = vector.shape_cast %11 : vector<16x32xbf16> to vector<1x1x16x32xbf16>
    tpu.vector_store %arg4[%c0_9, %c0_10, %c0_11, %c0_12], %14 {strides = array<i32>} : memref<2x1x16x32xbf16, #tpu.memory_space<vmem>>, vector<1x1x16x32xbf16>,
    %c1 = arith.constant 1 : index
    %c0_13 = arith.constant 0 : index
    %c0_14 = arith.constant 0 : index
    %15 = vector.load %arg2[%c1, %c0_13, %c0_14] : memref<2x32x64xbf16, #tpu.memory_space<vmem>>, vector<1x32x64xbf16>
    %16 = vector.shape_cast %15 : vector<1x32x64xbf16> to vector<32x64xbf16>
    %cst_15 = arith.constant dense<0.000000e+00> : vector<16x64xf32>
    %17 = tpu.matmul %1, %16, %cst_15 {dimension_numbers = #tpu.dot_dimension_numbers<[1], [0], [0], [1], [0, 0, 1, 1], [], []>} : vector<16x32xbf16>, vector<32x64xbf16>, vector<16x64xf32> -> vector<16x64xf32>
    %18 = vector.extract_strided_slice %17 {offsets = [0, 0], sizes = [16, 32], strides = [1, 1]} : vector<16x64xf32> to vector<16x32xf32>
    %19 = arith.truncf %18 : vector<16x32xf32> to vector<16x32xbf16>
    %c1_16 = arith.constant 1 : index
    %c0_17 = arith.constant 0 : index
    %c0_18 = arith.constant 0 : index
    %c0_19 = arith.constant 0 : index
    %20 = vector.load %arg3[%c1_16, %c0_17, %c0_18, %c0_19] : memref<2x1x16x32xbf16, #tpu.memory_space<vmem>>, vector<1x1x16x32xbf16>
    %21 = vector.shape_cast %20 : vector<1x1x16x32xbf16> to vector<16x32xbf16>
    %22 = vector.shape_cast %19 : vector<16x32xbf16> to vector<1x1x16x32xbf16>
    tpu.vector_store %arg3[%c1_16, %c0_17, %c0_18, %c0_19], %22 {strides = array<i32>} : memref<2x1x16x32xbf16, #tpu.memory_space<vmem>>, vector<1x1x16x32xbf16>,
    %23 = vector.extract_strided_slice %17 {offsets = [0, 32], sizes = [16, 32], strides = [1, 1]} : vector<16x64xf32> to vector<16x32xf32>
    %24 = arith.truncf %23 : vector<16x32xf32> to vector<16x32xbf16>
    %c1_20 = arith.constant 1 : index
    %c0_21 = arith.constant 0 : index
    %c0_22 = arith.constant 0 : index
    %c0_23 = arith.constant 0 : index
    %25 = vector.load %arg4[%c1_20, %c0_21, %c0_22, %c0_23] : memref<2x1x16x32xbf16, #tpu.memory_space<vmem>>, vector<1x1x16x32xbf16>
    %26 = vector.shape_cast %25 : vector<1x1x16x32xbf16> to vector<16x32xbf16>
    %27 = vector.shape_cast %24 : vector<16x32xbf16> to vector<1x1x16x32xbf16>
    tpu.vector_store %arg4[%c1_20, %c0_21, %c0_22, %c0_23], %27 {strides = array<i32>} : memref<2x1x16x32xbf16, #tpu.memory_space<vmem>>, vector<1x1x16x32xbf16>,
    return
  }
  func.func @transform_0(%arg0: i32) -> (i32, i32, i32) {
    %c0_i32 = arith.constant 0 : i32
    %c0_i32_0 = arith.constant 0 : i32
    %c0_i32_1 = arith.constant 0 : i32
    return %arg0, %c0_i32, %c0_i32_0 : i32, i32, i32
  }
  func.func @transform_1(%arg0: i32) -> (i32, i32, i32) {
    %c0_i32 = arith.constant 0 : i32
    %c0_i32_0 = arith.constant 0 : i32
    %c0_i32_1 = arith.constant 0 : i32
    %c0_i32_2 = arith.constant 0 : i32
    return %c0_i32, %c0_i32_0, %c0_i32_1 : i32, i32, i32
  }
  func.func @transform_2(%arg0: i32) -> (i32, i32, i32, i32) {
    %c0_i32 = arith.constant 0 : i32
    %c0_i32_0 = arith.constant 0 : i32
    %c0_i32_1 = arith.constant 0 : i32
    %c0_i32_2 = arith.constant 0 : i32
    return %c0_i32, %arg0, %c0_i32_0, %c0_i32_1 : i32, i32, i32, i32
  }
  func.func @transform_3(%arg0: i32) -> (i32, i32, i32, i32) {
    %c0_i32 = arith.constant 0 : i32
    %c0_i32_0 = arith.constant 0 : i32
    %c0_i32_1 = arith.constant 0 : i32
    %c0_i32_2 = arith.constant 0 : i32
    return %c0_i32, %arg0, %c0_i32_0, %c0_i32_1 : i32, i32, i32, i32
  }
}

module attributes {stable_mosaic.version = 11 : i64} {
  func.func @_encoder_kernel(%arg0: i32, %arg1: memref<1x16x18xf32, #tpu.memory_space<vmem>>, %arg2: memref<1x16x32xf32, #tpu.memory_space<vmem>>, %arg3: memref<1x1x16xf32, #tpu.memory_space<vmem>>, %arg4: memref<18x32xbf16, #tpu.memory_space<vmem>>, %arg5: memref<2x1x32xf32, #tpu.memory_space<vmem>>, %arg6: memref<2x32x96xbf16, #tpu.memory_space<vmem>>, %arg7: memref<2x32x32xbf16, #tpu.memory_space<vmem>>, %arg8: memref<2x1x32xf32, #tpu.memory_space<vmem>>, %arg9: memref<2x32x64xbf16, #tpu.memory_space<vmem>>, %arg10: memref<2x32x64xbf16, #tpu.memory_space<vmem>>, %arg11: memref<2x64x32xbf16, #tpu.memory_space<vmem>>, %arg12: memref<1x32xf32, #tpu.memory_space<vmem>>, %arg13: memref<1x16x32xbf16, #tpu.memory_space<vmem>>) attributes {dimension_semantics = [#tpu.dimension_semantics<parallel>], iteration_bounds = array<i64: 2>, scalar_prefetch = 0 : i64, scratch_operands = 0 : i64, tpu.core_type = #tpu.core_type<tc>, window_params = [{transform_indices = @transform_0, window_bounds = array<i64: 1, 16, 18>}, {transform_indices = @transform_1, window_bounds = array<i64: 1, 16, 32>}, {transform_indices = @transform_2, window_bounds = array<i64: 1, 1, 16>}, {pipeline_mode = #tpu.pipeline_mode<synchronous>, transform_indices = @transform_3, window_bounds = array<i64: 18, 32>}, {pipeline_mode = #tpu.pipeline_mode<synchronous>, transform_indices = @transform_4, window_bounds = array<i64: 2, 1, 32>}, {pipeline_mode = #tpu.pipeline_mode<synchronous>, transform_indices = @transform_5, window_bounds = array<i64: 2, 32, 96>}, {pipeline_mode = #tpu.pipeline_mode<synchronous>, transform_indices = @transform_6, window_bounds = array<i64: 2, 32, 32>}, {pipeline_mode = #tpu.pipeline_mode<synchronous>, transform_indices = @transform_7, window_bounds = array<i64: 2, 1, 32>}, {pipeline_mode = #tpu.pipeline_mode<synchronous>, transform_indices = @transform_8, window_bounds = array<i64: 2, 32, 64>}, {pipeline_mode = #tpu.pipeline_mode<synchronous>, transform_indices = @transform_9, window_bounds = array<i64: 2, 32, 64>}, {pipeline_mode = #tpu.pipeline_mode<synchronous>, transform_indices = @transform_10, window_bounds = array<i64: 2, 64, 32>}, {pipeline_mode = #tpu.pipeline_mode<synchronous>, transform_indices = @transform_11, window_bounds = array<i64: 1, 32>}, {transform_indices = @transform_12, window_bounds = array<i64: 1, 16, 32>}]} {
    %c0 = arith.constant 0 : index
    %c0_0 = arith.constant 0 : index
    %c0_1 = arith.constant 0 : index
    %0 = vector.load %arg1[%c0, %c0_0, %c0_1] : memref<1x16x18xf32, #tpu.memory_space<vmem>>, vector<1x16x18xf32>
    %1 = vector.shape_cast %0 : vector<1x16x18xf32> to vector<16x18xf32>
    %2 = arith.truncf %1 : vector<16x18xf32> to vector<16x18xbf16>
    %c0_2 = arith.constant 0 : index
    %c0_3 = arith.constant 0 : index
    %3 = vector.load %arg4[%c0_2, %c0_3] : memref<18x32xbf16, #tpu.memory_space<vmem>>, vector<18x32xbf16>
    %cst = arith.constant dense<0.000000e+00> : vector<16x32xf32>
    %4 = tpu.matmul %2, %3, %cst {dimension_numbers = #tpu.dot_dimension_numbers<[1], [0], [0], [1], [0, 0, 1, 1], [], []>} : vector<16x18xbf16>, vector<18x32xbf16>, vector<16x32xf32> -> vector<16x32xf32>
    %c0_4 = arith.constant 0 : index
    %c0_5 = arith.constant 0 : index
    %c0_6 = arith.constant 0 : index
    %5 = vector.load %arg2[%c0_4, %c0_5, %c0_6] : memref<1x16x32xf32, #tpu.memory_space<vmem>>, vector<1x16x32xf32>
    %6 = vector.shape_cast %5 : vector<1x16x32xf32> to vector<16x32xf32>
    %7 = arith.addf %4, %6 : vector<16x32xf32>
    %c0_7 = arith.constant 0 : index
    %c0_8 = arith.constant 0 : index
    %c0_9 = arith.constant 0 : index
    %8 = vector.load %arg3[%c0_7, %c0_8, %c0_9] : memref<1x1x16xf32, #tpu.memory_space<vmem>>, vector<1x1x16xf32>
    %9 = vector.shape_cast %8 : vector<1x1x16xf32> to vector<1x16xf32>
    %10 = vector.shape_cast %9 : vector<1x16xf32> to vector<1x16xf32>
    %11 = vector.broadcast %10 : vector<1x16xf32> to vector<16x16xf32>
    %c0_10 = arith.constant 0 : index
    %c0_11 = arith.constant 0 : index
    %c0_12 = arith.constant 0 : index
    %12 = vector.load %arg5[%c0_10, %c0_11, %c0_12] : memref<2x1x32xf32, #tpu.memory_space<vmem>>, vector<1x1x32xf32>
    %13 = vector.shape_cast %12 : vector<1x1x32xf32> to vector<1x32xf32>
    %14 = arith.mulf %7, %7 : vector<16x32xf32>
    %cst_13 = arith.constant dense<0.000000e+00> : vector<16xf32>
    %15 = vector.multi_reduction <add>, %14, %cst_13 [1] : vector<16x32xf32> to vector<16xf32>
    %16 = vector.shape_cast %15 : vector<16xf32> to vector<16x1xf32>
    %cst_14 = arith.constant 3.200000e+01 : f32
    %17 = vector.broadcast %cst_14 : f32 to vector<16x1xf32>
    %18 = arith.divf %16, %17 : vector<16x1xf32>
    %cst_15 = arith.constant 9.99999997E-7 : f32
    %19 = vector.broadcast %cst_15 : f32 to vector<16x1xf32>
    %20 = arith.addf %18, %19 : vector<16x1xf32>
    %21 = math.rsqrt %20 : vector<16x1xf32>
    %22 = vector.broadcast %21 : vector<16x1xf32> to vector<16x32xf32>
    %23 = arith.mulf %7, %22 : vector<16x32xf32>
    %24 = vector.broadcast %13 : vector<1x32xf32> to vector<16x32xf32>
    %25 = arith.mulf %23, %24 : vector<16x32xf32>
    %26 = arith.truncf %25 : vector<16x32xf32> to vector<16x32xbf16>
    %c0_16 = arith.constant 0 : index
    %c0_17 = arith.constant 0 : index
    %c0_18 = arith.constant 0 : index
    %27 = vector.load %arg6[%c0_16, %c0_17, %c0_18] : memref<2x32x96xbf16, #tpu.memory_space<vmem>>, vector<1x32x96xbf16>
    %28 = vector.shape_cast %27 : vector<1x32x96xbf16> to vector<32x96xbf16>
    %cst_19 = arith.constant dense<0.000000e+00> : vector<16x96xf32>
    %29 = tpu.matmul %26, %28, %cst_19 {dimension_numbers = #tpu.dot_dimension_numbers<[1], [0], [0], [1], [0, 0, 1, 1], [], []>} : vector<16x32xbf16>, vector<32x96xbf16>, vector<16x96xf32> -> vector<16x96xf32>
    %30 = vector.extract_strided_slice %29 {offsets = [0, 0], sizes = [16, 32], strides = [1, 1]} : vector<16x96xf32> to vector<16x32xf32>
    %31 = vector.extract_strided_slice %29 {offsets = [0, 32], sizes = [16, 32], strides = [1, 1]} : vector<16x96xf32> to vector<16x32xf32>
    %32 = vector.extract_strided_slice %29 {offsets = [0, 64], sizes = [16, 32], strides = [1, 1]} : vector<16x96xf32> to vector<16x32xf32>
    %c0_20 = arith.constant 0 : index
    %c0_21 = arith.constant 0 : index
    %c0_22 = arith.constant 0 : index
    %33 = vector.load %arg7[%c0_20, %c0_21, %c0_22] : memref<2x32x32xbf16, #tpu.memory_space<vmem>>, vector<1x32x32xbf16>
    %34 = vector.shape_cast %33 : vector<1x32x32xbf16> to vector<32x32xbf16>
    %cst_23 = arith.constant 0.000000e+00 : f32
    %35 = vector.broadcast %cst_23 : f32 to vector<16x32xf32>
    %36 = arith.truncf %30 : vector<16x32xf32> to vector<16x32xbf16>
    %37 = arith.truncf %31 : vector<16x32xf32> to vector<16x32xbf16>
    %38 = arith.truncf %32 : vector<16x32xf32> to vector<16x32xbf16>
    %39 = vector.extract_strided_slice %36 {offsets = [0, 0], sizes = [16, 8], strides = [1, 1]} : vector<16x32xbf16> to vector<16x8xbf16>
    %40 = vector.extract_strided_slice %37 {offsets = [0, 0], sizes = [16, 8], strides = [1, 1]} : vector<16x32xbf16> to vector<16x8xbf16>
    "tpu.trace_start"() <{level = 10 : i32, message = "qd,kd->qk"}> : () -> ()
    %cst_24 = arith.constant dense<0.000000e+00> : vector<16x16xf32>
    %41 = tpu.matmul %39, %40, %cst_24 {dimension_numbers = #tpu.dot_dimension_numbers<[1], [1], [0], [0], [0, 0, 1, 0], [], []>} : vector<16x8xbf16>, vector<16x8xbf16>, vector<16x16xf32> -> vector<16x16xf32>
    "tpu.trace_stop"() : () -> ()
    %42 = arith.addf %41, %11 : vector<16x16xf32>
    %cst_25 = arith.constant dense<0xFF800000> : vector<16xf32>
    %43 = vector.multi_reduction <maximumf>, %42, %cst_25 [1] : vector<16x16xf32> to vector<16xf32>
    %44 = vector.shape_cast %43 : vector<16xf32> to vector<16x1xf32>
    %45 = vector.broadcast %44 : vector<16x1xf32> to vector<16x16xf32>
    %46 = arith.subf %42, %45 : vector<16x16xf32>
    %47 = math.exp %46 : vector<16x16xf32>
    %cst_26 = arith.constant dense<0.000000e+00> : vector<16xf32>
    %48 = vector.multi_reduction <add>, %47, %cst_26 [1] : vector<16x16xf32> to vector<16xf32>
    %49 = vector.shape_cast %48 : vector<16xf32> to vector<16x1xf32>
    %50 = tpu.reciprocal %49 {approx = true} : vector<16x1xf32> -> vector<16x1xf32>
    %51 = vector.broadcast %50 : vector<16x1xf32> to vector<16x16xf32>
    %52 = arith.mulf %47, %51 : vector<16x16xf32>
    %53 = arith.truncf %52 : vector<16x16xf32> to vector<16x16xbf16>
    %54 = vector.extract_strided_slice %38 {offsets = [0, 0], sizes = [16, 8], strides = [1, 1]} : vector<16x32xbf16> to vector<16x8xbf16>
    %cst_27 = arith.constant dense<0.000000e+00> : vector<16x8xf32>
    %55 = tpu.matmul %53, %54, %cst_27 {dimension_numbers = #tpu.dot_dimension_numbers<[1], [0], [0], [1], [0, 0, 1, 1], [], []>} : vector<16x16xbf16>, vector<16x8xbf16>, vector<16x8xf32> -> vector<16x8xf32>
    %56 = arith.truncf %55 : vector<16x8xf32> to vector<16x8xbf16>
    %57 = vector.extract_strided_slice %34 {offsets = [0, 0], sizes = [8, 32], strides = [1, 1]} : vector<32x32xbf16> to vector<8x32xbf16>
    %cst_28 = arith.constant dense<0.000000e+00> : vector<16x32xf32>
    %58 = tpu.matmul %56, %57, %cst_28 {dimension_numbers = #tpu.dot_dimension_numbers<[1], [0], [0], [1], [0, 0, 1, 1], [], []>} : vector<16x8xbf16>, vector<8x32xbf16>, vector<16x32xf32> -> vector<16x32xf32>
    %59 = arith.addf %35, %58 : vector<16x32xf32>
    %60 = vector.extract_strided_slice %36 {offsets = [0, 8], sizes = [16, 8], strides = [1, 1]} : vector<16x32xbf16> to vector<16x8xbf16>
    %61 = vector.extract_strided_slice %37 {offsets = [0, 8], sizes = [16, 8], strides = [1, 1]} : vector<16x32xbf16> to vector<16x8xbf16>
    "tpu.trace_start"() <{level = 10 : i32, message = "qd,kd->qk"}> : () -> ()
    %cst_29 = arith.constant dense<0.000000e+00> : vector<16x16xf32>
    %62 = tpu.matmul %60, %61, %cst_29 {dimension_numbers = #tpu.dot_dimension_numbers<[1], [1], [0], [0], [0, 0, 1, 0], [], []>} : vector<16x8xbf16>, vector<16x8xbf16>, vector<16x16xf32> -> vector<16x16xf32>
    "tpu.trace_stop"() : () -> ()
    %63 = arith.addf %62, %11 : vector<16x16xf32>
    %cst_30 = arith.constant dense<0xFF800000> : vector<16xf32>
    %64 = vector.multi_reduction <maximumf>, %63, %cst_30 [1] : vector<16x16xf32> to vector<16xf32>
    %65 = vector.shape_cast %64 : vector<16xf32> to vector<16x1xf32>
    %66 = vector.broadcast %65 : vector<16x1xf32> to vector<16x16xf32>
    %67 = arith.subf %63, %66 : vector<16x16xf32>
    %68 = math.exp %67 : vector<16x16xf32>
    %cst_31 = arith.constant dense<0.000000e+00> : vector<16xf32>
    %69 = vector.multi_reduction <add>, %68, %cst_31 [1] : vector<16x16xf32> to vector<16xf32>
    %70 = vector.shape_cast %69 : vector<16xf32> to vector<16x1xf32>
    %71 = tpu.reciprocal %70 {approx = true} : vector<16x1xf32> -> vector<16x1xf32>
    %72 = vector.broadcast %71 : vector<16x1xf32> to vector<16x16xf32>
    %73 = arith.mulf %68, %72 : vector<16x16xf32>
    %74 = arith.truncf %73 : vector<16x16xf32> to vector<16x16xbf16>
    %75 = vector.extract_strided_slice %38 {offsets = [0, 8], sizes = [16, 8], strides = [1, 1]} : vector<16x32xbf16> to vector<16x8xbf16>
    %cst_32 = arith.constant dense<0.000000e+00> : vector<16x8xf32>
    %76 = tpu.matmul %74, %75, %cst_32 {dimension_numbers = #tpu.dot_dimension_numbers<[1], [0], [0], [1], [0, 0, 1, 1], [], []>} : vector<16x16xbf16>, vector<16x8xbf16>, vector<16x8xf32> -> vector<16x8xf32>
    %77 = arith.truncf %76 : vector<16x8xf32> to vector<16x8xbf16>
    %78 = vector.extract_strided_slice %34 {offsets = [8, 0], sizes = [8, 32], strides = [1, 1]} : vector<32x32xbf16> to vector<8x32xbf16>
    %cst_33 = arith.constant dense<0.000000e+00> : vector<16x32xf32>
    %79 = tpu.matmul %77, %78, %cst_33 {dimension_numbers = #tpu.dot_dimension_numbers<[1], [0], [0], [1], [0, 0, 1, 1], [], []>} : vector<16x8xbf16>, vector<8x32xbf16>, vector<16x32xf32> -> vector<16x32xf32>
    %80 = arith.addf %59, %79 : vector<16x32xf32>
    %81 = vector.extract_strided_slice %36 {offsets = [0, 16], sizes = [16, 8], strides = [1, 1]} : vector<16x32xbf16> to vector<16x8xbf16>
    %82 = vector.extract_strided_slice %37 {offsets = [0, 16], sizes = [16, 8], strides = [1, 1]} : vector<16x32xbf16> to vector<16x8xbf16>
    "tpu.trace_start"() <{level = 10 : i32, message = "qd,kd->qk"}> : () -> ()
    %cst_34 = arith.constant dense<0.000000e+00> : vector<16x16xf32>
    %83 = tpu.matmul %81, %82, %cst_34 {dimension_numbers = #tpu.dot_dimension_numbers<[1], [1], [0], [0], [0, 0, 1, 0], [], []>} : vector<16x8xbf16>, vector<16x8xbf16>, vector<16x16xf32> -> vector<16x16xf32>
    "tpu.trace_stop"() : () -> ()
    %84 = arith.addf %83, %11 : vector<16x16xf32>
    %cst_35 = arith.constant dense<0xFF800000> : vector<16xf32>
    %85 = vector.multi_reduction <maximumf>, %84, %cst_35 [1] : vector<16x16xf32> to vector<16xf32>
    %86 = vector.shape_cast %85 : vector<16xf32> to vector<16x1xf32>
    %87 = vector.broadcast %86 : vector<16x1xf32> to vector<16x16xf32>
    %88 = arith.subf %84, %87 : vector<16x16xf32>
    %89 = math.exp %88 : vector<16x16xf32>
    %cst_36 = arith.constant dense<0.000000e+00> : vector<16xf32>
    %90 = vector.multi_reduction <add>, %89, %cst_36 [1] : vector<16x16xf32> to vector<16xf32>
    %91 = vector.shape_cast %90 : vector<16xf32> to vector<16x1xf32>
    %92 = tpu.reciprocal %91 {approx = true} : vector<16x1xf32> -> vector<16x1xf32>
    %93 = vector.broadcast %92 : vector<16x1xf32> to vector<16x16xf32>
    %94 = arith.mulf %89, %93 : vector<16x16xf32>
    %95 = arith.truncf %94 : vector<16x16xf32> to vector<16x16xbf16>
    %96 = vector.extract_strided_slice %38 {offsets = [0, 16], sizes = [16, 8], strides = [1, 1]} : vector<16x32xbf16> to vector<16x8xbf16>
    %cst_37 = arith.constant dense<0.000000e+00> : vector<16x8xf32>
    %97 = tpu.matmul %95, %96, %cst_37 {dimension_numbers = #tpu.dot_dimension_numbers<[1], [0], [0], [1], [0, 0, 1, 1], [], []>} : vector<16x16xbf16>, vector<16x8xbf16>, vector<16x8xf32> -> vector<16x8xf32>
    %98 = arith.truncf %97 : vector<16x8xf32> to vector<16x8xbf16>
    %99 = vector.extract_strided_slice %34 {offsets = [16, 0], sizes = [8, 32], strides = [1, 1]} : vector<32x32xbf16> to vector<8x32xbf16>
    %cst_38 = arith.constant dense<0.000000e+00> : vector<16x32xf32>
    %100 = tpu.matmul %98, %99, %cst_38 {dimension_numbers = #tpu.dot_dimension_numbers<[1], [0], [0], [1], [0, 0, 1, 1], [], []>} : vector<16x8xbf16>, vector<8x32xbf16>, vector<16x32xf32> -> vector<16x32xf32>
    %101 = arith.addf %80, %100 : vector<16x32xf32>
    %102 = vector.extract_strided_slice %36 {offsets = [0, 24], sizes = [16, 8], strides = [1, 1]} : vector<16x32xbf16> to vector<16x8xbf16>
    %103 = vector.extract_strided_slice %37 {offsets = [0, 24], sizes = [16, 8], strides = [1, 1]} : vector<16x32xbf16> to vector<16x8xbf16>
    "tpu.trace_start"() <{level = 10 : i32, message = "qd,kd->qk"}> : () -> ()
    %cst_39 = arith.constant dense<0.000000e+00> : vector<16x16xf32>
    %104 = tpu.matmul %102, %103, %cst_39 {dimension_numbers = #tpu.dot_dimension_numbers<[1], [1], [0], [0], [0, 0, 1, 0], [], []>} : vector<16x8xbf16>, vector<16x8xbf16>, vector<16x16xf32> -> vector<16x16xf32>
    "tpu.trace_stop"() : () -> ()
    %105 = arith.addf %104, %11 : vector<16x16xf32>
    %cst_40 = arith.constant dense<0xFF800000> : vector<16xf32>
    %106 = vector.multi_reduction <maximumf>, %105, %cst_40 [1] : vector<16x16xf32> to vector<16xf32>
    %107 = vector.shape_cast %106 : vector<16xf32> to vector<16x1xf32>
    %108 = vector.broadcast %107 : vector<16x1xf32> to vector<16x16xf32>
    %109 = arith.subf %105, %108 : vector<16x16xf32>
    %110 = math.exp %109 : vector<16x16xf32>
    %cst_41 = arith.constant dense<0.000000e+00> : vector<16xf32>
    %111 = vector.multi_reduction <add>, %110, %cst_41 [1] : vector<16x16xf32> to vector<16xf32>
    %112 = vector.shape_cast %111 : vector<16xf32> to vector<16x1xf32>
    %113 = tpu.reciprocal %112 {approx = true} : vector<16x1xf32> -> vector<16x1xf32>
    %114 = vector.broadcast %113 : vector<16x1xf32> to vector<16x16xf32>
    %115 = arith.mulf %110, %114 : vector<16x16xf32>
    %116 = arith.truncf %115 : vector<16x16xf32> to vector<16x16xbf16>
    %117 = vector.extract_strided_slice %38 {offsets = [0, 24], sizes = [16, 8], strides = [1, 1]} : vector<16x32xbf16> to vector<16x8xbf16>
    %cst_42 = arith.constant dense<0.000000e+00> : vector<16x8xf32>
    %118 = tpu.matmul %116, %117, %cst_42 {dimension_numbers = #tpu.dot_dimension_numbers<[1], [0], [0], [1], [0, 0, 1, 1], [], []>} : vector<16x16xbf16>, vector<16x8xbf16>, vector<16x8xf32> -> vector<16x8xf32>
    %119 = arith.truncf %118 : vector<16x8xf32> to vector<16x8xbf16>
    %120 = vector.extract_strided_slice %34 {offsets = [24, 0], sizes = [8, 32], strides = [1, 1]} : vector<32x32xbf16> to vector<8x32xbf16>
    %cst_43 = arith.constant dense<0.000000e+00> : vector<16x32xf32>
    %121 = tpu.matmul %119, %120, %cst_43 {dimension_numbers = #tpu.dot_dimension_numbers<[1], [0], [0], [1], [0, 0, 1, 1], [], []>} : vector<16x8xbf16>, vector<8x32xbf16>, vector<16x32xf32> -> vector<16x32xf32>
    %122 = arith.addf %101, %121 : vector<16x32xf32>
    %123 = arith.addf %7, %122 : vector<16x32xf32>
    %c0_44 = arith.constant 0 : index
    %c0_45 = arith.constant 0 : index
    %c0_46 = arith.constant 0 : index
    %124 = vector.load %arg8[%c0_44, %c0_45, %c0_46] : memref<2x1x32xf32, #tpu.memory_space<vmem>>, vector<1x1x32xf32>
    %125 = vector.shape_cast %124 : vector<1x1x32xf32> to vector<1x32xf32>
    %126 = arith.mulf %123, %123 : vector<16x32xf32>
    %cst_47 = arith.constant dense<0.000000e+00> : vector<16xf32>
    %127 = vector.multi_reduction <add>, %126, %cst_47 [1] : vector<16x32xf32> to vector<16xf32>
    %128 = vector.shape_cast %127 : vector<16xf32> to vector<16x1xf32>
    %cst_48 = arith.constant 3.200000e+01 : f32
    %129 = vector.broadcast %cst_48 : f32 to vector<16x1xf32>
    %130 = arith.divf %128, %129 : vector<16x1xf32>
    %cst_49 = arith.constant 9.99999997E-7 : f32
    %131 = vector.broadcast %cst_49 : f32 to vector<16x1xf32>
    %132 = arith.addf %130, %131 : vector<16x1xf32>
    %133 = math.rsqrt %132 : vector<16x1xf32>
    %134 = vector.broadcast %133 : vector<16x1xf32> to vector<16x32xf32>
    %135 = arith.mulf %123, %134 : vector<16x32xf32>
    %136 = vector.broadcast %125 : vector<1x32xf32> to vector<16x32xf32>
    %137 = arith.mulf %135, %136 : vector<16x32xf32>
    %c0_50 = arith.constant 0 : index
    %c0_51 = arith.constant 0 : index
    %c0_52 = arith.constant 0 : index
    %138 = vector.load %arg9[%c0_50, %c0_51, %c0_52] : memref<2x32x64xbf16, #tpu.memory_space<vmem>>, vector<1x32x64xbf16>
    %139 = vector.shape_cast %138 : vector<1x32x64xbf16> to vector<32x64xbf16>
    %c0_53 = arith.constant 0 : index
    %c0_54 = arith.constant 0 : index
    %c0_55 = arith.constant 0 : index
    %140 = vector.load %arg10[%c0_53, %c0_54, %c0_55] : memref<2x32x64xbf16, #tpu.memory_space<vmem>>, vector<1x32x64xbf16>
    %141 = vector.shape_cast %140 : vector<1x32x64xbf16> to vector<32x64xbf16>
    %c0_56 = arith.constant 0 : index
    %c0_57 = arith.constant 0 : index
    %c0_58 = arith.constant 0 : index
    %142 = vector.load %arg11[%c0_56, %c0_57, %c0_58] : memref<2x64x32xbf16, #tpu.memory_space<vmem>>, vector<1x64x32xbf16>
    %143 = vector.shape_cast %142 : vector<1x64x32xbf16> to vector<64x32xbf16>
    %144 = arith.truncf %137 : vector<16x32xf32> to vector<16x32xbf16>
    %cst_59 = arith.constant dense<0.000000e+00> : vector<16x64xf32>
    %145 = tpu.matmul %144, %139, %cst_59 {dimension_numbers = #tpu.dot_dimension_numbers<[1], [0], [0], [1], [0, 0, 1, 1], [], []>} : vector<16x32xbf16>, vector<32x64xbf16>, vector<16x64xf32> -> vector<16x64xf32>
    %cst_60 = arith.constant dense<0.000000e+00> : vector<16x64xf32>
    %146 = tpu.matmul %144, %141, %cst_60 {dimension_numbers = #tpu.dot_dimension_numbers<[1], [0], [0], [1], [0, 0, 1, 1], [], []>} : vector<16x32xbf16>, vector<32x64xbf16>, vector<16x64xf32> -> vector<16x64xf32>
    %147 = arith.mulf %145, %145 : vector<16x64xf32>
    %148 = arith.mulf %145, %147 : vector<16x64xf32>
    %cst_61 = arith.constant 4.471500e-02 : f32
    %149 = vector.broadcast %cst_61 : f32 to vector<16x64xf32>
    %150 = arith.mulf %149, %148 : vector<16x64xf32>
    %151 = arith.addf %145, %150 : vector<16x64xf32>
    %cst_62 = arith.constant 0.797884583 : f32
    %152 = vector.broadcast %cst_62 : f32 to vector<16x64xf32>
    %153 = arith.mulf %152, %151 : vector<16x64xf32>
    %154 = math.tanh %153 : vector<16x64xf32>
    %cst_63 = arith.constant 1.000000e+00 : f32
    %155 = vector.broadcast %cst_63 : f32 to vector<16x64xf32>
    %156 = arith.addf %155, %154 : vector<16x64xf32>
    %cst_64 = arith.constant 5.000000e-01 : f32
    %157 = vector.broadcast %cst_64 : f32 to vector<16x64xf32>
    %158 = arith.mulf %157, %156 : vector<16x64xf32>
    %159 = arith.mulf %145, %158 : vector<16x64xf32>
    %160 = arith.mulf %159, %146 : vector<16x64xf32>
    %161 = arith.truncf %160 : vector<16x64xf32> to vector<16x64xbf16>
    %cst_65 = arith.constant dense<0.000000e+00> : vector<16x32xf32>
    %162 = tpu.matmul %161, %143, %cst_65 {dimension_numbers = #tpu.dot_dimension_numbers<[1], [0], [0], [1], [0, 0, 1, 1], [], []>} : vector<16x64xbf16>, vector<64x32xbf16>, vector<16x32xf32> -> vector<16x32xf32>
    %163 = arith.addf %123, %162 : vector<16x32xf32>
    %c1 = arith.constant 1 : index
    %c0_66 = arith.constant 0 : index
    %c0_67 = arith.constant 0 : index
    %164 = vector.load %arg5[%c1, %c0_66, %c0_67] : memref<2x1x32xf32, #tpu.memory_space<vmem>>, vector<1x1x32xf32>
    %165 = vector.shape_cast %164 : vector<1x1x32xf32> to vector<1x32xf32>
    %166 = arith.mulf %163, %163 : vector<16x32xf32>
    %cst_68 = arith.constant dense<0.000000e+00> : vector<16xf32>
    %167 = vector.multi_reduction <add>, %166, %cst_68 [1] : vector<16x32xf32> to vector<16xf32>
    %168 = vector.shape_cast %167 : vector<16xf32> to vector<16x1xf32>
    %cst_69 = arith.constant 3.200000e+01 : f32
    %169 = vector.broadcast %cst_69 : f32 to vector<16x1xf32>
    %170 = arith.divf %168, %169 : vector<16x1xf32>
    %cst_70 = arith.constant 9.99999997E-7 : f32
    %171 = vector.broadcast %cst_70 : f32 to vector<16x1xf32>
    %172 = arith.addf %170, %171 : vector<16x1xf32>
    %173 = math.rsqrt %172 : vector<16x1xf32>
    %174 = vector.broadcast %173 : vector<16x1xf32> to vector<16x32xf32>
    %175 = arith.mulf %163, %174 : vector<16x32xf32>
    %176 = vector.broadcast %165 : vector<1x32xf32> to vector<16x32xf32>
    %177 = arith.mulf %175, %176 : vector<16x32xf32>
    %178 = arith.truncf %177 : vector<16x32xf32> to vector<16x32xbf16>
    %c1_71 = arith.constant 1 : index
    %c0_72 = arith.constant 0 : index
    %c0_73 = arith.constant 0 : index
    %179 = vector.load %arg6[%c1_71, %c0_72, %c0_73] : memref<2x32x96xbf16, #tpu.memory_space<vmem>>, vector<1x32x96xbf16>
    %180 = vector.shape_cast %179 : vector<1x32x96xbf16> to vector<32x96xbf16>
    %cst_74 = arith.constant dense<0.000000e+00> : vector<16x96xf32>
    %181 = tpu.matmul %178, %180, %cst_74 {dimension_numbers = #tpu.dot_dimension_numbers<[1], [0], [0], [1], [0, 0, 1, 1], [], []>} : vector<16x32xbf16>, vector<32x96xbf16>, vector<16x96xf32> -> vector<16x96xf32>
    %182 = vector.extract_strided_slice %181 {offsets = [0, 0], sizes = [16, 32], strides = [1, 1]} : vector<16x96xf32> to vector<16x32xf32>
    %183 = vector.extract_strided_slice %181 {offsets = [0, 32], sizes = [16, 32], strides = [1, 1]} : vector<16x96xf32> to vector<16x32xf32>
    %184 = vector.extract_strided_slice %181 {offsets = [0, 64], sizes = [16, 32], strides = [1, 1]} : vector<16x96xf32> to vector<16x32xf32>
    %c1_75 = arith.constant 1 : index
    %c0_76 = arith.constant 0 : index
    %c0_77 = arith.constant 0 : index
    %185 = vector.load %arg7[%c1_75, %c0_76, %c0_77] : memref<2x32x32xbf16, #tpu.memory_space<vmem>>, vector<1x32x32xbf16>
    %186 = vector.shape_cast %185 : vector<1x32x32xbf16> to vector<32x32xbf16>
    %cst_78 = arith.constant 0.000000e+00 : f32
    %187 = vector.broadcast %cst_78 : f32 to vector<16x32xf32>
    %188 = arith.truncf %182 : vector<16x32xf32> to vector<16x32xbf16>
    %189 = arith.truncf %183 : vector<16x32xf32> to vector<16x32xbf16>
    %190 = arith.truncf %184 : vector<16x32xf32> to vector<16x32xbf16>
    %191 = vector.extract_strided_slice %188 {offsets = [0, 0], sizes = [16, 8], strides = [1, 1]} : vector<16x32xbf16> to vector<16x8xbf16>
    %192 = vector.extract_strided_slice %189 {offsets = [0, 0], sizes = [16, 8], strides = [1, 1]} : vector<16x32xbf16> to vector<16x8xbf16>
    "tpu.trace_start"() <{level = 10 : i32, message = "qd,kd->qk"}> : () -> ()
    %cst_79 = arith.constant dense<0.000000e+00> : vector<16x16xf32>
    %193 = tpu.matmul %191, %192, %cst_79 {dimension_numbers = #tpu.dot_dimension_numbers<[1], [1], [0], [0], [0, 0, 1, 0], [], []>} : vector<16x8xbf16>, vector<16x8xbf16>, vector<16x16xf32> -> vector<16x16xf32>
    "tpu.trace_stop"() : () -> ()
    %194 = arith.addf %193, %11 : vector<16x16xf32>
    %cst_80 = arith.constant dense<0xFF800000> : vector<16xf32>
    %195 = vector.multi_reduction <maximumf>, %194, %cst_80 [1] : vector<16x16xf32> to vector<16xf32>
    %196 = vector.shape_cast %195 : vector<16xf32> to vector<16x1xf32>
    %197 = vector.broadcast %196 : vector<16x1xf32> to vector<16x16xf32>
    %198 = arith.subf %194, %197 : vector<16x16xf32>
    %199 = math.exp %198 : vector<16x16xf32>
    %cst_81 = arith.constant dense<0.000000e+00> : vector<16xf32>
    %200 = vector.multi_reduction <add>, %199, %cst_81 [1] : vector<16x16xf32> to vector<16xf32>
    %201 = vector.shape_cast %200 : vector<16xf32> to vector<16x1xf32>
    %202 = tpu.reciprocal %201 {approx = true} : vector<16x1xf32> -> vector<16x1xf32>
    %203 = vector.broadcast %202 : vector<16x1xf32> to vector<16x16xf32>
    %204 = arith.mulf %199, %203 : vector<16x16xf32>
    %205 = arith.truncf %204 : vector<16x16xf32> to vector<16x16xbf16>
    %206 = vector.extract_strided_slice %190 {offsets = [0, 0], sizes = [16, 8], strides = [1, 1]} : vector<16x32xbf16> to vector<16x8xbf16>
    %cst_82 = arith.constant dense<0.000000e+00> : vector<16x8xf32>
    %207 = tpu.matmul %205, %206, %cst_82 {dimension_numbers = #tpu.dot_dimension_numbers<[1], [0], [0], [1], [0, 0, 1, 1], [], []>} : vector<16x16xbf16>, vector<16x8xbf16>, vector<16x8xf32> -> vector<16x8xf32>
    %208 = arith.truncf %207 : vector<16x8xf32> to vector<16x8xbf16>
    %209 = vector.extract_strided_slice %186 {offsets = [0, 0], sizes = [8, 32], strides = [1, 1]} : vector<32x32xbf16> to vector<8x32xbf16>
    %cst_83 = arith.constant dense<0.000000e+00> : vector<16x32xf32>
    %210 = tpu.matmul %208, %209, %cst_83 {dimension_numbers = #tpu.dot_dimension_numbers<[1], [0], [0], [1], [0, 0, 1, 1], [], []>} : vector<16x8xbf16>, vector<8x32xbf16>, vector<16x32xf32> -> vector<16x32xf32>
    %211 = arith.addf %187, %210 : vector<16x32xf32>
    %212 = vector.extract_strided_slice %188 {offsets = [0, 8], sizes = [16, 8], strides = [1, 1]} : vector<16x32xbf16> to vector<16x8xbf16>
    %213 = vector.extract_strided_slice %189 {offsets = [0, 8], sizes = [16, 8], strides = [1, 1]} : vector<16x32xbf16> to vector<16x8xbf16>
    "tpu.trace_start"() <{level = 10 : i32, message = "qd,kd->qk"}> : () -> ()
    %cst_84 = arith.constant dense<0.000000e+00> : vector<16x16xf32>
    %214 = tpu.matmul %212, %213, %cst_84 {dimension_numbers = #tpu.dot_dimension_numbers<[1], [1], [0], [0], [0, 0, 1, 0], [], []>} : vector<16x8xbf16>, vector<16x8xbf16>, vector<16x16xf32> -> vector<16x16xf32>
    "tpu.trace_stop"() : () -> ()
    %215 = arith.addf %214, %11 : vector<16x16xf32>
    %cst_85 = arith.constant dense<0xFF800000> : vector<16xf32>
    %216 = vector.multi_reduction <maximumf>, %215, %cst_85 [1] : vector<16x16xf32> to vector<16xf32>
    %217 = vector.shape_cast %216 : vector<16xf32> to vector<16x1xf32>
    %218 = vector.broadcast %217 : vector<16x1xf32> to vector<16x16xf32>
    %219 = arith.subf %215, %218 : vector<16x16xf32>
    %220 = math.exp %219 : vector<16x16xf32>
    %cst_86 = arith.constant dense<0.000000e+00> : vector<16xf32>
    %221 = vector.multi_reduction <add>, %220, %cst_86 [1] : vector<16x16xf32> to vector<16xf32>
    %222 = vector.shape_cast %221 : vector<16xf32> to vector<16x1xf32>
    %223 = tpu.reciprocal %222 {approx = true} : vector<16x1xf32> -> vector<16x1xf32>
    %224 = vector.broadcast %223 : vector<16x1xf32> to vector<16x16xf32>
    %225 = arith.mulf %220, %224 : vector<16x16xf32>
    %226 = arith.truncf %225 : vector<16x16xf32> to vector<16x16xbf16>
    %227 = vector.extract_strided_slice %190 {offsets = [0, 8], sizes = [16, 8], strides = [1, 1]} : vector<16x32xbf16> to vector<16x8xbf16>
    %cst_87 = arith.constant dense<0.000000e+00> : vector<16x8xf32>
    %228 = tpu.matmul %226, %227, %cst_87 {dimension_numbers = #tpu.dot_dimension_numbers<[1], [0], [0], [1], [0, 0, 1, 1], [], []>} : vector<16x16xbf16>, vector<16x8xbf16>, vector<16x8xf32> -> vector<16x8xf32>
    %229 = arith.truncf %228 : vector<16x8xf32> to vector<16x8xbf16>
    %230 = vector.extract_strided_slice %186 {offsets = [8, 0], sizes = [8, 32], strides = [1, 1]} : vector<32x32xbf16> to vector<8x32xbf16>
    %cst_88 = arith.constant dense<0.000000e+00> : vector<16x32xf32>
    %231 = tpu.matmul %229, %230, %cst_88 {dimension_numbers = #tpu.dot_dimension_numbers<[1], [0], [0], [1], [0, 0, 1, 1], [], []>} : vector<16x8xbf16>, vector<8x32xbf16>, vector<16x32xf32> -> vector<16x32xf32>
    %232 = arith.addf %211, %231 : vector<16x32xf32>
    %233 = vector.extract_strided_slice %188 {offsets = [0, 16], sizes = [16, 8], strides = [1, 1]} : vector<16x32xbf16> to vector<16x8xbf16>
    %234 = vector.extract_strided_slice %189 {offsets = [0, 16], sizes = [16, 8], strides = [1, 1]} : vector<16x32xbf16> to vector<16x8xbf16>
    "tpu.trace_start"() <{level = 10 : i32, message = "qd,kd->qk"}> : () -> ()
    %cst_89 = arith.constant dense<0.000000e+00> : vector<16x16xf32>
    %235 = tpu.matmul %233, %234, %cst_89 {dimension_numbers = #tpu.dot_dimension_numbers<[1], [1], [0], [0], [0, 0, 1, 0], [], []>} : vector<16x8xbf16>, vector<16x8xbf16>, vector<16x16xf32> -> vector<16x16xf32>
    "tpu.trace_stop"() : () -> ()
    %236 = arith.addf %235, %11 : vector<16x16xf32>
    %cst_90 = arith.constant dense<0xFF800000> : vector<16xf32>
    %237 = vector.multi_reduction <maximumf>, %236, %cst_90 [1] : vector<16x16xf32> to vector<16xf32>
    %238 = vector.shape_cast %237 : vector<16xf32> to vector<16x1xf32>
    %239 = vector.broadcast %238 : vector<16x1xf32> to vector<16x16xf32>
    %240 = arith.subf %236, %239 : vector<16x16xf32>
    %241 = math.exp %240 : vector<16x16xf32>
    %cst_91 = arith.constant dense<0.000000e+00> : vector<16xf32>
    %242 = vector.multi_reduction <add>, %241, %cst_91 [1] : vector<16x16xf32> to vector<16xf32>
    %243 = vector.shape_cast %242 : vector<16xf32> to vector<16x1xf32>
    %244 = tpu.reciprocal %243 {approx = true} : vector<16x1xf32> -> vector<16x1xf32>
    %245 = vector.broadcast %244 : vector<16x1xf32> to vector<16x16xf32>
    %246 = arith.mulf %241, %245 : vector<16x16xf32>
    %247 = arith.truncf %246 : vector<16x16xf32> to vector<16x16xbf16>
    %248 = vector.extract_strided_slice %190 {offsets = [0, 16], sizes = [16, 8], strides = [1, 1]} : vector<16x32xbf16> to vector<16x8xbf16>
    %cst_92 = arith.constant dense<0.000000e+00> : vector<16x8xf32>
    %249 = tpu.matmul %247, %248, %cst_92 {dimension_numbers = #tpu.dot_dimension_numbers<[1], [0], [0], [1], [0, 0, 1, 1], [], []>} : vector<16x16xbf16>, vector<16x8xbf16>, vector<16x8xf32> -> vector<16x8xf32>
    %250 = arith.truncf %249 : vector<16x8xf32> to vector<16x8xbf16>
    %251 = vector.extract_strided_slice %186 {offsets = [16, 0], sizes = [8, 32], strides = [1, 1]} : vector<32x32xbf16> to vector<8x32xbf16>
    %cst_93 = arith.constant dense<0.000000e+00> : vector<16x32xf32>
    %252 = tpu.matmul %250, %251, %cst_93 {dimension_numbers = #tpu.dot_dimension_numbers<[1], [0], [0], [1], [0, 0, 1, 1], [], []>} : vector<16x8xbf16>, vector<8x32xbf16>, vector<16x32xf32> -> vector<16x32xf32>
    %253 = arith.addf %232, %252 : vector<16x32xf32>
    %254 = vector.extract_strided_slice %188 {offsets = [0, 24], sizes = [16, 8], strides = [1, 1]} : vector<16x32xbf16> to vector<16x8xbf16>
    %255 = vector.extract_strided_slice %189 {offsets = [0, 24], sizes = [16, 8], strides = [1, 1]} : vector<16x32xbf16> to vector<16x8xbf16>
    "tpu.trace_start"() <{level = 10 : i32, message = "qd,kd->qk"}> : () -> ()
    %cst_94 = arith.constant dense<0.000000e+00> : vector<16x16xf32>
    %256 = tpu.matmul %254, %255, %cst_94 {dimension_numbers = #tpu.dot_dimension_numbers<[1], [1], [0], [0], [0, 0, 1, 0], [], []>} : vector<16x8xbf16>, vector<16x8xbf16>, vector<16x16xf32> -> vector<16x16xf32>
    "tpu.trace_stop"() : () -> ()
    %257 = arith.addf %256, %11 : vector<16x16xf32>
    %cst_95 = arith.constant dense<0xFF800000> : vector<16xf32>
    %258 = vector.multi_reduction <maximumf>, %257, %cst_95 [1] : vector<16x16xf32> to vector<16xf32>
    %259 = vector.shape_cast %258 : vector<16xf32> to vector<16x1xf32>
    %260 = vector.broadcast %259 : vector<16x1xf32> to vector<16x16xf32>
    %261 = arith.subf %257, %260 : vector<16x16xf32>
    %262 = math.exp %261 : vector<16x16xf32>
    %cst_96 = arith.constant dense<0.000000e+00> : vector<16xf32>
    %263 = vector.multi_reduction <add>, %262, %cst_96 [1] : vector<16x16xf32> to vector<16xf32>
    %264 = vector.shape_cast %263 : vector<16xf32> to vector<16x1xf32>
    %265 = tpu.reciprocal %264 {approx = true} : vector<16x1xf32> -> vector<16x1xf32>
    %266 = vector.broadcast %265 : vector<16x1xf32> to vector<16x16xf32>
    %267 = arith.mulf %262, %266 : vector<16x16xf32>
    %268 = arith.truncf %267 : vector<16x16xf32> to vector<16x16xbf16>
    %269 = vector.extract_strided_slice %190 {offsets = [0, 24], sizes = [16, 8], strides = [1, 1]} : vector<16x32xbf16> to vector<16x8xbf16>
    %cst_97 = arith.constant dense<0.000000e+00> : vector<16x8xf32>
    %270 = tpu.matmul %268, %269, %cst_97 {dimension_numbers = #tpu.dot_dimension_numbers<[1], [0], [0], [1], [0, 0, 1, 1], [], []>} : vector<16x16xbf16>, vector<16x8xbf16>, vector<16x8xf32> -> vector<16x8xf32>
    %271 = arith.truncf %270 : vector<16x8xf32> to vector<16x8xbf16>
    %272 = vector.extract_strided_slice %186 {offsets = [24, 0], sizes = [8, 32], strides = [1, 1]} : vector<32x32xbf16> to vector<8x32xbf16>
    %cst_98 = arith.constant dense<0.000000e+00> : vector<16x32xf32>
    %273 = tpu.matmul %271, %272, %cst_98 {dimension_numbers = #tpu.dot_dimension_numbers<[1], [0], [0], [1], [0, 0, 1, 1], [], []>} : vector<16x8xbf16>, vector<8x32xbf16>, vector<16x32xf32> -> vector<16x32xf32>
    %274 = arith.addf %253, %273 : vector<16x32xf32>
    %275 = arith.addf %163, %274 : vector<16x32xf32>
    %c1_99 = arith.constant 1 : index
    %c0_100 = arith.constant 0 : index
    %c0_101 = arith.constant 0 : index
    %276 = vector.load %arg8[%c1_99, %c0_100, %c0_101] : memref<2x1x32xf32, #tpu.memory_space<vmem>>, vector<1x1x32xf32>
    %277 = vector.shape_cast %276 : vector<1x1x32xf32> to vector<1x32xf32>
    %278 = arith.mulf %275, %275 : vector<16x32xf32>
    %cst_102 = arith.constant dense<0.000000e+00> : vector<16xf32>
    %279 = vector.multi_reduction <add>, %278, %cst_102 [1] : vector<16x32xf32> to vector<16xf32>
    %280 = vector.shape_cast %279 : vector<16xf32> to vector<16x1xf32>
    %cst_103 = arith.constant 3.200000e+01 : f32
    %281 = vector.broadcast %cst_103 : f32 to vector<16x1xf32>
    %282 = arith.divf %280, %281 : vector<16x1xf32>
    %cst_104 = arith.constant 9.99999997E-7 : f32
    %283 = vector.broadcast %cst_104 : f32 to vector<16x1xf32>
    %284 = arith.addf %282, %283 : vector<16x1xf32>
    %285 = math.rsqrt %284 : vector<16x1xf32>
    %286 = vector.broadcast %285 : vector<16x1xf32> to vector<16x32xf32>
    %287 = arith.mulf %275, %286 : vector<16x32xf32>
    %288 = vector.broadcast %277 : vector<1x32xf32> to vector<16x32xf32>
    %289 = arith.mulf %287, %288 : vector<16x32xf32>
    %c1_105 = arith.constant 1 : index
    %c0_106 = arith.constant 0 : index
    %c0_107 = arith.constant 0 : index
    %290 = vector.load %arg9[%c1_105, %c0_106, %c0_107] : memref<2x32x64xbf16, #tpu.memory_space<vmem>>, vector<1x32x64xbf16>
    %291 = vector.shape_cast %290 : vector<1x32x64xbf16> to vector<32x64xbf16>
    %c1_108 = arith.constant 1 : index
    %c0_109 = arith.constant 0 : index
    %c0_110 = arith.constant 0 : index
    %292 = vector.load %arg10[%c1_108, %c0_109, %c0_110] : memref<2x32x64xbf16, #tpu.memory_space<vmem>>, vector<1x32x64xbf16>
    %293 = vector.shape_cast %292 : vector<1x32x64xbf16> to vector<32x64xbf16>
    %c1_111 = arith.constant 1 : index
    %c0_112 = arith.constant 0 : index
    %c0_113 = arith.constant 0 : index
    %294 = vector.load %arg11[%c1_111, %c0_112, %c0_113] : memref<2x64x32xbf16, #tpu.memory_space<vmem>>, vector<1x64x32xbf16>
    %295 = vector.shape_cast %294 : vector<1x64x32xbf16> to vector<64x32xbf16>
    %296 = arith.truncf %289 : vector<16x32xf32> to vector<16x32xbf16>
    %cst_114 = arith.constant dense<0.000000e+00> : vector<16x64xf32>
    %297 = tpu.matmul %296, %291, %cst_114 {dimension_numbers = #tpu.dot_dimension_numbers<[1], [0], [0], [1], [0, 0, 1, 1], [], []>} : vector<16x32xbf16>, vector<32x64xbf16>, vector<16x64xf32> -> vector<16x64xf32>
    %cst_115 = arith.constant dense<0.000000e+00> : vector<16x64xf32>
    %298 = tpu.matmul %296, %293, %cst_115 {dimension_numbers = #tpu.dot_dimension_numbers<[1], [0], [0], [1], [0, 0, 1, 1], [], []>} : vector<16x32xbf16>, vector<32x64xbf16>, vector<16x64xf32> -> vector<16x64xf32>
    %299 = arith.mulf %297, %297 : vector<16x64xf32>
    %300 = arith.mulf %297, %299 : vector<16x64xf32>
    %cst_116 = arith.constant 4.471500e-02 : f32
    %301 = vector.broadcast %cst_116 : f32 to vector<16x64xf32>
    %302 = arith.mulf %301, %300 : vector<16x64xf32>
    %303 = arith.addf %297, %302 : vector<16x64xf32>
    %cst_117 = arith.constant 0.797884583 : f32
    %304 = vector.broadcast %cst_117 : f32 to vector<16x64xf32>
    %305 = arith.mulf %304, %303 : vector<16x64xf32>
    %306 = math.tanh %305 : vector<16x64xf32>
    %cst_118 = arith.constant 1.000000e+00 : f32
    %307 = vector.broadcast %cst_118 : f32 to vector<16x64xf32>
    %308 = arith.addf %307, %306 : vector<16x64xf32>
    %cst_119 = arith.constant 5.000000e-01 : f32
    %309 = vector.broadcast %cst_119 : f32 to vector<16x64xf32>
    %310 = arith.mulf %309, %308 : vector<16x64xf32>
    %311 = arith.mulf %297, %310 : vector<16x64xf32>
    %312 = arith.mulf %311, %298 : vector<16x64xf32>
    %313 = arith.truncf %312 : vector<16x64xf32> to vector<16x64xbf16>
    %cst_120 = arith.constant dense<0.000000e+00> : vector<16x32xf32>
    %314 = tpu.matmul %313, %295, %cst_120 {dimension_numbers = #tpu.dot_dimension_numbers<[1], [0], [0], [1], [0, 0, 1, 1], [], []>} : vector<16x64xbf16>, vector<64x32xbf16>, vector<16x32xf32> -> vector<16x32xf32>
    %315 = arith.addf %275, %314 : vector<16x32xf32>
    %c0_121 = arith.constant 0 : index
    %c0_122 = arith.constant 0 : index
    %316 = vector.load %arg12[%c0_121, %c0_122] : memref<1x32xf32, #tpu.memory_space<vmem>>, vector<1x32xf32>
    %317 = arith.mulf %315, %315 : vector<16x32xf32>
    %cst_123 = arith.constant dense<0.000000e+00> : vector<16xf32>
    %318 = vector.multi_reduction <add>, %317, %cst_123 [1] : vector<16x32xf32> to vector<16xf32>
    %319 = vector.shape_cast %318 : vector<16xf32> to vector<16x1xf32>
    %cst_124 = arith.constant 3.200000e+01 : f32
    %320 = vector.broadcast %cst_124 : f32 to vector<16x1xf32>
    %321 = arith.divf %319, %320 : vector<16x1xf32>
    %cst_125 = arith.constant 9.99999997E-7 : f32
    %322 = vector.broadcast %cst_125 : f32 to vector<16x1xf32>
    %323 = arith.addf %321, %322 : vector<16x1xf32>
    %324 = math.rsqrt %323 : vector<16x1xf32>
    %325 = vector.broadcast %324 : vector<16x1xf32> to vector<16x32xf32>
    %326 = arith.mulf %315, %325 : vector<16x32xf32>
    %327 = vector.broadcast %316 : vector<1x32xf32> to vector<16x32xf32>
    %328 = arith.mulf %326, %327 : vector<16x32xf32>
    %329 = arith.truncf %328 : vector<16x32xf32> to vector<16x32xbf16>
    %c0_126 = arith.constant 0 : index
    %c0_127 = arith.constant 0 : index
    %c0_128 = arith.constant 0 : index
    %330 = vector.load %arg13[%c0_126, %c0_127, %c0_128] : memref<1x16x32xbf16, #tpu.memory_space<vmem>>, vector<1x16x32xbf16>
    %331 = vector.shape_cast %330 : vector<1x16x32xbf16> to vector<16x32xbf16>
    %332 = vector.shape_cast %329 : vector<16x32xbf16> to vector<1x16x32xbf16>
    tpu.vector_store %arg13[%c0_126, %c0_127, %c0_128], %332 {strides = array<i32>} : memref<1x16x32xbf16, #tpu.memory_space<vmem>>, vector<1x16x32xbf16>,
    return
  }
  func.func @transform_0(%arg0: i32) -> (i32, i32, i32) {
    %c0_i32 = arith.constant 0 : i32
    %c0_i32_0 = arith.constant 0 : i32
    %c0_i32_1 = arith.constant 0 : i32
    return %arg0, %c0_i32, %c0_i32_0 : i32, i32, i32
  }
  func.func @transform_1(%arg0: i32) -> (i32, i32, i32) {
    %c0_i32 = arith.constant 0 : i32
    %c0_i32_0 = arith.constant 0 : i32
    %c0_i32_1 = arith.constant 0 : i32
    return %arg0, %c0_i32, %c0_i32_0 : i32, i32, i32
  }
  func.func @transform_2(%arg0: i32) -> (i32, i32, i32) {
    %c0_i32 = arith.constant 0 : i32
    %c0_i32_0 = arith.constant 0 : i32
    %c0_i32_1 = arith.constant 0 : i32
    return %arg0, %c0_i32, %c0_i32_0 : i32, i32, i32
  }
  func.func @transform_3(%arg0: i32) -> (i32, i32) {
    %c0_i32 = arith.constant 0 : i32
    %c0_i32_0 = arith.constant 0 : i32
    %c0_i32_1 = arith.constant 0 : i32
    return %c0_i32, %c0_i32_0 : i32, i32
  }
  func.func @transform_4(%arg0: i32) -> (i32, i32, i32) {
    %c0_i32 = arith.constant 0 : i32
    %c0_i32_0 = arith.constant 0 : i32
    %c0_i32_1 = arith.constant 0 : i32
    %c0_i32_2 = arith.constant 0 : i32
    return %c0_i32, %c0_i32_0, %c0_i32_1 : i32, i32, i32
  }
  func.func @transform_5(%arg0: i32) -> (i32, i32, i32) {
    %c0_i32 = arith.constant 0 : i32
    %c0_i32_0 = arith.constant 0 : i32
    %c0_i32_1 = arith.constant 0 : i32
    %c0_i32_2 = arith.constant 0 : i32
    return %c0_i32, %c0_i32_0, %c0_i32_1 : i32, i32, i32
  }
  func.func @transform_6(%arg0: i32) -> (i32, i32, i32) {
    %c0_i32 = arith.constant 0 : i32
    %c0_i32_0 = arith.constant 0 : i32
    %c0_i32_1 = arith.constant 0 : i32
    %c0_i32_2 = arith.constant 0 : i32
    return %c0_i32, %c0_i32_0, %c0_i32_1 : i32, i32, i32
  }
  func.func @transform_7(%arg0: i32) -> (i32, i32, i32) {
    %c0_i32 = arith.constant 0 : i32
    %c0_i32_0 = arith.constant 0 : i32
    %c0_i32_1 = arith.constant 0 : i32
    %c0_i32_2 = arith.constant 0 : i32
    return %c0_i32, %c0_i32_0, %c0_i32_1 : i32, i32, i32
  }
  func.func @transform_8(%arg0: i32) -> (i32, i32, i32) {
    %c0_i32 = arith.constant 0 : i32
    %c0_i32_0 = arith.constant 0 : i32
    %c0_i32_1 = arith.constant 0 : i32
    %c0_i32_2 = arith.constant 0 : i32
    return %c0_i32, %c0_i32_0, %c0_i32_1 : i32, i32, i32
  }
  func.func @transform_9(%arg0: i32) -> (i32, i32, i32) {
    %c0_i32 = arith.constant 0 : i32
    %c0_i32_0 = arith.constant 0 : i32
    %c0_i32_1 = arith.constant 0 : i32
    %c0_i32_2 = arith.constant 0 : i32
    return %c0_i32, %c0_i32_0, %c0_i32_1 : i32, i32, i32
  }
  func.func @transform_10(%arg0: i32) -> (i32, i32, i32) {
    %c0_i32 = arith.constant 0 : i32
    %c0_i32_0 = arith.constant 0 : i32
    %c0_i32_1 = arith.constant 0 : i32
    %c0_i32_2 = arith.constant 0 : i32
    return %c0_i32, %c0_i32_0, %c0_i32_1 : i32, i32, i32
  }
  func.func @transform_11(%arg0: i32) -> (i32, i32) {
    %c0_i32 = arith.constant 0 : i32
    %c0_i32_0 = arith.constant 0 : i32
    %c0_i32_1 = arith.constant 0 : i32
    return %c0_i32, %c0_i32_0 : i32, i32
  }
  func.func @transform_12(%arg0: i32) -> (i32, i32, i32) {
    %c0_i32 = arith.constant 0 : i32
    %c0_i32_0 = arith.constant 0 : i32
    %c0_i32_1 = arith.constant 0 : i32
    return %arg0, %c0_i32, %c0_i32_0 : i32, i32, i32
  }
}

module attributes {stable_mosaic.version = 11 : i64} {
  func.func @_generate_kernel(%arg0: i32, %arg1: memref<2x2x16x32xbf16, #tpu.memory_space<vmem>>, %arg2: memref<2x2x16x32xbf16, #tpu.memory_space<vmem>>, %arg3: memref<2x1x16xf32, #tpu.memory_space<vmem>>, %arg4: memref<128x32xf32, #tpu.memory_space<vmem>>, %arg5: memref<2x1x32xf32, #tpu.memory_space<vmem>>, %arg6: memref<2x32x96xbf16, #tpu.memory_space<vmem>>, %arg7: memref<2x32x32xbf16, #tpu.memory_space<vmem>>, %arg8: memref<2x1x32xf32, #tpu.memory_space<vmem>>, %arg9: memref<2x32x32xbf16, #tpu.memory_space<vmem>>, %arg10: memref<2x32x32xbf16, #tpu.memory_space<vmem>>, %arg11: memref<2x1x32xf32, #tpu.memory_space<vmem>>, %arg12: memref<2x32x64xbf16, #tpu.memory_space<vmem>>, %arg13: memref<2x32x64xbf16, #tpu.memory_space<vmem>>, %arg14: memref<2x64x32xbf16, #tpu.memory_space<vmem>>, %arg15: memref<1x32xf32, #tpu.memory_space<vmem>>, %arg16: memref<32x128xbf16, #tpu.memory_space<vmem>>, %arg17: memref<1x2x1xi32, #tpu.memory_space<vmem>>, %arg18: memref<2x2x8x32xf32, #tpu.memory_space<vmem>>, %arg19: memref<2x2x8x32xf32, #tpu.memory_space<vmem>>, %arg20: memref<2x32xf32, #tpu.memory_space<vmem>>, %arg21: memref<2x1xf32, #tpu.memory_space<vmem>>) attributes {dimension_semantics = [#tpu.dimension_semantics<arbitrary>], iteration_bounds = array<i64: 8>, scalar_prefetch = 0 : i64, scratch_operands = 4 : i64, tpu.core_type = #tpu.core_type<tc>, window_params = [{pipeline_mode = #tpu.pipeline_mode<synchronous>, transform_indices = @transform_0, window_bounds = array<i64: 2, 2, 16, 32>}, {pipeline_mode = #tpu.pipeline_mode<synchronous>, transform_indices = @transform_1, window_bounds = array<i64: 2, 2, 16, 32>}, {pipeline_mode = #tpu.pipeline_mode<synchronous>, transform_indices = @transform_2, window_bounds = array<i64: 2, 1, 16>}, {pipeline_mode = #tpu.pipeline_mode<synchronous>, transform_indices = @transform_3, window_bounds = array<i64: 128, 32>}, {pipeline_mode = #tpu.pipeline_mode<synchronous>, transform_indices = @transform_4, window_bounds = array<i64: 2, 1, 32>}, {pipeline_mode = #tpu.pipeline_mode<synchronous>, transform_indices = @transform_5, window_bounds = array<i64: 2, 32, 96>}, {pipeline_mode = #tpu.pipeline_mode<synchronous>, transform_indices = @transform_6, window_bounds = array<i64: 2, 32, 32>}, {pipeline_mode = #tpu.pipeline_mode<synchronous>, transform_indices = @transform_7, window_bounds = array<i64: 2, 1, 32>}, {pipeline_mode = #tpu.pipeline_mode<synchronous>, transform_indices = @transform_8, window_bounds = array<i64: 2, 32, 32>}, {pipeline_mode = #tpu.pipeline_mode<synchronous>, transform_indices = @transform_9, window_bounds = array<i64: 2, 32, 32>}, {pipeline_mode = #tpu.pipeline_mode<synchronous>, transform_indices = @transform_10, window_bounds = array<i64: 2, 1, 32>}, {pipeline_mode = #tpu.pipeline_mode<synchronous>, transform_indices = @transform_11, window_bounds = array<i64: 2, 32, 64>}, {pipeline_mode = #tpu.pipeline_mode<synchronous>, transform_indices = @transform_12, window_bounds = array<i64: 2, 32, 64>}, {pipeline_mode = #tpu.pipeline_mode<synchronous>, transform_indices = @transform_13, window_bounds = array<i64: 2, 64, 32>}, {pipeline_mode = #tpu.pipeline_mode<synchronous>, transform_indices = @transform_14, window_bounds = array<i64: 1, 32>}, {pipeline_mode = #tpu.pipeline_mode<synchronous>, transform_indices = @transform_15, window_bounds = array<i64: 32, 128>}, {transform_indices = @transform_16, window_bounds = array<i64: 1, 2, 1>}]} {
    %c0_i32 = arith.constant 0 : i32
    %0 = arith.cmpi eq, %arg0, %c0_i32 : i32
    %1 = arith.extui %0 : i1 to i32
    %c0_i32_0 = arith.constant 0 : i32
    %2 = arith.cmpi ne, %1, %c0_i32_0 : i32
    scf.if %2 {
      %cst_268 = arith.constant 0.000000e+00 : f32
      %660 = vector.broadcast %cst_268 : f32 to vector<2x2x8x32xf32>
      %c0_269 = arith.constant 0 : index
      %c0_270 = arith.constant 0 : index
      %c0_271 = arith.constant 0 : index
      %c0_272 = arith.constant 0 : index
      %661 = vector.load %arg18[%c0_269, %c0_270, %c0_271, %c0_272] : memref<2x2x8x32xf32, #tpu.memory_space<vmem>>, vector<2x2x8x32xf32>
      tpu.vector_store %arg18[%c0_269, %c0_270, %c0_271, %c0_272], %660 {strides = array<i32>} : memref<2x2x8x32xf32, #tpu.memory_space<vmem>>, vector<2x2x8x32xf32>,
      %cst_273 = arith.constant 0.000000e+00 : f32
      %662 = vector.broadcast %cst_273 : f32 to vector<2x2x8x32xf32>
      %c0_274 = arith.constant 0 : index
      %c0_275 = arith.constant 0 : index
      %c0_276 = arith.constant 0 : index
      %c0_277 = arith.constant 0 : index
      %663 = vector.load %arg19[%c0_274, %c0_275, %c0_276, %c0_277] : memref<2x2x8x32xf32, #tpu.memory_space<vmem>>, vector<2x2x8x32xf32>
      tpu.vector_store %arg19[%c0_274, %c0_275, %c0_276, %c0_277], %662 {strides = array<i32>} : memref<2x2x8x32xf32, #tpu.memory_space<vmem>>, vector<2x2x8x32xf32>,
      %cst_278 = arith.constant 0.000000e+00 : f32
      %664 = vector.broadcast %cst_278 : f32 to vector<2x1xf32>
      %c0_279 = arith.constant 0 : index
      %c0_280 = arith.constant 0 : index
      %665 = vector.load %arg21[%c0_279, %c0_280] : memref<2x1xf32, #tpu.memory_space<vmem>>, vector<2x1xf32>
      tpu.vector_store %arg21[%c0_279, %c0_280], %664 {strides = array<i32>} : memref<2x1xf32, #tpu.memory_space<vmem>>, vector<2x1xf32>,
      %c0_281 = arith.constant 0 : index
      %c0_282 = arith.constant 0 : index
      %666 = vector.load %arg4[%c0_281, %c0_282] : memref<128x32xf32, #tpu.memory_space<vmem>>, vector<1x32xf32>
      %667 = vector.shape_cast %666 : vector<1x32xf32> to vector<1x32xf32>
      %668 = vector.broadcast %667 : vector<1x32xf32> to vector<2x32xf32>
      %c0_283 = arith.constant 0 : index
      %c0_284 = arith.constant 0 : index
      %669 = vector.load %arg20[%c0_283, %c0_284] : memref<2x32xf32, #tpu.memory_space<vmem>>, vector<2x32xf32>
      tpu.vector_store %arg20[%c0_283, %c0_284], %668 {strides = array<i32>} : memref<2x32xf32, #tpu.memory_space<vmem>>, vector<2x32xf32>,
    } else {
    }
    %c0 = arith.constant 0 : index
    %c0_1 = arith.constant 0 : index
    %3 = vector.load %arg20[%c0, %c0_1] : memref<2x32xf32, #tpu.memory_space<vmem>>, vector<2x32xf32>
    %c0_2 = arith.constant 0 : index
    %c0_3 = arith.constant 0 : index
    %c0_4 = arith.constant 0 : index
    %4 = vector.load %arg3[%c0_2, %c0_3, %c0_4] : memref<2x1x16xf32, #tpu.memory_space<vmem>>, vector<2x1x16xf32>
    %5 = tpu.iota {dimensions = array<i32: 2>} : vector<1x1x8xi32>
    %6 = vector.broadcast %arg0 : i32 to vector<1x1x8xi32>
    %7 = arith.cmpi sle, %5, %6 : vector<1x1x8xi32>
    %cst = arith.constant 0.000000e+00 : f32
    %cst_5 = arith.constant -1.000000e+09 : f32
    %8 = vector.broadcast %cst : f32 to vector<1x1x8xf32>
    %9 = vector.broadcast %cst_5 : f32 to vector<1x1x8xf32>
    %10 = arith.select %7, %8, %9 : vector<1x1x8xi1>, vector<1x1x8xf32>
    %11 = vector.shape_cast %10 : vector<1x1x8xf32> to vector<1x1x8xf32>
    %12 = vector.broadcast %11 : vector<1x1x8xf32> to vector<2x1x8xf32>
    %c0_6 = arith.constant 0 : index
    %c0_7 = arith.constant 0 : index
    %c0_8 = arith.constant 0 : index
    %13 = vector.load %arg5[%c0_6, %c0_7, %c0_8] : memref<2x1x32xf32, #tpu.memory_space<vmem>>, vector<1x1x32xf32>
    %14 = vector.shape_cast %13 : vector<1x1x32xf32> to vector<1x32xf32>
    %15 = arith.mulf %3, %3 : vector<2x32xf32>
    %cst_9 = arith.constant dense<0.000000e+00> : vector<2xf32>
    %16 = vector.multi_reduction <add>, %15, %cst_9 [1] : vector<2x32xf32> to vector<2xf32>
    %17 = vector.shape_cast %16 : vector<2xf32> to vector<2x1xf32>
    %cst_10 = arith.constant 3.200000e+01 : f32
    %18 = vector.broadcast %cst_10 : f32 to vector<2x1xf32>
    %19 = arith.divf %17, %18 : vector<2x1xf32>
    %cst_11 = arith.constant 9.99999997E-7 : f32
    %20 = vector.broadcast %cst_11 : f32 to vector<2x1xf32>
    %21 = arith.addf %19, %20 : vector<2x1xf32>
    %22 = math.rsqrt %21 : vector<2x1xf32>
    %23 = vector.broadcast %22 : vector<2x1xf32> to vector<2x32xf32>
    %24 = arith.mulf %3, %23 : vector<2x32xf32>
    %25 = vector.broadcast %14 : vector<1x32xf32> to vector<2x32xf32>
    %26 = arith.mulf %24, %25 : vector<2x32xf32>
    %27 = arith.truncf %26 : vector<2x32xf32> to vector<2x32xbf16>
    %c0_12 = arith.constant 0 : index
    %c0_13 = arith.constant 0 : index
    %c0_14 = arith.constant 0 : index
    %28 = vector.load %arg6[%c0_12, %c0_13, %c0_14] : memref<2x32x96xbf16, #tpu.memory_space<vmem>>, vector<1x32x96xbf16>
    %29 = vector.shape_cast %28 : vector<1x32x96xbf16> to vector<32x96xbf16>
    %cst_15 = arith.constant dense<0.000000e+00> : vector<2x96xf32>
    %30 = tpu.matmul %27, %29, %cst_15 {dimension_numbers = #tpu.dot_dimension_numbers<[1], [0], [0], [1], [0, 0, 1, 1], [], []>} : vector<2x32xbf16>, vector<32x96xbf16>, vector<2x96xf32> -> vector<2x96xf32>
    %31 = vector.extract_strided_slice %30 {offsets = [0, 0], sizes = [2, 32], strides = [1, 1]} : vector<2x96xf32> to vector<2x32xf32>
    %32 = vector.shape_cast %31 : vector<2x32xf32> to vector<2x1x32xf32>
    %33 = vector.extract_strided_slice %30 {offsets = [0, 32], sizes = [2, 32], strides = [1, 1]} : vector<2x96xf32> to vector<2x32xf32>
    %34 = vector.extract_strided_slice %30 {offsets = [0, 64], sizes = [2, 32], strides = [1, 1]} : vector<2x96xf32> to vector<2x32xf32>
    %35 = vector.extract_strided_slice %33 {offsets = [0, 0], sizes = [1, 32], strides = [1, 1]} : vector<2x32xf32> to vector<1x32xf32>
    %c0_16 = arith.constant 0 : index
    %c0_17 = arith.constant 0 : index
    %36 = arith.index_cast %arg0 : i32 to index
    %c0_18 = arith.constant 0 : index
    %37 = vector.load %arg18[%c0_16, %c0_17, %36, %c0_18] : memref<2x2x8x32xf32, #tpu.memory_space<vmem>>, vector<1x1x1x32xf32>
    %38 = vector.shape_cast %37 : vector<1x1x1x32xf32> to vector<1x32xf32>
    %39 = vector.shape_cast %35 : vector<1x32xf32> to vector<1x1x1x32xf32>
    tpu.vector_store %arg18[%c0_16, %c0_17, %36, %c0_18], %39 {strides = array<i32>} : memref<2x2x8x32xf32, #tpu.memory_space<vmem>>, vector<1x1x1x32xf32>,
    %40 = vector.extract_strided_slice %34 {offsets = [0, 0], sizes = [1, 32], strides = [1, 1]} : vector<2x32xf32> to vector<1x32xf32>
    %c0_19 = arith.constant 0 : index
    %c0_20 = arith.constant 0 : index
    %41 = arith.index_cast %arg0 : i32 to index
    %c0_21 = arith.constant 0 : index
    %42 = vector.load %arg19[%c0_19, %c0_20, %41, %c0_21] : memref<2x2x8x32xf32, #tpu.memory_space<vmem>>, vector<1x1x1x32xf32>
    %43 = vector.shape_cast %42 : vector<1x1x1x32xf32> to vector<1x32xf32>
    %44 = vector.shape_cast %40 : vector<1x32xf32> to vector<1x1x1x32xf32>
    tpu.vector_store %arg19[%c0_19, %c0_20, %41, %c0_21], %44 {strides = array<i32>} : memref<2x2x8x32xf32, #tpu.memory_space<vmem>>, vector<1x1x1x32xf32>,
    %45 = vector.extract_strided_slice %33 {offsets = [1, 0], sizes = [1, 32], strides = [1, 1]} : vector<2x32xf32> to vector<1x32xf32>
    %c0_22 = arith.constant 0 : index
    %c1 = arith.constant 1 : index
    %46 = arith.index_cast %arg0 : i32 to index
    %c0_23 = arith.constant 0 : index
    %47 = vector.load %arg18[%c0_22, %c1, %46, %c0_23] : memref<2x2x8x32xf32, #tpu.memory_space<vmem>>, vector<1x1x1x32xf32>
    %48 = vector.shape_cast %47 : vector<1x1x1x32xf32> to vector<1x32xf32>
    %49 = vector.shape_cast %45 : vector<1x32xf32> to vector<1x1x1x32xf32>
    tpu.vector_store %arg18[%c0_22, %c1, %46, %c0_23], %49 {strides = array<i32>} : memref<2x2x8x32xf32, #tpu.memory_space<vmem>>, vector<1x1x1x32xf32>,
    %50 = vector.extract_strided_slice %34 {offsets = [1, 0], sizes = [1, 32], strides = [1, 1]} : vector<2x32xf32> to vector<1x32xf32>
    %c0_24 = arith.constant 0 : index
    %c1_25 = arith.constant 1 : index
    %51 = arith.index_cast %arg0 : i32 to index
    %c0_26 = arith.constant 0 : index
    %52 = vector.load %arg19[%c0_24, %c1_25, %51, %c0_26] : memref<2x2x8x32xf32, #tpu.memory_space<vmem>>, vector<1x1x1x32xf32>
    %53 = vector.shape_cast %52 : vector<1x1x1x32xf32> to vector<1x32xf32>
    %54 = vector.shape_cast %50 : vector<1x32xf32> to vector<1x1x1x32xf32>
    tpu.vector_store %arg19[%c0_24, %c1_25, %51, %c0_26], %54 {strides = array<i32>} : memref<2x2x8x32xf32, #tpu.memory_space<vmem>>, vector<1x1x1x32xf32>,
    %c0_27 = arith.constant 0 : index
    %c0_28 = arith.constant 0 : index
    %c0_29 = arith.constant 0 : index
    %c0_30 = arith.constant 0 : index
    %55 = vector.load %arg18[%c0_27, %c0_28, %c0_29, %c0_30] : memref<2x2x8x32xf32, #tpu.memory_space<vmem>>, vector<1x2x8x32xf32>
    %56 = vector.shape_cast %55 : vector<1x2x8x32xf32> to vector<2x8x32xf32>
    %c0_31 = arith.constant 0 : index
    %c0_32 = arith.constant 0 : index
    %c0_33 = arith.constant 0 : index
    %c0_34 = arith.constant 0 : index
    %57 = vector.load %arg19[%c0_31, %c0_32, %c0_33, %c0_34] : memref<2x2x8x32xf32, #tpu.memory_space<vmem>>, vector<1x2x8x32xf32>
    %58 = vector.shape_cast %57 : vector<1x2x8x32xf32> to vector<2x8x32xf32>
    %c0_35 = arith.constant 0 : index
    %c0_36 = arith.constant 0 : index
    %c0_37 = arith.constant 0 : index
    %59 = vector.load %arg7[%c0_35, %c0_36, %c0_37] : memref<2x32x32xbf16, #tpu.memory_space<vmem>>, vector<1x32x32xbf16>
    %60 = vector.shape_cast %59 : vector<1x32x32xbf16> to vector<32x32xbf16>
    %cst_38 = arith.constant 0.000000e+00 : f32
    %61 = vector.broadcast %cst_38 : f32 to vector<2x32xf32>
    %62 = arith.truncf %32 : vector<2x1x32xf32> to vector<2x1x32xbf16>
    %63 = arith.truncf %56 : vector<2x8x32xf32> to vector<2x8x32xbf16>
    %64 = arith.truncf %58 : vector<2x8x32xf32> to vector<2x8x32xbf16>
    %65 = vector.extract_strided_slice %62 {offsets = [0, 0, 0], sizes = [2, 1, 8], strides = [1, 1, 1]} : vector<2x1x32xbf16> to vector<2x1x8xbf16>
    %66 = vector.extract_strided_slice %63 {offsets = [0, 0, 0], sizes = [2, 8, 8], strides = [1, 1, 1]} : vector<2x8x32xbf16> to vector<2x8x8xbf16>
    "tpu.trace_start"() <{level = 10 : i32, message = "bqd,bkd->bqk"}> : () -> ()
    %cst_39 = arith.constant dense<0.000000e+00> : vector<2x1x8xf32>
    %67 = tpu.matmul %65, %66, %cst_39 {dimension_numbers = #tpu.dot_dimension_numbers<[2], [2], [1], [1], [0, 0, 0, 1, 1, 1], [0], [0]>} : vector<2x1x8xbf16>, vector<2x8x8xbf16>, vector<2x1x8xf32> -> vector<2x1x8xf32>
    "tpu.trace_stop"() : () -> ()
    %68 = arith.addf %67, %12 : vector<2x1x8xf32>
    %cst_40 = arith.constant dense<0xFF800000> : vector<2x1xf32>
    %69 = vector.multi_reduction <maximumf>, %68, %cst_40 [2] : vector<2x1x8xf32> to vector<2x1xf32>
    %70 = vector.shape_cast %69 : vector<2x1xf32> to vector<2x1x1xf32>
    %71 = vector.broadcast %70 : vector<2x1x1xf32> to vector<2x1x8xf32>
    %72 = arith.subf %68, %71 : vector<2x1x8xf32>
    %73 = math.exp %72 : vector<2x1x8xf32>
    %cst_41 = arith.constant dense<0.000000e+00> : vector<2x1xf32>
    %74 = vector.multi_reduction <add>, %73, %cst_41 [2] : vector<2x1x8xf32> to vector<2x1xf32>
    %75 = vector.shape_cast %74 : vector<2x1xf32> to vector<2x1x1xf32>
    %76 = tpu.reciprocal %75 {approx = true} : vector<2x1x1xf32> -> vector<2x1x1xf32>
    %77 = vector.broadcast %76 : vector<2x1x1xf32> to vector<2x1x8xf32>
    %78 = arith.mulf %73, %77 : vector<2x1x8xf32>
    %79 = arith.truncf %78 : vector<2x1x8xf32> to vector<2x1x8xbf16>
    %80 = vector.extract_strided_slice %64 {offsets = [0, 0, 0], sizes = [2, 8, 8], strides = [1, 1, 1]} : vector<2x8x32xbf16> to vector<2x8x8xbf16>
    "tpu.trace_start"() <{level = 10 : i32, message = "bqk,bkd->bqd"}> : () -> ()
    %cst_42 = arith.constant dense<0.000000e+00> : vector<2x1x8xf32>
    %81 = tpu.matmul %79, %80, %cst_42 {dimension_numbers = #tpu.dot_dimension_numbers<[2], [1], [1], [2], [0, 0, 0, 1, 1, 2], [0], [0]>} : vector<2x1x8xbf16>, vector<2x8x8xbf16>, vector<2x1x8xf32> -> vector<2x1x8xf32>
    "tpu.trace_stop"() : () -> ()
    %82 = vector.shape_cast %81 : vector<2x1x8xf32> to vector<2x8xf32>
    %83 = arith.truncf %82 : vector<2x8xf32> to vector<2x8xbf16>
    %84 = vector.extract_strided_slice %60 {offsets = [0, 0], sizes = [8, 32], strides = [1, 1]} : vector<32x32xbf16> to vector<8x32xbf16>
    %cst_43 = arith.constant dense<0.000000e+00> : vector<2x32xf32>
    %85 = tpu.matmul %83, %84, %cst_43 {dimension_numbers = #tpu.dot_dimension_numbers<[1], [0], [0], [1], [0, 0, 1, 1], [], []>} : vector<2x8xbf16>, vector<8x32xbf16>, vector<2x32xf32> -> vector<2x32xf32>
    %86 = arith.addf %61, %85 : vector<2x32xf32>
    %87 = vector.extract_strided_slice %62 {offsets = [0, 0, 8], sizes = [2, 1, 8], strides = [1, 1, 1]} : vector<2x1x32xbf16> to vector<2x1x8xbf16>
    %88 = vector.extract_strided_slice %63 {offsets = [0, 0, 8], sizes = [2, 8, 8], strides = [1, 1, 1]} : vector<2x8x32xbf16> to vector<2x8x8xbf16>
    "tpu.trace_start"() <{level = 10 : i32, message = "bqd,bkd->bqk"}> : () -> ()
    %cst_44 = arith.constant dense<0.000000e+00> : vector<2x1x8xf32>
    %89 = tpu.matmul %87, %88, %cst_44 {dimension_numbers = #tpu.dot_dimension_numbers<[2], [2], [1], [1], [0, 0, 0, 1, 1, 1], [0], [0]>} : vector<2x1x8xbf16>, vector<2x8x8xbf16>, vector<2x1x8xf32> -> vector<2x1x8xf32>
    "tpu.trace_stop"() : () -> ()
    %90 = arith.addf %89, %12 : vector<2x1x8xf32>
    %cst_45 = arith.constant dense<0xFF800000> : vector<2x1xf32>
    %91 = vector.multi_reduction <maximumf>, %90, %cst_45 [2] : vector<2x1x8xf32> to vector<2x1xf32>
    %92 = vector.shape_cast %91 : vector<2x1xf32> to vector<2x1x1xf32>
    %93 = vector.broadcast %92 : vector<2x1x1xf32> to vector<2x1x8xf32>
    %94 = arith.subf %90, %93 : vector<2x1x8xf32>
    %95 = math.exp %94 : vector<2x1x8xf32>
    %cst_46 = arith.constant dense<0.000000e+00> : vector<2x1xf32>
    %96 = vector.multi_reduction <add>, %95, %cst_46 [2] : vector<2x1x8xf32> to vector<2x1xf32>
    %97 = vector.shape_cast %96 : vector<2x1xf32> to vector<2x1x1xf32>
    %98 = tpu.reciprocal %97 {approx = true} : vector<2x1x1xf32> -> vector<2x1x1xf32>
    %99 = vector.broadcast %98 : vector<2x1x1xf32> to vector<2x1x8xf32>
    %100 = arith.mulf %95, %99 : vector<2x1x8xf32>
    %101 = arith.truncf %100 : vector<2x1x8xf32> to vector<2x1x8xbf16>
    %102 = vector.extract_strided_slice %64 {offsets = [0, 0, 8], sizes = [2, 8, 8], strides = [1, 1, 1]} : vector<2x8x32xbf16> to vector<2x8x8xbf16>
    "tpu.trace_start"() <{level = 10 : i32, message = "bqk,bkd->bqd"}> : () -> ()
    %cst_47 = arith.constant dense<0.000000e+00> : vector<2x1x8xf32>
    %103 = tpu.matmul %101, %102, %cst_47 {dimension_numbers = #tpu.dot_dimension_numbers<[2], [1], [1], [2], [0, 0, 0, 1, 1, 2], [0], [0]>} : vector<2x1x8xbf16>, vector<2x8x8xbf16>, vector<2x1x8xf32> -> vector<2x1x8xf32>
    "tpu.trace_stop"() : () -> ()
    %104 = vector.shape_cast %103 : vector<2x1x8xf32> to vector<2x8xf32>
    %105 = arith.truncf %104 : vector<2x8xf32> to vector<2x8xbf16>
    %106 = vector.extract_strided_slice %60 {offsets = [8, 0], sizes = [8, 32], strides = [1, 1]} : vector<32x32xbf16> to vector<8x32xbf16>
    %cst_48 = arith.constant dense<0.000000e+00> : vector<2x32xf32>
    %107 = tpu.matmul %105, %106, %cst_48 {dimension_numbers = #tpu.dot_dimension_numbers<[1], [0], [0], [1], [0, 0, 1, 1], [], []>} : vector<2x8xbf16>, vector<8x32xbf16>, vector<2x32xf32> -> vector<2x32xf32>
    %108 = arith.addf %86, %107 : vector<2x32xf32>
    %109 = vector.extract_strided_slice %62 {offsets = [0, 0, 16], sizes = [2, 1, 8], strides = [1, 1, 1]} : vector<2x1x32xbf16> to vector<2x1x8xbf16>
    %110 = vector.extract_strided_slice %63 {offsets = [0, 0, 16], sizes = [2, 8, 8], strides = [1, 1, 1]} : vector<2x8x32xbf16> to vector<2x8x8xbf16>
    "tpu.trace_start"() <{level = 10 : i32, message = "bqd,bkd->bqk"}> : () -> ()
    %cst_49 = arith.constant dense<0.000000e+00> : vector<2x1x8xf32>
    %111 = tpu.matmul %109, %110, %cst_49 {dimension_numbers = #tpu.dot_dimension_numbers<[2], [2], [1], [1], [0, 0, 0, 1, 1, 1], [0], [0]>} : vector<2x1x8xbf16>, vector<2x8x8xbf16>, vector<2x1x8xf32> -> vector<2x1x8xf32>
    "tpu.trace_stop"() : () -> ()
    %112 = arith.addf %111, %12 : vector<2x1x8xf32>
    %cst_50 = arith.constant dense<0xFF800000> : vector<2x1xf32>
    %113 = vector.multi_reduction <maximumf>, %112, %cst_50 [2] : vector<2x1x8xf32> to vector<2x1xf32>
    %114 = vector.shape_cast %113 : vector<2x1xf32> to vector<2x1x1xf32>
    %115 = vector.broadcast %114 : vector<2x1x1xf32> to vector<2x1x8xf32>
    %116 = arith.subf %112, %115 : vector<2x1x8xf32>
    %117 = math.exp %116 : vector<2x1x8xf32>
    %cst_51 = arith.constant dense<0.000000e+00> : vector<2x1xf32>
    %118 = vector.multi_reduction <add>, %117, %cst_51 [2] : vector<2x1x8xf32> to vector<2x1xf32>
    %119 = vector.shape_cast %118 : vector<2x1xf32> to vector<2x1x1xf32>
    %120 = tpu.reciprocal %119 {approx = true} : vector<2x1x1xf32> -> vector<2x1x1xf32>
    %121 = vector.broadcast %120 : vector<2x1x1xf32> to vector<2x1x8xf32>
    %122 = arith.mulf %117, %121 : vector<2x1x8xf32>
    %123 = arith.truncf %122 : vector<2x1x8xf32> to vector<2x1x8xbf16>
    %124 = vector.extract_strided_slice %64 {offsets = [0, 0, 16], sizes = [2, 8, 8], strides = [1, 1, 1]} : vector<2x8x32xbf16> to vector<2x8x8xbf16>
    "tpu.trace_start"() <{level = 10 : i32, message = "bqk,bkd->bqd"}> : () -> ()
    %cst_52 = arith.constant dense<0.000000e+00> : vector<2x1x8xf32>
    %125 = tpu.matmul %123, %124, %cst_52 {dimension_numbers = #tpu.dot_dimension_numbers<[2], [1], [1], [2], [0, 0, 0, 1, 1, 2], [0], [0]>} : vector<2x1x8xbf16>, vector<2x8x8xbf16>, vector<2x1x8xf32> -> vector<2x1x8xf32>
    "tpu.trace_stop"() : () -> ()
    %126 = vector.shape_cast %125 : vector<2x1x8xf32> to vector<2x8xf32>
    %127 = arith.truncf %126 : vector<2x8xf32> to vector<2x8xbf16>
    %128 = vector.extract_strided_slice %60 {offsets = [16, 0], sizes = [8, 32], strides = [1, 1]} : vector<32x32xbf16> to vector<8x32xbf16>
    %cst_53 = arith.constant dense<0.000000e+00> : vector<2x32xf32>
    %129 = tpu.matmul %127, %128, %cst_53 {dimension_numbers = #tpu.dot_dimension_numbers<[1], [0], [0], [1], [0, 0, 1, 1], [], []>} : vector<2x8xbf16>, vector<8x32xbf16>, vector<2x32xf32> -> vector<2x32xf32>
    %130 = arith.addf %108, %129 : vector<2x32xf32>
    %131 = vector.extract_strided_slice %62 {offsets = [0, 0, 24], sizes = [2, 1, 8], strides = [1, 1, 1]} : vector<2x1x32xbf16> to vector<2x1x8xbf16>
    %132 = vector.extract_strided_slice %63 {offsets = [0, 0, 24], sizes = [2, 8, 8], strides = [1, 1, 1]} : vector<2x8x32xbf16> to vector<2x8x8xbf16>
    "tpu.trace_start"() <{level = 10 : i32, message = "bqd,bkd->bqk"}> : () -> ()
    %cst_54 = arith.constant dense<0.000000e+00> : vector<2x1x8xf32>
    %133 = tpu.matmul %131, %132, %cst_54 {dimension_numbers = #tpu.dot_dimension_numbers<[2], [2], [1], [1], [0, 0, 0, 1, 1, 1], [0], [0]>} : vector<2x1x8xbf16>, vector<2x8x8xbf16>, vector<2x1x8xf32> -> vector<2x1x8xf32>
    "tpu.trace_stop"() : () -> ()
    %134 = arith.addf %133, %12 : vector<2x1x8xf32>
    %cst_55 = arith.constant dense<0xFF800000> : vector<2x1xf32>
    %135 = vector.multi_reduction <maximumf>, %134, %cst_55 [2] : vector<2x1x8xf32> to vector<2x1xf32>
    %136 = vector.shape_cast %135 : vector<2x1xf32> to vector<2x1x1xf32>
    %137 = vector.broadcast %136 : vector<2x1x1xf32> to vector<2x1x8xf32>
    %138 = arith.subf %134, %137 : vector<2x1x8xf32>
    %139 = math.exp %138 : vector<2x1x8xf32>
    %cst_56 = arith.constant dense<0.000000e+00> : vector<2x1xf32>
    %140 = vector.multi_reduction <add>, %139, %cst_56 [2] : vector<2x1x8xf32> to vector<2x1xf32>
    %141 = vector.shape_cast %140 : vector<2x1xf32> to vector<2x1x1xf32>
    %142 = tpu.reciprocal %141 {approx = true} : vector<2x1x1xf32> -> vector<2x1x1xf32>
    %143 = vector.broadcast %142 : vector<2x1x1xf32> to vector<2x1x8xf32>
    %144 = arith.mulf %139, %143 : vector<2x1x8xf32>
    %145 = arith.truncf %144 : vector<2x1x8xf32> to vector<2x1x8xbf16>
    %146 = vector.extract_strided_slice %64 {offsets = [0, 0, 24], sizes = [2, 8, 8], strides = [1, 1, 1]} : vector<2x8x32xbf16> to vector<2x8x8xbf16>
    "tpu.trace_start"() <{level = 10 : i32, message = "bqk,bkd->bqd"}> : () -> ()
    %cst_57 = arith.constant dense<0.000000e+00> : vector<2x1x8xf32>
    %147 = tpu.matmul %145, %146, %cst_57 {dimension_numbers = #tpu.dot_dimension_numbers<[2], [1], [1], [2], [0, 0, 0, 1, 1, 2], [0], [0]>} : vector<2x1x8xbf16>, vector<2x8x8xbf16>, vector<2x1x8xf32> -> vector<2x1x8xf32>
    "tpu.trace_stop"() : () -> ()
    %148 = vector.shape_cast %147 : vector<2x1x8xf32> to vector<2x8xf32>
    %149 = arith.truncf %148 : vector<2x8xf32> to vector<2x8xbf16>
    %150 = vector.extract_strided_slice %60 {offsets = [24, 0], sizes = [8, 32], strides = [1, 1]} : vector<32x32xbf16> to vector<8x32xbf16>
    %cst_58 = arith.constant dense<0.000000e+00> : vector<2x32xf32>
    %151 = tpu.matmul %149, %150, %cst_58 {dimension_numbers = #tpu.dot_dimension_numbers<[1], [0], [0], [1], [0, 0, 1, 1], [], []>} : vector<2x8xbf16>, vector<8x32xbf16>, vector<2x32xf32> -> vector<2x32xf32>
    %152 = arith.addf %130, %151 : vector<2x32xf32>
    %153 = arith.addf %3, %152 : vector<2x32xf32>
    %c0_59 = arith.constant 0 : index
    %c0_60 = arith.constant 0 : index
    %c0_61 = arith.constant 0 : index
    %154 = vector.load %arg8[%c0_59, %c0_60, %c0_61] : memref<2x1x32xf32, #tpu.memory_space<vmem>>, vector<1x1x32xf32>
    %155 = vector.shape_cast %154 : vector<1x1x32xf32> to vector<1x32xf32>
    %156 = arith.mulf %153, %153 : vector<2x32xf32>
    %cst_62 = arith.constant dense<0.000000e+00> : vector<2xf32>
    %157 = vector.multi_reduction <add>, %156, %cst_62 [1] : vector<2x32xf32> to vector<2xf32>
    %158 = vector.shape_cast %157 : vector<2xf32> to vector<2x1xf32>
    %cst_63 = arith.constant 3.200000e+01 : f32
    %159 = vector.broadcast %cst_63 : f32 to vector<2x1xf32>
    %160 = arith.divf %158, %159 : vector<2x1xf32>
    %cst_64 = arith.constant 9.99999997E-7 : f32
    %161 = vector.broadcast %cst_64 : f32 to vector<2x1xf32>
    %162 = arith.addf %160, %161 : vector<2x1xf32>
    %163 = math.rsqrt %162 : vector<2x1xf32>
    %164 = vector.broadcast %163 : vector<2x1xf32> to vector<2x32xf32>
    %165 = arith.mulf %153, %164 : vector<2x32xf32>
    %166 = vector.broadcast %155 : vector<1x32xf32> to vector<2x32xf32>
    %167 = arith.mulf %165, %166 : vector<2x32xf32>
    %168 = arith.truncf %167 : vector<2x32xf32> to vector<2x32xbf16>
    %c0_65 = arith.constant 0 : index
    %c0_66 = arith.constant 0 : index
    %c0_67 = arith.constant 0 : index
    %169 = vector.load %arg9[%c0_65, %c0_66, %c0_67] : memref<2x32x32xbf16, #tpu.memory_space<vmem>>, vector<1x32x32xbf16>
    %170 = vector.shape_cast %169 : vector<1x32x32xbf16> to vector<32x32xbf16>
    %cst_68 = arith.constant dense<0.000000e+00> : vector<2x32xf32>
    %171 = tpu.matmul %168, %170, %cst_68 {dimension_numbers = #tpu.dot_dimension_numbers<[1], [0], [0], [1], [0, 0, 1, 1], [], []>} : vector<2x32xbf16>, vector<32x32xbf16>, vector<2x32xf32> -> vector<2x32xf32>
    %172 = vector.shape_cast %171 : vector<2x32xf32> to vector<2x1x32xf32>
    %c0_69 = arith.constant 0 : index
    %c0_70 = arith.constant 0 : index
    %c0_71 = arith.constant 0 : index
    %c0_72 = arith.constant 0 : index
    %173 = vector.load %arg1[%c0_69, %c0_70, %c0_71, %c0_72] : memref<2x2x16x32xbf16, #tpu.memory_space<vmem>>, vector<1x2x16x32xbf16>
    %174 = vector.shape_cast %173 : vector<1x2x16x32xbf16> to vector<2x16x32xbf16>
    %c0_73 = arith.constant 0 : index
    %c0_74 = arith.constant 0 : index
    %c0_75 = arith.constant 0 : index
    %c0_76 = arith.constant 0 : index
    %175 = vector.load %arg2[%c0_73, %c0_74, %c0_75, %c0_76] : memref<2x2x16x32xbf16, #tpu.memory_space<vmem>>, vector<1x2x16x32xbf16>
    %176 = vector.shape_cast %175 : vector<1x2x16x32xbf16> to vector<2x16x32xbf16>
    %c0_77 = arith.constant 0 : index
    %c0_78 = arith.constant 0 : index
    %c0_79 = arith.constant 0 : index
    %177 = vector.load %arg10[%c0_77, %c0_78, %c0_79] : memref<2x32x32xbf16, #tpu.memory_space<vmem>>, vector<1x32x32xbf16>
    %178 = vector.shape_cast %177 : vector<1x32x32xbf16> to vector<32x32xbf16>
    %cst_80 = arith.constant 0.000000e+00 : f32
    %179 = vector.broadcast %cst_80 : f32 to vector<2x32xf32>
    %180 = arith.truncf %172 : vector<2x1x32xf32> to vector<2x1x32xbf16>
    %181 = vector.extract_strided_slice %180 {offsets = [0, 0, 0], sizes = [2, 1, 8], strides = [1, 1, 1]} : vector<2x1x32xbf16> to vector<2x1x8xbf16>
    %182 = vector.extract_strided_slice %174 {offsets = [0, 0, 0], sizes = [2, 16, 8], strides = [1, 1, 1]} : vector<2x16x32xbf16> to vector<2x16x8xbf16>
    "tpu.trace_start"() <{level = 10 : i32, message = "bqd,bkd->bqk"}> : () -> ()
    %cst_81 = arith.constant dense<0.000000e+00> : vector<2x1x16xf32>
    %183 = tpu.matmul %181, %182, %cst_81 {dimension_numbers = #tpu.dot_dimension_numbers<[2], [2], [1], [1], [0, 0, 0, 1, 1, 1], [0], [0]>} : vector<2x1x8xbf16>, vector<2x16x8xbf16>, vector<2x1x16xf32> -> vector<2x1x16xf32>
    "tpu.trace_stop"() : () -> ()
    %184 = arith.addf %183, %4 : vector<2x1x16xf32>
    %cst_82 = arith.constant dense<0xFF800000> : vector<2x1xf32>
    %185 = vector.multi_reduction <maximumf>, %184, %cst_82 [2] : vector<2x1x16xf32> to vector<2x1xf32>
    %186 = vector.shape_cast %185 : vector<2x1xf32> to vector<2x1x1xf32>
    %187 = vector.broadcast %186 : vector<2x1x1xf32> to vector<2x1x16xf32>
    %188 = arith.subf %184, %187 : vector<2x1x16xf32>
    %189 = math.exp %188 : vector<2x1x16xf32>
    %cst_83 = arith.constant dense<0.000000e+00> : vector<2x1xf32>
    %190 = vector.multi_reduction <add>, %189, %cst_83 [2] : vector<2x1x16xf32> to vector<2x1xf32>
    %191 = vector.shape_cast %190 : vector<2x1xf32> to vector<2x1x1xf32>
    %192 = tpu.reciprocal %191 {approx = true} : vector<2x1x1xf32> -> vector<2x1x1xf32>
    %193 = vector.broadcast %192 : vector<2x1x1xf32> to vector<2x1x16xf32>
    %194 = arith.mulf %189, %193 : vector<2x1x16xf32>
    %195 = arith.truncf %194 : vector<2x1x16xf32> to vector<2x1x16xbf16>
    %196 = vector.extract_strided_slice %176 {offsets = [0, 0, 0], sizes = [2, 16, 8], strides = [1, 1, 1]} : vector<2x16x32xbf16> to vector<2x16x8xbf16>
    "tpu.trace_start"() <{level = 10 : i32, message = "bqk,bkd->bqd"}> : () -> ()
    %cst_84 = arith.constant dense<0.000000e+00> : vector<2x1x8xf32>
    %197 = tpu.matmul %195, %196, %cst_84 {dimension_numbers = #tpu.dot_dimension_numbers<[2], [1], [1], [2], [0, 0, 0, 1, 1, 2], [0], [0]>} : vector<2x1x16xbf16>, vector<2x16x8xbf16>, vector<2x1x8xf32> -> vector<2x1x8xf32>
    "tpu.trace_stop"() : () -> ()
    %198 = vector.shape_cast %197 : vector<2x1x8xf32> to vector<2x8xf32>
    %199 = arith.truncf %198 : vector<2x8xf32> to vector<2x8xbf16>
    %200 = vector.extract_strided_slice %178 {offsets = [0, 0], sizes = [8, 32], strides = [1, 1]} : vector<32x32xbf16> to vector<8x32xbf16>
    %cst_85 = arith.constant dense<0.000000e+00> : vector<2x32xf32>
    %201 = tpu.matmul %199, %200, %cst_85 {dimension_numbers = #tpu.dot_dimension_numbers<[1], [0], [0], [1], [0, 0, 1, 1], [], []>} : vector<2x8xbf16>, vector<8x32xbf16>, vector<2x32xf32> -> vector<2x32xf32>
    %202 = arith.addf %179, %201 : vector<2x32xf32>
    %203 = vector.extract_strided_slice %180 {offsets = [0, 0, 8], sizes = [2, 1, 8], strides = [1, 1, 1]} : vector<2x1x32xbf16> to vector<2x1x8xbf16>
    %204 = vector.extract_strided_slice %174 {offsets = [0, 0, 8], sizes = [2, 16, 8], strides = [1, 1, 1]} : vector<2x16x32xbf16> to vector<2x16x8xbf16>
    "tpu.trace_start"() <{level = 10 : i32, message = "bqd,bkd->bqk"}> : () -> ()
    %cst_86 = arith.constant dense<0.000000e+00> : vector<2x1x16xf32>
    %205 = tpu.matmul %203, %204, %cst_86 {dimension_numbers = #tpu.dot_dimension_numbers<[2], [2], [1], [1], [0, 0, 0, 1, 1, 1], [0], [0]>} : vector<2x1x8xbf16>, vector<2x16x8xbf16>, vector<2x1x16xf32> -> vector<2x1x16xf32>
    "tpu.trace_stop"() : () -> ()
    %206 = arith.addf %205, %4 : vector<2x1x16xf32>
    %cst_87 = arith.constant dense<0xFF800000> : vector<2x1xf32>
    %207 = vector.multi_reduction <maximumf>, %206, %cst_87 [2] : vector<2x1x16xf32> to vector<2x1xf32>
    %208 = vector.shape_cast %207 : vector<2x1xf32> to vector<2x1x1xf32>
    %209 = vector.broadcast %208 : vector<2x1x1xf32> to vector<2x1x16xf32>
    %210 = arith.subf %206, %209 : vector<2x1x16xf32>
    %211 = math.exp %210 : vector<2x1x16xf32>
    %cst_88 = arith.constant dense<0.000000e+00> : vector<2x1xf32>
    %212 = vector.multi_reduction <add>, %211, %cst_88 [2] : vector<2x1x16xf32> to vector<2x1xf32>
    %213 = vector.shape_cast %212 : vector<2x1xf32> to vector<2x1x1xf32>
    %214 = tpu.reciprocal %213 {approx = true} : vector<2x1x1xf32> -> vector<2x1x1xf32>
    %215 = vector.broadcast %214 : vector<2x1x1xf32> to vector<2x1x16xf32>
    %216 = arith.mulf %211, %215 : vector<2x1x16xf32>
    %217 = arith.truncf %216 : vector<2x1x16xf32> to vector<2x1x16xbf16>
    %218 = vector.extract_strided_slice %176 {offsets = [0, 0, 8], sizes = [2, 16, 8], strides = [1, 1, 1]} : vector<2x16x32xbf16> to vector<2x16x8xbf16>
    "tpu.trace_start"() <{level = 10 : i32, message = "bqk,bkd->bqd"}> : () -> ()
    %cst_89 = arith.constant dense<0.000000e+00> : vector<2x1x8xf32>
    %219 = tpu.matmul %217, %218, %cst_89 {dimension_numbers = #tpu.dot_dimension_numbers<[2], [1], [1], [2], [0, 0, 0, 1, 1, 2], [0], [0]>} : vector<2x1x16xbf16>, vector<2x16x8xbf16>, vector<2x1x8xf32> -> vector<2x1x8xf32>
    "tpu.trace_stop"() : () -> ()
    %220 = vector.shape_cast %219 : vector<2x1x8xf32> to vector<2x8xf32>
    %221 = arith.truncf %220 : vector<2x8xf32> to vector<2x8xbf16>
    %222 = vector.extract_strided_slice %178 {offsets = [8, 0], sizes = [8, 32], strides = [1, 1]} : vector<32x32xbf16> to vector<8x32xbf16>
    %cst_90 = arith.constant dense<0.000000e+00> : vector<2x32xf32>
    %223 = tpu.matmul %221, %222, %cst_90 {dimension_numbers = #tpu.dot_dimension_numbers<[1], [0], [0], [1], [0, 0, 1, 1], [], []>} : vector<2x8xbf16>, vector<8x32xbf16>, vector<2x32xf32> -> vector<2x32xf32>
    %224 = arith.addf %202, %223 : vector<2x32xf32>
    %225 = vector.extract_strided_slice %180 {offsets = [0, 0, 16], sizes = [2, 1, 8], strides = [1, 1, 1]} : vector<2x1x32xbf16> to vector<2x1x8xbf16>
    %226 = vector.extract_strided_slice %174 {offsets = [0, 0, 16], sizes = [2, 16, 8], strides = [1, 1, 1]} : vector<2x16x32xbf16> to vector<2x16x8xbf16>
    "tpu.trace_start"() <{level = 10 : i32, message = "bqd,bkd->bqk"}> : () -> ()
    %cst_91 = arith.constant dense<0.000000e+00> : vector<2x1x16xf32>
    %227 = tpu.matmul %225, %226, %cst_91 {dimension_numbers = #tpu.dot_dimension_numbers<[2], [2], [1], [1], [0, 0, 0, 1, 1, 1], [0], [0]>} : vector<2x1x8xbf16>, vector<2x16x8xbf16>, vector<2x1x16xf32> -> vector<2x1x16xf32>
    "tpu.trace_stop"() : () -> ()
    %228 = arith.addf %227, %4 : vector<2x1x16xf32>
    %cst_92 = arith.constant dense<0xFF800000> : vector<2x1xf32>
    %229 = vector.multi_reduction <maximumf>, %228, %cst_92 [2] : vector<2x1x16xf32> to vector<2x1xf32>
    %230 = vector.shape_cast %229 : vector<2x1xf32> to vector<2x1x1xf32>
    %231 = vector.broadcast %230 : vector<2x1x1xf32> to vector<2x1x16xf32>
    %232 = arith.subf %228, %231 : vector<2x1x16xf32>
    %233 = math.exp %232 : vector<2x1x16xf32>
    %cst_93 = arith.constant dense<0.000000e+00> : vector<2x1xf32>
    %234 = vector.multi_reduction <add>, %233, %cst_93 [2] : vector<2x1x16xf32> to vector<2x1xf32>
    %235 = vector.shape_cast %234 : vector<2x1xf32> to vector<2x1x1xf32>
    %236 = tpu.reciprocal %235 {approx = true} : vector<2x1x1xf32> -> vector<2x1x1xf32>
    %237 = vector.broadcast %236 : vector<2x1x1xf32> to vector<2x1x16xf32>
    %238 = arith.mulf %233, %237 : vector<2x1x16xf32>
    %239 = arith.truncf %238 : vector<2x1x16xf32> to vector<2x1x16xbf16>
    %240 = vector.extract_strided_slice %176 {offsets = [0, 0, 16], sizes = [2, 16, 8], strides = [1, 1, 1]} : vector<2x16x32xbf16> to vector<2x16x8xbf16>
    "tpu.trace_start"() <{level = 10 : i32, message = "bqk,bkd->bqd"}> : () -> ()
    %cst_94 = arith.constant dense<0.000000e+00> : vector<2x1x8xf32>
    %241 = tpu.matmul %239, %240, %cst_94 {dimension_numbers = #tpu.dot_dimension_numbers<[2], [1], [1], [2], [0, 0, 0, 1, 1, 2], [0], [0]>} : vector<2x1x16xbf16>, vector<2x16x8xbf16>, vector<2x1x8xf32> -> vector<2x1x8xf32>
    "tpu.trace_stop"() : () -> ()
    %242 = vector.shape_cast %241 : vector<2x1x8xf32> to vector<2x8xf32>
    %243 = arith.truncf %242 : vector<2x8xf32> to vector<2x8xbf16>
    %244 = vector.extract_strided_slice %178 {offsets = [16, 0], sizes = [8, 32], strides = [1, 1]} : vector<32x32xbf16> to vector<8x32xbf16>
    %cst_95 = arith.constant dense<0.000000e+00> : vector<2x32xf32>
    %245 = tpu.matmul %243, %244, %cst_95 {dimension_numbers = #tpu.dot_dimension_numbers<[1], [0], [0], [1], [0, 0, 1, 1], [], []>} : vector<2x8xbf16>, vector<8x32xbf16>, vector<2x32xf32> -> vector<2x32xf32>
    %246 = arith.addf %224, %245 : vector<2x32xf32>
    %247 = vector.extract_strided_slice %180 {offsets = [0, 0, 24], sizes = [2, 1, 8], strides = [1, 1, 1]} : vector<2x1x32xbf16> to vector<2x1x8xbf16>
    %248 = vector.extract_strided_slice %174 {offsets = [0, 0, 24], sizes = [2, 16, 8], strides = [1, 1, 1]} : vector<2x16x32xbf16> to vector<2x16x8xbf16>
    "tpu.trace_start"() <{level = 10 : i32, message = "bqd,bkd->bqk"}> : () -> ()
    %cst_96 = arith.constant dense<0.000000e+00> : vector<2x1x16xf32>
    %249 = tpu.matmul %247, %248, %cst_96 {dimension_numbers = #tpu.dot_dimension_numbers<[2], [2], [1], [1], [0, 0, 0, 1, 1, 1], [0], [0]>} : vector<2x1x8xbf16>, vector<2x16x8xbf16>, vector<2x1x16xf32> -> vector<2x1x16xf32>
    "tpu.trace_stop"() : () -> ()
    %250 = arith.addf %249, %4 : vector<2x1x16xf32>
    %cst_97 = arith.constant dense<0xFF800000> : vector<2x1xf32>
    %251 = vector.multi_reduction <maximumf>, %250, %cst_97 [2] : vector<2x1x16xf32> to vector<2x1xf32>
    %252 = vector.shape_cast %251 : vector<2x1xf32> to vector<2x1x1xf32>
    %253 = vector.broadcast %252 : vector<2x1x1xf32> to vector<2x1x16xf32>
    %254 = arith.subf %250, %253 : vector<2x1x16xf32>
    %255 = math.exp %254 : vector<2x1x16xf32>
    %cst_98 = arith.constant dense<0.000000e+00> : vector<2x1xf32>
    %256 = vector.multi_reduction <add>, %255, %cst_98 [2] : vector<2x1x16xf32> to vector<2x1xf32>
    %257 = vector.shape_cast %256 : vector<2x1xf32> to vector<2x1x1xf32>
    %258 = tpu.reciprocal %257 {approx = true} : vector<2x1x1xf32> -> vector<2x1x1xf32>
    %259 = vector.broadcast %258 : vector<2x1x1xf32> to vector<2x1x16xf32>
    %260 = arith.mulf %255, %259 : vector<2x1x16xf32>
    %261 = arith.truncf %260 : vector<2x1x16xf32> to vector<2x1x16xbf16>
    %262 = vector.extract_strided_slice %176 {offsets = [0, 0, 24], sizes = [2, 16, 8], strides = [1, 1, 1]} : vector<2x16x32xbf16> to vector<2x16x8xbf16>
    "tpu.trace_start"() <{level = 10 : i32, message = "bqk,bkd->bqd"}> : () -> ()
    %cst_99 = arith.constant dense<0.000000e+00> : vector<2x1x8xf32>
    %263 = tpu.matmul %261, %262, %cst_99 {dimension_numbers = #tpu.dot_dimension_numbers<[2], [1], [1], [2], [0, 0, 0, 1, 1, 2], [0], [0]>} : vector<2x1x16xbf16>, vector<2x16x8xbf16>, vector<2x1x8xf32> -> vector<2x1x8xf32>
    "tpu.trace_stop"() : () -> ()
    %264 = vector.shape_cast %263 : vector<2x1x8xf32> to vector<2x8xf32>
    %265 = arith.truncf %264 : vector<2x8xf32> to vector<2x8xbf16>
    %266 = vector.extract_strided_slice %178 {offsets = [24, 0], sizes = [8, 32], strides = [1, 1]} : vector<32x32xbf16> to vector<8x32xbf16>
    %cst_100 = arith.constant dense<0.000000e+00> : vector<2x32xf32>
    %267 = tpu.matmul %265, %266, %cst_100 {dimension_numbers = #tpu.dot_dimension_numbers<[1], [0], [0], [1], [0, 0, 1, 1], [], []>} : vector<2x8xbf16>, vector<8x32xbf16>, vector<2x32xf32> -> vector<2x32xf32>
    %268 = arith.addf %246, %267 : vector<2x32xf32>
    %269 = arith.addf %153, %268 : vector<2x32xf32>
    %c0_101 = arith.constant 0 : index
    %c0_102 = arith.constant 0 : index
    %c0_103 = arith.constant 0 : index
    %270 = vector.load %arg11[%c0_101, %c0_102, %c0_103] : memref<2x1x32xf32, #tpu.memory_space<vmem>>, vector<1x1x32xf32>
    %271 = vector.shape_cast %270 : vector<1x1x32xf32> to vector<1x32xf32>
    %272 = arith.mulf %269, %269 : vector<2x32xf32>
    %cst_104 = arith.constant dense<0.000000e+00> : vector<2xf32>
    %273 = vector.multi_reduction <add>, %272, %cst_104 [1] : vector<2x32xf32> to vector<2xf32>
    %274 = vector.shape_cast %273 : vector<2xf32> to vector<2x1xf32>
    %cst_105 = arith.constant 3.200000e+01 : f32
    %275 = vector.broadcast %cst_105 : f32 to vector<2x1xf32>
    %276 = arith.divf %274, %275 : vector<2x1xf32>
    %cst_106 = arith.constant 9.99999997E-7 : f32
    %277 = vector.broadcast %cst_106 : f32 to vector<2x1xf32>
    %278 = arith.addf %276, %277 : vector<2x1xf32>
    %279 = math.rsqrt %278 : vector<2x1xf32>
    %280 = vector.broadcast %279 : vector<2x1xf32> to vector<2x32xf32>
    %281 = arith.mulf %269, %280 : vector<2x32xf32>
    %282 = vector.broadcast %271 : vector<1x32xf32> to vector<2x32xf32>
    %283 = arith.mulf %281, %282 : vector<2x32xf32>
    %c0_107 = arith.constant 0 : index
    %c0_108 = arith.constant 0 : index
    %c0_109 = arith.constant 0 : index
    %284 = vector.load %arg12[%c0_107, %c0_108, %c0_109] : memref<2x32x64xbf16, #tpu.memory_space<vmem>>, vector<1x32x64xbf16>
    %285 = vector.shape_cast %284 : vector<1x32x64xbf16> to vector<32x64xbf16>
    %c0_110 = arith.constant 0 : index
    %c0_111 = arith.constant 0 : index
    %c0_112 = arith.constant 0 : index
    %286 = vector.load %arg13[%c0_110, %c0_111, %c0_112] : memref<2x32x64xbf16, #tpu.memory_space<vmem>>, vector<1x32x64xbf16>
    %287 = vector.shape_cast %286 : vector<1x32x64xbf16> to vector<32x64xbf16>
    %c0_113 = arith.constant 0 : index
    %c0_114 = arith.constant 0 : index
    %c0_115 = arith.constant 0 : index
    %288 = vector.load %arg14[%c0_113, %c0_114, %c0_115] : memref<2x64x32xbf16, #tpu.memory_space<vmem>>, vector<1x64x32xbf16>
    %289 = vector.shape_cast %288 : vector<1x64x32xbf16> to vector<64x32xbf16>
    %290 = arith.truncf %283 : vector<2x32xf32> to vector<2x32xbf16>
    %cst_116 = arith.constant dense<0.000000e+00> : vector<2x64xf32>
    %291 = tpu.matmul %290, %285, %cst_116 {dimension_numbers = #tpu.dot_dimension_numbers<[1], [0], [0], [1], [0, 0, 1, 1], [], []>} : vector<2x32xbf16>, vector<32x64xbf16>, vector<2x64xf32> -> vector<2x64xf32>
    %cst_117 = arith.constant dense<0.000000e+00> : vector<2x64xf32>
    %292 = tpu.matmul %290, %287, %cst_117 {dimension_numbers = #tpu.dot_dimension_numbers<[1], [0], [0], [1], [0, 0, 1, 1], [], []>} : vector<2x32xbf16>, vector<32x64xbf16>, vector<2x64xf32> -> vector<2x64xf32>
    %293 = arith.mulf %291, %291 : vector<2x64xf32>
    %294 = arith.mulf %291, %293 : vector<2x64xf32>
    %cst_118 = arith.constant 4.471500e-02 : f32
    %295 = vector.broadcast %cst_118 : f32 to vector<2x64xf32>
    %296 = arith.mulf %295, %294 : vector<2x64xf32>
    %297 = arith.addf %291, %296 : vector<2x64xf32>
    %cst_119 = arith.constant 0.797884583 : f32
    %298 = vector.broadcast %cst_119 : f32 to vector<2x64xf32>
    %299 = arith.mulf %298, %297 : vector<2x64xf32>
    %300 = math.tanh %299 : vector<2x64xf32>
    %cst_120 = arith.constant 1.000000e+00 : f32
    %301 = vector.broadcast %cst_120 : f32 to vector<2x64xf32>
    %302 = arith.addf %301, %300 : vector<2x64xf32>
    %cst_121 = arith.constant 5.000000e-01 : f32
    %303 = vector.broadcast %cst_121 : f32 to vector<2x64xf32>
    %304 = arith.mulf %303, %302 : vector<2x64xf32>
    %305 = arith.mulf %291, %304 : vector<2x64xf32>
    %306 = arith.mulf %305, %292 : vector<2x64xf32>
    %307 = arith.truncf %306 : vector<2x64xf32> to vector<2x64xbf16>
    %cst_122 = arith.constant dense<0.000000e+00> : vector<2x32xf32>
    %308 = tpu.matmul %307, %289, %cst_122 {dimension_numbers = #tpu.dot_dimension_numbers<[1], [0], [0], [1], [0, 0, 1, 1], [], []>} : vector<2x64xbf16>, vector<64x32xbf16>, vector<2x32xf32> -> vector<2x32xf32>
    %309 = arith.addf %269, %308 : vector<2x32xf32>
    %c1_123 = arith.constant 1 : index
    %c0_124 = arith.constant 0 : index
    %c0_125 = arith.constant 0 : index
    %310 = vector.load %arg5[%c1_123, %c0_124, %c0_125] : memref<2x1x32xf32, #tpu.memory_space<vmem>>, vector<1x1x32xf32>
    %311 = vector.shape_cast %310 : vector<1x1x32xf32> to vector<1x32xf32>
    %312 = arith.mulf %309, %309 : vector<2x32xf32>
    %cst_126 = arith.constant dense<0.000000e+00> : vector<2xf32>
    %313 = vector.multi_reduction <add>, %312, %cst_126 [1] : vector<2x32xf32> to vector<2xf32>
    %314 = vector.shape_cast %313 : vector<2xf32> to vector<2x1xf32>
    %cst_127 = arith.constant 3.200000e+01 : f32
    %315 = vector.broadcast %cst_127 : f32 to vector<2x1xf32>
    %316 = arith.divf %314, %315 : vector<2x1xf32>
    %cst_128 = arith.constant 9.99999997E-7 : f32
    %317 = vector.broadcast %cst_128 : f32 to vector<2x1xf32>
    %318 = arith.addf %316, %317 : vector<2x1xf32>
    %319 = math.rsqrt %318 : vector<2x1xf32>
    %320 = vector.broadcast %319 : vector<2x1xf32> to vector<2x32xf32>
    %321 = arith.mulf %309, %320 : vector<2x32xf32>
    %322 = vector.broadcast %311 : vector<1x32xf32> to vector<2x32xf32>
    %323 = arith.mulf %321, %322 : vector<2x32xf32>
    %324 = arith.truncf %323 : vector<2x32xf32> to vector<2x32xbf16>
    %c1_129 = arith.constant 1 : index
    %c0_130 = arith.constant 0 : index
    %c0_131 = arith.constant 0 : index
    %325 = vector.load %arg6[%c1_129, %c0_130, %c0_131] : memref<2x32x96xbf16, #tpu.memory_space<vmem>>, vector<1x32x96xbf16>
    %326 = vector.shape_cast %325 : vector<1x32x96xbf16> to vector<32x96xbf16>
    %cst_132 = arith.constant dense<0.000000e+00> : vector<2x96xf32>
    %327 = tpu.matmul %324, %326, %cst_132 {dimension_numbers = #tpu.dot_dimension_numbers<[1], [0], [0], [1], [0, 0, 1, 1], [], []>} : vector<2x32xbf16>, vector<32x96xbf16>, vector<2x96xf32> -> vector<2x96xf32>
    %328 = vector.extract_strided_slice %327 {offsets = [0, 0], sizes = [2, 32], strides = [1, 1]} : vector<2x96xf32> to vector<2x32xf32>
    %329 = vector.shape_cast %328 : vector<2x32xf32> to vector<2x1x32xf32>
    %330 = vector.extract_strided_slice %327 {offsets = [0, 32], sizes = [2, 32], strides = [1, 1]} : vector<2x96xf32> to vector<2x32xf32>
    %331 = vector.extract_strided_slice %327 {offsets = [0, 64], sizes = [2, 32], strides = [1, 1]} : vector<2x96xf32> to vector<2x32xf32>
    %332 = vector.extract_strided_slice %330 {offsets = [0, 0], sizes = [1, 32], strides = [1, 1]} : vector<2x32xf32> to vector<1x32xf32>
    %c1_133 = arith.constant 1 : index
    %c0_134 = arith.constant 0 : index
    %333 = arith.index_cast %arg0 : i32 to index
    %c0_135 = arith.constant 0 : index
    %334 = vector.load %arg18[%c1_133, %c0_134, %333, %c0_135] : memref<2x2x8x32xf32, #tpu.memory_space<vmem>>, vector<1x1x1x32xf32>
    %335 = vector.shape_cast %334 : vector<1x1x1x32xf32> to vector<1x32xf32>
    %336 = vector.shape_cast %332 : vector<1x32xf32> to vector<1x1x1x32xf32>
    tpu.vector_store %arg18[%c1_133, %c0_134, %333, %c0_135], %336 {strides = array<i32>} : memref<2x2x8x32xf32, #tpu.memory_space<vmem>>, vector<1x1x1x32xf32>,
    %337 = vector.extract_strided_slice %331 {offsets = [0, 0], sizes = [1, 32], strides = [1, 1]} : vector<2x32xf32> to vector<1x32xf32>
    %c1_136 = arith.constant 1 : index
    %c0_137 = arith.constant 0 : index
    %338 = arith.index_cast %arg0 : i32 to index
    %c0_138 = arith.constant 0 : index
    %339 = vector.load %arg19[%c1_136, %c0_137, %338, %c0_138] : memref<2x2x8x32xf32, #tpu.memory_space<vmem>>, vector<1x1x1x32xf32>
    %340 = vector.shape_cast %339 : vector<1x1x1x32xf32> to vector<1x32xf32>
    %341 = vector.shape_cast %337 : vector<1x32xf32> to vector<1x1x1x32xf32>
    tpu.vector_store %arg19[%c1_136, %c0_137, %338, %c0_138], %341 {strides = array<i32>} : memref<2x2x8x32xf32, #tpu.memory_space<vmem>>, vector<1x1x1x32xf32>,
    %342 = vector.extract_strided_slice %330 {offsets = [1, 0], sizes = [1, 32], strides = [1, 1]} : vector<2x32xf32> to vector<1x32xf32>
    %c1_139 = arith.constant 1 : index
    %c1_140 = arith.constant 1 : index
    %343 = arith.index_cast %arg0 : i32 to index
    %c0_141 = arith.constant 0 : index
    %344 = vector.load %arg18[%c1_139, %c1_140, %343, %c0_141] : memref<2x2x8x32xf32, #tpu.memory_space<vmem>>, vector<1x1x1x32xf32>
    %345 = vector.shape_cast %344 : vector<1x1x1x32xf32> to vector<1x32xf32>
    %346 = vector.shape_cast %342 : vector<1x32xf32> to vector<1x1x1x32xf32>
    tpu.vector_store %arg18[%c1_139, %c1_140, %343, %c0_141], %346 {strides = array<i32>} : memref<2x2x8x32xf32, #tpu.memory_space<vmem>>, vector<1x1x1x32xf32>,
    %347 = vector.extract_strided_slice %331 {offsets = [1, 0], sizes = [1, 32], strides = [1, 1]} : vector<2x32xf32> to vector<1x32xf32>
    %c1_142 = arith.constant 1 : index
    %c1_143 = arith.constant 1 : index
    %348 = arith.index_cast %arg0 : i32 to index
    %c0_144 = arith.constant 0 : index
    %349 = vector.load %arg19[%c1_142, %c1_143, %348, %c0_144] : memref<2x2x8x32xf32, #tpu.memory_space<vmem>>, vector<1x1x1x32xf32>
    %350 = vector.shape_cast %349 : vector<1x1x1x32xf32> to vector<1x32xf32>
    %351 = vector.shape_cast %347 : vector<1x32xf32> to vector<1x1x1x32xf32>
    tpu.vector_store %arg19[%c1_142, %c1_143, %348, %c0_144], %351 {strides = array<i32>} : memref<2x2x8x32xf32, #tpu.memory_space<vmem>>, vector<1x1x1x32xf32>,
    %c1_145 = arith.constant 1 : index
    %c0_146 = arith.constant 0 : index
    %c0_147 = arith.constant 0 : index
    %c0_148 = arith.constant 0 : index
    %352 = vector.load %arg18[%c1_145, %c0_146, %c0_147, %c0_148] : memref<2x2x8x32xf32, #tpu.memory_space<vmem>>, vector<1x2x8x32xf32>
    %353 = vector.shape_cast %352 : vector<1x2x8x32xf32> to vector<2x8x32xf32>
    %c1_149 = arith.constant 1 : index
    %c0_150 = arith.constant 0 : index
    %c0_151 = arith.constant 0 : index
    %c0_152 = arith.constant 0 : index
    %354 = vector.load %arg19[%c1_149, %c0_150, %c0_151, %c0_152] : memref<2x2x8x32xf32, #tpu.memory_space<vmem>>, vector<1x2x8x32xf32>
    %355 = vector.shape_cast %354 : vector<1x2x8x32xf32> to vector<2x8x32xf32>
    %c1_153 = arith.constant 1 : index
    %c0_154 = arith.constant 0 : index
    %c0_155 = arith.constant 0 : index
    %356 = vector.load %arg7[%c1_153, %c0_154, %c0_155] : memref<2x32x32xbf16, #tpu.memory_space<vmem>>, vector<1x32x32xbf16>
    %357 = vector.shape_cast %356 : vector<1x32x32xbf16> to vector<32x32xbf16>
    %cst_156 = arith.constant 0.000000e+00 : f32
    %358 = vector.broadcast %cst_156 : f32 to vector<2x32xf32>
    %359 = arith.truncf %329 : vector<2x1x32xf32> to vector<2x1x32xbf16>
    %360 = arith.truncf %353 : vector<2x8x32xf32> to vector<2x8x32xbf16>
    %361 = arith.truncf %355 : vector<2x8x32xf32> to vector<2x8x32xbf16>
    %362 = vector.extract_strided_slice %359 {offsets = [0, 0, 0], sizes = [2, 1, 8], strides = [1, 1, 1]} : vector<2x1x32xbf16> to vector<2x1x8xbf16>
    %363 = vector.extract_strided_slice %360 {offsets = [0, 0, 0], sizes = [2, 8, 8], strides = [1, 1, 1]} : vector<2x8x32xbf16> to vector<2x8x8xbf16>
    "tpu.trace_start"() <{level = 10 : i32, message = "bqd,bkd->bqk"}> : () -> ()
    %cst_157 = arith.constant dense<0.000000e+00> : vector<2x1x8xf32>
    %364 = tpu.matmul %362, %363, %cst_157 {dimension_numbers = #tpu.dot_dimension_numbers<[2], [2], [1], [1], [0, 0, 0, 1, 1, 1], [0], [0]>} : vector<2x1x8xbf16>, vector<2x8x8xbf16>, vector<2x1x8xf32> -> vector<2x1x8xf32>
    "tpu.trace_stop"() : () -> ()
    %365 = arith.addf %364, %12 : vector<2x1x8xf32>
    %cst_158 = arith.constant dense<0xFF800000> : vector<2x1xf32>
    %366 = vector.multi_reduction <maximumf>, %365, %cst_158 [2] : vector<2x1x8xf32> to vector<2x1xf32>
    %367 = vector.shape_cast %366 : vector<2x1xf32> to vector<2x1x1xf32>
    %368 = vector.broadcast %367 : vector<2x1x1xf32> to vector<2x1x8xf32>
    %369 = arith.subf %365, %368 : vector<2x1x8xf32>
    %370 = math.exp %369 : vector<2x1x8xf32>
    %cst_159 = arith.constant dense<0.000000e+00> : vector<2x1xf32>
    %371 = vector.multi_reduction <add>, %370, %cst_159 [2] : vector<2x1x8xf32> to vector<2x1xf32>
    %372 = vector.shape_cast %371 : vector<2x1xf32> to vector<2x1x1xf32>
    %373 = tpu.reciprocal %372 {approx = true} : vector<2x1x1xf32> -> vector<2x1x1xf32>
    %374 = vector.broadcast %373 : vector<2x1x1xf32> to vector<2x1x8xf32>
    %375 = arith.mulf %370, %374 : vector<2x1x8xf32>
    %376 = arith.truncf %375 : vector<2x1x8xf32> to vector<2x1x8xbf16>
    %377 = vector.extract_strided_slice %361 {offsets = [0, 0, 0], sizes = [2, 8, 8], strides = [1, 1, 1]} : vector<2x8x32xbf16> to vector<2x8x8xbf16>
    "tpu.trace_start"() <{level = 10 : i32, message = "bqk,bkd->bqd"}> : () -> ()
    %cst_160 = arith.constant dense<0.000000e+00> : vector<2x1x8xf32>
    %378 = tpu.matmul %376, %377, %cst_160 {dimension_numbers = #tpu.dot_dimension_numbers<[2], [1], [1], [2], [0, 0, 0, 1, 1, 2], [0], [0]>} : vector<2x1x8xbf16>, vector<2x8x8xbf16>, vector<2x1x8xf32> -> vector<2x1x8xf32>
    "tpu.trace_stop"() : () -> ()
    %379 = vector.shape_cast %378 : vector<2x1x8xf32> to vector<2x8xf32>
    %380 = arith.truncf %379 : vector<2x8xf32> to vector<2x8xbf16>
    %381 = vector.extract_strided_slice %357 {offsets = [0, 0], sizes = [8, 32], strides = [1, 1]} : vector<32x32xbf16> to vector<8x32xbf16>
    %cst_161 = arith.constant dense<0.000000e+00> : vector<2x32xf32>
    %382 = tpu.matmul %380, %381, %cst_161 {dimension_numbers = #tpu.dot_dimension_numbers<[1], [0], [0], [1], [0, 0, 1, 1], [], []>} : vector<2x8xbf16>, vector<8x32xbf16>, vector<2x32xf32> -> vector<2x32xf32>
    %383 = arith.addf %358, %382 : vector<2x32xf32>
    %384 = vector.extract_strided_slice %359 {offsets = [0, 0, 8], sizes = [2, 1, 8], strides = [1, 1, 1]} : vector<2x1x32xbf16> to vector<2x1x8xbf16>
    %385 = vector.extract_strided_slice %360 {offsets = [0, 0, 8], sizes = [2, 8, 8], strides = [1, 1, 1]} : vector<2x8x32xbf16> to vector<2x8x8xbf16>
    "tpu.trace_start"() <{level = 10 : i32, message = "bqd,bkd->bqk"}> : () -> ()
    %cst_162 = arith.constant dense<0.000000e+00> : vector<2x1x8xf32>
    %386 = tpu.matmul %384, %385, %cst_162 {dimension_numbers = #tpu.dot_dimension_numbers<[2], [2], [1], [1], [0, 0, 0, 1, 1, 1], [0], [0]>} : vector<2x1x8xbf16>, vector<2x8x8xbf16>, vector<2x1x8xf32> -> vector<2x1x8xf32>
    "tpu.trace_stop"() : () -> ()
    %387 = arith.addf %386, %12 : vector<2x1x8xf32>
    %cst_163 = arith.constant dense<0xFF800000> : vector<2x1xf32>
    %388 = vector.multi_reduction <maximumf>, %387, %cst_163 [2] : vector<2x1x8xf32> to vector<2x1xf32>
    %389 = vector.shape_cast %388 : vector<2x1xf32> to vector<2x1x1xf32>
    %390 = vector.broadcast %389 : vector<2x1x1xf32> to vector<2x1x8xf32>
    %391 = arith.subf %387, %390 : vector<2x1x8xf32>
    %392 = math.exp %391 : vector<2x1x8xf32>
    %cst_164 = arith.constant dense<0.000000e+00> : vector<2x1xf32>
    %393 = vector.multi_reduction <add>, %392, %cst_164 [2] : vector<2x1x8xf32> to vector<2x1xf32>
    %394 = vector.shape_cast %393 : vector<2x1xf32> to vector<2x1x1xf32>
    %395 = tpu.reciprocal %394 {approx = true} : vector<2x1x1xf32> -> vector<2x1x1xf32>
    %396 = vector.broadcast %395 : vector<2x1x1xf32> to vector<2x1x8xf32>
    %397 = arith.mulf %392, %396 : vector<2x1x8xf32>
    %398 = arith.truncf %397 : vector<2x1x8xf32> to vector<2x1x8xbf16>
    %399 = vector.extract_strided_slice %361 {offsets = [0, 0, 8], sizes = [2, 8, 8], strides = [1, 1, 1]} : vector<2x8x32xbf16> to vector<2x8x8xbf16>
    "tpu.trace_start"() <{level = 10 : i32, message = "bqk,bkd->bqd"}> : () -> ()
    %cst_165 = arith.constant dense<0.000000e+00> : vector<2x1x8xf32>
    %400 = tpu.matmul %398, %399, %cst_165 {dimension_numbers = #tpu.dot_dimension_numbers<[2], [1], [1], [2], [0, 0, 0, 1, 1, 2], [0], [0]>} : vector<2x1x8xbf16>, vector<2x8x8xbf16>, vector<2x1x8xf32> -> vector<2x1x8xf32>
    "tpu.trace_stop"() : () -> ()
    %401 = vector.shape_cast %400 : vector<2x1x8xf32> to vector<2x8xf32>
    %402 = arith.truncf %401 : vector<2x8xf32> to vector<2x8xbf16>
    %403 = vector.extract_strided_slice %357 {offsets = [8, 0], sizes = [8, 32], strides = [1, 1]} : vector<32x32xbf16> to vector<8x32xbf16>
    %cst_166 = arith.constant dense<0.000000e+00> : vector<2x32xf32>
    %404 = tpu.matmul %402, %403, %cst_166 {dimension_numbers = #tpu.dot_dimension_numbers<[1], [0], [0], [1], [0, 0, 1, 1], [], []>} : vector<2x8xbf16>, vector<8x32xbf16>, vector<2x32xf32> -> vector<2x32xf32>
    %405 = arith.addf %383, %404 : vector<2x32xf32>
    %406 = vector.extract_strided_slice %359 {offsets = [0, 0, 16], sizes = [2, 1, 8], strides = [1, 1, 1]} : vector<2x1x32xbf16> to vector<2x1x8xbf16>
    %407 = vector.extract_strided_slice %360 {offsets = [0, 0, 16], sizes = [2, 8, 8], strides = [1, 1, 1]} : vector<2x8x32xbf16> to vector<2x8x8xbf16>
    "tpu.trace_start"() <{level = 10 : i32, message = "bqd,bkd->bqk"}> : () -> ()
    %cst_167 = arith.constant dense<0.000000e+00> : vector<2x1x8xf32>
    %408 = tpu.matmul %406, %407, %cst_167 {dimension_numbers = #tpu.dot_dimension_numbers<[2], [2], [1], [1], [0, 0, 0, 1, 1, 1], [0], [0]>} : vector<2x1x8xbf16>, vector<2x8x8xbf16>, vector<2x1x8xf32> -> vector<2x1x8xf32>
    "tpu.trace_stop"() : () -> ()
    %409 = arith.addf %408, %12 : vector<2x1x8xf32>
    %cst_168 = arith.constant dense<0xFF800000> : vector<2x1xf32>
    %410 = vector.multi_reduction <maximumf>, %409, %cst_168 [2] : vector<2x1x8xf32> to vector<2x1xf32>
    %411 = vector.shape_cast %410 : vector<2x1xf32> to vector<2x1x1xf32>
    %412 = vector.broadcast %411 : vector<2x1x1xf32> to vector<2x1x8xf32>
    %413 = arith.subf %409, %412 : vector<2x1x8xf32>
    %414 = math.exp %413 : vector<2x1x8xf32>
    %cst_169 = arith.constant dense<0.000000e+00> : vector<2x1xf32>
    %415 = vector.multi_reduction <add>, %414, %cst_169 [2] : vector<2x1x8xf32> to vector<2x1xf32>
    %416 = vector.shape_cast %415 : vector<2x1xf32> to vector<2x1x1xf32>
    %417 = tpu.reciprocal %416 {approx = true} : vector<2x1x1xf32> -> vector<2x1x1xf32>
    %418 = vector.broadcast %417 : vector<2x1x1xf32> to vector<2x1x8xf32>
    %419 = arith.mulf %414, %418 : vector<2x1x8xf32>
    %420 = arith.truncf %419 : vector<2x1x8xf32> to vector<2x1x8xbf16>
    %421 = vector.extract_strided_slice %361 {offsets = [0, 0, 16], sizes = [2, 8, 8], strides = [1, 1, 1]} : vector<2x8x32xbf16> to vector<2x8x8xbf16>
    "tpu.trace_start"() <{level = 10 : i32, message = "bqk,bkd->bqd"}> : () -> ()
    %cst_170 = arith.constant dense<0.000000e+00> : vector<2x1x8xf32>
    %422 = tpu.matmul %420, %421, %cst_170 {dimension_numbers = #tpu.dot_dimension_numbers<[2], [1], [1], [2], [0, 0, 0, 1, 1, 2], [0], [0]>} : vector<2x1x8xbf16>, vector<2x8x8xbf16>, vector<2x1x8xf32> -> vector<2x1x8xf32>
    "tpu.trace_stop"() : () -> ()
    %423 = vector.shape_cast %422 : vector<2x1x8xf32> to vector<2x8xf32>
    %424 = arith.truncf %423 : vector<2x8xf32> to vector<2x8xbf16>
    %425 = vector.extract_strided_slice %357 {offsets = [16, 0], sizes = [8, 32], strides = [1, 1]} : vector<32x32xbf16> to vector<8x32xbf16>
    %cst_171 = arith.constant dense<0.000000e+00> : vector<2x32xf32>
    %426 = tpu.matmul %424, %425, %cst_171 {dimension_numbers = #tpu.dot_dimension_numbers<[1], [0], [0], [1], [0, 0, 1, 1], [], []>} : vector<2x8xbf16>, vector<8x32xbf16>, vector<2x32xf32> -> vector<2x32xf32>
    %427 = arith.addf %405, %426 : vector<2x32xf32>
    %428 = vector.extract_strided_slice %359 {offsets = [0, 0, 24], sizes = [2, 1, 8], strides = [1, 1, 1]} : vector<2x1x32xbf16> to vector<2x1x8xbf16>
    %429 = vector.extract_strided_slice %360 {offsets = [0, 0, 24], sizes = [2, 8, 8], strides = [1, 1, 1]} : vector<2x8x32xbf16> to vector<2x8x8xbf16>
    "tpu.trace_start"() <{level = 10 : i32, message = "bqd,bkd->bqk"}> : () -> ()
    %cst_172 = arith.constant dense<0.000000e+00> : vector<2x1x8xf32>
    %430 = tpu.matmul %428, %429, %cst_172 {dimension_numbers = #tpu.dot_dimension_numbers<[2], [2], [1], [1], [0, 0, 0, 1, 1, 1], [0], [0]>} : vector<2x1x8xbf16>, vector<2x8x8xbf16>, vector<2x1x8xf32> -> vector<2x1x8xf32>
    "tpu.trace_stop"() : () -> ()
    %431 = arith.addf %430, %12 : vector<2x1x8xf32>
    %cst_173 = arith.constant dense<0xFF800000> : vector<2x1xf32>
    %432 = vector.multi_reduction <maximumf>, %431, %cst_173 [2] : vector<2x1x8xf32> to vector<2x1xf32>
    %433 = vector.shape_cast %432 : vector<2x1xf32> to vector<2x1x1xf32>
    %434 = vector.broadcast %433 : vector<2x1x1xf32> to vector<2x1x8xf32>
    %435 = arith.subf %431, %434 : vector<2x1x8xf32>
    %436 = math.exp %435 : vector<2x1x8xf32>
    %cst_174 = arith.constant dense<0.000000e+00> : vector<2x1xf32>
    %437 = vector.multi_reduction <add>, %436, %cst_174 [2] : vector<2x1x8xf32> to vector<2x1xf32>
    %438 = vector.shape_cast %437 : vector<2x1xf32> to vector<2x1x1xf32>
    %439 = tpu.reciprocal %438 {approx = true} : vector<2x1x1xf32> -> vector<2x1x1xf32>
    %440 = vector.broadcast %439 : vector<2x1x1xf32> to vector<2x1x8xf32>
    %441 = arith.mulf %436, %440 : vector<2x1x8xf32>
    %442 = arith.truncf %441 : vector<2x1x8xf32> to vector<2x1x8xbf16>
    %443 = vector.extract_strided_slice %361 {offsets = [0, 0, 24], sizes = [2, 8, 8], strides = [1, 1, 1]} : vector<2x8x32xbf16> to vector<2x8x8xbf16>
    "tpu.trace_start"() <{level = 10 : i32, message = "bqk,bkd->bqd"}> : () -> ()
    %cst_175 = arith.constant dense<0.000000e+00> : vector<2x1x8xf32>
    %444 = tpu.matmul %442, %443, %cst_175 {dimension_numbers = #tpu.dot_dimension_numbers<[2], [1], [1], [2], [0, 0, 0, 1, 1, 2], [0], [0]>} : vector<2x1x8xbf16>, vector<2x8x8xbf16>, vector<2x1x8xf32> -> vector<2x1x8xf32>
    "tpu.trace_stop"() : () -> ()
    %445 = vector.shape_cast %444 : vector<2x1x8xf32> to vector<2x8xf32>
    %446 = arith.truncf %445 : vector<2x8xf32> to vector<2x8xbf16>
    %447 = vector.extract_strided_slice %357 {offsets = [24, 0], sizes = [8, 32], strides = [1, 1]} : vector<32x32xbf16> to vector<8x32xbf16>
    %cst_176 = arith.constant dense<0.000000e+00> : vector<2x32xf32>
    %448 = tpu.matmul %446, %447, %cst_176 {dimension_numbers = #tpu.dot_dimension_numbers<[1], [0], [0], [1], [0, 0, 1, 1], [], []>} : vector<2x8xbf16>, vector<8x32xbf16>, vector<2x32xf32> -> vector<2x32xf32>
    %449 = arith.addf %427, %448 : vector<2x32xf32>
    %450 = arith.addf %309, %449 : vector<2x32xf32>
    %c1_177 = arith.constant 1 : index
    %c0_178 = arith.constant 0 : index
    %c0_179 = arith.constant 0 : index
    %451 = vector.load %arg8[%c1_177, %c0_178, %c0_179] : memref<2x1x32xf32, #tpu.memory_space<vmem>>, vector<1x1x32xf32>
    %452 = vector.shape_cast %451 : vector<1x1x32xf32> to vector<1x32xf32>
    %453 = arith.mulf %450, %450 : vector<2x32xf32>
    %cst_180 = arith.constant dense<0.000000e+00> : vector<2xf32>
    %454 = vector.multi_reduction <add>, %453, %cst_180 [1] : vector<2x32xf32> to vector<2xf32>
    %455 = vector.shape_cast %454 : vector<2xf32> to vector<2x1xf32>
    %cst_181 = arith.constant 3.200000e+01 : f32
    %456 = vector.broadcast %cst_181 : f32 to vector<2x1xf32>
    %457 = arith.divf %455, %456 : vector<2x1xf32>
    %cst_182 = arith.constant 9.99999997E-7 : f32
    %458 = vector.broadcast %cst_182 : f32 to vector<2x1xf32>
    %459 = arith.addf %457, %458 : vector<2x1xf32>
    %460 = math.rsqrt %459 : vector<2x1xf32>
    %461 = vector.broadcast %460 : vector<2x1xf32> to vector<2x32xf32>
    %462 = arith.mulf %450, %461 : vector<2x32xf32>
    %463 = vector.broadcast %452 : vector<1x32xf32> to vector<2x32xf32>
    %464 = arith.mulf %462, %463 : vector<2x32xf32>
    %465 = arith.truncf %464 : vector<2x32xf32> to vector<2x32xbf16>
    %c1_183 = arith.constant 1 : index
    %c0_184 = arith.constant 0 : index
    %c0_185 = arith.constant 0 : index
    %466 = vector.load %arg9[%c1_183, %c0_184, %c0_185] : memref<2x32x32xbf16, #tpu.memory_space<vmem>>, vector<1x32x32xbf16>
    %467 = vector.shape_cast %466 : vector<1x32x32xbf16> to vector<32x32xbf16>
    %cst_186 = arith.constant dense<0.000000e+00> : vector<2x32xf32>
    %468 = tpu.matmul %465, %467, %cst_186 {dimension_numbers = #tpu.dot_dimension_numbers<[1], [0], [0], [1], [0, 0, 1, 1], [], []>} : vector<2x32xbf16>, vector<32x32xbf16>, vector<2x32xf32> -> vector<2x32xf32>
    %469 = vector.shape_cast %468 : vector<2x32xf32> to vector<2x1x32xf32>
    %c1_187 = arith.constant 1 : index
    %c0_188 = arith.constant 0 : index
    %c0_189 = arith.constant 0 : index
    %c0_190 = arith.constant 0 : index
    %470 = vector.load %arg1[%c1_187, %c0_188, %c0_189, %c0_190] : memref<2x2x16x32xbf16, #tpu.memory_space<vmem>>, vector<1x2x16x32xbf16>
    %471 = vector.shape_cast %470 : vector<1x2x16x32xbf16> to vector<2x16x32xbf16>
    %c1_191 = arith.constant 1 : index
    %c0_192 = arith.constant 0 : index
    %c0_193 = arith.constant 0 : index
    %c0_194 = arith.constant 0 : index
    %472 = vector.load %arg2[%c1_191, %c0_192, %c0_193, %c0_194] : memref<2x2x16x32xbf16, #tpu.memory_space<vmem>>, vector<1x2x16x32xbf16>
    %473 = vector.shape_cast %472 : vector<1x2x16x32xbf16> to vector<2x16x32xbf16>
    %c1_195 = arith.constant 1 : index
    %c0_196 = arith.constant 0 : index
    %c0_197 = arith.constant 0 : index
    %474 = vector.load %arg10[%c1_195, %c0_196, %c0_197] : memref<2x32x32xbf16, #tpu.memory_space<vmem>>, vector<1x32x32xbf16>
    %475 = vector.shape_cast %474 : vector<1x32x32xbf16> to vector<32x32xbf16>
    %cst_198 = arith.constant 0.000000e+00 : f32
    %476 = vector.broadcast %cst_198 : f32 to vector<2x32xf32>
    %477 = arith.truncf %469 : vector<2x1x32xf32> to vector<2x1x32xbf16>
    %478 = vector.extract_strided_slice %477 {offsets = [0, 0, 0], sizes = [2, 1, 8], strides = [1, 1, 1]} : vector<2x1x32xbf16> to vector<2x1x8xbf16>
    %479 = vector.extract_strided_slice %471 {offsets = [0, 0, 0], sizes = [2, 16, 8], strides = [1, 1, 1]} : vector<2x16x32xbf16> to vector<2x16x8xbf16>
    "tpu.trace_start"() <{level = 10 : i32, message = "bqd,bkd->bqk"}> : () -> ()
    %cst_199 = arith.constant dense<0.000000e+00> : vector<2x1x16xf32>
    %480 = tpu.matmul %478, %479, %cst_199 {dimension_numbers = #tpu.dot_dimension_numbers<[2], [2], [1], [1], [0, 0, 0, 1, 1, 1], [0], [0]>} : vector<2x1x8xbf16>, vector<2x16x8xbf16>, vector<2x1x16xf32> -> vector<2x1x16xf32>
    "tpu.trace_stop"() : () -> ()
    %481 = arith.addf %480, %4 : vector<2x1x16xf32>
    %cst_200 = arith.constant dense<0xFF800000> : vector<2x1xf32>
    %482 = vector.multi_reduction <maximumf>, %481, %cst_200 [2] : vector<2x1x16xf32> to vector<2x1xf32>
    %483 = vector.shape_cast %482 : vector<2x1xf32> to vector<2x1x1xf32>
    %484 = vector.broadcast %483 : vector<2x1x1xf32> to vector<2x1x16xf32>
    %485 = arith.subf %481, %484 : vector<2x1x16xf32>
    %486 = math.exp %485 : vector<2x1x16xf32>
    %cst_201 = arith.constant dense<0.000000e+00> : vector<2x1xf32>
    %487 = vector.multi_reduction <add>, %486, %cst_201 [2] : vector<2x1x16xf32> to vector<2x1xf32>
    %488 = vector.shape_cast %487 : vector<2x1xf32> to vector<2x1x1xf32>
    %489 = tpu.reciprocal %488 {approx = true} : vector<2x1x1xf32> -> vector<2x1x1xf32>
    %490 = vector.broadcast %489 : vector<2x1x1xf32> to vector<2x1x16xf32>
    %491 = arith.mulf %486, %490 : vector<2x1x16xf32>
    %492 = arith.truncf %491 : vector<2x1x16xf32> to vector<2x1x16xbf16>
    %493 = vector.extract_strided_slice %473 {offsets = [0, 0, 0], sizes = [2, 16, 8], strides = [1, 1, 1]} : vector<2x16x32xbf16> to vector<2x16x8xbf16>
    "tpu.trace_start"() <{level = 10 : i32, message = "bqk,bkd->bqd"}> : () -> ()
    %cst_202 = arith.constant dense<0.000000e+00> : vector<2x1x8xf32>
    %494 = tpu.matmul %492, %493, %cst_202 {dimension_numbers = #tpu.dot_dimension_numbers<[2], [1], [1], [2], [0, 0, 0, 1, 1, 2], [0], [0]>} : vector<2x1x16xbf16>, vector<2x16x8xbf16>, vector<2x1x8xf32> -> vector<2x1x8xf32>
    "tpu.trace_stop"() : () -> ()
    %495 = vector.shape_cast %494 : vector<2x1x8xf32> to vector<2x8xf32>
    %496 = arith.truncf %495 : vector<2x8xf32> to vector<2x8xbf16>
    %497 = vector.extract_strided_slice %475 {offsets = [0, 0], sizes = [8, 32], strides = [1, 1]} : vector<32x32xbf16> to vector<8x32xbf16>
    %cst_203 = arith.constant dense<0.000000e+00> : vector<2x32xf32>
    %498 = tpu.matmul %496, %497, %cst_203 {dimension_numbers = #tpu.dot_dimension_numbers<[1], [0], [0], [1], [0, 0, 1, 1], [], []>} : vector<2x8xbf16>, vector<8x32xbf16>, vector<2x32xf32> -> vector<2x32xf32>
    %499 = arith.addf %476, %498 : vector<2x32xf32>
    %500 = vector.extract_strided_slice %477 {offsets = [0, 0, 8], sizes = [2, 1, 8], strides = [1, 1, 1]} : vector<2x1x32xbf16> to vector<2x1x8xbf16>
    %501 = vector.extract_strided_slice %471 {offsets = [0, 0, 8], sizes = [2, 16, 8], strides = [1, 1, 1]} : vector<2x16x32xbf16> to vector<2x16x8xbf16>
    "tpu.trace_start"() <{level = 10 : i32, message = "bqd,bkd->bqk"}> : () -> ()
    %cst_204 = arith.constant dense<0.000000e+00> : vector<2x1x16xf32>
    %502 = tpu.matmul %500, %501, %cst_204 {dimension_numbers = #tpu.dot_dimension_numbers<[2], [2], [1], [1], [0, 0, 0, 1, 1, 1], [0], [0]>} : vector<2x1x8xbf16>, vector<2x16x8xbf16>, vector<2x1x16xf32> -> vector<2x1x16xf32>
    "tpu.trace_stop"() : () -> ()
    %503 = arith.addf %502, %4 : vector<2x1x16xf32>
    %cst_205 = arith.constant dense<0xFF800000> : vector<2x1xf32>
    %504 = vector.multi_reduction <maximumf>, %503, %cst_205 [2] : vector<2x1x16xf32> to vector<2x1xf32>
    %505 = vector.shape_cast %504 : vector<2x1xf32> to vector<2x1x1xf32>
    %506 = vector.broadcast %505 : vector<2x1x1xf32> to vector<2x1x16xf32>
    %507 = arith.subf %503, %506 : vector<2x1x16xf32>
    %508 = math.exp %507 : vector<2x1x16xf32>
    %cst_206 = arith.constant dense<0.000000e+00> : vector<2x1xf32>
    %509 = vector.multi_reduction <add>, %508, %cst_206 [2] : vector<2x1x16xf32> to vector<2x1xf32>
    %510 = vector.shape_cast %509 : vector<2x1xf32> to vector<2x1x1xf32>
    %511 = tpu.reciprocal %510 {approx = true} : vector<2x1x1xf32> -> vector<2x1x1xf32>
    %512 = vector.broadcast %511 : vector<2x1x1xf32> to vector<2x1x16xf32>
    %513 = arith.mulf %508, %512 : vector<2x1x16xf32>
    %514 = arith.truncf %513 : vector<2x1x16xf32> to vector<2x1x16xbf16>
    %515 = vector.extract_strided_slice %473 {offsets = [0, 0, 8], sizes = [2, 16, 8], strides = [1, 1, 1]} : vector<2x16x32xbf16> to vector<2x16x8xbf16>
    "tpu.trace_start"() <{level = 10 : i32, message = "bqk,bkd->bqd"}> : () -> ()
    %cst_207 = arith.constant dense<0.000000e+00> : vector<2x1x8xf32>
    %516 = tpu.matmul %514, %515, %cst_207 {dimension_numbers = #tpu.dot_dimension_numbers<[2], [1], [1], [2], [0, 0, 0, 1, 1, 2], [0], [0]>} : vector<2x1x16xbf16>, vector<2x16x8xbf16>, vector<2x1x8xf32> -> vector<2x1x8xf32>
    "tpu.trace_stop"() : () -> ()
    %517 = vector.shape_cast %516 : vector<2x1x8xf32> to vector<2x8xf32>
    %518 = arith.truncf %517 : vector<2x8xf32> to vector<2x8xbf16>
    %519 = vector.extract_strided_slice %475 {offsets = [8, 0], sizes = [8, 32], strides = [1, 1]} : vector<32x32xbf16> to vector<8x32xbf16>
    %cst_208 = arith.constant dense<0.000000e+00> : vector<2x32xf32>
    %520 = tpu.matmul %518, %519, %cst_208 {dimension_numbers = #tpu.dot_dimension_numbers<[1], [0], [0], [1], [0, 0, 1, 1], [], []>} : vector<2x8xbf16>, vector<8x32xbf16>, vector<2x32xf32> -> vector<2x32xf32>
    %521 = arith.addf %499, %520 : vector<2x32xf32>
    %522 = vector.extract_strided_slice %477 {offsets = [0, 0, 16], sizes = [2, 1, 8], strides = [1, 1, 1]} : vector<2x1x32xbf16> to vector<2x1x8xbf16>
    %523 = vector.extract_strided_slice %471 {offsets = [0, 0, 16], sizes = [2, 16, 8], strides = [1, 1, 1]} : vector<2x16x32xbf16> to vector<2x16x8xbf16>
    "tpu.trace_start"() <{level = 10 : i32, message = "bqd,bkd->bqk"}> : () -> ()
    %cst_209 = arith.constant dense<0.000000e+00> : vector<2x1x16xf32>
    %524 = tpu.matmul %522, %523, %cst_209 {dimension_numbers = #tpu.dot_dimension_numbers<[2], [2], [1], [1], [0, 0, 0, 1, 1, 1], [0], [0]>} : vector<2x1x8xbf16>, vector<2x16x8xbf16>, vector<2x1x16xf32> -> vector<2x1x16xf32>
    "tpu.trace_stop"() : () -> ()
    %525 = arith.addf %524, %4 : vector<2x1x16xf32>
    %cst_210 = arith.constant dense<0xFF800000> : vector<2x1xf32>
    %526 = vector.multi_reduction <maximumf>, %525, %cst_210 [2] : vector<2x1x16xf32> to vector<2x1xf32>
    %527 = vector.shape_cast %526 : vector<2x1xf32> to vector<2x1x1xf32>
    %528 = vector.broadcast %527 : vector<2x1x1xf32> to vector<2x1x16xf32>
    %529 = arith.subf %525, %528 : vector<2x1x16xf32>
    %530 = math.exp %529 : vector<2x1x16xf32>
    %cst_211 = arith.constant dense<0.000000e+00> : vector<2x1xf32>
    %531 = vector.multi_reduction <add>, %530, %cst_211 [2] : vector<2x1x16xf32> to vector<2x1xf32>
    %532 = vector.shape_cast %531 : vector<2x1xf32> to vector<2x1x1xf32>
    %533 = tpu.reciprocal %532 {approx = true} : vector<2x1x1xf32> -> vector<2x1x1xf32>
    %534 = vector.broadcast %533 : vector<2x1x1xf32> to vector<2x1x16xf32>
    %535 = arith.mulf %530, %534 : vector<2x1x16xf32>
    %536 = arith.truncf %535 : vector<2x1x16xf32> to vector<2x1x16xbf16>
    %537 = vector.extract_strided_slice %473 {offsets = [0, 0, 16], sizes = [2, 16, 8], strides = [1, 1, 1]} : vector<2x16x32xbf16> to vector<2x16x8xbf16>
    "tpu.trace_start"() <{level = 10 : i32, message = "bqk,bkd->bqd"}> : () -> ()
    %cst_212 = arith.constant dense<0.000000e+00> : vector<2x1x8xf32>
    %538 = tpu.matmul %536, %537, %cst_212 {dimension_numbers = #tpu.dot_dimension_numbers<[2], [1], [1], [2], [0, 0, 0, 1, 1, 2], [0], [0]>} : vector<2x1x16xbf16>, vector<2x16x8xbf16>, vector<2x1x8xf32> -> vector<2x1x8xf32>
    "tpu.trace_stop"() : () -> ()
    %539 = vector.shape_cast %538 : vector<2x1x8xf32> to vector<2x8xf32>
    %540 = arith.truncf %539 : vector<2x8xf32> to vector<2x8xbf16>
    %541 = vector.extract_strided_slice %475 {offsets = [16, 0], sizes = [8, 32], strides = [1, 1]} : vector<32x32xbf16> to vector<8x32xbf16>
    %cst_213 = arith.constant dense<0.000000e+00> : vector<2x32xf32>
    %542 = tpu.matmul %540, %541, %cst_213 {dimension_numbers = #tpu.dot_dimension_numbers<[1], [0], [0], [1], [0, 0, 1, 1], [], []>} : vector<2x8xbf16>, vector<8x32xbf16>, vector<2x32xf32> -> vector<2x32xf32>
    %543 = arith.addf %521, %542 : vector<2x32xf32>
    %544 = vector.extract_strided_slice %477 {offsets = [0, 0, 24], sizes = [2, 1, 8], strides = [1, 1, 1]} : vector<2x1x32xbf16> to vector<2x1x8xbf16>
    %545 = vector.extract_strided_slice %471 {offsets = [0, 0, 24], sizes = [2, 16, 8], strides = [1, 1, 1]} : vector<2x16x32xbf16> to vector<2x16x8xbf16>
    "tpu.trace_start"() <{level = 10 : i32, message = "bqd,bkd->bqk"}> : () -> ()
    %cst_214 = arith.constant dense<0.000000e+00> : vector<2x1x16xf32>
    %546 = tpu.matmul %544, %545, %cst_214 {dimension_numbers = #tpu.dot_dimension_numbers<[2], [2], [1], [1], [0, 0, 0, 1, 1, 1], [0], [0]>} : vector<2x1x8xbf16>, vector<2x16x8xbf16>, vector<2x1x16xf32> -> vector<2x1x16xf32>
    "tpu.trace_stop"() : () -> ()
    %547 = arith.addf %546, %4 : vector<2x1x16xf32>
    %cst_215 = arith.constant dense<0xFF800000> : vector<2x1xf32>
    %548 = vector.multi_reduction <maximumf>, %547, %cst_215 [2] : vector<2x1x16xf32> to vector<2x1xf32>
    %549 = vector.shape_cast %548 : vector<2x1xf32> to vector<2x1x1xf32>
    %550 = vector.broadcast %549 : vector<2x1x1xf32> to vector<2x1x16xf32>
    %551 = arith.subf %547, %550 : vector<2x1x16xf32>
    %552 = math.exp %551 : vector<2x1x16xf32>
    %cst_216 = arith.constant dense<0.000000e+00> : vector<2x1xf32>
    %553 = vector.multi_reduction <add>, %552, %cst_216 [2] : vector<2x1x16xf32> to vector<2x1xf32>
    %554 = vector.shape_cast %553 : vector<2x1xf32> to vector<2x1x1xf32>
    %555 = tpu.reciprocal %554 {approx = true} : vector<2x1x1xf32> -> vector<2x1x1xf32>
    %556 = vector.broadcast %555 : vector<2x1x1xf32> to vector<2x1x16xf32>
    %557 = arith.mulf %552, %556 : vector<2x1x16xf32>
    %558 = arith.truncf %557 : vector<2x1x16xf32> to vector<2x1x16xbf16>
    %559 = vector.extract_strided_slice %473 {offsets = [0, 0, 24], sizes = [2, 16, 8], strides = [1, 1, 1]} : vector<2x16x32xbf16> to vector<2x16x8xbf16>
    "tpu.trace_start"() <{level = 10 : i32, message = "bqk,bkd->bqd"}> : () -> ()
    %cst_217 = arith.constant dense<0.000000e+00> : vector<2x1x8xf32>
    %560 = tpu.matmul %558, %559, %cst_217 {dimension_numbers = #tpu.dot_dimension_numbers<[2], [1], [1], [2], [0, 0, 0, 1, 1, 2], [0], [0]>} : vector<2x1x16xbf16>, vector<2x16x8xbf16>, vector<2x1x8xf32> -> vector<2x1x8xf32>
    "tpu.trace_stop"() : () -> ()
    %561 = vector.shape_cast %560 : vector<2x1x8xf32> to vector<2x8xf32>
    %562 = arith.truncf %561 : vector<2x8xf32> to vector<2x8xbf16>
    %563 = vector.extract_strided_slice %475 {offsets = [24, 0], sizes = [8, 32], strides = [1, 1]} : vector<32x32xbf16> to vector<8x32xbf16>
    %cst_218 = arith.constant dense<0.000000e+00> : vector<2x32xf32>
    %564 = tpu.matmul %562, %563, %cst_218 {dimension_numbers = #tpu.dot_dimension_numbers<[1], [0], [0], [1], [0, 0, 1, 1], [], []>} : vector<2x8xbf16>, vector<8x32xbf16>, vector<2x32xf32> -> vector<2x32xf32>
    %565 = arith.addf %543, %564 : vector<2x32xf32>
    %566 = arith.addf %450, %565 : vector<2x32xf32>
    %c1_219 = arith.constant 1 : index
    %c0_220 = arith.constant 0 : index
    %c0_221 = arith.constant 0 : index
    %567 = vector.load %arg11[%c1_219, %c0_220, %c0_221] : memref<2x1x32xf32, #tpu.memory_space<vmem>>, vector<1x1x32xf32>
    %568 = vector.shape_cast %567 : vector<1x1x32xf32> to vector<1x32xf32>
    %569 = arith.mulf %566, %566 : vector<2x32xf32>
    %cst_222 = arith.constant dense<0.000000e+00> : vector<2xf32>
    %570 = vector.multi_reduction <add>, %569, %cst_222 [1] : vector<2x32xf32> to vector<2xf32>
    %571 = vector.shape_cast %570 : vector<2xf32> to vector<2x1xf32>
    %cst_223 = arith.constant 3.200000e+01 : f32
    %572 = vector.broadcast %cst_223 : f32 to vector<2x1xf32>
    %573 = arith.divf %571, %572 : vector<2x1xf32>
    %cst_224 = arith.constant 9.99999997E-7 : f32
    %574 = vector.broadcast %cst_224 : f32 to vector<2x1xf32>
    %575 = arith.addf %573, %574 : vector<2x1xf32>
    %576 = math.rsqrt %575 : vector<2x1xf32>
    %577 = vector.broadcast %576 : vector<2x1xf32> to vector<2x32xf32>
    %578 = arith.mulf %566, %577 : vector<2x32xf32>
    %579 = vector.broadcast %568 : vector<1x32xf32> to vector<2x32xf32>
    %580 = arith.mulf %578, %579 : vector<2x32xf32>
    %c1_225 = arith.constant 1 : index
    %c0_226 = arith.constant 0 : index
    %c0_227 = arith.constant 0 : index
    %581 = vector.load %arg12[%c1_225, %c0_226, %c0_227] : memref<2x32x64xbf16, #tpu.memory_space<vmem>>, vector<1x32x64xbf16>
    %582 = vector.shape_cast %581 : vector<1x32x64xbf16> to vector<32x64xbf16>
    %c1_228 = arith.constant 1 : index
    %c0_229 = arith.constant 0 : index
    %c0_230 = arith.constant 0 : index
    %583 = vector.load %arg13[%c1_228, %c0_229, %c0_230] : memref<2x32x64xbf16, #tpu.memory_space<vmem>>, vector<1x32x64xbf16>
    %584 = vector.shape_cast %583 : vector<1x32x64xbf16> to vector<32x64xbf16>
    %c1_231 = arith.constant 1 : index
    %c0_232 = arith.constant 0 : index
    %c0_233 = arith.constant 0 : index
    %585 = vector.load %arg14[%c1_231, %c0_232, %c0_233] : memref<2x64x32xbf16, #tpu.memory_space<vmem>>, vector<1x64x32xbf16>
    %586 = vector.shape_cast %585 : vector<1x64x32xbf16> to vector<64x32xbf16>
    %587 = arith.truncf %580 : vector<2x32xf32> to vector<2x32xbf16>
    %cst_234 = arith.constant dense<0.000000e+00> : vector<2x64xf32>
    %588 = tpu.matmul %587, %582, %cst_234 {dimension_numbers = #tpu.dot_dimension_numbers<[1], [0], [0], [1], [0, 0, 1, 1], [], []>} : vector<2x32xbf16>, vector<32x64xbf16>, vector<2x64xf32> -> vector<2x64xf32>
    %cst_235 = arith.constant dense<0.000000e+00> : vector<2x64xf32>
    %589 = tpu.matmul %587, %584, %cst_235 {dimension_numbers = #tpu.dot_dimension_numbers<[1], [0], [0], [1], [0, 0, 1, 1], [], []>} : vector<2x32xbf16>, vector<32x64xbf16>, vector<2x64xf32> -> vector<2x64xf32>
    %590 = arith.mulf %588, %588 : vector<2x64xf32>
    %591 = arith.mulf %588, %590 : vector<2x64xf32>
    %cst_236 = arith.constant 4.471500e-02 : f32
    %592 = vector.broadcast %cst_236 : f32 to vector<2x64xf32>
    %593 = arith.mulf %592, %591 : vector<2x64xf32>
    %594 = arith.addf %588, %593 : vector<2x64xf32>
    %cst_237 = arith.constant 0.797884583 : f32
    %595 = vector.broadcast %cst_237 : f32 to vector<2x64xf32>
    %596 = arith.mulf %595, %594 : vector<2x64xf32>
    %597 = math.tanh %596 : vector<2x64xf32>
    %cst_238 = arith.constant 1.000000e+00 : f32
    %598 = vector.broadcast %cst_238 : f32 to vector<2x64xf32>
    %599 = arith.addf %598, %597 : vector<2x64xf32>
    %cst_239 = arith.constant 5.000000e-01 : f32
    %600 = vector.broadcast %cst_239 : f32 to vector<2x64xf32>
    %601 = arith.mulf %600, %599 : vector<2x64xf32>
    %602 = arith.mulf %588, %601 : vector<2x64xf32>
    %603 = arith.mulf %602, %589 : vector<2x64xf32>
    %604 = arith.truncf %603 : vector<2x64xf32> to vector<2x64xbf16>
    %cst_240 = arith.constant dense<0.000000e+00> : vector<2x32xf32>
    %605 = tpu.matmul %604, %586, %cst_240 {dimension_numbers = #tpu.dot_dimension_numbers<[1], [0], [0], [1], [0, 0, 1, 1], [], []>} : vector<2x64xbf16>, vector<64x32xbf16>, vector<2x32xf32> -> vector<2x32xf32>
    %606 = arith.addf %566, %605 : vector<2x32xf32>
    %c0_241 = arith.constant 0 : index
    %c0_242 = arith.constant 0 : index
    %607 = vector.load %arg15[%c0_241, %c0_242] : memref<1x32xf32, #tpu.memory_space<vmem>>, vector<1x32xf32>
    %608 = arith.mulf %606, %606 : vector<2x32xf32>
    %cst_243 = arith.constant dense<0.000000e+00> : vector<2xf32>
    %609 = vector.multi_reduction <add>, %608, %cst_243 [1] : vector<2x32xf32> to vector<2xf32>
    %610 = vector.shape_cast %609 : vector<2xf32> to vector<2x1xf32>
    %cst_244 = arith.constant 3.200000e+01 : f32
    %611 = vector.broadcast %cst_244 : f32 to vector<2x1xf32>
    %612 = arith.divf %610, %611 : vector<2x1xf32>
    %cst_245 = arith.constant 9.99999997E-7 : f32
    %613 = vector.broadcast %cst_245 : f32 to vector<2x1xf32>
    %614 = arith.addf %612, %613 : vector<2x1xf32>
    %615 = math.rsqrt %614 : vector<2x1xf32>
    %616 = vector.broadcast %615 : vector<2x1xf32> to vector<2x32xf32>
    %617 = arith.mulf %606, %616 : vector<2x32xf32>
    %618 = vector.broadcast %607 : vector<1x32xf32> to vector<2x32xf32>
    %619 = arith.mulf %617, %618 : vector<2x32xf32>
    %cst_246 = arith.constant 0.176776692 : f32
    %620 = vector.broadcast %cst_246 : f32 to vector<2x32xf32>
    %621 = arith.mulf %619, %620 : vector<2x32xf32>
    %622 = arith.truncf %621 : vector<2x32xf32> to vector<2x32xbf16>
    %c0_247 = arith.constant 0 : index
    %c0_248 = arith.constant 0 : index
    %623 = vector.load %arg16[%c0_247, %c0_248] : memref<32x128xbf16, #tpu.memory_space<vmem>>, vector<32x128xbf16>
    %cst_249 = arith.constant dense<0.000000e+00> : vector<2x128xf32>
    %624 = tpu.matmul %622, %623, %cst_249 {dimension_numbers = #tpu.dot_dimension_numbers<[1], [0], [0], [1], [0, 0, 1, 1], [], []>} : vector<2x32xbf16>, vector<32x128xbf16>, vector<2x128xf32> -> vector<2x128xf32>
    %625 = tpu.iota {dimensions = array<i32: 1>} : vector<2x128xi32>
    %c64_i32 = arith.constant 64 : i32
    %626 = vector.broadcast %c64_i32 : i32 to vector<2x128xi32>
    %627 = arith.cmpi slt, %625, %626 : vector<2x128xi32>
    %cst_250 = arith.constant -1.000000e+09 : f32
    %628 = vector.broadcast %cst_250 : f32 to vector<2x128xf32>
    %629 = arith.select %627, %624, %628 : vector<2x128xi1>, vector<2x128xf32>
    %cst_251 = arith.constant dense<0xFF800000> : vector<2xf32>
    %630 = vector.multi_reduction <maximumf>, %629, %cst_251 [1] : vector<2x128xf32> to vector<2xf32>
    %631 = vector.shape_cast %630 : vector<2xf32> to vector<2x1xf32>
    %632 = vector.broadcast %631 : vector<2x1xf32> to vector<2x128xf32>
    %633 = arith.cmpf oeq, %629, %632 : vector<2x128xf32>
    %634 = arith.sitofp %625 : vector<2x128xi32> to vector<2x128xf32>
    %cst_252 = arith.constant 1.280000e+02 : f32
    %635 = vector.broadcast %cst_252 : f32 to vector<2x128xf32>
    %636 = arith.select %633, %634, %635 : vector<2x128xi1>, vector<2x128xf32>
    %cst_253 = arith.constant dense<0x7F800000> : vector<2xf32>
    %637 = vector.multi_reduction <minimumf>, %636, %cst_253 [1] : vector<2x128xf32> to vector<2xf32>
    %638 = vector.shape_cast %637 : vector<2xf32> to vector<2x1xf32>
    %639 = arith.fptosi %638 : vector<2x1xf32> to vector<2x1xi32>
    %c0_254 = arith.constant 0 : index
    %c0_255 = arith.constant 0 : index
    %640 = vector.load %arg21[%c0_254, %c0_255] : memref<2x1xf32, #tpu.memory_space<vmem>>, vector<2x1xf32>
    %cst_256 = arith.constant 5.000000e-01 : f32
    %641 = vector.broadcast %cst_256 : f32 to vector<2x1xf32>
    %642 = arith.cmpf ogt, %640, %641 : vector<2x1xf32>
    %c0_i32_257 = arith.constant 0 : i32
    %643 = vector.broadcast %c0_i32_257 : i32 to vector<2x1xi32>
    %644 = arith.select %642, %643, %639 : vector<2x1xi1>, vector<2x1xi32>
    %c1_i32 = arith.constant 1 : i32
    %645 = vector.broadcast %c1_i32 : i32 to vector<2x1xi32>
    %646 = arith.cmpi eq, %644, %645 : vector<2x1xi32>
    %647 = arith.ori %642, %646 : vector<2x1xi1>
    %648 = arith.extui %647 : vector<2x1xi1> to vector<2x1xi32>
    %649 = arith.sitofp %648 : vector<2x1xi32> to vector<2x1xf32>
    %c0_258 = arith.constant 0 : index
    %c0_259 = arith.constant 0 : index
    %650 = vector.load %arg21[%c0_258, %c0_259] : memref<2x1xf32, #tpu.memory_space<vmem>>, vector<2x1xf32>
    tpu.vector_store %arg21[%c0_258, %c0_259], %649 {strides = array<i32>} : memref<2x1xf32, #tpu.memory_space<vmem>>, vector<2x1xf32>,
    %651 = vector.shape_cast %644 : vector<2x1xi32> to vector<1x2x1xi32>
    %c0_260 = arith.constant 0 : index
    %c0_261 = arith.constant 0 : index
    %c0_262 = arith.constant 0 : index
    %652 = vector.load %arg17[%c0_260, %c0_261, %c0_262] : memref<1x2x1xi32, #tpu.memory_space<vmem>>, vector<1x2x1xi32>
    tpu.vector_store %arg17[%c0_260, %c0_261, %c0_262], %651 {strides = array<i32>} : memref<1x2x1xi32, #tpu.memory_space<vmem>>, vector<1x2x1xi32>,
    %653 = vector.broadcast %644 : vector<2x1xi32> to vector<2x128xi32>
    %654 = arith.cmpi eq, %625, %653 : vector<2x128xi32>
    %655 = arith.extui %654 : vector<2x128xi1> to vector<2x128xi32>
    %656 = arith.sitofp %655 : vector<2x128xi32> to vector<2x128xf32>
    %c0_263 = arith.constant 0 : index
    %c0_264 = arith.constant 0 : index
    %657 = vector.load %arg4[%c0_263, %c0_264] : memref<128x32xf32, #tpu.memory_space<vmem>>, vector<128x32xf32>
    %cst_265 = arith.constant dense<0.000000e+00> : vector<2x32xf32>
    %658 = tpu.matmul %656, %657, %cst_265 {dimension_numbers = #tpu.dot_dimension_numbers<[1], [0], [0], [1], [0, 0, 1, 1], [], []>} : vector<2x128xf32>, vector<128x32xf32>, vector<2x32xf32> -> vector<2x32xf32>
    %c0_266 = arith.constant 0 : index
    %c0_267 = arith.constant 0 : index
    %659 = vector.load %arg20[%c0_266, %c0_267] : memref<2x32xf32, #tpu.memory_space<vmem>>, vector<2x32xf32>
    tpu.vector_store %arg20[%c0_266, %c0_267], %658 {strides = array<i32>} : memref<2x32xf32, #tpu.memory_space<vmem>>, vector<2x32xf32>,
    return
  }
  func.func @transform_0(%arg0: i32) -> (i32, i32, i32, i32) {
    %c0_i32 = arith.constant 0 : i32
    %c0_i32_0 = arith.constant 0 : i32
    %c0_i32_1 = arith.constant 0 : i32
    %c0_i32_2 = arith.constant 0 : i32
    %c0_i32_3 = arith.constant 0 : i32
    return %c0_i32, %c0_i32_0, %c0_i32_1, %c0_i32_2 : i32, i32, i32, i32
  }
  func.func @transform_1(%arg0: i32) -> (i32, i32, i32, i32) {
    %c0_i32 = arith.constant 0 : i32
    %c0_i32_0 = arith.constant 0 : i32
    %c0_i32_1 = arith.constant 0 : i32
    %c0_i32_2 = arith.constant 0 : i32
    %c0_i32_3 = arith.constant 0 : i32
    return %c0_i32, %c0_i32_0, %c0_i32_1, %c0_i32_2 : i32, i32, i32, i32
  }
  func.func @transform_2(%arg0: i32) -> (i32, i32, i32) {
    %c0_i32 = arith.constant 0 : i32
    %c0_i32_0 = arith.constant 0 : i32
    %c0_i32_1 = arith.constant 0 : i32
    %c0_i32_2 = arith.constant 0 : i32
    return %c0_i32, %c0_i32_0, %c0_i32_1 : i32, i32, i32
  }
  func.func @transform_3(%arg0: i32) -> (i32, i32) {
    %c0_i32 = arith.constant 0 : i32
    %c0_i32_0 = arith.constant 0 : i32
    %c0_i32_1 = arith.constant 0 : i32
    return %c0_i32, %c0_i32_0 : i32, i32
  }
  func.func @transform_4(%arg0: i32) -> (i32, i32, i32) {
    %c0_i32 = arith.constant 0 : i32
    %c0_i32_0 = arith.constant 0 : i32
    %c0_i32_1 = arith.constant 0 : i32
    %c0_i32_2 = arith.constant 0 : i32
    return %c0_i32, %c0_i32_0, %c0_i32_1 : i32, i32, i32
  }
  func.func @transform_5(%arg0: i32) -> (i32, i32, i32) {
    %c0_i32 = arith.constant 0 : i32
    %c0_i32_0 = arith.constant 0 : i32
    %c0_i32_1 = arith.constant 0 : i32
    %c0_i32_2 = arith.constant 0 : i32
    return %c0_i32, %c0_i32_0, %c0_i32_1 : i32, i32, i32
  }
  func.func @transform_6(%arg0: i32) -> (i32, i32, i32) {
    %c0_i32 = arith.constant 0 : i32
    %c0_i32_0 = arith.constant 0 : i32
    %c0_i32_1 = arith.constant 0 : i32
    %c0_i32_2 = arith.constant 0 : i32
    return %c0_i32, %c0_i32_0, %c0_i32_1 : i32, i32, i32
  }
  func.func @transform_7(%arg0: i32) -> (i32, i32, i32) {
    %c0_i32 = arith.constant 0 : i32
    %c0_i32_0 = arith.constant 0 : i32
    %c0_i32_1 = arith.constant 0 : i32
    %c0_i32_2 = arith.constant 0 : i32
    return %c0_i32, %c0_i32_0, %c0_i32_1 : i32, i32, i32
  }
  func.func @transform_8(%arg0: i32) -> (i32, i32, i32) {
    %c0_i32 = arith.constant 0 : i32
    %c0_i32_0 = arith.constant 0 : i32
    %c0_i32_1 = arith.constant 0 : i32
    %c0_i32_2 = arith.constant 0 : i32
    return %c0_i32, %c0_i32_0, %c0_i32_1 : i32, i32, i32
  }
  func.func @transform_9(%arg0: i32) -> (i32, i32, i32) {
    %c0_i32 = arith.constant 0 : i32
    %c0_i32_0 = arith.constant 0 : i32
    %c0_i32_1 = arith.constant 0 : i32
    %c0_i32_2 = arith.constant 0 : i32
    return %c0_i32, %c0_i32_0, %c0_i32_1 : i32, i32, i32
  }
  func.func @transform_10(%arg0: i32) -> (i32, i32, i32) {
    %c0_i32 = arith.constant 0 : i32
    %c0_i32_0 = arith.constant 0 : i32
    %c0_i32_1 = arith.constant 0 : i32
    %c0_i32_2 = arith.constant 0 : i32
    return %c0_i32, %c0_i32_0, %c0_i32_1 : i32, i32, i32
  }
  func.func @transform_11(%arg0: i32) -> (i32, i32, i32) {
    %c0_i32 = arith.constant 0 : i32
    %c0_i32_0 = arith.constant 0 : i32
    %c0_i32_1 = arith.constant 0 : i32
    %c0_i32_2 = arith.constant 0 : i32
    return %c0_i32, %c0_i32_0, %c0_i32_1 : i32, i32, i32
  }
  func.func @transform_12(%arg0: i32) -> (i32, i32, i32) {
    %c0_i32 = arith.constant 0 : i32
    %c0_i32_0 = arith.constant 0 : i32
    %c0_i32_1 = arith.constant 0 : i32
    %c0_i32_2 = arith.constant 0 : i32
    return %c0_i32, %c0_i32_0, %c0_i32_1 : i32, i32, i32
  }
  func.func @transform_13(%arg0: i32) -> (i32, i32, i32) {
    %c0_i32 = arith.constant 0 : i32
    %c0_i32_0 = arith.constant 0 : i32
    %c0_i32_1 = arith.constant 0 : i32
    %c0_i32_2 = arith.constant 0 : i32
    return %c0_i32, %c0_i32_0, %c0_i32_1 : i32, i32, i32
  }
  func.func @transform_14(%arg0: i32) -> (i32, i32) {
    %c0_i32 = arith.constant 0 : i32
    %c0_i32_0 = arith.constant 0 : i32
    %c0_i32_1 = arith.constant 0 : i32
    return %c0_i32, %c0_i32_0 : i32, i32
  }
  func.func @transform_15(%arg0: i32) -> (i32, i32) {
    %c0_i32 = arith.constant 0 : i32
    %c0_i32_0 = arith.constant 0 : i32
    %c0_i32_1 = arith.constant 0 : i32
    return %c0_i32, %c0_i32_0 : i32, i32
  }
  func.func @transform_16(%arg0: i32) -> (i32, i32, i32) {
    %c0_i32 = arith.constant 0 : i32
    %c0_i32_0 = arith.constant 0 : i32
    %c0_i32_1 = arith.constant 0 : i32
    return %arg0, %c0_i32, %c0_i32_0 : i32, i32, i32
  }
}

</mosaic_0001>

<bundles_post_ra>
// kernel: deplot_generate.4
= control target key start
LH: loop header
LB: loop body
LE: loop exit
PB: predicated region body
PF: predicated region fallthrough
CT: control target
= control target key end

     0   :  { %s682_s12 = smov 0   ;;  %s684_s13 = smov 0   ;;  %s759_s0 = inlined_call_operand.vmem [shape: bf16[2,16,32], index: 0, kind: input, shape index: {}]   ;;  %s760_s1 = inlined_call_operand.vmem [shape: bf16[2,32,64], index: 1, kind: input, shape index: {}]   ;;  %s761_s2 = inlined_call_operand.vmem [shape: bf16[2,2,16,32], index: 2, kind: output, shape index: {0}]   ;;  %s762_s3 = inlined_call_operand.vmem [shape: bf16[2,2,16,32], index: 3, kind: output, shape index: {1}]  }
   0x1   :  { %s686_s14 = smov 0  }
   0x2 LB: > { %s695_s15 = sadd.s32 4294967295, %s657_s14   ;;  %s697_s16 = sadd.s32 1, %s657_s14   ;;  %s657_s14 = sphi %s686_s14, %s766_s14   ;;  %s653_s13 = sphi %s684_s13, %s765_s13   ;;  %s649_s12 = sphi %s682_s12, %s764_s12  }
   0x3   : > { %s65_s17 = ssub.s32 %s657_s14, %s697_s16  ;;  %s68_s18 = sadd.s32 1, %s653_s13 }
   0x4   : > { %p66_p0 = scmp.eq.s32.totalorder %s65_s17, 0  ;;  %p78_p1 = scmp.ne.s32.totalorder %s653_s13, %s649_s12 }
   0x5   : > { %p79_p2 = scmp.eq.s32.totalorder %s695_s15, 1  ;;  %p542_p3 = scmp.ge.s32.totalorder %s657_s14, 1 }
   0x6   : > { %s705_s19 = scalar_select %p66_p0, %s653_s13, %s68_s18  }
   0x7   : > { %p707_p4 = por %p79_p2, %p78_p1  ;;  %p140_p5 = scmp.lt.s32.totalorder %s657_s14, 3 }
   0x9   : > { %p141_p6 = pnand %p542_p3, %p140_p5 }
   0xa   : > { %v630_v0 = vld [vmem:[%s760_s1] sm:$0xff] (!%p141_p6)   ;;  %v659_v1 = vmov (!%p141_p6), 0.0   ;;  %v631_v2 = vld [vmem:[%s760_s1 + $0x10] sm:$0xff] (!%p141_p6)   ;;  %v632_v3 = vld [vmem:[%s760_s1 + $0x8] sm:$0xff] (!%p141_p6)   ;;  %vm660_vm0 = vmmov (!%p141_p6), 0   ;;  %p167_p7 = scmp.lt.s32.totalorder (!%p141_p6), %s695_s15, 1 }
   0xb   : > { %144 = sbr.rel (%p141_p6) target bundleno = 365 (0x16d), region = 28  ;;  %587 = vmatprep.subr.bf16.mxu0 (!%p141_p6), %v659_v1  ;;  %595 = vmatprep.subr.bf16.mxu1 (!%p141_p6), %v659_v1  ;;  %v633_v4 = vld [vmem:[%s760_s1 + $0x18] sm:$0xff] (!%p141_p6)   ;;  %vm196_vm1 = vcmask (!%p141_p6), 261120   ;;  %s158_s7 = sand.u32 (!%p141_p6), 1, %s649_s12   ;;  %vm249_vm2 = vcmask (!%p141_p6), 257024  }
   0xc   : > { %588 = vmatpush3.bf16.msra.mxu0 (!%p141_p6), %v630_v0  ;;  %591 = vmatprep.mubr.msk.bf16.mxu0 (!%p141_p6), %vm660_vm0, %v659_v1  ;;  %s543_s8 = sshll.u32 (!%p141_p6), %s158_s7, 4  ;;  %s661_s10 = smov (!%p141_p6), 96  }
   0xd   : > { %596 = vmatpush3.bf16.msra.mxu1 (!%p141_p6), %v631_v2  ;;  %589 = vmatprep.subr.bf16.mxu0 (!%p141_p6), %v659_v1  ;;  %s160_s9 = scalar_lea.vmem (!%p141_p6), [#allocation2], %s543_s8  ;;  %s166_s11 = scalar_lea.vmem (!%p141_p6), [#allocation3], %s543_s8 }
   0xe   : > { %597 = vmatprep.subr.bf16.mxu1 (!%p141_p6), %v659_v1  ;;  %599 = vmatprep.mubr.msk.bf16.mxu1 (!%p141_p6), %vm660_vm0, %v659_v1 }
  0x10   : > { %590 = vmatpush3.bf16.msra.mxu0 (!%p141_p6), %v632_v3 }
  0x11   : > { %598 = vmatpush3.bf16.msra.mxu1 (!%p141_p6), %v633_v4 }
  0x12   : > { %s168_s29 = scalar_select %p167_p7, %s695_s15, 1 }
  0x13   : > { %s579_s12 = sshll.u32 (%p707_p4), %s695_s15, 3 }
  0x14   : > { %s574_s30 = sshll.u32 %s168_s29, 3  ;;  %s351_s18 = scalar_lea.vmem (%p707_p4), %s761_s2, %s579_s12 }
  0x15   : > { %s171_s6 = scalar_lea.vmem %s759_s0, %s574_s30 }
  0x16   : > { %v634_v5 = vld [vmem:[%s171_s6] sm:$0xff]  }
  0x17   : > { %592 = vmatmul.mubr.msk.bf16.vlgmr.msra.gmra.mrb[0].mxu0 %vm196_vm1, %v634_v5  ;;  %600 = vmatmul.mubr.msk.bf16.vlgmr.msra.gmra.mrb[0].mxu1 %vm196_vm1, %v634_v5 }
  0xea   : > { %v234_v6 = vpop.f32.mrb[0].mxu0  ;;  %v311_v7 = vpop.f32.mrb[0].mxu1 }
  0xeb   : > { %v575_v8 = vpack.c.bf16 %v234_v6, %v234_v6  ;;  %v577_v9 = vpack.c.bf16 %v311_v7, %v311_v7  ;;  %v593_v10 = vpop.f32.mrb[1].mxu0  ;;  %v601_v11 = vpop.f32.mrb[1].mxu1 }
  0xec   : > { %v237_v12 = vpop.f32.mrb[2].mxu0  ;;  %v314_v13 = vpop.f32.mrb[2].mxu1 }
  0xed   : > { %250 = vst.msk [vmem:[%s160_s9] sm:$0xf] %vm249_vm2, %v575_v8  ;;  %562 = vst.msk [vmem:[%s160_s9 + $0x8] sm:$0xf] %vm249_vm2, %v577_v9  ;;  %v576_v14 = vpack.c.bf16 %v237_v12, %v237_v12  ;;  %v578_v15 = vpack.c.bf16 %v314_v13, %v314_v13  ;;  %329 = vrot.lane.b32.xlu1 %v577_v9, %s661_s10  ;;  %v602_v16 = vpop.f32.mrb[3].mxu1  ;;  %252 = vrot.lane.b32.xlu0 %v575_v8, %s661_s10  ;;  %v594_v17 = vpop.f32.mrb[3].mxu0 }
  0xef   : > { %251 = vst.msk [vmem:[%s160_s9 + $0x4] sm:$0xf] %vm249_vm2, %v576_v14  ;;  %563 = vst.msk [vmem:[%s160_s9 + $0xc] sm:$0xf] %vm249_vm2, %v578_v15 }
  0xf1   : > { %331 = vrot.lane.b32.xlu1 %v578_v15, %s661_s10  ;;  %254 = vrot.lane.b32.xlu0 %v576_v14, %s661_s10 }
  0xf6   : > { %v367_v22 = vld [vmem:[%s160_s9] sm:$0xff] (%p707_p4)   ;;  %v371_v23 = vld [vmem:[%s160_s9 + $0x8] sm:$0xff] (%p707_p4)  }
  0xf7   : > { %368 = vst [vmem:[%s351_s18] sm:$0xff] (%p707_p4), %v367_v22   ;;  %372 = vst [vmem:[%s351_s18 + $0x10] sm:$0xff] (%p707_p4), %v371_v23  }
 0x15e   : > { %348 = sbr.rel (!%p707_p4) target bundleno = 357 (0x165), region = 32 }
 0x15f   : > { %v330_v18 = vpop.permute.xlu1 %329  ;;  %v253_v19 = vpop.permute.xlu0 %252 }
 0x160   : > { %564 = vst.msk [vmem:[%s166_s11 + $0x8] sm:$0xf] %vm249_vm2, %v330_v18  ;;  %258 = vst.msk [vmem:[%s166_s11] sm:$0xf] %vm249_vm2, %v253_v19 }
 0x163   : > { %v332_v20 = vpop.permute.xlu1 %331  ;;  %v255_v21 = vpop.permute.xlu0 %254 }
 0x164   : > { %565 = vst.msk [vmem:[%s166_s11 + $0xc] sm:$0xf] %vm249_vm2, %v332_v20  ;;  %259 = vst.msk [vmem:[%s166_s11 + $0x4] sm:$0xf] %vm249_vm2, %v255_v21 }
 0x165 PF: > { %405 = sbr.rel (!%p707_p4) target bundleno = 365 (0x16d), region = 73  ;;  %s580_s21 = sshll.u32 (%p707_p4), %s695_s15, 3 }
 0x166   : > { %s408_s24 = scalar_lea.vmem (%p707_p4), %s762_s3, %s580_s21 }
 0x16b   : > { %v424_v24 = vld [vmem:[%s166_s11] sm:$0xff] (%p707_p4)   ;;  %v428_v25 = vld [vmem:[%s166_s11 + $0x8] sm:$0xff] (%p707_p4)  }
 0x16c   : > { %425 = vst [vmem:[%s408_s24] sm:$0xff] %v424_v24   ;;  %429 = vst [vmem:[%s408_s24 + $0x10] sm:$0xff] %v428_v25  }
 0x16d PF: > { %p11_p8 = scmp.ge.s32.totalorder %s697_s16, 4   ;;  %s764_s12 = smov %s653_s13 }
 0x16e   : > { %s765_s13 = smov %s705_s19  ;;  %s766_s14 = smov %s697_s16 }
 0x16f   :  { %13 = sbr.rel (!%p11_p8) target bundleno = 2 (0x2), region = 155 }

// kernel: deplot_generate.3
= control target key start
LH: loop header
LB: loop body
LE: loop exit
PB: predicated region body
PF: predicated region fallthrough
CT: control target
= control target key end

     0   :  { %s3307_s21 = smov 0   ;;  %s3776_s0 = inlined_call_operand.vmem [shape: f32[2,16,18], index: 0, kind: input, shape index: {}]   ;;  %s3777_s1 = inlined_call_operand.vmem [shape: f32[2,16,32], index: 1, kind: input, shape index: {}]   ;;  %s3778_s2 = inlined_call_operand.vmem [shape: f32[2,1,16], index: 2, kind: input, shape index: {}]   ;;  %s3779_s3 = inlined_call_operand.vmem [shape: bf16[18,32], index: 3, kind: input, shape index: {}]   ;;  %s3780_s4 = inlined_call_operand.vmem [shape: f32[2,1,32], index: 4, kind: input, shape index: {}]   ;;  %s3781_s5 = inlined_call_operand.vmem [shape: bf16[2,32,96], index: 5, kind: input, shape index: {}]   ;;  %s3782_s6 = inlined_call_operand.vmem [shape: bf16[2,32,32], index: 6, kind: input, shape index: {}]   ;;  %s3783_s7 = inlined_call_operand.vmem [shape: f32[2,1,32], index: 7, kind: input, shape index: {}]   ;;  %s3784_s8 = inlined_call_operand.vmem [shape: bf16[2,32,64], index: 8, kind: input, shape index: {}]   ;;  %s3785_s9 = inlined_call_operand.vmem [shape: bf16[2,32,64], index: 9, kind: input, shape index: {}]   ;;  %s3786_s10 = inlined_call_operand.vmem [shape: bf16[2,64,32], index: 10, kind: input, shape index: {}]   ;;  %s3787_s11 = inlined_call_operand.vmem [shape: f32[1,32], index: 11, kind: input, shape index: {}]   ;;  %s3788_s12 = inlined_call_operand.vmem [shape: bf16[2,16,32], index: 12, kind: output, shape index: {}]  }
   0x1 LB: > { %s2675_s22 = sadd.s32 4294967295, %s3227_s21   ;;  %p2679_p0 = scmp.ge.s32.totalorder %s3227_s21, 1  ;;  %s3227_s21 = sphi %s3307_s21, %s22_s21  }
   0x2   : > { %p380_p1 = scmp.lt.s32.totalorder %s3227_s21, 3 }
   0x4   : > { %p381_p2 = pnand %p2679_p0, %p380_p1 }
   0x5   : > { %v3106_v0 = vld [vmem:[%s3779_s3] sm:$0xff] (!%p381_p2)   ;;  %v3229_v1 = vmov (!%p381_p2), 0.0   ;;  %v3107_v2 = vld [vmem:[%s3779_s3 + $0x8] ss:$0 sps:$4 sm:$0x11] (!%p381_p2)   ;;  %vm470_vm0 = vcmask (!%p381_p2), 1040384  }
   0x6   : > { %384 = sbr.rel (%p381_p2) target bundleno = 7224 (0x1c38), region = 68  ;;  %2861 = vmatprep.subr.bf16.mxu0 (!%p381_p2), %v3229_v1  ;;  %2869 = vmatprep.subr.bf16.mxu1 (!%p381_p2), %v3229_v1  ;;  %p430_p3 = scmp.lt.s32.totalorder (!%p381_p2), %s2675_s22, 1  ;;  %v472_v3 = vsel (!%p381_p2), %vm470_vm0, %v3107_v2, 0  ;;  %vm3230_vm1 = vmmov (!%p381_p2), 0   ;;  %vm466_vm2 = vcmask (!%p381_p2), 146432   ;;  %vm525_vm3 = vcmask (!%p381_p2), 261120  }
   0x7   : > { %2862 = vmatpush3.bf16.msra.mxu0 (!%p381_p2), %v3106_v0  ;;  %2865 = vmatprep.mubr.msk.bf16.mxu0 (!%p381_p2), %vm3230_vm1, %v3229_v1  ;;  %v3108_v19 = vld [vmem:[%s3781_s5] sm:$0xff] (!%p381_p2)   ;;  %v3109_v20 = vld [vmem:[%s3781_s5 + $0x8] sm:$0xff] (!%p381_p2)   ;;  %s3231_s24 = smov (!%p381_p2), 120   ;;  %s3232_s25 = smov (!%p381_p2), 96   ;;  %vm618_vm4 = vcmask (!%p381_p2), 64512   ;;  %vm666_vm5 = vcmask (!%p381_p2), 130048  }
   0x8   : > { %2863 = vmatprep.subr.bf16.mxu0 (!%p381_p2), %v3229_v1  ;;  %2873 = vmatprep.mubr.msk.bf16.mxu1 (!%p381_p2), %vm3230_vm1, %v3229_v1  ;;  %v2690_v30 = vld [vmem:[%s3780_s4] ss:$0 sm:$0xff] (!%p381_p2)  ;;  %s3233_s26 = smov (!%p381_p2), 88   ;;  %s3235_s13 = smov (!%p381_p2), 80   ;;  %vm863_vm6 = vcmask (!%p381_p2), 1043456   ;;  %vm1495_vm7 = vcmask (!%p381_p2), 523264  }
   0x9   : > { %2870 = vmatpush3.bf16.msra.mxu1 (!%p381_p2), %v3108_v19  ;;  %s3236_s14 = smov (!%p381_p2), 112   ;;  %s3791_s20 = smov (!%p381_p2), 48   ;;  %vm2596_vm8 = vcmask (!%p381_p2), 257024  }
   0xa   : > { %2871 = vmatprep.subr.bf16.mxu1 (!%p381_p2), %v3229_v1  ;;  %s3790_s23 = smov (!%p381_p2), 104   ;;  %s3789_s17 = smov (!%p381_p2), 40  }
   0xb   : > { %2864 = vmatpush3.bf16.msra.mxu0 (!%p381_p2), %v472_v3 }
   0xc   : > { %2877 = vmatprep.subr.bf16.mxu0 (!%p381_p2), %v3229_v1 }
   0xd   : > { %s3798_s22 = smov (!%p430_p3, %s2675_s22), 1  ;;  %2872 = vmatpush3.bf16.msra.mxu1 %v3109_v20 }
   0xe   : > { %s2777_s27 = sshll.u32 %s3798_s22, 4  ;;  %2883 = vmatprep.subr.bf16.mxu1 %v3229_v1  ;;  %s3389_s29 = scalar_lea.vmem %s3778_s2, %s3798_s22 }
   0xf   : > { %s434_s30 = scalar_lea.vmem %s3776_s0, %s2777_s27  ;;  %s439_s15 = scalar_lea.vmem %s3777_s1, %s2777_s27  ;;  %v3392_v45 = vld [vmem:[%s3389_s29] ss:$0 sm:$0xff] }
  0x10   : > { %v449_v4 = vld [vmem:[%s434_s30] sm:$0xff]  ;;  %v450_v5 = vld [vmem:[%s434_s30 + $0x8] sm:$0xff]  ;;  %s3234_s30 = smov 64   ;;  %s3792_s27 = smov 72  }
  0x11   : > { %v451_v6 = vpack.c.bf16 %v450_v5, %v449_v4  ;;  %v455_v7 = vld [vmem:[%s439_s15] sm:$0xff]  ;;  %v456_v9 = vld [vmem:[%s439_s15 + $0x8] sm:$0xff]  ;;  %s3237_s15 = smov 56  }
  0x13   : > { %2866 = vmatmul.mubr.msk.bf16.vlgmr.msra.gmra.mrb[0].mxu0 %vm466_vm2, %v451_v6 }
  0x14   : > { %2879 = vmatprep.mubr.msk.bf16.mxu0 %vm3230_vm1, %v3229_v1 }
  0xe6   : > { %v508_v8 = vpop.f32.mrb[0].mxu0 }
  0xe7   : > { %v3340_v10 = vadd.f32 %v508_v8, %v455_v7  ;;  %v2867_v11 = vpop.f32.mrb[1].mxu0 }
  0xe8   : > { %v511_v12 = vpop.f32.mrb[2].mxu0 }
  0xe9   : > { %v3342_v13 = vadd.f32 %v511_v12, %v456_v9  ;;  %v2868_v14 = vpop.f32.mrb[3].mxu0  ;;  %v523_v15 = vmul.f32 %v3340_v10, %v3340_v10 }
  0xeb   : > { %v526_v16 = vsel %vm525_vm3, %v523_v15, 0.0  ;;  %v524_v17 = vmul.f32 %v3342_v13, %v3342_v13 }
  0xec   : > { %527 = vadd.xlane.f32.xlu0 %v526_v16 }
  0xed   : > { %v529_v18 = vsel %vm525_vm3, %v524_v17, 0.0 }
  0xf0   : > { %530 = vadd.xlane.f32.xlu0 %v529_v18 }
 0x179   : > { %v528_v21 = vpop.xlane.xlu0 %527 }
 0x17a   : > { %v533_v22 = vmul.f32 0.03125, %v528_v21 }
 0x17c   : > { %v535_v23 = vadd.f32 1e-06, %v533_v22 }
 0x17d   : > { %v531_v24 = vpop.xlane.xlu0 %530 }
 0x17e   : > { %3128 = vrsqrt.f32 %v535_v23  ;;  %v534_v25 = vmul.f32 0.03125, %v531_v24 }
 0x180   : > { %v536_v26 = vadd.f32 1e-06, %v534_v25 }
 0x182   : > { %3130 = vrsqrt.f32 %v536_v26 }
 0x188   : > { %v3129_v27 = vpop.eup %3128 }
 0x189   : > { %v539_v28 = vmul.f32 %v3129_v27, %v3340_v10 }
 0x18b   : > { %v547_v32 = vmul.f32 %v2690_v30, %v539_v28 }
 0x18c   : > { %v3131_v29 = vpop.eup %3130 }
 0x18d   : > { %v540_v31 = vmul.f32 %v3131_v29, %v3342_v13 }
 0x18f   : > { %v548_v33 = vmul.f32 %v2690_v30, %v540_v31 }
 0x191   : > { %v549_v34 = vpack.c.bf16 %v548_v33, %v547_v32 }
 0x193   : > { %2874 = vmatmul.mubr.msk.bf16.vlgmr.msra.gmra.mrb[0].mxu1 %vm525_vm3, %v549_v34 }
 0x194   : > { %2885 = vmatprep.mubr.msk.bf16.mxu1 %vm3230_vm1, %v3229_v1 }
 0x266   : > { %v603_v35 = vpop.f32.mrb[0].mxu1 }
 0x267   : > { %v2875_v36 = vpop.f32.mrb[1].mxu1 }
 0x268   : > { %v606_v37 = vpop.f32.mrb[2].mxu1 }
 0x269   : > { %v3366_v38 = vpack.c.bf16 %v606_v37, %v603_v35  ;;  %v2876_v39 = vpop.f32.mrb[3].mxu1  ;;  %v610_v37 = vld [vmem:[%s3782_s6] sm:$0xf] }
 0x26a   : > { %v912_v39 = vsel %vm863_vm6, %v610_v37, 0 }
 0x26b   : > { %738 = vrot.lane.b32.xlu0 %v3366_v38, %s3231_s24  ;;  %616 = vrot.lane.b32.xlu1 %v3366_v38, %s3232_s25 }
 0x26f   : > { %740 = vrot.lane.b32.xlu1 %v3366_v38, %s3233_s26 }
 0x2dd   : > { %v617_v40 = vpop.permute.xlu1 %616  ;;  %v739_v44 = vpop.permute.xlu0 %738 }
 0x2de   : > { %v623_v41 = vsel %vm618_vm4, %v617_v40, 0  ;;  %v611_v40 = vld [vmem:[%s3782_s6 + $0x4] sm:$0xf] }
 0x2df   : > { %2878 = vmatpush3.bf16.xpose.msra.mxu0 %v623_v41  ;;  %v865_v41 = vsel %vm863_vm6, %v611_v40, 0 }
 0x2e0   : > { %2889 = vmatprep.subr.bf16.mxu0 %v3229_v1 }
 0x2e1   : > { %v741_v42 = vpop.permute.xlu1 %740 }
 0x2e2   : > { %v746_v43 = vsel %vm618_vm4, %v741_v42, 0 }
 0x2e6   : > { %2880 = vmatmul.mubr.msk.bf16.vlgmr.msra.gmra.mrb[4].mxu0 %vm618_vm4, %v3366_v38 }
 0x2e7   : > { %2890 = vmatpush3.bf16.xpose.msra.mxu0 %v746_v43  ;;  %2891 = vmatprep.mubr.msk.bf16.mxu0 %vm3230_vm1, %v3229_v1 }
 0x2e8   : > { %2901 = vmatprep.subr.bf16.mxu0 %v3229_v1 }
 0x2ee   : > { %2892 = vmatmul.mubr.msk.bf16.vlgmr.msra.gmra.mrb[8].mxu0 %vm618_vm4, %v739_v44 }
 0x2ef   : > { %2903 = vmatprep.mubr.msk.bf16.mxu0 %vm3230_vm1, %v3229_v1  ;;  %2902 = vmatpush3.bf16.msra.mxu0 %v865_v41 }
 0x2f0   : > { %2913 = vmatprep.subr.bf16.mxu0 %v3229_v1 }
 0x3b9   : > { %v659_v46 = vpop.f32.mrb[4].mxu0 }
 0x3ba   : > { %v660_v47 = vadd.f32 %v3392_v45, %v659_v46  ;;  %v2881_v48 = vpop.f32.mrb[5].mxu0 }
 0x3bb   : > { %v662_v49 = vpop.f32.mrb[6].mxu0 }
 0x3bc   : > { %v663_v50 = vadd.f32 %v3392_v45, %v662_v49  ;;  %v2882_v51 = vpop.f32.mrb[7].mxu0  ;;  %v667_v52 = vsel %vm666_vm5, %v660_v47, -inf }
 0x3bd   : > { %668 = vmax.xlane.f32.xlu1 %v667_v52 }
 0x3be   : > { %v670_v53 = vsel %vm666_vm5, %v663_v50, -inf }
 0x3bf   : > { %671 = vmax.xlane.f32.xlu0 %v670_v53 }
 0x3c1   : > { %v782_v54 = vpop.f32.mrb[8].mxu0 }
 0x3c2   : > { %v783_v55 = vadd.f32 %v3392_v45, %v782_v54  ;;  %v2893_v56 = vpop.f32.mrb[9].mxu0 }
 0x3c3   : > { %v785_v57 = vpop.f32.mrb[10].mxu0 }
 0x3c4   : > { %v786_v58 = vadd.f32 %v3392_v45, %v785_v57  ;;  %v2894_v59 = vpop.f32.mrb[11].mxu0  ;;  %v789_v60 = vsel %vm666_vm5, %v783_v55, -inf }
 0x3c5   : > { %790 = vmax.xlane.f32.xlu1 %v789_v60 }
 0x3c6   : > { %v792_v61 = vsel %vm666_vm5, %v786_v58, -inf }
 0x3c9   : > { %793 = vmax.xlane.f32.xlu1 %v792_v61 }
 0x44a   : > { %v669_v62 = vpop.xlane.xlu1 %668 }
 0x44b   : > { %v673_v63 = vsub.f32 %v660_v47, %v669_v62 }
 0x44c   : > { %v672_v0 = vpop.xlane.xlu0 %671 }
 0x44d   : > { %v675_v2 = vmul.f32 1.442695, %v673_v63  ;;  %v674_v3 = vsub.f32 %v663_v50, %v672_v0 }
 0x44f   : > { %3132 = vpow2.f32 %v675_v2  ;;  %v677_v4 = vmul.f32 1.442695, %v674_v3 }
 0x451   : > { %3134 = vpow2.f32 %v677_v4 }
 0x452   : > { %v791_v5 = vpop.xlane.xlu1 %790 }
 0x453   : > { %v795_v6 = vsub.f32 %v783_v55, %v791_v5 }
 0x455   : > { %v797_v7 = vmul.f32 1.442695, %v795_v6 }
 0x456   : > { %v794_v8 = vpop.xlane.xlu1 %793 }
 0x457   : > { %3136 = vpow2.f32 %v797_v7  ;;  %v796_v9 = vsub.f32 %v786_v58, %v794_v8 }
 0x459   : > { %v3133_v11 = vpop.eup %3132  ;;  %v799_v12 = vmul.f32 1.442695, %v796_v9 }
 0x45a   : > { %v679_v14 = vsel %vm666_vm5, %v3133_v11, 0.0 }
 0x45b   : > { %v3135_v15 = vpop.eup %3134  ;;  %3138 = vpow2.f32 %v799_v12  ;;  %680 = vadd.xlane.f32.xlu1 %v679_v14 }
 0x45c   : > { %v682_v16 = vsel %vm666_vm5, %v3135_v15, 0.0 }
 0x45f   : > { %683 = vadd.xlane.f32.xlu1 %v682_v16 }
 0x461   : > { %v3137_v17 = vpop.eup %3136 }
 0x462   : > { %v801_v18 = vsel %vm666_vm5, %v3137_v17, 0.0 }
 0x463   : > { %802 = vadd.xlane.f32.xlu1 %v801_v18 }
 0x465   : > { %v3139_v19 = vpop.eup %3138 }
 0x466   : > { %v804_v20 = vsel %vm666_vm5, %v3139_v19, 0.0 }
 0x467   : > { %805 = vadd.xlane.f32.xlu0 %v804_v20 }
 0x474   : > { %690 = vrot.lane.b32.xlu1 %v3366_v38, %s3234_s30 }
 0x478   : > { %957 = vrot.lane.b32.xlu1 %v3366_v38, %s3235_s13 }
 0x47c   : > { %955 = vrot.lane.b32.xlu1 %v3366_v38, %s3236_s14 }
 0x47d   : > { %812 = vrot.lane.b32.xlu0 %v3366_v38, %s3237_s15 }
 0x4e8   : > { %v681_v21 = vpop.xlane.xlu1 %680 }
 0x4e9   : > { %3140 = vrcp.f32 %v681_v21 }
 0x4ec   : > { %v684_v22 = vpop.xlane.xlu1 %683 }
 0x4ed   : > { %3142 = vrcp.f32 %v684_v22 }
 0x4f0   : > { %v803_v23 = vpop.xlane.xlu1 %802 }
 0x4f1   : > { %3144 = vrcp.f32 %v803_v23 }
 0x4f3   : > { %v3141_v26 = vpop.eup %3140 }
 0x4f4   : > { %v806_v24 = vpop.xlane.xlu0 %805  ;;  %v691_v25 = vpop.permute.xlu1 %690  ;;  %v687_v28 = vmul.f32 %v3141_v26, %v3133_v11 }
 0x4f5   : > { %3146 = vrcp.f32 %v806_v24  ;;  %2884 = vmatpush3.bf16.msra.mxu1 %v691_v25 }
 0x4f6   : > { %2895 = vmatprep.subr.bf16.mxu1 %v3229_v1 }
 0x4f7   : > { %v3143_v27 = vpop.eup %3142 }
 0x4f8   : > { %v688_v29 = vmul.f32 %v3143_v27, %v3135_v15  ;;  %v813_v31 = vpop.permute.xlu0 %812  ;;  %v958_v50 = vpop.permute.xlu1 %957 }
 0x4f9   : > { %v963_v54 = vsel %vm618_vm4, %v958_v50, 0 }
 0x4fa   : > { %v689_v30 = vpack.c.bf16 %v688_v29, %v687_v28 }
 0x4fb   : > { %v3145_v32 = vpop.eup %3144 }
 0x4fc   : > { %2886 = vmatmul.mubr.msk.bf16.vlgmr.msra.gmra.mrb[4].mxu1 %vm666_vm5, %v689_v30  ;;  %v809_v34 = vmul.f32 %v3145_v32, %v3137_v17  ;;  %v956_v55 = vpop.permute.xlu1 %955 }
 0x4fd   : > { %2896 = vmatpush3.bf16.msra.mxu1 %v813_v31  ;;  %2897 = vmatprep.mubr.msk.bf16.mxu1 %vm3230_vm1, %v3229_v1 }
 0x4fe   : > { %2907 = vmatprep.subr.bf16.mxu1 %v3229_v1 }
 0x4ff   : > { %v3147_v33 = vpop.eup %3146 }
 0x500   : > { %v810_v35 = vmul.f32 %v3147_v33, %v3139_v19 }
 0x502   : > { %v811_v36 = vpack.c.bf16 %v810_v35, %v809_v34  ;;  %v612_v34 = vld [vmem:[%s3782_s6 + $0x8] sm:$0xf] }
 0x503   : > { %v1081_v35 = vsel %vm863_vm6, %v612_v34, 0 }
 0x504   : > { %2898 = vmatmul.mubr.msk.bf16.vlgmr.msra.gmra.mrb[8].mxu1 %vm666_vm5, %v811_v36 }
 0x505   : > { %2909 = vmatprep.mubr.msk.bf16.mxu1 %vm3230_vm1, %v3229_v1  ;;  %2908 = vmatpush3.bf16.msra.mxu1 %v912_v39 }
 0x506   : > { %2919 = vmatprep.subr.bf16.mxu1 %v3229_v1 }
 0x5cf   : > { %v730_v42 = vpop.f32.mrb[4].mxu1 }
 0x5d0   : > { %v2887_v43 = vpop.f32.mrb[5].mxu1 }
 0x5d1   : > { %v733_v44 = vpop.f32.mrb[6].mxu1 }
 0x5d2   : > { %v737_v46 = vpack.c.bf16 %v733_v44, %v730_v42  ;;  %v2888_v47 = vpop.f32.mrb[7].mxu1 }
 0x5d4   : > { %2910 = vmatmul.mubr.msk.bf16.vlgmr.msra.gmra.mrb[12].mxu1 %vm618_vm4, %v737_v46 }
 0x5d5   : > { %2921 = vmatprep.mubr.msk.bf16.mxu1 %vm3230_vm1, %v3229_v1 }
 0x5d7   : > { %v852_v48 = vpop.f32.mrb[8].mxu1 }
 0x5d8   : > { %v2899_v49 = vpop.f32.mrb[9].mxu1 }
 0x5d9   : > { %v855_v51 = vpop.f32.mrb[10].mxu1 }
 0x5da   : > { %v859_v52 = vpack.c.bf16 %v855_v51, %v852_v48  ;;  %v2900_v53 = vpop.f32.mrb[11].mxu1 }
 0x5dc   : > { %2904 = vmatmul.mubr.msk.bf16.vlgmr.msra.gmra.mrb[12].mxu0 %vm618_vm4, %v859_v52 }
 0x5dd   : > { %2914 = vmatpush3.bf16.xpose.msra.mxu0 %v963_v54  ;;  %2915 = vmatprep.mubr.msk.bf16.mxu0 %vm3230_vm1, %v3229_v1 }
 0x5de   : > { %2925 = vmatprep.subr.bf16.mxu0 %v3229_v1 }
 0x5e4   : > { %2916 = vmatmul.mubr.msk.bf16.vlgmr.msra.gmra.mrb[16].mxu0 %vm618_vm4, %v956_v55 }
 0x5e5   : > { %2927 = vmatprep.mubr.msk.bf16.mxu0 %vm3230_vm1, %v3229_v1  ;;  %2926 = vmatpush3.bf16.msra.mxu0 %v1081_v35 }
 0x5e6   : > { %2937 = vmatprep.subr.bf16.mxu0 %v3229_v1 }
 0x6a7   : > { %v948_v56 = vpop.f32.mrb[12].mxu1 }
 0x6a8   : > { %v2911_v57 = vpop.f32.mrb[13].mxu1 }
 0x6a9   : > { %v951_v58 = vpop.f32.mrb[14].mxu1 }
 0x6aa   : > { %v2912_v59 = vpop.f32.mrb[15].mxu1 }
 0x6af   : > { %v901_v60 = vpop.f32.mrb[12].mxu0 }
 0x6b0   : > { %v3443_v61 = vadd.f32 %v948_v56, %v901_v60  ;;  %v2905_v62 = vpop.f32.mrb[13].mxu0 }
 0x6b1   : > { %v904_v63 = vpop.f32.mrb[14].mxu0  ;;  %v613_v62 = vld [vmem:[%s3782_s6 + $0xc] sm:$0xf] }
 0x6b2   : > { %v3445_v0 = vadd.f32 %v951_v58, %v904_v63  ;;  %v2906_v2 = vpop.f32.mrb[15].mxu0  ;;  %v1252_v63 = vsel %vm863_vm6, %v613_v62, 0 }
 0x6b7   : > { %v999_v3 = vpop.f32.mrb[16].mxu0 }
 0x6b8   : > { %v1000_v4 = vadd.f32 %v3392_v45, %v999_v3  ;;  %v2917_v5 = vpop.f32.mrb[17].mxu0 }
 0x6b9   : > { %v1002_v6 = vpop.f32.mrb[18].mxu0 }
 0x6ba   : > { %v1003_v7 = vadd.f32 %v3392_v45, %v1002_v6  ;;  %v2918_v8 = vpop.f32.mrb[19].mxu0  ;;  %v1006_v9 = vsel %vm666_vm5, %v1000_v4, -inf }
 0x6bb   : > { %1007 = vmax.xlane.f32.xlu0 %v1006_v9 }
 0x6bc   : > { %v1009_v11 = vsel %vm666_vm5, %v1003_v7, -inf }
 0x6bd   : > { %1010 = vmax.xlane.f32.xlu1 %v1009_v11 }
 0x6ce   : > { %1029 = vrot.lane.b32.xlu1 %v3366_v38, %s3791_s20 }
 0x6d2   : > { %1126 = vrot.lane.b32.xlu1 %v3366_v38, %s3790_s23  ;;  %s3796_s23 = smov 40  }
 0x748   : > { %v1008_v12 = vpop.xlane.xlu0 %1007 }
 0x749   : > { %v1012_v14 = vsub.f32 %v1000_v4, %v1008_v12 }
 0x74a   : > { %v1011_v15 = vpop.xlane.xlu1 %1010 }
 0x74b   : > { %v1014_v16 = vmul.f32 1.442695, %v1012_v14  ;;  %v1013_v17 = vsub.f32 %v1003_v7, %v1011_v15 }
 0x74d   : > { %3148 = vpow2.f32 %v1014_v16  ;;  %v1016_v18 = vmul.f32 1.442695, %v1013_v17 }
 0x74e   : > { %v1030_v19 = vpop.permute.xlu1 %1029 }
 0x74f   : > { %3150 = vpow2.f32 %v1016_v18  ;;  %2920 = vmatpush3.bf16.msra.mxu1 %v1030_v19 }
 0x750   : > { %2931 = vmatprep.subr.bf16.mxu1 %v3229_v1 }
 0x752   : > { %v1127_v33 = vpop.permute.xlu1 %1126 }
 0x757   : > { %v3149_v20 = vpop.eup %3148 }
 0x758   : > { %v1018_v21 = vsel %vm666_vm5, %v3149_v20, 0.0 }
 0x759   : > { %v3151_v22 = vpop.eup %3150  ;;  %1019 = vadd.xlane.f32.xlu0 %v1018_v21 }
 0x75a   : > { %v1021_v23 = vsel %vm666_vm5, %v3151_v22, 0.0 }
 0x75d   : > { %1022 = vadd.xlane.f32.xlu0 %v1021_v23 }
 0x773   : > { %1128 = vrot.lane.b32.xlu0 %v3366_v38, %s3792_s27 }
 0x7e6   : > { %v1020_v24 = vpop.xlane.xlu0 %1019 }
 0x7e7   : > { %3152 = vrcp.f32 %v1020_v24 }
 0x7ea   : > { %v1023_v25 = vpop.xlane.xlu0 %1022 }
 0x7eb   : > { %3154 = vrcp.f32 %v1023_v25 }
 0x7ee   : > { %v1129_v30 = vpop.permute.xlu0 %1128 }
 0x7ef   : > { %v1134_v32 = vsel %vm618_vm4, %v1129_v30, 0 }
 0x7f1   : > { %v3153_v26 = vpop.eup %3152 }
 0x7f2   : > { %v1026_v28 = vmul.f32 %v3153_v26, %v3149_v20 }
 0x7f5   : > { %v3155_v27 = vpop.eup %3154 }
 0x7f6   : > { %v1027_v29 = vmul.f32 %v3155_v27, %v3151_v22 }
 0x7f8   : > { %v1028_v31 = vpack.c.bf16 %v1027_v29, %v1026_v28 }
 0x7fa   : > { %2922 = vmatmul.mubr.msk.bf16.vlgmr.msra.gmra.mrb[16].mxu1 %vm666_vm5, %v1028_v31 }
 0x7fb   : > { %2932 = vmatpush3.bf16.xpose.msra.mxu1 %v1134_v32  ;;  %2933 = vmatprep.mubr.msk.bf16.mxu1 %vm3230_vm1, %v3229_v1  ;;  %v3112_v32 = vld [vmem:[%s3784_s8 + $0x8] sm:$0xff]  }
 0x7fc   : > { %2943 = vmatprep.subr.bf16.mxu1 %v3229_v1 }
 0x802   : > { %2934 = vmatmul.mubr.msk.bf16.vlgmr.msra.gmra.mrb[20].mxu1 %vm618_vm4, %v1127_v33  ;;  %v3113_v33 = vld [vmem:[%s3785_s9 + $0x8] sm:$0xff]  }
 0x803   : > { %2945 = vmatprep.mubr.msk.bf16.mxu1 %vm3230_vm1, %v3229_v1  ;;  %2944 = vmatpush3.bf16.msra.mxu1 %v1252_v63 }
 0x804   : > { %2957 = vmatprep.subr.bf16.mxu1 %v3229_v1 }
 0x8cd   : > { %v1069_v36 = vpop.f32.mrb[16].mxu1 }
 0x8ce   : > { %v2923_v37 = vpop.f32.mrb[17].mxu1 }
 0x8cf   : > { %v1072_v39 = vpop.f32.mrb[18].mxu1 }
 0x8d0   : > { %v1076_v40 = vpack.c.bf16 %v1072_v39, %v1069_v36  ;;  %v2924_v41 = vpop.f32.mrb[19].mxu1 }
 0x8d2   : > { %2928 = vmatmul.mubr.msk.bf16.vlgmr.msra.gmra.mrb[20].mxu0 %vm618_vm4, %v1076_v40 }
 0x8d3   : > { %2939 = vmatprep.mubr.msk.bf16.mxu0 %vm3230_vm1, %v3229_v1 }
 0x8d5   : > { %v1170_v42 = vpop.f32.mrb[20].mxu1 }
 0x8d6   : > { %v1171_v43 = vadd.f32 %v3392_v45, %v1170_v42  ;;  %v2935_v44 = vpop.f32.mrb[21].mxu1 }
 0x8d7   : > { %v1173_v46 = vpop.f32.mrb[22].mxu1  ;;  %v2706_v44 = vld [vmem:[%s3783_s7] ss:$0 sm:$0xff] }
 0x8d8   : > { %v1174_v47 = vadd.f32 %v3392_v45, %v1173_v46  ;;  %v2936_v48 = vpop.f32.mrb[23].mxu1  ;;  %v1177_v49 = vsel %vm666_vm5, %v1171_v43, -inf }
 0x8d9   : > { %1178 = vmax.xlane.f32.xlu1 %v1177_v49 }
 0x8da   : > { %v1180_v50 = vsel %vm666_vm5, %v1174_v47, -inf }
 0x8db   : > { %1181 = vmax.xlane.f32.xlu0 %v1180_v50  ;;  %v3114_v50 = vld [vmem:[%s3786_s10] sm:$0xff]  }
 0x966   : > { %v1179_v51 = vpop.xlane.xlu1 %1178 }
 0x967   : > { %v1183_v52 = vsub.f32 %v1171_v43, %v1179_v51  ;;  %v3115_v51 = vld [vmem:[%s3786_s10 + $0x8] sm:$0xff]  }
 0x968   : > { %v1182_v53 = vpop.xlane.xlu0 %1181 }
 0x969   : > { %v1185_v54 = vmul.f32 1.442695, %v1183_v52  ;;  %v1184_v55 = vsub.f32 %v1174_v47, %v1182_v53  ;;  %v3116_v52 = vld [vmem:[%s3786_s10 + $0x10] sm:$0xff]   ;;  %v3117_v53 = vld [vmem:[%s3786_s10 + $0x18] sm:$0xff]  }
 0x96b   : > { %3156 = vpow2.f32 %v1185_v54  ;;  %v1187_v56 = vmul.f32 1.442695, %v1184_v55 }
 0x96d   : > { %3158 = vpow2.f32 %v1187_v56 }
 0x975   : > { %v3157_v57 = vpop.eup %3156 }
 0x976   : > { %v1189_v58 = vsel %vm666_vm5, %v3157_v57, 0.0 }
 0x977   : > { %v3159_v59 = vpop.eup %3158  ;;  %1190 = vadd.xlane.f32.xlu0 %v1189_v58 }
 0x978   : > { %v1192_v60 = vsel %vm666_vm5, %v3159_v59, 0.0 }
 0x979   : > { %1193 = vadd.xlane.f32.xlu1 %v1192_v60 }
 0x98d   : > { %1200 = vrot.lane.b32.xlu0 %v3366_v38, %s3789_s17 }
 0x9a5   : > { %v1117_v2 = vpop.f32.mrb[20].mxu0 }
 0x9a6   : > { %v1124_v3 = vadd.f32 %v1117_v2, %v3443_v61  ;;  %v2929_v4 = vpop.f32.mrb[21].mxu0 }
 0x9a7   : > { %v1120_v5 = vpop.f32.mrb[22].mxu0 }
 0x9a8   : > { %v1125_v6 = vadd.f32 %v1120_v5, %v3445_v0  ;;  %v2930_v7 = vpop.f32.mrb[23].mxu0 }
 0xa04   : > { %v1191_v8 = vpop.xlane.xlu0 %1190 }
 0xa05   : > { %3160 = vrcp.f32 %v1191_v8 }
 0xa06   : > { %v1194_v38 = vpop.xlane.xlu1 %1193 }
 0xa07   : > { %3162 = vrcp.f32 %v1194_v38 }
 0xa08   : > { %v1201_v9 = vpop.permute.xlu0 %1200 }
 0xa09   : > { %2938 = vmatpush3.bf16.msra.mxu0 %v1201_v9 }
 0xa0a   : > { %2949 = vmatprep.subr.bf16.mxu0 %v3229_v1 }
 0xa0f   : > { %v3161_v11 = vpop.eup %3160 }
 0xa10   : > { %v1197_v14 = vmul.f32 %v3161_v11, %v3157_v57 }
 0xa11   : > { %v3163_v12 = vpop.eup %3162 }
 0xa12   : > { %v1198_v15 = vmul.f32 %v3163_v12, %v3159_v59 }
 0xa14   : > { %v1199_v16 = vpack.c.bf16 %v1198_v15, %v1197_v14 }
 0xa16   : > { %2940 = vmatmul.mubr.msk.bf16.vlgmr.msra.gmra.mrb[24].mxu0 %vm666_vm5, %v1199_v16 }
 0xa17   : > { %2953 = vmatprep.mubr.msk.bf16.mxu0 %vm3230_vm1, %v3229_v1 }
 0xae9   : > { %v1240_v61 = vpop.f32.mrb[24].mxu0 }
 0xaea   : > { %v2941_v0 = vpop.f32.mrb[25].mxu0 }
 0xaeb   : > { %v1243_v17 = vpop.f32.mrb[26].mxu0 }
 0xaec   : > { %v1247_v18 = vpack.c.bf16 %v1243_v17, %v1240_v61  ;;  %v2942_v19 = vpop.f32.mrb[27].mxu0 }
 0xaee   : > { %2946 = vmatmul.mubr.msk.bf16.vlgmr.msra.gmra.mrb[24].mxu1 %vm618_vm4, %v1247_v18 }
 0xaef   : > { %2961 = vmatprep.mubr.msk.bf16.mxu1 %vm3230_vm1, %v3229_v1 }
 0xbc1   : > { %v1288_v20 = vpop.f32.mrb[24].mxu1 }
 0xbc2   : > { %v1295_v21 = vadd.f32 %v1288_v20, %v1124_v3  ;;  %v2947_v22 = vpop.f32.mrb[25].mxu1 }
 0xbc3   : > { %v1291_v23 = vpop.f32.mrb[26].mxu1 }
 0xbc4   : > { %v3499_v24 = vadd.f32 %v1295_v21, %v3340_v10  ;;  %v1296_v25 = vadd.f32 %v1291_v23, %v1125_v6  ;;  %v2948_v26 = vpop.f32.mrb[27].mxu1  ;;  %v3110_v10 = vld [vmem:[%s3784_s8] sm:$0xff]  }
 0xbc5   : > { %2950 = vmatpush3.bf16.msra.mxu0 %v3110_v10 }
 0xbc6   : > { %v3502_v27 = vadd.f32 %v1296_v25, %v3342_v13  ;;  %v1300_v28 = vmul.f32 %v3499_v24, %v3499_v24  ;;  %v3111_v13 = vld [vmem:[%s3785_s9] sm:$0xff]   ;;  %2951 = vmatprep.subr.bf16.mxu0 %v3229_v1 }
 0xbc7   : > { %2958 = vmatpush3.bf16.msra.mxu1 %v3111_v13 }
 0xbc8   : > { %v1302_v29 = vsel %vm525_vm3, %v1300_v28, 0.0  ;;  %v1301_v30 = vmul.f32 %v3502_v27, %v3502_v27  ;;  %2959 = vmatprep.subr.bf16.mxu1 %v3229_v1 }
 0xbc9   : > { %1303 = vadd.xlane.f32.xlu1 %v1302_v29  ;;  %2952 = vmatpush3.bf16.msra.mxu0 %v3112_v32 }
 0xbca   : > { %v1305_v31 = vsel %vm525_vm3, %v1301_v30, 0.0  ;;  %2965 = vmatprep.subr.bf16.mxu0 %v3229_v1 }
 0xbcb   : > { %2960 = vmatpush3.bf16.msra.mxu1 %v3113_v33 }
 0xbcc   : > { %2977 = vmatprep.subr.bf16.mxu1 %v3229_v1 }
 0xbcd   : > { %1306 = vadd.xlane.f32.xlu1 %v1305_v31 }
 0xc56   : > { %v1304_v34 = vpop.xlane.xlu1 %1303 }
 0xc57   : > { %v1308_v35 = vmul.f32 0.03125, %v1304_v34 }
 0xc59   : > { %v1310_v36 = vadd.f32 1e-06, %v1308_v35 }
 0xc5a   : > { %v1307_v37 = vpop.xlane.xlu1 %1306 }
 0xc5b   : > { %3164 = vrsqrt.f32 %v1310_v36  ;;  %v1309_v39 = vmul.f32 0.03125, %v1307_v37 }
 0xc5d   : > { %v1311_v40 = vadd.f32 1e-06, %v1309_v39 }
 0xc5f   : > { %3166 = vrsqrt.f32 %v1311_v40 }
 0xc65   : > { %v3165_v41 = vpop.eup %3164 }
 0xc66   : > { %v1314_v42 = vmul.f32 %v3165_v41, %v3499_v24  ;;  %v2719_v41 = vld [vmem:[%s3780_s4 + $0x1] ss:$0 sm:$0xff] }
 0xc68   : > { %v1322_v47 = vmul.f32 %v2706_v44, %v1314_v42 }
 0xc69   : > { %v3167_v43 = vpop.eup %3166 }
 0xc6a   : > { %v1315_v46 = vmul.f32 %v3167_v43, %v3502_v27 }
 0xc6c   : > { %v1323_v48 = vmul.f32 %v2706_v44, %v1315_v46 }
 0xc6e   : > { %v1340_v49 = vpack.c.bf16 %v1323_v48, %v1322_v47 }
 0xc70   : > { %2954 = vmatmul.mubr.msk.bf16.vlgmr.msra.gmra.mrb[28].mxu0 %vm525_vm3, %v1340_v49  ;;  %2962 = vmatmul.mubr.msk.bf16.vlgmr.msra.gmra.mrb[28].mxu1 %vm525_vm3, %v1340_v49 }
 0xc71   : > { %2973 = vmatprep.mubr.msk.bf16.mxu0 %vm3230_vm1, %v3229_v1  ;;  %2981 = vmatprep.mubr.msk.bf16.mxu1 %vm3230_vm1, %v3229_v1 }
 0xc72   : > { %2966 = vmatpush3.bf16.msra.mxu0 %v3114_v50 }
 0xc73   : > { %2967 = vmatprep.subr.bf16.mxu0 %v3229_v1 }
 0xc76   : > { %2968 = vmatpush3.bf16.msra.mxu0 %v3115_v51 }
 0xc77   : > { %2969 = vmatprep.subr.bf16.mxu0 %v3229_v1 }
 0xc7a   : > { %2970 = vmatpush3.bf16.msra.mxu0 %v3116_v52 }
 0xc7b   : > { %2971 = vmatprep.subr.bf16.mxu0 %v3229_v1 }
 0xc7e   : > { %2972 = vmatpush3.bf16.msra.mxu0 %v3117_v53 }
 0xc7f   : > { %2991 = vmatprep.subr.bf16.mxu0 %v3229_v1 }
 0xd43   : > { %v1390_v54 = vpop.f32.mrb[28].mxu0  ;;  %v1443_v55 = vpop.f32.mrb[28].mxu1 }
 0xd44   : > { %v1450_v56 = vmul.f32 %v1390_v54, %v1390_v54  ;;  %v2955_v57 = vpop.f32.mrb[29].mxu0  ;;  %v2963_v58 = vpop.f32.mrb[29].mxu1 }
 0xd45   : > { %v1393_v59 = vpop.f32.mrb[30].mxu0  ;;  %v1446_v60 = vpop.f32.mrb[30].mxu1 }
 0xd46   : > { %v1452_v62 = vmul.f32 %v1450_v56, %v1390_v54  ;;  %v1451_v63 = vmul.f32 %v1393_v59, %v1393_v59  ;;  %v2956_v2 = vpop.f32.mrb[31].mxu0  ;;  %v2964_v3 = vpop.f32.mrb[31].mxu1 }
 0xd48   : > { %v1454_v4 = vmul.f32 0.044715, %v1452_v62  ;;  %v1453_v5 = vmul.f32 %v1451_v63, %v1393_v59 }
 0xd4a   : > { %v1456_v6 = vadd.f32 %v1454_v4, %v1390_v54  ;;  %v1455_v7 = vmul.f32 0.044715, %v1453_v5 }
 0xd4c   : > { %v1458_v8 = vmul.f32 0.7978846, %v1456_v6  ;;  %v1457_v38 = vadd.f32 %v1455_v7, %v1393_v59 }
 0xd4e   : > { %3168 = vtanh.f32 %v1458_v8  ;;  %v1459_v9 = vmul.f32 0.7978846, %v1457_v38 }
 0xd50   : > { %3170 = vtanh.f32 %v1459_v9 }
 0xd58   : > { %v3169_v11 = vpop.eup %3168 }
 0xd59   : > { %v1462_v12 = vadd.f32 1.0, %v3169_v11 }
 0xd5a   : > { %v3171_v14 = vpop.eup %3170 }
 0xd5b   : > { %v1464_v15 = vmul.f32 0.5, %v1462_v12  ;;  %v1463_v16 = vadd.f32 1.0, %v3171_v14 }
 0xd5d   : > { %v1466_v61 = vmul.f32 %v1464_v15, %v1390_v54  ;;  %v1465_v0 = vmul.f32 0.5, %v1463_v16 }
 0xd5f   : > { %v1468_v17 = vmul.f32 %v1466_v61, %v1443_v55  ;;  %v1467_v18 = vmul.f32 %v1465_v0, %v1393_v59 }
 0xd61   : > { %v1469_v19 = vmul.f32 %v1467_v18, %v1446_v60 }
 0xd63   : > { %v1470_v20 = vpack.c.bf16 %v1469_v19, %v1468_v17 }
 0xd65   : > { %2974 = vmatmul.mubr.msk.bf16.vlgmr.msra.gmra.mrb[32].mxu0 %vm1495_vm7, %v1470_v20 }
 0xd66   : > { %2993 = vmatprep.mubr.msk.bf16.mxu0 %vm3230_vm1, %v3229_v1 }
 0xe38   : > { %v1533_v21 = vpop.f32.mrb[32].mxu0 }
 0xe39   : > { %v3557_v22 = vadd.f32 %v1533_v21, %v3499_v24  ;;  %v2975_v23 = vpop.f32.mrb[33].mxu0  ;;  %v3118_v24 = vld [vmem:[%s3781_s5 + $0x10] sm:$0xff]  }
 0xe3a   : > { %v1536_v25 = vpop.f32.mrb[34].mxu0  ;;  %2978 = vmatpush3.bf16.msra.mxu1 %v3118_v24 }
 0xe3b   : > { %v3560_v26 = vadd.f32 %v1536_v25, %v3502_v27  ;;  %v2976_v28 = vpop.f32.mrb[35].mxu0  ;;  %v1544_v29 = vmul.f32 %v3557_v22, %v3557_v22  ;;  %v3119_v27 = vld [vmem:[%s3781_s5 + $0x18] sm:$0xff]   ;;  %2979 = vmatprep.subr.bf16.mxu1 %v3229_v1 }
 0xe3d   : > { %v1546_v30 = vsel %vm525_vm3, %v1544_v29, 0.0  ;;  %v1545_v31 = vmul.f32 %v3560_v26, %v3560_v26 }
 0xe3e   : > { %1547 = vadd.xlane.f32.xlu1 %v1546_v30  ;;  %2980 = vmatpush3.bf16.msra.mxu1 %v3119_v27 }
 0xe3f   : > { %v1549_v10 = vsel %vm525_vm3, %v1545_v31, 0.0  ;;  %2985 = vmatprep.subr.bf16.mxu1 %v3229_v1 }
 0xe42   : > { %1550 = vadd.xlane.f32.xlu1 %v1549_v10 }
 0xecb   : > { %v1548_v13 = vpop.xlane.xlu1 %1547 }
 0xecc   : > { %v1552_v32 = vmul.f32 0.03125, %v1548_v13 }
 0xece   : > { %v1554_v33 = vadd.f32 1e-06, %v1552_v32 }
 0xecf   : > { %v1551_v34 = vpop.xlane.xlu1 %1550 }
 0xed0   : > { %3172 = vrsqrt.f32 %v1554_v33  ;;  %v1553_v35 = vmul.f32 0.03125, %v1551_v34 }
 0xed2   : > { %v1555_v36 = vadd.f32 1e-06, %v1553_v35 }
 0xed4   : > { %3174 = vrsqrt.f32 %v1555_v36 }
 0xeda   : > { %v3173_v37 = vpop.eup %3172 }
 0xedb   : > { %v1558_v39 = vmul.f32 %v3173_v37, %v3557_v22 }
 0xedd   : > { %v1566_v43 = vmul.f32 %v2719_v41, %v1558_v39 }
 0xede   : > { %v3175_v40 = vpop.eup %3174 }
 0xedf   : > { %v1559_v42 = vmul.f32 %v3175_v40, %v3560_v26 }
 0xee1   : > { %v1567_v44 = vmul.f32 %v2719_v41, %v1559_v42 }
 0xee3   : > { %v1568_v46 = vpack.c.bf16 %v1567_v44, %v1566_v43 }
 0xee5   : > { %2982 = vmatmul.mubr.msk.bf16.vlgmr.msra.gmra.mrb[32].mxu1 %vm525_vm3, %v1568_v46 }
 0xee6   : > { %2987 = vmatprep.mubr.msk.bf16.mxu1 %vm3230_vm1, %v3229_v1 }
 0xfb8   : > { %v1623_v47 = vpop.f32.mrb[32].mxu1 }
 0xfb9   : > { %v2983_v48 = vpop.f32.mrb[33].mxu1 }
 0xfba   : > { %v1626_v49 = vpop.f32.mrb[34].mxu1  ;;  %v2727_v48 = vld [vmem:[%s3782_s6 + $0x10] sm:$0xf] }
 0xfbb   : > { %v3584_v50 = vpack.c.bf16 %v1626_v49, %v1623_v47  ;;  %v2984_v51 = vpop.f32.mrb[35].mxu1  ;;  %v1930_v49 = vsel %vm863_vm6, %v2727_v48, 0 }
 0xfbc   : > { %v2728_v51 = vld [vmem:[%s3782_s6 + $0x14] sm:$0xf] }
 0xfbd   : > { %1759 = vrot.lane.b32.xlu0 %v3584_v50, %s3233_s26  ;;  %1637 = vrot.lane.b32.xlu1 %v3584_v50, %s3232_s25 }
 0xfc1   : > { %1757 = vrot.lane.b32.xlu0 %v3584_v50, %s3231_s24  ;;  %s2779_s24 = sshll.u32 %s3798_s22, 3 }
0x102f   : > { %v1638_v52 = vpop.permute.xlu1 %1637  ;;  %v1760_v54 = vpop.permute.xlu0 %1759 }
0x1030   : > { %v1643_v53 = vsel %vm618_vm4, %v1638_v52, 0  ;;  %v1765_v55 = vsel %vm618_vm4, %v1760_v54, 0  ;;  %v1883_v52 = vsel %vm863_vm6, %v2728_v51, 0 }
0x1031   : > { %2986 = vmatpush3.bf16.xpose.msra.mxu1 %v1643_v53 }
0x1032   : > { %2997 = vmatprep.subr.bf16.mxu1 %v3229_v1 }
0x1033   : > { %v1758_v56 = vpop.permute.xlu0 %1757 }
0x1038   : > { %2988 = vmatmul.mubr.msk.bf16.vlgmr.msra.gmra.mrb[36].mxu1 %vm618_vm4, %v3584_v50 }
0x1039   : > { %2998 = vmatpush3.bf16.xpose.msra.mxu1 %v1765_v55  ;;  %2999 = vmatprep.mubr.msk.bf16.mxu1 %vm3230_vm1, %v3229_v1 }
0x103a   : > { %3009 = vmatprep.subr.bf16.mxu1 %v3229_v1 }
0x1040   : > { %3000 = vmatmul.mubr.msk.bf16.vlgmr.msra.gmra.mrb[40].mxu1 %vm618_vm4, %v1758_v56 }
0x1041   : > { %3011 = vmatprep.mubr.msk.bf16.mxu1 %vm3230_vm1, %v3229_v1  ;;  %3010 = vmatpush3.bf16.msra.mxu1 %v1883_v52 }
0x1042   : > { %3021 = vmatprep.subr.bf16.mxu1 %v3229_v1 }
0x110b   : > { %v1679_v57 = vpop.f32.mrb[36].mxu1 }
0x110c   : > { %v1680_v58 = vadd.f32 %v3392_v45, %v1679_v57  ;;  %v2989_v59 = vpop.f32.mrb[37].mxu1 }
0x110d   : > { %v1682_v60 = vpop.f32.mrb[38].mxu1 }
0x110e   : > { %v1683_v62 = vadd.f32 %v3392_v45, %v1682_v60  ;;  %v2990_v63 = vpop.f32.mrb[39].mxu1  ;;  %v1686_v2 = vsel %vm666_vm5, %v1680_v58, -inf }
0x110f   : > { %1687 = vmax.xlane.f32.xlu0 %v1686_v2 }
0x1110   : > { %v1689_v3 = vsel %vm666_vm5, %v1683_v62, -inf }
0x1111   : > { %1690 = vmax.xlane.f32.xlu1 %v1689_v3 }
0x1113   : > { %v1801_v4 = vpop.f32.mrb[40].mxu1 }
0x1114   : > { %v1802_v5 = vadd.f32 %v3392_v45, %v1801_v4  ;;  %v3001_v6 = vpop.f32.mrb[41].mxu1 }
0x1115   : > { %v1804_v7 = vpop.f32.mrb[42].mxu1 }
0x1116   : > { %v1805_v8 = vadd.f32 %v3392_v45, %v1804_v7  ;;  %v3002_v38 = vpop.f32.mrb[43].mxu1  ;;  %v1808_v9 = vsel %vm666_vm5, %v1802_v5, -inf }
0x1117   : > { %1809 = vmax.xlane.f32.xlu0 %v1808_v9 }
0x1118   : > { %v1811_v11 = vsel %vm666_vm5, %v1805_v8, -inf }
0x111b   : > { %1812 = vmax.xlane.f32.xlu0 %v1811_v11 }
0x119c   : > { %v1688_v12 = vpop.xlane.xlu0 %1687 }
0x119d   : > { %v1692_v14 = vsub.f32 %v1680_v58, %v1688_v12 }
0x119e   : > { %v1691_v15 = vpop.xlane.xlu1 %1690 }
0x119f   : > { %v1694_v16 = vmul.f32 1.442695, %v1692_v14  ;;  %v1693_v61 = vsub.f32 %v1683_v62, %v1691_v15 }
0x11a1   : > { %3176 = vpow2.f32 %v1694_v16  ;;  %v1696_v0 = vmul.f32 1.442695, %v1693_v61  ;;  %v3657_v61 = vld [vmem:[%s3389_s29] ss:$0 sm:$0xff]  ;;  %s3793_s29 = smov 72  }
0x11a3   : > { %3178 = vpow2.f32 %v1696_v0 }
0x11a4   : > { %v1810_v17 = vpop.xlane.xlu0 %1809 }
0x11a5   : > { %v1814_v18 = vsub.f32 %v1802_v5, %v1810_v17 }
0x11a7   : > { %v1816_v19 = vmul.f32 1.442695, %v1814_v18 }
0x11a8   : > { %v1813_v20 = vpop.xlane.xlu0 %1812 }
0x11a9   : > { %3180 = vpow2.f32 %v1816_v19  ;;  %v1815_v45 = vsub.f32 %v1805_v8, %v1813_v20 }
0x11ab   : > { %v3177_v21 = vpop.eup %3176  ;;  %v1818_v23 = vmul.f32 1.442695, %v1815_v45 }
0x11ac   : > { %v1698_v25 = vsel %vm666_vm5, %v3177_v21, 0.0 }
0x11ad   : > { %v3179_v28 = vpop.eup %3178  ;;  %3182 = vpow2.f32 %v1818_v23  ;;  %1699 = vadd.xlane.f32.xlu0 %v1698_v25 }
0x11ae   : > { %v1701_v29 = vsel %vm666_vm5, %v3179_v28, 0.0 }
0x11af   : > { %1702 = vadd.xlane.f32.xlu1 %v1701_v29 }
0x11b3   : > { %v3181_v30 = vpop.eup %3180 }
0x11b4   : > { %v1820_v31 = vsel %vm666_vm5, %v3181_v30, 0.0 }
0x11b5   : > { %1821 = vadd.xlane.f32.xlu0 %v1820_v31 }
0x11b7   : > { %v3183_v10 = vpop.eup %3182 }
0x11b8   : > { %v1823_v24 = vsel %vm666_vm5, %v3183_v10, 0.0 }
0x11b9   : > { %1824 = vadd.xlane.f32.xlu1 %v1823_v24 }
0x11ca   : > { %1831 = vrot.lane.b32.xlu1 %v3584_v50, %s3237_s15 }
0x11cb   : > { %1709 = vrot.lane.b32.xlu0 %v3584_v50, %s3234_s30  ;;  %s447_s30 = scalar_lea.vmem %s3788_s12, %s2779_s24 }
0x11ce   : > { %1975 = vrot.lane.b32.xlu1 %v3584_v50, %s3235_s13  ;;  %s3794_s13 = smov 48  }
0x11cf   : > { %1973 = vrot.lane.b32.xlu0 %v3584_v50, %s3236_s14  ;;  %s3795_s14 = smov 104  }
0x123a   : > { %v1700_v27 = vpop.xlane.xlu0 %1699 }
0x123b   : > { %3184 = vrcp.f32 %v1700_v27 }
0x123c   : > { %v1703_v13 = vpop.xlane.xlu1 %1702 }
0x123d   : > { %3186 = vrcp.f32 %v1703_v13 }
0x1242   : > { %v1822_v32 = vpop.xlane.xlu0 %1821 }
0x1243   : > { %3188 = vrcp.f32 %v1822_v32 }
0x1245   : > { %v3185_v33 = vpop.eup %3184 }
0x1246   : > { %v1825_v34 = vpop.xlane.xlu1 %1824  ;;  %v1710_v35 = vpop.permute.xlu0 %1709  ;;  %v1706_v37 = vmul.f32 %v3185_v33, %v3177_v21 }
0x1247   : > { %v3187_v36 = vpop.eup %3186  ;;  %3190 = vrcp.f32 %v1825_v34  ;;  %2992 = vmatpush3.bf16.msra.mxu0 %v1710_v35 }
0x1248   : > { %v1707_v39 = vmul.f32 %v3187_v36, %v3179_v28  ;;  %3003 = vmatprep.subr.bf16.mxu0 %v3229_v1 }
0x124a   : > { %v1832_v40 = vpop.permute.xlu1 %1831  ;;  %v1708_v41 = vpack.c.bf16 %v1707_v39, %v1706_v37  ;;  %v1974_v4 = vpop.permute.xlu0 %1973 }
0x124c   : > { %2994 = vmatmul.mubr.msk.bf16.vlgmr.msra.gmra.mrb[36].mxu0 %vm666_vm5, %v1708_v41 }
0x124d   : > { %3004 = vmatpush3.bf16.msra.mxu0 %v1832_v40  ;;  %3005 = vmatprep.mubr.msk.bf16.mxu0 %vm3230_vm1, %v3229_v1  ;;  %v3189_v42 = vpop.eup %3188 }
0x124e   : > { %3015 = vmatprep.subr.bf16.mxu0 %v3229_v1  ;;  %v1828_v44 = vmul.f32 %v3189_v42, %v3181_v30  ;;  %v1976_v60 = vpop.permute.xlu1 %1975 }
0x124f   : > { %v1981_v3 = vsel %vm618_vm4, %v1976_v60, 0 }
0x1251   : > { %v3191_v43 = vpop.eup %3190 }
0x1252   : > { %v1829_v46 = vmul.f32 %v3191_v43, %v3183_v10 }
0x1254   : > { %v1830_v47 = vpack.c.bf16 %v1829_v46, %v1828_v44  ;;  %v2729_v44 = vld [vmem:[%s3782_s6 + $0x18] sm:$0xf] }
0x1255   : > { %v2099_v46 = vsel %vm863_vm6, %v2729_v44, 0 }
0x1256   : > { %3006 = vmatmul.mubr.msk.bf16.vlgmr.msra.gmra.mrb[40].mxu0 %vm666_vm5, %v1830_v47 }
0x1257   : > { %3017 = vmatprep.mubr.msk.bf16.mxu0 %vm3230_vm1, %v3229_v1  ;;  %3016 = vmatpush3.bf16.msra.mxu0 %v1930_v49 }
0x1258   : > { %3027 = vmatprep.subr.bf16.mxu0 %v3229_v1 }
0x131f   : > { %v1749_v53 = vpop.f32.mrb[36].mxu0 }
0x1320   : > { %v2995_v54 = vpop.f32.mrb[37].mxu0 }
0x1321   : > { %v1752_v55 = vpop.f32.mrb[38].mxu0 }
0x1322   : > { %v1756_v56 = vpack.c.bf16 %v1752_v55, %v1749_v53  ;;  %v2996_v57 = vpop.f32.mrb[39].mxu0 }
0x1324   : > { %3018 = vmatmul.mubr.msk.bf16.vlgmr.msra.gmra.mrb[44].mxu0 %vm618_vm4, %v1756_v56 }
0x1325   : > { %3029 = vmatprep.mubr.msk.bf16.mxu0 %vm3230_vm1, %v3229_v1 }
0x1329   : > { %v1871_v58 = vpop.f32.mrb[40].mxu0 }
0x132a   : > { %v3007_v59 = vpop.f32.mrb[41].mxu0 }
0x132b   : > { %v1874_v62 = vpop.f32.mrb[42].mxu0 }
0x132c   : > { %v1878_v63 = vpack.c.bf16 %v1874_v62, %v1871_v58  ;;  %v3008_v2 = vpop.f32.mrb[43].mxu0 }
0x132e   : > { %3012 = vmatmul.mubr.msk.bf16.vlgmr.msra.gmra.mrb[44].mxu1 %vm618_vm4, %v1878_v63 }
0x132f   : > { %3022 = vmatpush3.bf16.xpose.msra.mxu1 %v1981_v3  ;;  %3023 = vmatprep.mubr.msk.bf16.mxu1 %vm3230_vm1, %v3229_v1 }
0x1330   : > { %3033 = vmatprep.subr.bf16.mxu1 %v3229_v1 }
0x1336   : > { %3024 = vmatmul.mubr.msk.bf16.vlgmr.msra.gmra.mrb[48].mxu1 %vm618_vm4, %v1974_v4 }
0x1337   : > { %3035 = vmatprep.mubr.msk.bf16.mxu1 %vm3230_vm1, %v3229_v1  ;;  %3034 = vmatpush3.bf16.msra.mxu1 %v2099_v46 }
0x1338   : > { %3045 = vmatprep.subr.bf16.mxu1 %v3229_v1 }
0x13f7   : > { %v1966_v5 = vpop.f32.mrb[44].mxu0 }
0x13f8   : > { %v3019_v6 = vpop.f32.mrb[45].mxu0 }
0x13f9   : > { %v1969_v7 = vpop.f32.mrb[46].mxu0 }
0x13fa   : > { %v3020_v8 = vpop.f32.mrb[47].mxu0 }
0x1401   : > { %v1919_v38 = vpop.f32.mrb[44].mxu1 }
0x1402   : > { %v3652_v9 = vadd.f32 %v1966_v5, %v1919_v38  ;;  %v3013_v11 = vpop.f32.mrb[45].mxu1 }
0x1403   : > { %v1922_v12 = vpop.f32.mrb[46].mxu1 }
0x1404   : > { %v3654_v14 = vadd.f32 %v1969_v7, %v1922_v12  ;;  %v3014_v15 = vpop.f32.mrb[47].mxu1 }
0x1409   : > { %v2017_v16 = vpop.f32.mrb[48].mxu1 }
0x140a   : > { %v2018_v0 = vadd.f32 %v3657_v61, %v2017_v16  ;;  %v3025_v17 = vpop.f32.mrb[49].mxu1 }
0x140b   : > { %v2020_v18 = vpop.f32.mrb[50].mxu1 }
0x140c   : > { %v2021_v19 = vadd.f32 %v3657_v61, %v2020_v18  ;;  %v3026_v20 = vpop.f32.mrb[51].mxu1  ;;  %v2024_v45 = vsel %vm666_vm5, %v2018_v0, -inf }
0x140d   : > { %2025 = vmax.xlane.f32.xlu1 %v2024_v45 }
0x140e   : > { %v2027_v21 = vsel %vm666_vm5, %v2021_v19, -inf }
0x140f   : > { %2028 = vmax.xlane.f32.xlu0 %v2027_v21 }
0x149a   : > { %v2026_v23 = vpop.xlane.xlu1 %2025 }
0x149b   : > { %v2030_v25 = vsub.f32 %v2018_v0, %v2026_v23 }
0x149c   : > { %v2029_v28 = vpop.xlane.xlu0 %2028 }
0x149d   : > { %v2032_v29 = vmul.f32 1.442695, %v2030_v25  ;;  %v2031_v30 = vsub.f32 %v2021_v19, %v2029_v28 }
0x149f   : > { %3192 = vpow2.f32 %v2032_v29  ;;  %v2034_v31 = vmul.f32 1.442695, %v2031_v30 }
0x14a1   : > { %3194 = vpow2.f32 %v2034_v31 }
0x14a9   : > { %v3193_v10 = vpop.eup %3192 }
0x14aa   : > { %v2036_v24 = vsel %vm666_vm5, %v3193_v10, 0.0 }
0x14ab   : > { %v3195_v27 = vpop.eup %3194  ;;  %2037 = vadd.xlane.f32.xlu0 %v2036_v24 }
0x14ac   : > { %v2039_v13 = vsel %vm666_vm5, %v3195_v27, 0.0 }
0x14ad   : > { %2040 = vadd.xlane.f32.xlu1 %v2039_v13 }
0x14be   : > { %2146 = vrot.lane.b32.xlu1 %v3584_v50, %s3793_s29 }
0x14c1   : > { %2047 = vrot.lane.b32.xlu0 %v3584_v50, %s3794_s13 }
0x14c2   : > { %2144 = vrot.lane.b32.xlu1 %v3584_v50, %s3795_s14 }
0x1538   : > { %v2038_v32 = vpop.xlane.xlu0 %2037 }
0x1539   : > { %3196 = vrcp.f32 %v2038_v32 }
0x153a   : > { %v2041_v33 = vpop.xlane.xlu1 %2040 }
0x153b   : > { %3198 = vrcp.f32 %v2041_v33 }
0x153c   : > { %v2048_v34 = vpop.permute.xlu0 %2047 }
0x153d   : > { %3028 = vmatpush3.bf16.msra.mxu0 %v2048_v34 }
0x153e   : > { %3039 = vmatprep.subr.bf16.mxu0 %v3229_v1  ;;  %v2147_v40 = vpop.permute.xlu1 %2146 }
0x153f   : > { %v2152_v42 = vsel %vm618_vm4, %v2147_v40, 0 }
0x1542   : > { %v2145_v43 = vpop.permute.xlu1 %2144 }
0x1543   : > { %v3197_v35 = vpop.eup %3196 }
0x1544   : > { %v2044_v37 = vmul.f32 %v3197_v35, %v3193_v10 }
0x1545   : > { %v3199_v36 = vpop.eup %3198 }
0x1546   : > { %v2045_v39 = vmul.f32 %v3199_v36, %v3195_v27 }
0x1548   : > { %v2046_v41 = vpack.c.bf16 %v2045_v39, %v2044_v37 }
0x154a   : > { %3030 = vmatmul.mubr.msk.bf16.vlgmr.msra.gmra.mrb[48].mxu0 %vm666_vm5, %v2046_v41  ;;  %v3122_v41 = vld [vmem:[%s3784_s8 + $0x18] sm:$0xff]  }
0x154b   : > { %3040 = vmatpush3.bf16.xpose.msra.mxu0 %v2152_v42  ;;  %3041 = vmatprep.mubr.msk.bf16.mxu0 %vm3230_vm1, %v3229_v1  ;;  %v3123_v42 = vld [vmem:[%s3785_s9 + $0x18] sm:$0xff]  }
0x154c   : > { %3051 = vmatprep.subr.bf16.mxu0 %v3229_v1 }
0x1552   : > { %3042 = vmatmul.mubr.msk.bf16.vlgmr.msra.gmra.mrb[52].mxu0 %vm618_vm4, %v2145_v43 }
0x1553   : > { %3053 = vmatprep.mubr.msk.bf16.mxu0 %vm3230_vm1, %v3229_v1 }
0x161d   : > { %v2087_v47 = vpop.f32.mrb[48].mxu0 }
0x161e   : > { %v3031_v48 = vpop.f32.mrb[49].mxu0 }
0x161f   : > { %v2090_v49 = vpop.f32.mrb[50].mxu0 }
0x1620   : > { %v2094_v51 = vpack.c.bf16 %v2090_v49, %v2087_v47  ;;  %v3032_v52 = vpop.f32.mrb[51].mxu0 }
0x1622   : > { %3036 = vmatmul.mubr.msk.bf16.vlgmr.msra.gmra.mrb[52].mxu1 %vm618_vm4, %v2094_v51 }
0x1623   : > { %3047 = vmatprep.mubr.msk.bf16.mxu1 %vm3230_vm1, %v3229_v1 }
0x1625   : > { %v2188_v53 = vpop.f32.mrb[52].mxu0 }
0x1626   : > { %v2189_v54 = vadd.f32 %v3657_v61, %v2188_v53  ;;  %v3043_v55 = vpop.f32.mrb[53].mxu0 }
0x1627   : > { %v2191_v56 = vpop.f32.mrb[54].mxu0 }
0x1628   : > { %v2192_v57 = vadd.f32 %v3657_v61, %v2191_v56  ;;  %v3044_v58 = vpop.f32.mrb[55].mxu0  ;;  %v2195_v59 = vsel %vm666_vm5, %v2189_v54, -inf }
0x1629   : > { %2196 = vmax.xlane.f32.xlu0 %v2195_v59  ;;  %v3124_v59 = vld [vmem:[%s3786_s10 + $0x20] sm:$0xff]  }
0x162a   : > { %v2198_v60 = vsel %vm666_vm5, %v2192_v57, -inf }
0x162b   : > { %2199 = vmax.xlane.f32.xlu1 %v2198_v60  ;;  %v3125_v60 = vld [vmem:[%s3786_s10 + $0x28] sm:$0xff]  }
0x163c   : > { %2218 = vrot.lane.b32.xlu1 %v3584_v50, %s3796_s23  ;;  %v2730_v50 = vld [vmem:[%s3782_s6 + $0x1c] sm:$0xf] }
0x163d   : > { %v2270_v12 = vsel %vm863_vm6, %v2730_v50, 0 }
0x163e   : > { %3052 = vmatpush3.bf16.msra.mxu0 %v2270_v12 }
0x163f   : > { %3065 = vmatprep.subr.bf16.mxu0 %v3229_v1 }
0x16b6   : > { %v2197_v62 = vpop.xlane.xlu0 %2196 }
0x16b7   : > { %v2201_v63 = vsub.f32 %v2189_v54, %v2197_v62  ;;  %v2744_v54 = vld [vmem:[%s3783_s7 + $0x1] ss:$0 sm:$0xff]  ;;  %v3126_v62 = vld [vmem:[%s3786_s10 + $0x30] sm:$0xff]  }
0x16b8   : > { %v2200_v2 = vpop.xlane.xlu1 %2199 }
0x16b9   : > { %v2203_v3 = vmul.f32 1.442695, %v2201_v63  ;;  %v2202_v4 = vsub.f32 %v2192_v57, %v2200_v2  ;;  %v3127_v63 = vld [vmem:[%s3786_s10 + $0x38] sm:$0xff]  }
0x16bb   : > { %3200 = vpow2.f32 %v2203_v3  ;;  %v2205_v5 = vmul.f32 1.442695, %v2202_v4 }
0x16bc   : > { %v2219_v6 = vpop.permute.xlu1 %2218 }
0x16bd   : > { %3202 = vpow2.f32 %v2205_v5  ;;  %3046 = vmatpush3.bf16.msra.mxu1 %v2219_v6 }
0x16be   : > { %3057 = vmatprep.subr.bf16.mxu1 %v3229_v1 }
0x16c5   : > { %v3201_v7 = vpop.eup %3200 }
0x16c6   : > { %v2207_v8 = vsel %vm666_vm5, %v3201_v7, 0.0 }
0x16c7   : > { %v3203_v38 = vpop.eup %3202  ;;  %2208 = vadd.xlane.f32.xlu0 %v2207_v8 }
0x16c8   : > { %v2210_v11 = vsel %vm666_vm5, %v3203_v38, 0.0 }
0x16cb   : > { %2211 = vadd.xlane.f32.xlu0 %v2210_v11 }
0x16f5   : > { %v2135_v15 = vpop.f32.mrb[52].mxu1 }
0x16f6   : > { %v2142_v16 = vadd.f32 %v2135_v15, %v3652_v9  ;;  %v3037_v61 = vpop.f32.mrb[53].mxu1 }
0x16f7   : > { %v2138_v0 = vpop.f32.mrb[54].mxu1 }
0x16f8   : > { %v2143_v17 = vadd.f32 %v2138_v0, %v3654_v14  ;;  %v3038_v18 = vpop.f32.mrb[55].mxu1 }
0x1754   : > { %v2209_v19 = vpop.xlane.xlu0 %2208 }
0x1755   : > { %3204 = vrcp.f32 %v2209_v19 }
0x1758   : > { %v2212_v20 = vpop.xlane.xlu0 %2211 }
0x1759   : > { %3206 = vrcp.f32 %v2212_v20 }
0x175f   : > { %v3205_v45 = vpop.eup %3204 }
0x1760   : > { %v2215_v23 = vmul.f32 %v3205_v45, %v3201_v7 }
0x1763   : > { %v3207_v21 = vpop.eup %3206 }
0x1764   : > { %v2216_v25 = vmul.f32 %v3207_v21, %v3203_v38 }
0x1766   : > { %v2217_v28 = vpack.c.bf16 %v2216_v25, %v2215_v23 }
0x1768   : > { %3048 = vmatmul.mubr.msk.bf16.vlgmr.msra.gmra.mrb[56].mxu1 %vm666_vm5, %v2217_v28 }
0x1769   : > { %3061 = vmatprep.mubr.msk.bf16.mxu1 %vm3230_vm1, %v3229_v1 }
0x183b   : > { %v2258_v9 = vpop.f32.mrb[56].mxu1 }
0x183c   : > { %v3049_v29 = vpop.f32.mrb[57].mxu1 }
0x183d   : > { %v2261_v30 = vpop.f32.mrb[58].mxu1 }
0x183e   : > { %v2265_v31 = vpack.c.bf16 %v2261_v30, %v2258_v9  ;;  %v3050_v14 = vpop.f32.mrb[59].mxu1 }
0x1840   : > { %3054 = vmatmul.mubr.msk.bf16.vlgmr.msra.gmra.mrb[56].mxu0 %vm618_vm4, %v2265_v31 }
0x1841   : > { %3069 = vmatprep.mubr.msk.bf16.mxu0 %vm3230_vm1, %v3229_v1 }
0x1913   : > { %v2306_v10 = vpop.f32.mrb[56].mxu0 }
0x1914   : > { %v2313_v24 = vadd.f32 %v2306_v10, %v2142_v16  ;;  %v3055_v27 = vpop.f32.mrb[57].mxu0 }
0x1915   : > { %v2309_v13 = vpop.f32.mrb[58].mxu0 }
0x1916   : > { %v3711_v32 = vadd.f32 %v2313_v24, %v3557_v22  ;;  %v2314_v33 = vadd.f32 %v2309_v13, %v2143_v17  ;;  %v3056_v34 = vpop.f32.mrb[59].mxu0  ;;  %v3120_v22 = vld [vmem:[%s3784_s8 + $0x10] sm:$0xff]  }
0x1917   : > { %3058 = vmatpush3.bf16.msra.mxu1 %v3120_v22 }
0x1918   : > { %v3714_v35 = vadd.f32 %v2314_v33, %v3560_v26  ;;  %v2319_v36 = vmul.f32 %v3711_v32, %v3711_v32  ;;  %v3121_v26 = vld [vmem:[%s3785_s9 + $0x10] sm:$0xff]   ;;  %3059 = vmatprep.subr.bf16.mxu1 %v3229_v1 }
0x1919   : > { %3066 = vmatpush3.bf16.msra.mxu0 %v3121_v26 }
0x191a   : > { %v2321_v37 = vsel %vm525_vm3, %v2319_v36, 0.0  ;;  %v2320_v39 = vmul.f32 %v3714_v35, %v3714_v35  ;;  %3067 = vmatprep.subr.bf16.mxu0 %v3229_v1 }
0x191b   : > { %2322 = vadd.xlane.f32.xlu0 %v2321_v37  ;;  %3060 = vmatpush3.bf16.msra.mxu1 %v3122_v41 }
0x191c   : > { %v2324_v40 = vsel %vm525_vm3, %v2320_v39, 0.0  ;;  %3073 = vmatprep.subr.bf16.mxu1 %v3229_v1 }
0x191d   : > { %3068 = vmatpush3.bf16.msra.mxu0 %v3123_v42 }
0x191f   : > { %2325 = vadd.xlane.f32.xlu0 %v2324_v40 }
0x19a8   : > { %v2323_v43 = vpop.xlane.xlu0 %2322 }
0x19a9   : > { %v2327_v44 = vmul.f32 0.03125, %v2323_v43 }
0x19ab   : > { %v2329_v46 = vadd.f32 1e-06, %v2327_v44 }
0x19ac   : > { %v2326_v47 = vpop.xlane.xlu0 %2325 }
0x19ad   : > { %3208 = vrsqrt.f32 %v2329_v46  ;;  %v2328_v48 = vmul.f32 0.03125, %v2326_v47 }
0x19af   : > { %v2330_v49 = vadd.f32 1e-06, %v2328_v48 }
0x19b1   : > { %3210 = vrsqrt.f32 %v2330_v49 }
0x19b7   : > { %v3209_v51 = vpop.eup %3208 }
0x19b8   : > { %v2333_v52 = vmul.f32 %v3209_v51, %v3711_v32 }
0x19ba   : > { %v2341_v56 = vmul.f32 %v2744_v54, %v2333_v52 }
0x19bb   : > { %v3211_v53 = vpop.eup %3210 }
0x19bc   : > { %v2334_v55 = vmul.f32 %v3211_v53, %v3714_v35 }
0x19be   : > { %v2342_v57 = vmul.f32 %v2744_v54, %v2334_v55 }
0x19c0   : > { %v2362_v58 = vpack.c.bf16 %v2342_v57, %v2341_v56 }
0x19c2   : > { %3062 = vmatmul.mubr.msk.bf16.vlgmr.msra.gmra.mrb[60].mxu1 %vm525_vm3, %v2362_v58  ;;  %3070 = vmatmul.mubr.msk.bf16.vlgmr.msra.gmra.mrb[60].mxu0 %vm525_vm3, %v2362_v58 }
0x19c3   : > { %3081 = vmatprep.mubr.msk.bf16.mxu1 %vm3230_vm1, %v3229_v1  ;;  %3074 = vmatpush3.bf16.msra.mxu1 %v3124_v59 }
0x19c4   : > { %3075 = vmatprep.subr.bf16.mxu1 %v3229_v1 }
0x19c7   : > { %3076 = vmatpush3.bf16.msra.mxu1 %v3125_v60 }
0x19c8   : > { %3077 = vmatprep.subr.bf16.mxu1 %v3229_v1 }
0x19cb   : > { %3078 = vmatpush3.bf16.msra.mxu1 %v3126_v62 }
0x19cc   : > { %3079 = vmatprep.subr.bf16.mxu1 %v3229_v1 }
0x19cf   : > { %3080 = vmatpush3.bf16.msra.mxu1 %v3127_v63 }
0x1a95   : > { %v2412_v2 = vpop.f32.mrb[60].mxu1  ;;  %v2465_v3 = vpop.f32.mrb[60].mxu0 }
0x1a96   : > { %v2472_v4 = vmul.f32 %v2412_v2, %v2412_v2  ;;  %v3063_v5 = vpop.f32.mrb[61].mxu1  ;;  %v3071_v6 = vpop.f32.mrb[61].mxu0 }
0x1a97   : > { %v2415_v7 = vpop.f32.mrb[62].mxu1  ;;  %v2468_v8 = vpop.f32.mrb[62].mxu0 }
0x1a98   : > { %v2474_v38 = vmul.f32 %v2472_v4, %v2412_v2  ;;  %v2473_v11 = vmul.f32 %v2415_v7, %v2415_v7  ;;  %v3064_v50 = vpop.f32.mrb[63].mxu1  ;;  %v3072_v12 = vpop.f32.mrb[63].mxu0 }
0x1a9a   : > { %v2476_v15 = vmul.f32 0.044715, %v2474_v38  ;;  %v2475_v16 = vmul.f32 %v2473_v11, %v2415_v7 }
0x1a9c   : > { %v2478_v61 = vadd.f32 %v2476_v15, %v2412_v2  ;;  %v2477_v1 = vmul.f32 0.044715, %v2475_v16 }
0x1a9e   : > { %v2480_v0 = vmul.f32 0.7978846, %v2478_v61  ;;  %v2479_v17 = vadd.f32 %v2477_v1, %v2415_v7 }
0x1aa0   : > { %3212 = vtanh.f32 %v2480_v0  ;;  %v2481_v18 = vmul.f32 0.7978846, %v2479_v17 }
0x1aa2   : > { %3214 = vtanh.f32 %v2481_v18 }
0x1aaa   : > { %v3213_v19 = vpop.eup %3212 }
0x1aab   : > { %v2484_v20 = vadd.f32 1.0, %v3213_v19 }
0x1aac   : > { %v3215_v45 = vpop.eup %3214 }
0x1aad   : > { %v2486_v21 = vmul.f32 0.5, %v2484_v20  ;;  %v2485_v23 = vadd.f32 1.0, %v3215_v45 }
0x1aaf   : > { %v2488_v25 = vmul.f32 %v2486_v21, %v2412_v2  ;;  %v2487_v28 = vmul.f32 0.5, %v2485_v23 }
0x1ab1   : > { %v2490_v9 = vmul.f32 %v2488_v25, %v2465_v3  ;;  %v2489_v29 = vmul.f32 %v2487_v28, %v2415_v7 }
0x1ab3   : > { %v2491_v30 = vmul.f32 %v2489_v29, %v2468_v8 }
0x1ab5   : > { %v2492_v31 = vpack.c.bf16 %v2491_v30, %v2490_v9 }
0x1ab7   : > { %3082 = vmatmul.mubr.msk.bf16.vlgmr.msra.gmra.mrb[64].mxu1 %vm1495_vm7, %v2492_v31 }
0x1b8a   : > { %v2554_v14 = vpop.f32.mrb[64].mxu1 }
0x1b8b   : > { %v2561_v10 = vadd.f32 %v2554_v14, %v3711_v32  ;;  %v3083_v24 = vpop.f32.mrb[65].mxu1 }
0x1b8c   : > { %v2557_v27 = vpop.f32.mrb[66].mxu1 }
0x1b8d   : > { %v2562_v13 = vadd.f32 %v2557_v27, %v3714_v35  ;;  %v3084_v33 = vpop.f32.mrb[67].mxu1  ;;  %v2564_v34 = vmul.f32 %v2561_v10, %v2561_v10  ;;  %v2772_v35 = vld [vmem:[%s3787_s11] ss:$0 sm:$0xff] }
0x1b8f   : > { %v2566_v36 = vsel %vm525_vm3, %v2564_v34, 0.0  ;;  %v2565_v37 = vmul.f32 %v2562_v13, %v2562_v13 }
0x1b90   : > { %2567 = vadd.xlane.f32.xlu0 %v2566_v36 }
0x1b91   : > { %v2569_v39 = vsel %vm525_vm3, %v2565_v37, 0.0 }
0x1b94   : > { %2570 = vadd.xlane.f32.xlu0 %v2569_v39 }
0x1c1d   : > { %v2568_v40 = vpop.xlane.xlu0 %2567 }
0x1c1e   : > { %v2572_v22 = vmul.f32 0.03125, %v2568_v40 }
0x1c20   : > { %v2574_v26 = vadd.f32 1e-06, %v2572_v22 }
0x1c21   : > { %v2571_v41 = vpop.xlane.xlu0 %2570 }
0x1c22   : > { %3216 = vrsqrt.f32 %v2574_v26  ;;  %v2573_v32 = vmul.f32 0.03125, %v2571_v41 }
0x1c24   : > { %v2575_v42 = vadd.f32 1e-06, %v2573_v32 }
0x1c26   : > { %3218 = vrsqrt.f32 %v2575_v42 }
0x1c2c   : > { %v3217_v43 = vpop.eup %3216 }
0x1c2d   : > { %v2578_v44 = vmul.f32 %v3217_v43, %v2561_v10 }
0x1c2f   : > { %v2586_v46 = vmul.f32 %v2772_v35, %v2578_v44 }
0x1c30   : > { %v3219_v47 = vpop.eup %3218 }
0x1c31   : > { %v2780_v48 = vpack.c.bf16 %v2586_v46, %v2586_v46  ;;  %v2579_v49 = vmul.f32 %v3219_v47, %v2562_v13 }
0x1c33   : > { %2597 = vst.msk [vmem:[%s447_s30] sm:$0xf] %vm2596_vm8, %v2780_v48  ;;  %v2587_v51 = vmul.f32 %v2772_v35, %v2579_v49 }
0x1c35   : > { %v2781_v52 = vpack.c.bf16 %v2587_v51, %v2587_v51 }
0x1c37   : > { %2598 = vst.msk [vmem:[%s447_s30 + $0x4] sm:$0xf] %vm2596_vm8, %v2781_v52 }
0x1c38 PF: > { %s22_s21 = sadd.s32 1, %s3227_s21  }
0x1c39   : > { %p19_p4 = scmp.ge.s32.totalorder %s22_s21, 4  }
0x1c3b   :  { %21 = sbr.rel (!%p19_p4) target bundleno = 1 (0x1), region = 111 }

// kernel: deplot_generate.5
= control target key start
LH: loop header
LB: loop body
LE: loop exit
PB: predicated region body
PF: predicated region fallthrough
CT: control target
= control target key end

     0   :  { %s7516_s21 = smov 0   ;;  %s8675_s0 = inlined_call_operand.vmem [shape: bf16[2,2,16,32], index: 0, kind: input, shape index: {}]   ;;  %s8676_s1 = inlined_call_operand.vmem [shape: bf16[2,2,16,32], index: 1, kind: input, shape index: {}]   ;;  %s8677_s2 = inlined_call_operand.vmem [shape: f32[2,1,16], index: 2, kind: input, shape index: {}]   ;;  %s8678_s3 = inlined_call_operand.vmem [shape: f32[128,32], index: 3, kind: input, shape index: {}]   ;;  %s8679_s4 = inlined_call_operand.vmem [shape: f32[2,1,32], index: 4, kind: input, shape index: {}]   ;;  %s8680_s5 = inlined_call_operand.vmem [shape: bf16[2,32,96], index: 5, kind: input, shape index: {}]   ;;  %s8681_s6 = inlined_call_operand.vmem [shape: bf16[2,32,32], index: 6, kind: input, shape index: {}]   ;;  %s8682_s7 = inlined_call_operand.vmem [shape: f32[2,1,32], index: 7, kind: input, shape index: {}]   ;;  %s8683_s8 = inlined_call_operand.vmem [shape: bf16[2,32,32], index: 8, kind: input, shape index: {}]   ;;  %s8684_s9 = inlined_call_operand.vmem [shape: bf16[2,32,32], index: 9, kind: input, shape index: {}]   ;;  %s8685_s10 = inlined_call_operand.vmem [shape: f32[2,1,32], index: 10, kind: input, shape index: {}]   ;;  %s8686_s11 = inlined_call_operand.vmem [shape: bf16[2,32,64], index: 11, kind: input, shape index: {}]   ;;  %s8687_s12 = inlined_call_operand.vmem [shape: bf16[2,32,64], index: 12, kind: input, shape index: {}]   ;;  %s8688_s13 = inlined_call_operand.vmem [shape: bf16[2,64,32], index: 13, kind: input, shape index: {}]   ;;  %s8689_s14 = inlined_call_operand.vmem [shape: f32[1,32], index: 14, kind: input, shape index: {}]   ;;  %s8690_s15 = inlined_call_operand.vmem [shape: bf16[32,128], index: 15, kind: input, shape index: {}]   ;;  %s8691_s16 = inlined_call_operand.vmem [shape: s32[8,2,1], index: 16, kind: output, shape index: {}]  }
   0x1   :  { %8698 = sst [smem:[#allocation6_spill]] %s8675_s0 }
   0x2 LB: > { %s7522_s22 = sadd.s32 4294967295, %s7416_s21   ;;  %p6125_p0 = scmp.ge.s32.totalorder %s7416_s21, 1  ;;  %s7416_s21 = sphi %s7516_s21, %s26_s21  }
   0x3   : > { %p452_p1 = scmp.lt.s32.totalorder %s7416_s21, 9 }
   0x5   : > { %p453_p2 = pnand %p6125_p0, %p452_p1 }
   0x6   : > { %p496_p3 = scmp.lt.s32.totalorder (!%p453_p2), %s7522_s22, 7  ;;  %p6127_p4 = scmp.ne.s32.totalorder (!%p453_p2), %s7522_s22, 0 }
   0x7   : > { %456 = sbr.rel (%p453_p2) target bundleno = 16221 (0x3f5d), region = 84 }
   0xe   : > { %s497_s23 = scalar_select %p496_p3, %s7522_s22, 7 }
   0xf   : > { %504 = sbr.rel (%p6127_p4) target bundleno = 22 (0x16), region = 88  ;;  %vm505_vm0 = vcmask (!%p6127_p4), 261120   ;;  %vm514_vm1 = vcmask (!%p6127_p4), 1024   ;;  %v6128_v0 = vld [vmem:[%s8678_s3] ss:$0 sm:$0xff] (!%p6127_p4)  ;;  %vm521_vm2 = vcmask (!%p6127_p4), 254976  }
  0x10   : > { %s6126_s24 = sshll.u32 %s497_s23, 1  ;;  %v7418_v1 = vmov (!%p6127_p4), 0.0   ;;  %522 = vst.msk [vmem:[#allocation4] sm:$0x3] (!%p6127_p4), %vm521_vm2, %v6128_v0 }
  0x11   : > { %s7531_s27 = scalar_lea.vmem %s8691_s16, %s6126_s24  ;;  %506 = vst.msk [vmem:[#allocation2] sm:$0xff] (!%p6127_p4), %vm505_vm0, %v7418_v1  ;;  %507 = vst.msk [vmem:[#allocation2 + $0x8] sm:$0xff] (!%p6127_p4), %vm505_vm0, %v7418_v1 }
  0x12   : > { %508 = vst.msk [vmem:[#allocation2 + $0x10] sm:$0xff] (!%p6127_p4), %vm505_vm0, %v7418_v1  ;;  %509 = vst.msk [vmem:[#allocation2 + $0x18] sm:$0xff] (!%p6127_p4), %vm505_vm0, %v7418_v1 }
  0x13   : > { %510 = vst.msk [vmem:[#allocation3] sm:$0xff] (!%p6127_p4), %vm505_vm0, %v7418_v1  ;;  %511 = vst.msk [vmem:[#allocation3 + $0x8] sm:$0xff] (!%p6127_p4), %vm505_vm0, %v7418_v1 }
  0x14   : > { %512 = vst.msk [vmem:[#allocation3 + $0x10] sm:$0xff] (!%p6127_p4), %vm505_vm0, %v7418_v1  ;;  %513 = vst.msk [vmem:[#allocation3 + $0x18] sm:$0xff] (!%p6127_p4), %vm505_vm0, %v7418_v1 }
  0x15   : > { %515 = vst.msk [vmem:[#allocation5] sm:$0x3] (!%p6127_p4), %vm514_vm1, %v7418_v1 }
  0x16 PF: > { %vm533_vm3 = vcmask 254976   ;;  %v7227_v5 = vld [vmem:[%s8680_s5] sm:$0xff]   ;;  %v7419_v6 = vmov 0.0   ;;  %vm7420_vm4 = vmmov 0   ;;  %v7228_v7 = vld [vmem:[%s8680_s5 + $0x8] sm:$0xff]   ;;  %vm566_vm5 = vcmask 261120  }
  0x17   : > { %v523_v2 = vld [vmem:[#allocation4] sm:$0x3]  ;;  %6567 = vmatprep.subr.bf16.mxu0 %v7419_v6  ;;  %6571 = vmatprep.mubr.msk.bf16.mxu0 %vm7420_vm4, %v7419_v6  ;;  %s7421_s23 = smov 96   ;;  %v526_v20 = vlaneseq  ;;  %v7422_v21 = vmov 1966171168   ;;  %vm639_vm6 = vcmask 253952   ;;  %v528_v42 = vstv %s7522_s22 }
  0x18   : > { %v532_v3 = vmul.f32 %v523_v2, %v523_v2  ;;  %6568 = vmatpush3.bf16.msra.mxu0 %v7227_v5  ;;  %6587 = vmatprep.subr.bf16.mxu1 %v7419_v6  ;;  %v6129_v12 = vld [vmem:[%s8679_s4] ss:$0 sm:$0xff]  ;;  %v612_v22 = vunpack.c.l.s4 %v7422_v21  ;;  %vm648_vm7 = vcmask 254977   ;;  %s7563_s24 = scalar_lea.vmem [#allocation2], %s7416_s21  ;;  %vm666_vm8 = vcmask 64512   ;;  %s7423_s25 = smov 120  }
  0x19   : > { %6569 = vmatprep.subr.bf16.mxu0 %v7419_v6  ;;  %6589 = vmatprep.mubr.msk.bf16.mxu1 %vm7420_vm4, %v7419_v6  ;;  %v615_v25 = vshrl.u32 %v526_v20, 7  ;;  %v7603_v40 = vand.u32 127, %v526_v20  ;;  %v7424_v45 = vmov -1e+09   ;;  %vm759_vm10 = vcmask 57344   ;;  %s8697_s22 = smov 64  }
  0x1a   : > { %v534_v4 = vsel %vm533_vm3, %v532_v3, 0.0  ;;  %v613_v24 = vunpack.c.0.s8 %v612_v22  ;;  %s7620_s26 = scalar_lea.vmem [#allocation3], %s7416_s21  ;;  %vm787_vm11 = vcmask 1043456   ;;  %vm1112_vm12 = vcmask 1041409   ;;  %s8695_s28 = smov 112  }
  0x1b   : > { %535 = vadd.xlane.f32.xlu0 %v534_v4  ;;  %vm529_vm9 = vcmp.le.s32.totalorder %v7603_v40, %v528_v42  ;;  %s8693_s18 = smov 104   ;;  %s8699_s19 = sld [smem:[#allocation6_spill]]  ;;  %vm1984_vm13 = vcmask 122880   ;;  %vm2015_vm14 = vcmask 130048   ;;  %vm3156_vm15 = vcmask 523264  }
  0x1c   : > { %6570 = vmatpush3.bf16.msra.mxu0 %v7228_v7  ;;  %v7569_v26 = vsub.s32 %v613_v24, %v615_v25  ;;  %v7607_v46 = vsel %vm529_vm9, 0.0, %v7424_v45  ;;  %vm5951_vm0 = vcmp.lt.s32.totalorder %v7603_v40, 64  ;;  %vm5953_vm1 = vcmask 1041408  }
  0x1d   : > { %6575 = vmatprep.subr.bf16.mxu0 %v7419_v6 }
  0xa8   : > { %v536_v8 = vpop.xlane.xlu0 %535 }
  0xa9   : > { %v538_v9 = vmul.f32 0.03125, %v536_v8 }
  0xab   : > { %v539_v10 = vadd.f32 1e-06, %v538_v9 }
  0xad   : > { %7261 = vrsqrt.f32 %v539_v10 }
  0xb7   : > { %v7262_v11 = vpop.eup %7261 }
  0xb8   : > { %v541_v13 = vmul.f32 %v7262_v11, %v523_v2 }
  0xba   : > { %v548_v14 = vmul.f32 %v6129_v12, %v541_v13 }
  0xbc   : > { %v549_v15 = vpack.c.bf16 %v548_v14, %v548_v14 }
  0xbe   : > { %6572 = vmatmul.mubr.msk.bf16.vlgmr.msra.gmra.mrb[0].mxu0 %vm566_vm5, %v549_v15 }
  0xbf   : > { %6577 = vmatprep.mubr.msk.bf16.mxu0 %vm7420_vm4, %v7419_v6 }
 0x191   : > { %v7558_v16 = vpop.f32.mrb[0].mxu0 }
 0x192   : > { %635 = vrot.lane.b32.xlu0 %v7558_v16, %s7421_s23  ;;  %v6573_v17 = vpop.f32.mrb[1].mxu0  ;;  %v617_v29 = vrot.slane %v7558_v16, %v7569_v26 }
 0x193   : > { %v607_v18 = vpop.f32.mrb[2].mxu0 }
 0x194   : > { %v6574_v19 = vpop.f32.mrb[3].mxu0  ;;  %v625_v33 = vrot.slane %v617_v29, %v7569_v26  ;;  %v618_v34 = vcombine.high %v617_v29, %v617_v29 }
 0x196   : > { %v7585_v35 = vpack.c.bf16 %v625_v33, %v625_v33  ;;  %v632_v37 = vrot.slane %v618_v34, %v7569_v26 }
 0x198   : > { %v7597_v38 = vpack.c.bf16 %v632_v37, %v632_v37 }
 0x204   : > { %v636_v23 = vpop.permute.xlu0 %635 }
 0x205   : > { %6325 = vst.msk [vmem:[%s7563_s24 - $0x1] sm:$0x1] %vm639_vm6, %v636_v23 }
 0x206   : > { %6332 = vst.msk [vmem:[%s7563_s24 + $0x6] sm:$0x2] %vm648_vm7, %v636_v23 }
 0x20d   : > { %v653_v27 = vld [vmem:[#allocation2 + $0x8] sm:$0xff]  ;;  %v652_v28 = vld [vmem:[#allocation2] sm:$0xff] }
 0x20e   : > { %v7573_v30 = vpack.c.bf16 %v653_v27, %v653_v27  ;;  %v7575_v31 = vpack.c.bf16 %v652_v28, %v652_v28 }
 0x210   : > { %935 = vrot.lane.b32.xlu0 %v7573_v30, %s7423_s25  ;;  %v671_v32 = vsel %vm666_vm8, %v7575_v31, 0  ;;  %v717_v36 = vsel %vm666_vm8, %v7573_v30, 0 }
 0x211   : > { %6576 = vmatpush3.bf16.xpose.msra.mxu0 %v671_v32 }
 0x212   : > { %6581 = vmatprep.subr.bf16.mxu0 %v7419_v6 }
 0x214   : > { %883 = vrot.lane.b32.xlu0 %v7575_v31, %s7423_s25 }
 0x218   : > { %880 = vrot.lane.b32.xlu0 %v7585_v35, %s7423_s25  ;;  %6578 = vmatmul.mubr.msk.bf16.vlgmr.msra.gmra.mrb[4].mxu0 %vm666_vm8, %v7585_v35 }
 0x219   : > { %6582 = vmatpush3.bf16.xpose.msra.mxu0 %v717_v36  ;;  %6583 = vmatprep.mubr.msk.bf16.mxu0 %vm7420_vm4, %v7419_v6 }
 0x21a   : > { %6593 = vmatprep.subr.bf16.mxu0 %v7419_v6 }
 0x220   : > { %6584 = vmatmul.mubr.msk.bf16.vlgmr.msra.gmra.mrb[8].mxu0 %vm666_vm8, %v7597_v38 }
 0x221   : > { %6595 = vmatprep.mubr.msk.bf16.mxu0 %vm7420_vm4, %v7419_v6 }
 0x282   : > { %v936_v13 = vpop.permute.xlu0 %935 }
 0x283   : > { %v941_v19 = vsel %vm666_vm8, %v936_v13, 0 }
 0x286   : > { %v884_v18 = vpop.permute.xlu0 %883 }
 0x287   : > { %v889_v20 = vsel %vm666_vm8, %v884_v18, 0 }
 0x28a   : > { %v881_v21 = vpop.permute.xlu0 %880 }
 0x2eb   : > { %v707_v39 = vpop.f32.mrb[4].mxu0 }
 0x2ec   : > { %v6579_v41 = vpop.f32.mrb[5].mxu0  ;;  %v708_v51 = vadd.f32 %v707_v39, %v7607_v46 }
 0x2ed   : > { %v710_v43 = vpop.f32.mrb[6].mxu0 }
 0x2ee   : > { %v6580_v44 = vpop.f32.mrb[7].mxu0  ;;  %v760_v54 = vsel %vm759_vm10, %v708_v51, -inf }
 0x2f3   : > { %v753_v47 = vpop.f32.mrb[8].mxu0 }
 0x2f4   : > { %v754_v48 = vadd.f32 %v753_v47, %v7607_v46  ;;  %v6585_v49 = vpop.f32.mrb[9].mxu0 }
 0x2f5   : > { %v756_v50 = vpop.f32.mrb[10].mxu0 }
 0x2f6   : > { %v6586_v52 = vpop.f32.mrb[11].mxu0  ;;  %v763_v53 = vsel %vm759_vm10, %v754_v48, -inf }
 0x2f7   : > { %764 = vmax.xlane.f32.xlu1 %v763_v53 }
 0x2fb   : > { %761 = vmax.xlane.f32.xlu1 %v760_v54 }
 0x384   : > { %v765_v55 = vpop.xlane.xlu1 %764 }
 0x385   : > { %v767_v56 = vsub.f32 %v754_v48, %v765_v55 }
 0x387   : > { %v770_v59 = vmul.f32 1.442695, %v767_v56 }
 0x388   : > { %v762_v57 = vpop.xlane.xlu1 %761 }
 0x389   : > { %v766_v58 = vsub.f32 %v708_v51, %v762_v57 }
 0x38b   : > { %v768_v60 = vmul.f32 1.442695, %v766_v58 }
 0x38d   : > { %7263 = vpow2.f32 %v768_v60 }
 0x38e   : > { %7265 = vpow2.f32 %v770_v59 }
 0x397   : > { %v7264_v61 = vpop.eup %7263 }
 0x398   : > { %v772_v62 = vsel %vm759_vm10, %v7264_v61, 0.0  ;;  %v7266_v63 = vpop.eup %7265 }
 0x399   : > { %773 = vadd.xlane.f32.xlu1 %v772_v62  ;;  %v775_v0 = vsel %vm759_vm10, %v7266_v63, 0.0 }
 0x39d   : > { %776 = vadd.xlane.f32.xlu1 %v775_v0 }
 0x3ae   : > { %641 = vrot.lane.b32.xlu1 %v7558_v16, %s8697_s22 }
 0x3b2   : > { %932 = vrot.lane.b32.xlu1 %v7597_v38, %s7423_s25 }
 0x426   : > { %v774_v1 = vpop.xlane.xlu1 %773 }
 0x427   : > { %7267 = vrcp.f32 %v774_v1 }
 0x42a   : > { %v777_v2 = vpop.xlane.xlu1 %776 }
 0x42b   : > { %7269 = vrcp.f32 %v777_v2 }
 0x42e   : > { %v642_v3 = vpop.permute.xlu1 %641 }
 0x42f   : > { %6328 = vst.msk [vmem:[%s7620_s26 - $0x1] sm:$0x1] %vm639_vm6, %v642_v3 }
 0x430   : > { %6336 = vst.msk [vmem:[%s7620_s26 + $0x6] sm:$0x2] %vm648_vm7, %v642_v3 }
 0x431   : > { %v7268_v4 = vpop.eup %7267 }
 0x432   : > { %v780_v11 = vmul.f32 %v7268_v4, %v7264_v61  ;;  %v933_v22 = vpop.permute.xlu1 %932 }
 0x434   : > { %v782_v16 = vpack.c.bf16 %v780_v11, %v780_v11 }
 0x435   : > { %v7270_v5 = vpop.eup %7269 }
 0x436   : > { %v781_v12 = vmul.f32 %v7270_v5, %v7266_v63 }
 0x437   : > { %v654_v7 = vld [vmem:[#allocation3] sm:$0xff]  ;;  %v655_v8 = vld [vmem:[#allocation3 + $0x8] sm:$0xff] }
 0x438   : > { %v7626_v9 = vpack.c.bf16 %v654_v7, %v654_v7  ;;  %v7628_v10 = vpack.c.bf16 %v655_v8, %v655_v8  ;;  %v783_v17 = vpack.c.bf16 %v781_v12, %v781_v12 }
 0x43a   : > { %v789_v14 = vsel %vm787_vm11, %v7626_v9, 0  ;;  %v835_v15 = vsel %vm787_vm11, %v7628_v10, 0 }
 0x43b   : > { %6588 = vmatpush3.bf16.msra.mxu1 %v789_v14  ;;  %6594 = vmatpush3.bf16.msra.mxu0 %v835_v15  ;;  %v656_v15 = vld [vmem:[%s8681_s6] sm:$0xf] }
 0x43c   : > { %6599 = vmatprep.subr.bf16.mxu1 %v7419_v6  ;;  %6605 = vmatprep.subr.bf16.mxu0 %v7419_v6  ;;  %v1172_v18 = vsel %vm787_vm11, %v656_v15, 0 }
 0x43e   : > { %6590 = vmatmul.mubr.msk.bf16.vlgmr.msra.gmra.mrb[0].mxu1 %vm666_vm8, %v782_v16  ;;  %6596 = vmatmul.mubr.msk.bf16.vlgmr.msra.gmra.mrb[12].mxu0 %vm666_vm8, %v783_v17 }
 0x43f   : > { %6601 = vmatprep.mubr.msk.bf16.mxu1 %vm7420_vm4, %v7419_v6  ;;  %6607 = vmatprep.mubr.msk.bf16.mxu0 %vm7420_vm4, %v7419_v6 }
 0x444   : > { %6600 = vmatpush3.bf16.xpose.msra.mxu1 %v889_v20  ;;  %6606 = vmatpush3.bf16.xpose.msra.mxu0 %v941_v19 }
 0x445   : > { %6617 = vmatprep.subr.bf16.mxu0 %v7419_v6  ;;  %6611 = vmatprep.subr.bf16.mxu1 %v7419_v6 }
 0x44b   : > { %6602 = vmatmul.mubr.msk.bf16.vlgmr.msra.gmra.mrb[4].mxu1 %vm666_vm8, %v881_v21  ;;  %6608 = vmatmul.mubr.msk.bf16.vlgmr.msra.gmra.mrb[16].mxu0 %vm666_vm8, %v933_v22 }
 0x44c   : > { %6613 = vmatprep.mubr.msk.bf16.mxu1 %vm7420_vm4, %v7419_v6  ;;  %6619 = vmatprep.mubr.msk.bf16.mxu0 %vm7420_vm4, %v7419_v6 }
 0x511   : > { %v825_v23 = vpop.f32.mrb[0].mxu1  ;;  %v871_v24 = vpop.f32.mrb[12].mxu0 }
 0x512   : > { %v877_v25 = vpack.c.bf16 %v825_v23, %v825_v23  ;;  %v878_v27 = vpack.c.bf16 %v871_v24, %v871_v24  ;;  %v6591_v28 = vpop.f32.mrb[1].mxu1  ;;  %v6597_v29 = vpop.f32.mrb[13].mxu0  ;;  %v657_v24 = vld [vmem:[%s8681_s6 + $0x4] sm:$0xf] }
 0x513   : > { %v828_v32 = vpop.f32.mrb[2].mxu1  ;;  %v874_v33 = vpop.f32.mrb[14].mxu0 }
 0x514   : > { %v1164_v34 = vunpack.c.l.b16 %v878_v27  ;;  %v6592_v36 = vpop.f32.mrb[3].mxu1  ;;  %v6598_v37 = vpop.f32.mrb[15].mxu0  ;;  %v1163_v39 = vunpack.c.l.b16 %v877_v25  ;;  %v1119_v25 = vsel %vm787_vm11, %v657_v24, 0 }
 0x516   : > { %v1165_v41 = vrot.slane %v1164_v34, 7 }
 0x518   : > { %v7653_v42 = vsel %vm1112_vm12, %v1165_v41, %v1163_v39 }
 0x519   : > { %v1167_v20 = vpack.c.b16 %v7653_v42, %v7653_v42 }
 0x51e   : > { %v925_v43 = vpop.f32.mrb[4].mxu1  ;;  %v977_v44 = vpop.f32.mrb[16].mxu0 }
 0x51f   : > { %v926_v45 = vadd.f32 %v925_v43, %v7607_v46  ;;  %v978_v47 = vadd.f32 %v977_v44, %v7607_v46  ;;  %v6603_v48 = vpop.f32.mrb[5].mxu1  ;;  %v6609_v49 = vpop.f32.mrb[17].mxu0 }
 0x520   : > { %v928_v50 = vpop.f32.mrb[6].mxu1  ;;  %v980_v51 = vpop.f32.mrb[18].mxu0 }
 0x521   : > { %v6604_v52 = vpop.f32.mrb[7].mxu1  ;;  %v6610_v53 = vpop.f32.mrb[19].mxu0  ;;  %v983_v54 = vsel %vm759_vm10, %v926_v45, -inf  ;;  %v986_v55 = vsel %vm759_vm10, %v978_v47, -inf }
 0x522   : > { %984 = vmax.xlane.f32.xlu0 %v983_v54  ;;  %987 = vmax.xlane.f32.xlu1 %v986_v55 }
 0x533   : > { %1057 = vrot.lane.b32.xlu1 %v7628_v10, %s7423_s25 }
 0x537   : > { %1266 = vrot.lane.b32.xlu1 %v7573_v30, %s8695_s28 }
 0x53b   : > { %1216 = vrot.lane.b32.xlu1 %v7575_v31, %s8695_s28 }
 0x53f   : > { %1264 = vrot.lane.b32.xlu1 %v7597_v38, %s8695_s28 }
 0x5af   : > { %v985_v56 = vpop.xlane.xlu0 %984  ;;  %v988_v57 = vpop.xlane.xlu1 %987 }
 0x5b0   : > { %v989_v58 = vsub.f32 %v926_v45, %v985_v56  ;;  %v990_v59 = vsub.f32 %v978_v47, %v988_v57 }
 0x5b2   : > { %v991_v60 = vmul.f32 1.442695, %v989_v58  ;;  %v993_v61 = vmul.f32 1.442695, %v990_v59 }
 0x5b3   : > { %v1058_v62 = vpop.permute.xlu1 %1057 }
 0x5b4   : > { %7271 = vpow2.f32 %v991_v60  ;;  %v1063_v63 = vsel %vm787_vm11, %v1058_v62, 0 }
 0x5b5   : > { %6618 = vmatpush3.bf16.msra.mxu0 %v1063_v63  ;;  %7273 = vpow2.f32 %v993_v61 }
 0x5b6   : > { %6629 = vmatprep.subr.bf16.mxu0 %v7419_v6 }
 0x5b7   : > { %v1267_v19 = vpop.permute.xlu1 %1266 }
 0x5b8   : > { %v1272_v21 = vsel %vm666_vm8, %v1267_v19, 0 }
 0x5bb   : > { %v1217_v22 = vpop.permute.xlu1 %1216 }
 0x5bc   : > { %v1222_v50 = vsel %vm666_vm8, %v1217_v22, 0 }
 0x5be   : > { %v7272_v0 = vpop.eup %7271 }
 0x5bf   : > { %v995_v1 = vsel %vm759_vm10, %v7272_v0, 0.0  ;;  %v7274_v2 = vpop.eup %7273  ;;  %v1265_v23 = vpop.permute.xlu1 %1264 }
 0x5c0   : > { %996 = vadd.xlane.f32.xlu0 %v995_v1  ;;  %v998_v3 = vsel %vm759_vm10, %v7274_v2, 0.0 }
 0x5c4   : > { %999 = vadd.xlane.f32.xlu0 %v998_v3 }
 0x5da   : > { %1008 = vrot.lane.b32.xlu0 %v7626_v9, %s7423_s25 }
 0x5de   : > { %1214 = vrot.lane.b32.xlu0 %v7585_v35, %s8695_s28 }
 0x64d   : > { %v997_v4 = vpop.xlane.xlu0 %996 }
 0x64e   : > { %7275 = vrcp.f32 %v997_v4 }
 0x651   : > { %v1000_v5 = vpop.xlane.xlu0 %999 }
 0x652   : > { %7277 = vrcp.f32 %v1000_v5 }
 0x655   : > { %v1009_v7 = vpop.permute.xlu0 %1008 }
 0x656   : > { %v1014_v8 = vsel %vm787_vm11, %v1009_v7, 0 }
 0x657   : > { %6612 = vmatpush3.bf16.msra.mxu1 %v1014_v8 }
 0x658   : > { %v7276_v11 = vpop.eup %7275  ;;  %6623 = vmatprep.subr.bf16.mxu1 %v7419_v6 }
 0x659   : > { %v1003_v12 = vmul.f32 %v7276_v11, %v7272_v0  ;;  %v1215_v53 = vpop.permute.xlu0 %1214 }
 0x65b   : > { %v1005_v13 = vpack.c.bf16 %v1003_v12, %v1003_v12 }
 0x65c   : > { %v7278_v14 = vpop.eup %7277 }
 0x65d   : > { %6614 = vmatmul.mubr.msk.bf16.vlgmr.msra.gmra.mrb[8].mxu1 %vm666_vm8, %v1005_v13  ;;  %v1004_v16 = vmul.f32 %v7278_v14, %v7274_v2 }
 0x65e   : > { %6625 = vmatprep.mubr.msk.bf16.mxu1 %vm7420_vm4, %v7419_v6  ;;  %6624 = vmatpush3.bf16.msra.mxu1 %v1119_v25 }
 0x65f   : > { %v1006_v17 = vpack.c.bf16 %v1004_v16, %v1004_v16  ;;  %6635 = vmatprep.subr.bf16.mxu1 %v7419_v6 }
 0x661   : > { %6620 = vmatmul.mubr.msk.bf16.vlgmr.msra.gmra.mrb[20].mxu0 %vm666_vm8, %v1006_v17 }
 0x662   : > { %6630 = vmatpush3.bf16.msra.mxu0 %v1172_v18  ;;  %6631 = vmatprep.mubr.msk.bf16.mxu0 %vm7420_vm4, %v7419_v6 }
 0x663   : > { %6641 = vmatprep.subr.bf16.mxu0 %v7419_v6 }
 0x669   : > { %6632 = vmatmul.mubr.msk.bf16.vlgmr.msra.gmra.mrb[24].mxu0 %vm666_vm8, %v1167_v20 }
 0x66a   : > { %6643 = vmatprep.mubr.msk.bf16.mxu0 %vm7420_vm4, %v7419_v6 }
 0x66b   : > { %6642 = vmatpush3.bf16.xpose.msra.mxu0 %v1272_v21 }
 0x66c   : > { %6653 = vmatprep.subr.bf16.mxu0 %v7419_v6 }
 0x672   : > { %6644 = vmatmul.mubr.msk.bf16.vlgmr.msra.gmra.mrb[28].mxu0 %vm666_vm8, %v1265_v23 }
 0x673   : > { %6655 = vmatprep.mubr.msk.bf16.mxu0 %vm7420_vm4, %v7419_v6 }
 0x730   : > { %v1050_v27 = vpop.f32.mrb[8].mxu1 }
 0x731   : > { %v6615_v28 = vpop.f32.mrb[9].mxu1  ;;  %v1105_v34 = vpack.c.bf16 %v1050_v27, %v1050_v27 }
 0x732   : > { %v1053_v29 = vpop.f32.mrb[10].mxu1 }
 0x733   : > { %v6616_v32 = vpop.f32.mrb[11].mxu1  ;;  %v1109_v43 = vunpack.c.l.b16 %v1105_v34 }
 0x734   : > { %v1099_v33 = vpop.f32.mrb[20].mxu0 }
 0x735   : > { %v1106_v36 = vpack.c.bf16 %v1099_v33, %v1099_v33  ;;  %v6621_v37 = vpop.f32.mrb[21].mxu0 }
 0x736   : > { %v1102_v39 = vpop.f32.mrb[22].mxu0 }
 0x737   : > { %v1110_v41 = vunpack.c.l.b16 %v1106_v36  ;;  %v6622_v42 = vpop.f32.mrb[23].mxu0 }
 0x738   : > { %v658_v42 = vld [vmem:[%s8681_s6 + $0x8] sm:$0xf] }
 0x739   : > { %v1111_v44 = vrot.slane %v1110_v41, 7 }
 0x73b   : > { %v1113_v45 = vsel %vm1112_vm12, %v1111_v44, %v1109_v43  ;;  %v1447_v43 = vsel %vm787_vm11, %v658_v42, 0 }
 0x73c   : > { %v1114_v47 = vpack.c.b16 %v1113_v45, %v1113_v45  ;;  %v1208_v48 = vpop.f32.mrb[24].mxu0 }
 0x73d   : > { %v6633_v49 = vpop.f32.mrb[25].mxu0 }
 0x73e   : > { %6626 = vmatmul.mubr.msk.bf16.vlgmr.msra.gmra.mrb[12].mxu1 %vm666_vm8, %v1114_v47  ;;  %v1211_v51 = vpop.f32.mrb[26].mxu0 }
 0x73f   : > { %6636 = vmatpush3.bf16.xpose.msra.mxu1 %v1222_v50  ;;  %v6634_v52 = vpop.f32.mrb[27].mxu0  ;;  %6637 = vmatprep.mubr.msk.bf16.mxu1 %vm7420_vm4, %v7419_v6 }
 0x740   : > { %6647 = vmatprep.subr.bf16.mxu1 %v7419_v6 }
 0x745   : > { %v1308_v54 = vpop.f32.mrb[28].mxu0 }
 0x746   : > { %v1309_v55 = vadd.f32 %v1308_v54, %v7607_v46  ;;  %v6645_v56 = vpop.f32.mrb[29].mxu0  ;;  %6638 = vmatmul.mubr.msk.bf16.vlgmr.msra.gmra.mrb[16].mxu1 %vm666_vm8, %v1215_v53 }
 0x747   : > { %v1311_v57 = vpop.f32.mrb[30].mxu0  ;;  %6649 = vmatprep.mubr.msk.bf16.mxu1 %vm7420_vm4, %v7419_v6 }
 0x748   : > { %v6646_v58 = vpop.f32.mrb[31].mxu0  ;;  %v1317_v59 = vsel %vm759_vm10, %v1309_v55, -inf }
 0x749   : > { %1318 = vmax.xlane.f32.xlu1 %v1317_v59 }
 0x75a   : > { %1386 = vrot.lane.b32.xlu1 %v7628_v10, %s8695_s28 }
 0x75e   : > { %1542 = vrot.lane.b32.xlu1 %v7573_v30, %s8693_s18 }
 0x762   : > { %1492 = vrot.lane.b32.xlu1 %v7575_v31, %s8693_s18 }
 0x766   : > { %1540 = vrot.lane.b32.xlu1 %v7597_v38, %s8693_s18 }
 0x7d6   : > { %v1319_v60 = vpop.xlane.xlu1 %1318 }
 0x7d7   : > { %v1321_v63 = vsub.f32 %v1309_v55, %v1319_v60 }
 0x7d9   : > { %v1324_v0 = vmul.f32 1.442695, %v1321_v63 }
 0x7da   : > { %v1387_v61 = vpop.permute.xlu1 %1386 }
 0x7db   : > { %v1392_v62 = vsel %vm787_vm11, %v1387_v61, 0  ;;  %7279 = vpow2.f32 %v1324_v0 }
 0x7dc   : > { %6654 = vmatpush3.bf16.msra.mxu0 %v1392_v62 }
 0x7dd   : > { %6665 = vmatprep.subr.bf16.mxu0 %v7419_v6 }
 0x7de   : > { %v1543_v18 = vpop.permute.xlu1 %1542 }
 0x7df   : > { %v1548_v62 = vsel %vm666_vm8, %v1543_v18, 0 }
 0x7e2   : > { %v1493_v23 = vpop.permute.xlu1 %1492 }
 0x7e3   : > { %v1498_v25 = vsel %vm666_vm8, %v1493_v23, 0 }
 0x7e5   : > { %v7280_v12 = vpop.eup %7279 }
 0x7e6   : > { %v1329_v13 = vsel %vm759_vm10, %v7280_v12, 0.0  ;;  %v1541_v63 = vpop.permute.xlu1 %1540 }
 0x811   : > { %v1155_v1 = vpop.f32.mrb[12].mxu1 }
 0x812   : > { %v7724_v2 = vadd.f32 %v1208_v48, %v1155_v1  ;;  %v6627_v3 = vpop.f32.mrb[13].mxu1 }
 0x813   : > { %v1158_v30 = vpop.f32.mrb[14].mxu1 }
 0x814   : > { %v6628_v4 = vpop.f32.mrb[15].mxu1 }
 0x819   : > { %v1258_v31 = vpop.f32.mrb[16].mxu1 }
 0x81a   : > { %v1259_v5 = vadd.f32 %v1258_v31, %v7607_v46  ;;  %v6639_v38 = vpop.f32.mrb[17].mxu1 }
 0x81b   : > { %v1261_v7 = vpop.f32.mrb[18].mxu1 }
 0x81c   : > { %v6640_v8 = vpop.f32.mrb[19].mxu1  ;;  %v1314_v11 = vsel %vm759_vm10, %v1259_v5, -inf }
 0x81d   : > { %1315 = vmax.xlane.f32.xlu0 %v1314_v11 }
 0x821   : > { %1330 = vadd.xlane.f32.xlu0 %v1329_v13 }
 0x8aa   : > { %v1316_v14 = vpop.xlane.xlu0 %1315 }
 0x8ab   : > { %v1320_v15 = vsub.f32 %v1259_v5, %v1316_v14 }
 0x8ad   : > { %v1322_v16 = vmul.f32 1.442695, %v1320_v15 }
 0x8ae   : > { %v1331_v17 = vpop.xlane.xlu0 %1330 }
 0x8af   : > { %7281 = vpow2.f32 %v1322_v16 }
 0x8b0   : > { %7283 = vrcp.f32 %v1331_v17 }
 0x8b9   : > { %v7282_v19 = vpop.eup %7281 }
 0x8ba   : > { %v7284_v20 = vpop.eup %7283  ;;  %v1326_v21 = vsel %vm759_vm10, %v7282_v19, 0.0 }
 0x8bb   : > { %1327 = vadd.xlane.f32.xlu0 %v1326_v21  ;;  %v1335_v22 = vmul.f32 %v7284_v20, %v7280_v12 }
 0x8bd   : > { %v1337_v24 = vpack.c.bf16 %v1335_v22, %v1335_v22 }
 0x8bf   : > { %6656 = vmatmul.mubr.msk.bf16.vlgmr.msra.gmra.mrb[32].mxu0 %vm666_vm8, %v1337_v24 }
 0x8c0   : > { %6666 = vmatpush3.bf16.xpose.msra.mxu0 %v1498_v25  ;;  %6667 = vmatprep.mubr.msk.bf16.mxu0 %vm7420_vm4, %v7419_v6 }
 0x8c1   : > { %6677 = vmatprep.subr.bf16.mxu0 %v7419_v6 }
 0x8d1   : > { %1338 = vrot.lane.b32.xlu0 %v7626_v9, %s8695_s28 }
 0x8d5   : > { %1490 = vrot.lane.b32.xlu0 %v7585_v35, %s8693_s18 }
 0x948   : > { %v1328_v27 = vpop.xlane.xlu0 %1327 }
 0x949   : > { %7285 = vrcp.f32 %v1328_v27 }
 0x94c   : > { %v1339_v28 = vpop.permute.xlu0 %1338 }
 0x94d   : > { %v1344_v29 = vsel %vm787_vm11, %v1339_v28, 0 }
 0x94e   : > { %6648 = vmatpush3.bf16.msra.mxu1 %v1344_v29 }
 0x94f   : > { %6659 = vmatprep.subr.bf16.mxu1 %v7419_v6 }
 0x950   : > { %v1491_v32 = vpop.permute.xlu0 %1490 }
 0x951   : > { %6668 = vmatmul.mubr.msk.bf16.vlgmr.msra.gmra.mrb[36].mxu0 %vm666_vm8, %v1491_v32 }
 0x952   : > { %6679 = vmatprep.mubr.msk.bf16.mxu0 %vm7420_vm4, %v7419_v6 }
 0x953   : > { %v7286_v33 = vpop.eup %7285 }
 0x954   : > { %v1334_v34 = vmul.f32 %v7286_v33, %v7282_v19 }
 0x956   : > { %v1336_v36 = vpack.c.bf16 %v1334_v34, %v1334_v34  ;;  %v659_v34 = vld [vmem:[%s8681_s6 + $0xc] sm:$0xf] }
 0x958   : > { %6650 = vmatmul.mubr.msk.bf16.vlgmr.msra.gmra.mrb[20].mxu1 %vm666_vm8, %v1336_v36  ;;  %v1723_v36 = vsel %vm787_vm11, %v659_v34, 0 }
 0x959   : > { %6661 = vmatprep.mubr.msk.bf16.mxu1 %vm7420_vm4, %v7419_v6  ;;  %6660 = vmatpush3.bf16.msra.mxu1 %v1447_v43 }
 0x95a   : > { %6671 = vmatprep.subr.bf16.mxu1 %v7419_v6 }
 0x992   : > { %v1428_v35 = vpop.f32.mrb[32].mxu0 }
 0x993   : > { %v6657_v37 = vpop.f32.mrb[33].mxu0  ;;  %v1435_v48 = vpack.c.bf16 %v1428_v35, %v1428_v35 }
 0x994   : > { %v1431_v39 = vpop.f32.mrb[34].mxu0 }
 0x995   : > { %v6658_v41 = vpop.f32.mrb[35].mxu0  ;;  %v1439_v52 = vunpack.c.l.b16 %v1435_v48 }
 0x997   : > { %v1440_v57 = vrot.slane %v1439_v52, 7 }
 0xa24   : > { %v1534_v44 = vpop.f32.mrb[36].mxu0 }
 0xa25   : > { %v1535_v45 = vadd.f32 %v1534_v44, %v7607_v46  ;;  %v6669_v47 = vpop.f32.mrb[37].mxu0 }
 0xa26   : > { %v1537_v49 = vpop.f32.mrb[38].mxu0 }
 0xa27   : > { %v6670_v50 = vpop.f32.mrb[39].mxu0  ;;  %v1590_v51 = vsel %vm759_vm10, %v1535_v45, -inf }
 0xa28   : > { %1591 = vmax.xlane.f32.xlu0 %v1590_v51 }
 0xa2b   : > { %v1380_v53 = vpop.f32.mrb[20].mxu1 }
 0xa2c   : > { %v1434_v54 = vpack.c.bf16 %v1380_v53, %v1380_v53  ;;  %v6651_v55 = vpop.f32.mrb[21].mxu1 }
 0xa2d   : > { %v1383_v56 = vpop.f32.mrb[22].mxu1 }
 0xa2e   : > { %v1438_v58 = vunpack.c.l.b16 %v1434_v54  ;;  %v6652_v59 = vpop.f32.mrb[23].mxu1 }
 0xa30   : > { %v1441_v60 = vsel %vm1112_vm12, %v1440_v57, %v1438_v58  ;;  %v7407_v58 = vld [vmem:[#allocation4] sm:$0x3] }
 0xa31   : > { %v1442_v61 = vpack.c.b16 %v1441_v60, %v1441_v60 }
 0xa33   : > { %6662 = vmatmul.mubr.msk.bf16.vlgmr.msra.gmra.mrb[24].mxu1 %vm666_vm8, %v1442_v61 }
 0xa34   : > { %6672 = vmatpush3.bf16.xpose.msra.mxu1 %v1548_v62  ;;  %6673 = vmatprep.mubr.msk.bf16.mxu1 %vm7420_vm4, %v7419_v6 }
 0xa35   : > { %6683 = vmatprep.subr.bf16.mxu1 %v7419_v6 }
 0xa3b   : > { %6674 = vmatmul.mubr.msk.bf16.vlgmr.msra.gmra.mrb[28].mxu1 %vm666_vm8, %v1541_v63  ;;  %v7229_v63 = vld [vmem:[%s8683_s8] sm:$0xff]  }
 0xa3c   : > { %6685 = vmatprep.mubr.msk.bf16.mxu1 %vm7420_vm4, %v7419_v6 }
 0xab5   : > { %v1592_v0 = vpop.xlane.xlu0 %1591 }
 0xab6   : > { %v1596_v1 = vsub.f32 %v1535_v45, %v1592_v0  ;;  %v7230_v0 = vld [vmem:[%s8683_s8 + $0x8] sm:$0xff]  }
 0xab8   : > { %v1598_v3 = vmul.f32 1.442695, %v1596_v1 }
 0xaba   : > { %7287 = vpow2.f32 %v1598_v3 }
 0xac4   : > { %v7288_v30 = vpop.eup %7287 }
 0xac5   : > { %v1602_v4 = vsel %vm759_vm10, %v7288_v30, 0.0 }
 0xac6   : > { %1603 = vadd.xlane.f32.xlu0 %v1602_v4 }
 0xb06   : > { %v1483_v31 = vpop.f32.mrb[24].mxu1 }
 0xb07   : > { %v7765_v5 = vadd.f32 %v1483_v31, %v7724_v2  ;;  %v6663_v38 = vpop.f32.mrb[25].mxu1  ;;  %v6159_v31 = vld [vmem:[%s8682_s7] ss:$0 sm:$0xff] }
 0xb08   : > { %v1486_v7 = vpop.f32.mrb[26].mxu1 }
 0xb09   : > { %v6664_v8 = vpop.f32.mrb[27].mxu1 }
 0xb0a   : > { %v7817_v8 = vld [vmem:[%s8699_s19] sm:$0xff]  }
 0xb0e   : > { %v1584_v11 = vpop.f32.mrb[28].mxu1 }
 0xb0f   : > { %v1585_v12 = vadd.f32 %v1584_v11, %v7607_v46  ;;  %v6675_v13 = vpop.f32.mrb[29].mxu1  ;;  %v1891_v11 = vsel %vm666_vm8, %v7817_v8, 0 }
 0xb10   : > { %v1587_v14 = vpop.f32.mrb[30].mxu1 }
 0xb11   : > { %v6676_v15 = vpop.f32.mrb[31].mxu1  ;;  %v1593_v16 = vsel %vm759_vm10, %v1585_v12, -inf }
 0xb12   : > { %1594 = vmax.xlane.f32.xlu1 %v1593_v16 }
 0xb23   : > { %1662 = vrot.lane.b32.xlu1 %v7628_v10, %s8693_s18 }
 0xb53   : > { %v1604_v23 = vpop.xlane.xlu0 %1603 }
 0xb9f   : > { %v1595_v17 = vpop.xlane.xlu1 %1594 }
 0xba0   : > { %v1597_v18 = vsub.f32 %v1585_v12, %v1595_v17  ;;  %v7824_v12 = vld [vmem:[%s8699_s19 + $0x8] sm:$0xff]  }
 0xba1   : > { %v1942_v13 = vsel %vm666_vm8, %v7824_v12, 0 }
 0xba2   : > { %v1600_v19 = vmul.f32 1.442695, %v1597_v18 }
 0xba3   : > { %v1663_v2 = vpop.permute.xlu1 %1662 }
 0xba4   : > { %7289 = vpow2.f32 %v1600_v19  ;;  %v1668_v20 = vsel %vm787_vm11, %v1663_v2, 0 }
 0xba5   : > { %6684 = vmatpush3.bf16.msra.mxu1 %v1668_v20  ;;  %7291 = vrcp.f32 %v1604_v23  ;;  %v7848_v23 = vld [vmem:[%s8677_s2] sm:$0x1] }
 0xba6   : > { %6695 = vmatprep.subr.bf16.mxu1 %v7419_v6 }
 0xbae   : > { %v7290_v21 = vpop.eup %7289 }
 0xbaf   : > { %v1605_v22 = vsel %vm759_vm10, %v7290_v21, 0.0  ;;  %v7292_v10 = vpop.eup %7291 }
 0xbb0   : > { %1606 = vadd.xlane.f32.xlu0 %v1605_v22  ;;  %v1610_v25 = vmul.f32 %v7292_v10, %v7288_v30 }
 0xbb2   : > { %v1612_v29 = vpack.c.bf16 %v1610_v25, %v1610_v25 }
 0xbc6   : > { %1614 = vrot.lane.b32.xlu0 %v7626_v9, %s8693_s18 }
 0xc3d   : > { %v1607_v24 = vpop.xlane.xlu0 %1606 }
 0xc3e   : > { %7293 = vrcp.f32 %v1607_v24  ;;  %v7853_v24 = vld [vmem:[%s8677_s2 + $0x1] sm:$0x1] }
 0xc41   : > { %v1615_v27 = vpop.permute.xlu0 %1614 }
 0xc42   : > { %v1620_v28 = vsel %vm787_vm11, %v1615_v27, 0 }
 0xc43   : > { %6678 = vmatpush3.bf16.msra.mxu0 %v1620_v28 }
 0xc44   : > { %6689 = vmatprep.subr.bf16.mxu0 %v7419_v6 }
 0xc46   : > { %6680 = vmatmul.mubr.msk.bf16.vlgmr.msra.gmra.mrb[40].mxu0 %vm666_vm8, %v1612_v29 }
 0xc47   : > { %6691 = vmatprep.mubr.msk.bf16.mxu0 %vm7420_vm4, %v7419_v6  ;;  %6690 = vmatpush3.bf16.msra.mxu0 %v1723_v36 }
 0xc48   : > { %v7294_v32 = vpop.eup %7293  ;;  %6703 = vmatprep.subr.bf16.mxu0 %v7419_v6 }
 0xc49   : > { %v1611_v9 = vmul.f32 %v7294_v32, %v7290_v21 }
 0xc4b   : > { %v1613_v33 = vpack.c.bf16 %v1611_v9, %v1611_v9 }
 0xc4d   : > { %6686 = vmatmul.mubr.msk.bf16.vlgmr.msra.gmra.mrb[32].mxu1 %vm666_vm8, %v1613_v33 }
 0xc4e   : > { %6699 = vmatprep.mubr.msk.bf16.mxu1 %vm7420_vm4, %v7419_v6  ;;  %6696 = vmatpush3.bf16.msra.mxu1 %v7229_v63 }
 0xc4f   : > { %6697 = vmatprep.subr.bf16.mxu1 %v7419_v6 }
 0xc52   : > { %6698 = vmatpush3.bf16.msra.mxu1 %v7230_v0 }
 0xc53   : > { %6709 = vmatprep.subr.bf16.mxu1 %v7419_v6 }
 0xd19   : > { %v1656_v35 = vpop.f32.mrb[40].mxu0 }
 0xd1a   : > { %v6681_v37 = vpop.f32.mrb[41].mxu0  ;;  %v1710_v43 = vpack.c.bf16 %v1656_v35, %v1656_v35 }
 0xd1b   : > { %v1659_v39 = vpop.f32.mrb[42].mxu0 }
 0xd1c   : > { %v6682_v41 = vpop.f32.mrb[43].mxu0  ;;  %v1714_v50 = vunpack.c.l.b16 %v1710_v43 }
 0xd20   : > { %v1704_v42 = vpop.f32.mrb[32].mxu1 }
 0xd21   : > { %v1711_v44 = vpack.c.bf16 %v1704_v42, %v1704_v42  ;;  %v6687_v45 = vpop.f32.mrb[33].mxu1 }
 0xd22   : > { %v1707_v47 = vpop.f32.mrb[34].mxu1 }
 0xd23   : > { %v1715_v48 = vunpack.c.l.b16 %v1711_v44  ;;  %v6688_v49 = vpop.f32.mrb[35].mxu1 }
 0xd25   : > { %v1716_v51 = vrot.slane %v1715_v48, 7 }
 0xd27   : > { %v1717_v52 = vsel %vm1112_vm12, %v1716_v51, %v1714_v50  ;;  %v7866_v51 = vld [vmem:[%s8676_s1] sm:$0xff]  }
 0xd28   : > { %v1718_v53 = vpack.c.b16 %v1717_v52, %v1717_v52  ;;  %v7874_v52 = vld [vmem:[%s8676_s1 + $0x8] sm:$0xff]  }
 0xd2a   : > { %6692 = vmatmul.mubr.msk.bf16.vlgmr.msra.gmra.mrb[44].mxu0 %vm666_vm8, %v1718_v53 }
 0xd2b   : > { %6705 = vmatprep.mubr.msk.bf16.mxu0 %vm7420_vm4, %v7419_v6  ;;  %6704 = vmatpush3.bf16.xpose.msra.mxu0 %v1891_v11 }
 0xd2c   : > { %6715 = vmatprep.subr.bf16.mxu0 %v7419_v6 }
 0xdfd   : > { %v1759_v54 = vpop.f32.mrb[44].mxu0 }
 0xdfe   : > { %v1765_v55 = vadd.f32 %v1759_v54, %v7765_v5  ;;  %v6693_v56 = vpop.f32.mrb[45].mxu0 }
 0xdff   : > { %v1762_v57 = vpop.f32.mrb[46].mxu0 }
 0xe00   : > { %v7794_v59 = vadd.f32 %v7407_v58, %v1765_v55  ;;  %v6694_v60 = vpop.f32.mrb[47].mxu0 }
 0xe02   : > { %v1768_v61 = vmul.f32 %v7794_v59, %v7794_v59 }
 0xe04   : > { %v1769_v62 = vsel %vm533_vm3, %v1768_v61, 0.0 }
 0xe05   : > { %1770 = vadd.xlane.f32.xlu1 %v1769_v62 }
 0xe92   : > { %v1771_v1 = vpop.xlane.xlu1 %1770 }
 0xe93   : > { %v1772_v3 = vmul.f32 0.03125, %v1771_v1 }
 0xe95   : > { %v1773_v30 = vadd.f32 1e-06, %v1772_v3 }
 0xe97   : > { %7295 = vrsqrt.f32 %v1773_v30 }
 0xea1   : > { %v7296_v4 = vpop.eup %7295 }
 0xea2   : > { %v1775_v5 = vmul.f32 %v7296_v4, %v7794_v59 }
 0xea4   : > { %v1782_v38 = vmul.f32 %v6159_v31, %v1775_v5 }
 0xea6   : > { %v1783_v7 = vpack.c.bf16 %v1782_v38, %v1782_v38 }
 0xea8   : > { %6700 = vmatmul.mubr.msk.bf16.vlgmr.msra.gmra.mrb[36].mxu1 %vm566_vm5, %v1783_v7 }
 0xea9   : > { %6711 = vmatprep.mubr.msk.bf16.mxu1 %vm7420_vm4, %v7419_v6  ;;  %6710 = vmatpush3.bf16.xpose.msra.mxu1 %v1942_v13 }
 0xeaa   : > { %6721 = vmatprep.subr.bf16.mxu1 %v7419_v6 }
 0xf7b   : > { %v1837_v14 = vpop.f32.mrb[36].mxu1 }
 0xf7c   : > { %v1850_v15 = vrot.slane %v1837_v14, %v7569_v26  ;;  %v6701_v16 = vpop.f32.mrb[37].mxu1 }
 0xf7d   : > { %v1840_v17 = vpop.f32.mrb[38].mxu1 }
 0xf7e   : > { %v1851_v18 = vcombine.high %v1850_v15, %v1850_v15  ;;  %v1858_v19 = vrot.slane %v1850_v15, %v7569_v26  ;;  %v6702_v2 = vpop.f32.mrb[39].mxu1 }
 0xf80   : > { %v1865_v20 = vrot.slane %v1851_v18, %v7569_v26  ;;  %v7833_v21 = vpack.c.bf16 %v1858_v19, %v1858_v19 }
 0xf82   : > { %v7835_v22 = vpack.c.bf16 %v1865_v20, %v1865_v20  ;;  %6706 = vmatmul.mubr.msk.bf16.vlgmr.msra.gmra.mrb[48].mxu0 %vm666_vm8, %v7833_v21 }
 0xf83   : > { %6717 = vmatprep.mubr.msk.bf16.mxu0 %vm7420_vm4, %v7419_v6  ;;  %6716 = vmatpush3.bf16.msra.mxu0 %v7866_v51 }
 0xf84   : > { %6712 = vmatmul.mubr.msk.bf16.vlgmr.msra.gmra.mrb[40].mxu1 %vm666_vm8, %v7835_v22  ;;  %6727 = vmatprep.subr.bf16.mxu0 %v7419_v6 }
 0xf85   : > { %6723 = vmatprep.mubr.msk.bf16.mxu1 %vm7420_vm4, %v7419_v6  ;;  %6722 = vmatpush3.bf16.msra.mxu1 %v7874_v52 }
 0xf86   : > { %6733 = vmatprep.subr.bf16.mxu1 %v7419_v6 }
0x1055   : > { %v1927_v10 = vpop.f32.mrb[48].mxu0 }
0x1056   : > { %v1928_v25 = vadd.f32 %v1927_v10, %v7848_v23  ;;  %v6707_v27 = vpop.f32.mrb[49].mxu0 }
0x1057   : > { %v1930_v28 = vpop.f32.mrb[50].mxu0  ;;  %v1978_v29 = vpop.f32.mrb[40].mxu1 }
0x1058   : > { %v1979_v32 = vadd.f32 %v1978_v29, %v7853_v24  ;;  %v6708_v9 = vpop.f32.mrb[51].mxu0  ;;  %v6713_v33 = vpop.f32.mrb[41].mxu1  ;;  %v1985_v34 = vsel %vm1984_vm13, %v1928_v25, -inf }
0x1059   : > { %v1981_v36 = vpop.f32.mrb[42].mxu1  ;;  %1986 = vmax.xlane.f32.xlu1 %v1985_v34 }
0x105a   : > { %v6714_v35 = vpop.f32.mrb[43].mxu1  ;;  %v1988_v37 = vsel %vm1984_vm13, %v1979_v32, -inf }
0x105b   : > { %1989 = vmax.xlane.f32.xlu0 %v1988_v37 }
0x10e6   : > { %v1987_v39 = vpop.xlane.xlu1 %1986 }
0x10e7   : > { %v1991_v41 = vsub.f32 %v1928_v25, %v1987_v39 }
0x10e8   : > { %v1990_v42 = vpop.xlane.xlu0 %1989 }
0x10e9   : > { %v1993_v43 = vmul.f32 1.442695, %v1991_v41  ;;  %v1992_v44 = vsub.f32 %v1979_v32, %v1990_v42 }
0x10eb   : > { %7297 = vpow2.f32 %v1993_v43  ;;  %v1995_v45 = vmul.f32 1.442695, %v1992_v44 }
0x10ed   : > { %7299 = vpow2.f32 %v1995_v45 }
0x10f5   : > { %v7298_v47 = vpop.eup %7297 }
0x10f6   : > { %v1997_v48 = vsel %vm1984_vm13, %v7298_v47, 0.0 }
0x10f7   : > { %v7300_v49 = vpop.eup %7299  ;;  %1998 = vadd.xlane.f32.xlu1 %v1997_v48 }
0x10f8   : > { %v2000_v50 = vsel %vm1984_vm13, %v7300_v49, 0.0 }
0x10f9   : > { %2001 = vadd.xlane.f32.xlu0 %v2000_v50 }
0x1108   : > { %2113 = vrot.lane.b32.xlu1 %v7817_v8, %s7423_s25 }
0x110c   : > { %2162 = vrot.lane.b32.xlu1 %v7835_v22, %s7423_s25 }
0x110f   : > { %2164 = vrot.lane.b32.xlu0 %v7824_v12, %s7423_s25 }
0x1110   : > { %2111 = vrot.lane.b32.xlu1 %v7833_v21, %s7423_s25 }
0x1184   : > { %v1999_v53 = vpop.xlane.xlu1 %1998 }
0x1185   : > { %7301 = vrcp.f32 %v1999_v53 }
0x1186   : > { %v2002_v54 = vpop.xlane.xlu0 %2001 }
0x1187   : > { %7303 = vrcp.f32 %v2002_v54 }
0x1188   : > { %v2114_v56 = vpop.permute.xlu1 %2113 }
0x1189   : > { %v2119_v61 = vsel %vm666_vm8, %v2114_v56, 0 }
0x118a   : > { %v2165_v60 = vpop.permute.xlu0 %2164 }
0x118b   : > { %v2170_v0 = vsel %vm666_vm8, %v2165_v60, 0 }
0x118c   : > { %v2163_v3 = vpop.permute.xlu1 %2162 }
0x118f   : > { %v7302_v55 = vpop.eup %7301 }
0x1190   : > { %v2005_v57 = vmul.f32 %v7302_v55, %v7298_v47  ;;  %v2112_v30 = vpop.permute.xlu1 %2111 }
0x1191   : > { %v7304_v58 = vpop.eup %7303 }
0x1192   : > { %v2007_v62 = vpack.c.bf16 %v2005_v57, %v2005_v57  ;;  %v2006_v63 = vmul.f32 %v7304_v58, %v7300_v49 }
0x1194   : > { %6718 = vmatmul.mubr.msk.bf16.vlgmr.msra.gmra.mrb[52].mxu0 %vm2015_vm14, %v2007_v62  ;;  %v2008_v1 = vpack.c.bf16 %v2006_v63, %v2006_v63 }
0x1195   : > { %6728 = vmatpush3.bf16.xpose.msra.mxu0 %v2119_v61  ;;  %6729 = vmatprep.mubr.msk.bf16.mxu0 %vm7420_vm4, %v7419_v6  ;;  %v1876_v61 = vld [vmem:[%s8684_s9] sm:$0xf] }
0x1196   : > { %6724 = vmatmul.mubr.msk.bf16.vlgmr.msra.gmra.mrb[44].mxu1 %vm2015_vm14, %v2008_v1  ;;  %6739 = vmatprep.subr.bf16.mxu0 %v7419_v6 }
0x1197   : > { %6734 = vmatpush3.bf16.xpose.msra.mxu1 %v2170_v0  ;;  %6735 = vmatprep.mubr.msk.bf16.mxu1 %vm7420_vm4, %v7419_v6  ;;  %v2394_v0 = vsel %vm787_vm11, %v1876_v61, 0 }
0x1198   : > { %6745 = vmatprep.subr.bf16.mxu1 %v7419_v6 }
0x119c   : > { %6730 = vmatmul.mubr.msk.bf16.vlgmr.msra.gmra.mrb[56].mxu0 %vm666_vm8, %v2112_v30 }
0x119d   : > { %6741 = vmatprep.mubr.msk.bf16.mxu0 %vm7420_vm4, %v7419_v6 }
0x119e   : > { %6736 = vmatmul.mubr.msk.bf16.vlgmr.msra.gmra.mrb[48].mxu1 %vm666_vm8, %v2163_v3 }
0x119f   : > { %6747 = vmatprep.mubr.msk.bf16.mxu1 %vm7420_vm4, %v7419_v6 }
0x1267   : > { %v2053_v4 = vpop.f32.mrb[52].mxu0 }
0x1268   : > { %v6719_v31 = vpop.f32.mrb[53].mxu0  ;;  %v2108_v7 = vpack.c.bf16 %v2053_v4, %v2053_v4 }
0x1269   : > { %v2056_v5 = vpop.f32.mrb[54].mxu0  ;;  %v2102_v38 = vpop.f32.mrb[44].mxu1  ;;  %v1877_v31 = vld [vmem:[%s8684_s9 + $0x4] sm:$0xf] }
0x126a   : > { %v2109_v11 = vpack.c.bf16 %v2102_v38, %v2102_v38  ;;  %v6720_v13 = vpop.f32.mrb[55].mxu0  ;;  %v6725_v14 = vpop.f32.mrb[45].mxu1  ;;  %v2385_v18 = vunpack.c.l.b16 %v2108_v7  ;;  %v2341_v5 = vsel %vm787_vm11, %v1877_v31, 0 }
0x126b   : > { %v2105_v15 = vpop.f32.mrb[46].mxu1 }
0x126c   : > { %v2386_v16 = vunpack.c.l.b16 %v2109_v11  ;;  %v6726_v17 = vpop.f32.mrb[47].mxu1 }
0x126e   : > { %v2387_v19 = vrot.slane %v2386_v16, 7 }
0x126f   : > { %v2155_v2 = vpop.f32.mrb[56].mxu0 }
0x1270   : > { %v2388_v20 = vsel %vm1112_vm12, %v2387_v19, %v2385_v18  ;;  %v2156_v10 = vadd.f32 %v2155_v2, %v7848_v23  ;;  %v6731_v25 = vpop.f32.mrb[57].mxu0 }
0x1271   : > { %v2158_v27 = vpop.f32.mrb[58].mxu0  ;;  %v2206_v28 = vpop.f32.mrb[48].mxu1  ;;  %v2389_v1 = vpack.c.b16 %v2388_v20, %v2388_v20 }
0x1272   : > { %v2207_v29 = vadd.f32 %v2206_v28, %v7853_v24  ;;  %v6732_v32 = vpop.f32.mrb[59].mxu0  ;;  %v6737_v9 = vpop.f32.mrb[49].mxu1  ;;  %v2212_v33 = vsel %vm1984_vm13, %v2156_v10, -inf }
0x1273   : > { %v2209_v34 = vpop.f32.mrb[50].mxu1  ;;  %2213 = vmax.xlane.f32.xlu1 %v2212_v33 }
0x1274   : > { %v6738_v36 = vpop.f32.mrb[51].mxu1  ;;  %v2215_v35 = vsel %vm1984_vm13, %v2207_v29, -inf }
0x1275   : > { %2216 = vmax.xlane.f32.xlu0 %v2215_v35 }
0x1284   : > { %2236 = vrot.lane.b32.xlu1 %v7866_v51, %s7423_s25 }
0x1288   : > { %2488 = vrot.lane.b32.xlu1 %v7824_v12, %s8695_s28 }
0x128c   : > { %2438 = vrot.lane.b32.xlu1 %v7817_v8, %s8695_s28 }
0x1290   : > { %2436 = vrot.lane.b32.xlu1 %v7833_v21, %s8695_s28 }
0x1300   : > { %v2214_v37 = vpop.xlane.xlu1 %2213 }
0x1301   : > { %v2218_v39 = vsub.f32 %v2156_v10, %v2214_v37 }
0x1302   : > { %v2217_v41 = vpop.xlane.xlu0 %2216 }
0x1303   : > { %v2220_v42 = vmul.f32 1.442695, %v2218_v39  ;;  %v2219_v43 = vsub.f32 %v2207_v29, %v2217_v41 }
0x1304   : > { %v2237_v44 = vpop.permute.xlu1 %2236 }
0x1305   : > { %7305 = vpow2.f32 %v2220_v42  ;;  %v2222_v45 = vmul.f32 1.442695, %v2219_v43  ;;  %6740 = vmatpush3.bf16.msra.mxu0 %v2237_v44 }
0x1306   : > { %6751 = vmatprep.subr.bf16.mxu0 %v7419_v6 }
0x1307   : > { %7307 = vpow2.f32 %v2222_v45 }
0x1308   : > { %v2489_v3 = vpop.permute.xlu1 %2488 }
0x1309   : > { %v2494_v30 = vsel %vm666_vm8, %v2489_v3, 0 }
0x130c   : > { %v2439_v25 = vpop.permute.xlu1 %2438 }
0x130d   : > { %v2444_v28 = vsel %vm666_vm8, %v2439_v25, 0 }
0x130f   : > { %v7306_v47 = vpop.eup %7305 }
0x1310   : > { %v2224_v48 = vsel %vm1984_vm13, %v7306_v47, 0.0  ;;  %v2437_v36 = vpop.permute.xlu1 %2436 }
0x1311   : > { %v7308_v49 = vpop.eup %7307  ;;  %2225 = vadd.xlane.f32.xlu0 %v2224_v48 }
0x1312   : > { %v2227_v50 = vsel %vm1984_vm13, %v7308_v49, 0.0 }
0x1315   : > { %2228 = vadd.xlane.f32.xlu0 %v2227_v50 }
0x132b   : > { %2282 = vrot.lane.b32.xlu0 %v7874_v52, %s7423_s25 }
0x132f   : > { %2486 = vrot.lane.b32.xlu0 %v7835_v22, %s8695_s28 }
0x139e   : > { %v2226_v53 = vpop.xlane.xlu0 %2225 }
0x139f   : > { %7309 = vrcp.f32 %v2226_v53 }
0x13a2   : > { %v2229_v54 = vpop.xlane.xlu0 %2228 }
0x13a3   : > { %7311 = vrcp.f32 %v2229_v54 }
0x13a6   : > { %v2283_v55 = vpop.permute.xlu0 %2282 }
0x13a7   : > { %6746 = vmatpush3.bf16.msra.mxu1 %v2283_v55 }
0x13a8   : > { %6757 = vmatprep.subr.bf16.mxu1 %v7419_v6 }
0x13a9   : > { %v7310_v56 = vpop.eup %7309 }
0x13aa   : > { %v2232_v57 = vmul.f32 %v7310_v56, %v7306_v47  ;;  %v2487_v4 = vpop.permute.xlu0 %2486 }
0x13ac   : > { %v2234_v58 = vpack.c.bf16 %v2232_v57, %v2232_v57 }
0x13ad   : > { %v7312_v60 = vpop.eup %7311 }
0x13ae   : > { %6742 = vmatmul.mubr.msk.bf16.vlgmr.msra.gmra.mrb[60].mxu0 %vm2015_vm14, %v2234_v58  ;;  %v2233_v62 = vmul.f32 %v7312_v60, %v7308_v49 }
0x13af   : > { %6753 = vmatprep.mubr.msk.bf16.mxu0 %vm7420_vm4, %v7419_v6  ;;  %6752 = vmatpush3.bf16.msra.mxu0 %v2341_v5 }
0x13b0   : > { %v2235_v63 = vpack.c.bf16 %v2233_v62, %v2233_v62  ;;  %6763 = vmatprep.subr.bf16.mxu0 %v7419_v6 }
0x13b2   : > { %6748 = vmatmul.mubr.msk.bf16.vlgmr.msra.gmra.mrb[52].mxu1 %vm2015_vm14, %v2235_v63 }
0x13b3   : > { %6758 = vmatpush3.bf16.msra.mxu1 %v2394_v0  ;;  %6759 = vmatprep.mubr.msk.bf16.mxu1 %vm7420_vm4, %v7419_v6 }
0x13b4   : > { %6769 = vmatprep.subr.bf16.mxu1 %v7419_v6 }
0x13ba   : > { %6760 = vmatmul.mubr.msk.bf16.vlgmr.msra.gmra.mrb[56].mxu1 %vm666_vm8, %v2389_v1 }
0x13bb   : > { %6771 = vmatprep.mubr.msk.bf16.mxu1 %vm7420_vm4, %v7419_v6 }
0x13bc   : > { %6770 = vmatpush3.bf16.xpose.msra.mxu1 %v2494_v30 }
0x13bd   : > { %6781 = vmatprep.subr.bf16.mxu1 %v7419_v6 }
0x13c3   : > { %6772 = vmatmul.mubr.msk.bf16.vlgmr.msra.gmra.mrb[60].mxu1 %vm666_vm8, %v2487_v4 }
0x13c4   : > { %6783 = vmatprep.mubr.msk.bf16.mxu1 %vm7420_vm4, %v7419_v6 }
0x1481   : > { %v2276_v38 = vpop.f32.mrb[60].mxu0 }
0x1482   : > { %v6743_v7 = vpop.f32.mrb[61].mxu0  ;;  %v2328_v15 = vpack.c.bf16 %v2276_v38, %v2276_v38 }
0x1483   : > { %v2279_v11 = vpop.f32.mrb[62].mxu0 }
0x1484   : > { %v6744_v13 = vpop.f32.mrb[63].mxu0  ;;  %v2332_v20 = vunpack.c.l.b16 %v2328_v15 }
0x1485   : > { %v2322_v14 = vpop.f32.mrb[52].mxu1 }
0x1486   : > { %v2329_v16 = vpack.c.bf16 %v2322_v14, %v2322_v14  ;;  %v6749_v17 = vpop.f32.mrb[53].mxu1 }
0x1487   : > { %v2325_v18 = vpop.f32.mrb[54].mxu1 }
0x1488   : > { %v2333_v19 = vunpack.c.l.b16 %v2329_v16  ;;  %v6750_v2 = vpop.f32.mrb[55].mxu1  ;;  %v1878_v18 = vld [vmem:[%s8684_s9 + $0x8] sm:$0xf] }
0x148a   : > { %v2334_v10 = vrot.slane %v2333_v19, 7  ;;  %v2665_v19 = vsel %vm787_vm11, %v1878_v18, 0 }
0x148c   : > { %v2335_v27 = vsel %vm1112_vm12, %v2334_v10, %v2332_v20 }
0x148d   : > { %v2336_v29 = vpack.c.b16 %v2335_v27, %v2335_v27  ;;  %v2430_v32 = vpop.f32.mrb[56].mxu1 }
0x148e   : > { %v6761_v9 = vpop.f32.mrb[57].mxu1 }
0x148f   : > { %6754 = vmatmul.mubr.msk.bf16.vlgmr.msra.gmra.mrb[64].mxu0 %vm666_vm8, %v2336_v29  ;;  %v2433_v33 = vpop.f32.mrb[58].mxu1 }
0x1490   : > { %v6762_v34 = vpop.f32.mrb[59].mxu1  ;;  %6764 = vmatpush3.bf16.xpose.msra.mxu0 %v2444_v28  ;;  %6765 = vmatprep.mubr.msk.bf16.mxu0 %vm7420_vm4, %v7419_v6 }
0x1491   : > { %6775 = vmatprep.subr.bf16.mxu0 %v7419_v6 }
0x1496   : > { %v2530_v35 = vpop.f32.mrb[60].mxu1 }
0x1497   : > { %v2531_v37 = vadd.f32 %v2530_v35, %v7853_v24  ;;  %v6773_v39 = vpop.f32.mrb[61].mxu1  ;;  %6766 = vmatmul.mubr.msk.bf16.vlgmr.msra.gmra.mrb[68].mxu0 %vm666_vm8, %v2437_v36 }
0x1498   : > { %v2533_v41 = vpop.f32.mrb[62].mxu1  ;;  %6777 = vmatprep.mubr.msk.bf16.mxu0 %vm7420_vm4, %v7419_v6 }
0x1499   : > { %v6774_v42 = vpop.f32.mrb[63].mxu1  ;;  %v2539_v43 = vsel %vm1984_vm13, %v2531_v37, -inf }
0x149a   : > { %2540 = vmax.xlane.f32.xlu0 %v2539_v43 }
0x1527   : > { %v2541_v44 = vpop.xlane.xlu0 %2540 }
0x1528   : > { %v2543_v45 = vsub.f32 %v2531_v37, %v2541_v44 }
0x152a   : > { %v2546_v47 = vmul.f32 1.442695, %v2543_v45 }
0x152c   : > { %7313 = vpow2.f32 %v2546_v47 }
0x1536   : > { %v7314_v48 = vpop.eup %7313 }
0x1537   : > { %v2551_v49 = vsel %vm1984_vm13, %v7314_v48, 0.0 }
0x1538   : > { %2552 = vadd.xlane.f32.xlu0 %v2551_v49 }
0x1562   : > { %v2377_v50 = vpop.f32.mrb[64].mxu0 }
0x1563   : > { %v7956_v53 = vadd.f32 %v2430_v32, %v2377_v50  ;;  %v6755_v54 = vpop.f32.mrb[65].mxu0 }
0x1564   : > { %v2380_v55 = vpop.f32.mrb[66].mxu0 }
0x1565   : > { %v6756_v56 = vpop.f32.mrb[67].mxu0 }
0x156a   : > { %v2480_v57 = vpop.f32.mrb[68].mxu0 }
0x156b   : > { %v2481_v58 = vadd.f32 %v2480_v57, %v7848_v23  ;;  %v6767_v60 = vpop.f32.mrb[69].mxu0 }
0x156c   : > { %v2483_v61 = vpop.f32.mrb[70].mxu0 }
0x156d   : > { %v6768_v62 = vpop.f32.mrb[71].mxu0  ;;  %v2536_v63 = vsel %vm1984_vm13, %v2481_v58, -inf }
0x156e   : > { %2537 = vmax.xlane.f32.xlu1 %v2536_v63 }
0x157f   : > { %2560 = vrot.lane.b32.xlu1 %v7866_v51, %s8695_s28 }
0x1583   : > { %2760 = vrot.lane.b32.xlu1 %v7824_v12, %s8693_s18 }
0x1587   : > { %2710 = vrot.lane.b32.xlu1 %v7817_v8, %s8693_s18 }
0x158b   : > { %2708 = vrot.lane.b32.xlu1 %v7833_v21, %s8693_s18 }
0x15c5   : > { %v2553_v8 = vpop.xlane.xlu0 %2552 }
0x15fb   : > { %v2538_v0 = vpop.xlane.xlu1 %2537 }
0x15fc   : > { %v2542_v1 = vsub.f32 %v2481_v58, %v2538_v0 }
0x15fe   : > { %v2544_v3 = vmul.f32 1.442695, %v2542_v1 }
0x15ff   : > { %v2561_v30 = vpop.permute.xlu1 %2560 }
0x1600   : > { %7315 = vpow2.f32 %v2544_v3  ;;  %6776 = vmatpush3.bf16.msra.mxu0 %v2561_v30 }
0x1601   : > { %6787 = vmatprep.subr.bf16.mxu0 %v7419_v6  ;;  %7317 = vrcp.f32 %v2553_v8 }
0x1603   : > { %v2761_v38 = vpop.permute.xlu1 %2760 }
0x1604   : > { %v2766_v45 = vsel %vm666_vm8, %v2761_v38, 0 }
0x1607   : > { %v2711_v13 = vpop.permute.xlu1 %2710 }
0x160a   : > { %v7316_v4 = vpop.eup %7315 }
0x160b   : > { %v2548_v31 = vsel %vm1984_vm13, %v7316_v4, 0.0  ;;  %v7318_v12 = vpop.eup %7317  ;;  %v2709_v17 = vpop.permute.xlu1 %2708 }
0x160c   : > { %2549 = vadd.xlane.f32.xlu0 %v2548_v31  ;;  %v2557_v5 = vmul.f32 %v7318_v12, %v7314_v48 }
0x160e   : > { %v2559_v11 = vpack.c.bf16 %v2557_v5, %v2557_v5 }
0x1622   : > { %2606 = vrot.lane.b32.xlu0 %v7874_v52, %s8695_s28  ;;  %s8702_s28 = smov 104  }
0x1626   : > { %2758 = vrot.lane.b32.xlu0 %v7835_v22, %s8693_s18  ;;  %v2716_v22 = vsel %vm666_vm8, %v2711_v13, 0 }
0x1699   : > { %v2550_v21 = vpop.xlane.xlu0 %2549 }
0x169a   : > { %7319 = vrcp.f32 %v2550_v21 }
0x169d   : > { %v2607_v7 = vpop.permute.xlu0 %2606 }
0x169e   : > { %6782 = vmatpush3.bf16.msra.mxu1 %v2607_v7 }
0x169f   : > { %6793 = vmatprep.subr.bf16.mxu1 %v7419_v6 }
0x16a1   : > { %6784 = vmatmul.mubr.msk.bf16.vlgmr.msra.gmra.mrb[64].mxu1 %vm2015_vm14, %v2559_v11  ;;  %v2759_v49 = vpop.permute.xlu0 %2758 }
0x16a2   : > { %6795 = vmatprep.mubr.msk.bf16.mxu1 %vm7420_vm4, %v7419_v6 }
0x16a4   : > { %v7320_v14 = vpop.eup %7319 }
0x16a5   : > { %v2556_v15 = vmul.f32 %v7320_v14, %v7316_v4 }
0x16a7   : > { %6794 = vmatpush3.bf16.xpose.msra.mxu1 %v2716_v22  ;;  %v2558_v16 = vpack.c.bf16 %v2556_v15, %v2556_v15 }
0x16a8   : > { %6805 = vmatprep.subr.bf16.mxu1 %v7419_v6 }
0x16a9   : > { %6778 = vmatmul.mubr.msk.bf16.vlgmr.msra.gmra.mrb[72].mxu0 %vm2015_vm14, %v2558_v16 }
0x16aa   : > { %6789 = vmatprep.mubr.msk.bf16.mxu0 %vm7420_vm4, %v7419_v6  ;;  %6788 = vmatpush3.bf16.msra.mxu0 %v2665_v19 }
0x16ab   : > { %6799 = vmatprep.subr.bf16.mxu0 %v7419_v6 }
0x16ae   : > { %6796 = vmatmul.mubr.msk.bf16.vlgmr.msra.gmra.mrb[68].mxu1 %vm666_vm8, %v2709_v17 }
0x16af   : > { %6807 = vmatprep.mubr.msk.bf16.mxu1 %vm7420_vm4, %v7419_v6 }
0x1774   : > { %v2646_v2 = vpop.f32.mrb[64].mxu1 }
0x1775   : > { %v6785_v20 = vpop.f32.mrb[65].mxu1  ;;  %v2653_v25 = vpack.c.bf16 %v2646_v2, %v2646_v2 }
0x1776   : > { %v2649_v10 = vpop.f32.mrb[66].mxu1 }
0x1777   : > { %v6786_v27 = vpop.f32.mrb[67].mxu1  ;;  %v2657_v28 = vunpack.c.l.b16 %v2653_v25 }
0x1779   : > { %v2658_v34 = vrot.slane %v2657_v28, 7 }
0x177c   : > { %v2600_v29 = vpop.f32.mrb[72].mxu0 }
0x177d   : > { %v2652_v32 = vpack.c.bf16 %v2600_v29, %v2600_v29  ;;  %v6779_v9 = vpop.f32.mrb[73].mxu0 }
0x177e   : > { %v2603_v33 = vpop.f32.mrb[74].mxu0 }
0x177f   : > { %v2656_v36 = vunpack.c.l.b16 %v2652_v32  ;;  %v6780_v35 = vpop.f32.mrb[75].mxu0 }
0x1781   : > { %v2659_v37 = vsel %vm1112_vm12, %v2658_v34, %v2656_v36  ;;  %v2752_v39 = vpop.f32.mrb[68].mxu1 }
0x1782   : > { %v2660_v41 = vpack.c.b16 %v2659_v37, %v2659_v37  ;;  %v2753_v42 = vadd.f32 %v2752_v39, %v7848_v23  ;;  %v6797_v43 = vpop.f32.mrb[69].mxu1 }
0x1783   : > { %v2755_v44 = vpop.f32.mrb[70].mxu1 }
0x1784   : > { %6790 = vmatmul.mubr.msk.bf16.vlgmr.msra.gmra.mrb[76].mxu0 %vm666_vm8, %v2660_v41  ;;  %v6798_v47 = vpop.f32.mrb[71].mxu1  ;;  %v2808_v48 = vsel %vm1984_vm13, %v2753_v42, -inf }
0x1785   : > { %6800 = vmatpush3.bf16.xpose.msra.mxu0 %v2766_v45  ;;  %2809 = vmax.xlane.f32.xlu1 %v2808_v48  ;;  %v7235_v47 = vld [vmem:[%s8686_s11] sm:$0xff]  }
0x1786   : > { %6801 = vmatprep.mubr.msk.bf16.mxu0 %vm7420_vm4, %v7419_v6  ;;  %6811 = vmatprep.subr.bf16.mxu0 %v7419_v6  ;;  %v7236_v48 = vld [vmem:[%s8687_s12] sm:$0xff]  }
0x178c   : > { %6802 = vmatmul.mubr.msk.bf16.vlgmr.msra.gmra.mrb[80].mxu0 %vm666_vm8, %v2759_v49  ;;  %v7238_v49 = vld [vmem:[%s8687_s12 + $0x8] sm:$0xff]  }
0x178d   : > { %6813 = vmatprep.mubr.msk.bf16.mxu0 %vm7420_vm4, %v7419_v6 }
0x1796   : > { %2832 = vrot.lane.b32.xlu1 %v7866_v51, %s8693_s18 }
0x1812   : > { %v2810_v23 = vpop.xlane.xlu1 %2809 }
0x1813   : > { %v2814_v50 = vsub.f32 %v2753_v42, %v2810_v23 }
0x1815   : > { %v2816_v54 = vmul.f32 1.442695, %v2814_v50 }
0x1816   : > { %v2833_v4 = vpop.permute.xlu1 %2832 }
0x1817   : > { %7321 = vpow2.f32 %v2816_v54  ;;  %6806 = vmatpush3.bf16.msra.mxu1 %v2833_v4 }
0x1818   : > { %6817 = vmatprep.subr.bf16.mxu1 %v7419_v6 }
0x1821   : > { %v7322_v51 = vpop.eup %7321 }
0x1822   : > { %v2820_v30 = vsel %vm1984_vm13, %v7322_v51, 0.0 }
0x1857   : > { %v2701_v55 = vpop.f32.mrb[76].mxu0 }
0x1858   : > { %v8005_v56 = vadd.f32 %v2701_v55, %v7956_v53  ;;  %v6791_v57 = vpop.f32.mrb[77].mxu0 }
0x1859   : > { %v2704_v58 = vpop.f32.mrb[78].mxu0 }
0x185a   : > { %v6792_v60 = vpop.f32.mrb[79].mxu0 }
0x185f   : > { %v2802_v61 = vpop.f32.mrb[80].mxu0 }
0x1860   : > { %v2803_v62 = vadd.f32 %v2802_v61, %v7853_v24  ;;  %v6803_v63 = vpop.f32.mrb[81].mxu0  ;;  %v7239_v61 = vld [vmem:[%s8688_s13] sm:$0xff]  }
0x1861   : > { %v2805_v0 = vpop.f32.mrb[82].mxu0  ;;  %v7241_v63 = vld [vmem:[%s8688_s13 + $0x10] sm:$0xff]  }
0x1862   : > { %v6804_v1 = vpop.f32.mrb[83].mxu0  ;;  %v2811_v3 = vsel %vm1984_vm13, %v2803_v62, -inf  ;;  %v7242_v0 = vld [vmem:[%s8688_s13 + $0x18] sm:$0xff]  }
0x1863   : > { %2812 = vmax.xlane.f32.xlu0 %v2811_v3 }
0x1867   : > { %2821 = vadd.xlane.f32.xlu0 %v2820_v30 }
0x18f0   : > { %v2813_v53 = vpop.xlane.xlu0 %2812 }
0x18f1   : > { %v2815_v31 = vsub.f32 %v2803_v62, %v2813_v53  ;;  %v7240_v62 = vld [vmem:[%s8688_s13 + $0x8] sm:$0xff]  }
0x18f3   : > { %v2818_v8 = vmul.f32 1.442695, %v2815_v31 }
0x18f4   : > { %v2822_v12 = vpop.xlane.xlu0 %2821 }
0x18f5   : > { %7323 = vpow2.f32 %v2818_v8 }
0x18f6   : > { %7325 = vrcp.f32 %v2822_v12 }
0x18ff   : > { %v7324_v24 = vpop.eup %7323 }
0x1900   : > { %v7326_v21 = vpop.eup %7325  ;;  %v2823_v5 = vsel %vm1984_vm13, %v7324_v24, 0.0 }
0x1901   : > { %v2828_v38 = vmul.f32 %v7326_v21, %v7322_v51  ;;  %2824 = vadd.xlane.f32.xlu0 %v2823_v5 }
0x1903   : > { %v2830_v7 = vpack.c.bf16 %v2828_v38, %v2828_v38 }
0x1905   : > { %6808 = vmatmul.mubr.msk.bf16.vlgmr.msra.gmra.mrb[72].mxu1 %vm2015_vm14, %v2830_v7 }
0x1906   : > { %6819 = vmatprep.mubr.msk.bf16.mxu1 %vm7420_vm4, %v7419_v6 }
0x1917   : > { %2878 = vrot.lane.b32.xlu0 %v7874_v52, %s8693_s18  ;;  %v1879_v52 = vld [vmem:[%s8684_s9 + $0xc] sm:$0xf] }
0x1918   : > { %v2937_v2 = vsel %vm787_vm11, %v1879_v52, 0 }
0x1919   : > { %6818 = vmatpush3.bf16.msra.mxu1 %v2937_v2 }
0x191a   : > { %6831 = vmatprep.subr.bf16.mxu1 %v7419_v6 }
0x198e   : > { %v2825_v11 = vpop.xlane.xlu0 %2824 }
0x198f   : > { %7327 = vrcp.f32 %v2825_v11 }
0x1992   : > { %v2879_v13 = vpop.permute.xlu0 %2878 }
0x1993   : > { %6812 = vmatpush3.bf16.msra.mxu0 %v2879_v13 }
0x1994   : > { %6823 = vmatprep.subr.bf16.mxu0 %v7419_v6 }
0x1999   : > { %v7328_v14 = vpop.eup %7327 }
0x199a   : > { %v2829_v22 = vmul.f32 %v7328_v14, %v7324_v24 }
0x199c   : > { %v2831_v15 = vpack.c.bf16 %v2829_v22, %v2829_v22 }
0x199e   : > { %6814 = vmatmul.mubr.msk.bf16.vlgmr.msra.gmra.mrb[84].mxu0 %vm2015_vm14, %v2831_v15 }
0x199f   : > { %6827 = vmatprep.mubr.msk.bf16.mxu0 %vm7420_vm4, %v7419_v6  ;;  %6824 = vmatpush3.bf16.msra.mxu0 %v7235_v47 }
0x19a0   : > { %6825 = vmatprep.subr.bf16.mxu0 %v7419_v6 }
0x19d8   : > { %v2872_v16 = vpop.f32.mrb[72].mxu1 }
0x19d9   : > { %v6809_v17 = vpop.f32.mrb[73].mxu1  ;;  %v2924_v10 = vpack.c.bf16 %v2872_v16, %v2872_v16 }
0x19da   : > { %v2875_v18 = vpop.f32.mrb[74].mxu1 }
0x19db   : > { %v6810_v19 = vpop.f32.mrb[75].mxu1  ;;  %v2928_v9 = vunpack.c.l.b16 %v2924_v10  ;;  %v7243_v10 = vld [vmem:[%s8680_s5 + $0x10] sm:$0xff]  }
0x1a71   : > { %v2918_v20 = vpop.f32.mrb[84].mxu0 }
0x1a72   : > { %v2925_v25 = vpack.c.bf16 %v2918_v20, %v2918_v20  ;;  %v6815_v27 = vpop.f32.mrb[85].mxu0 }
0x1a73   : > { %v2921_v28 = vpop.f32.mrb[86].mxu0 }
0x1a74   : > { %v2929_v29 = vunpack.c.l.b16 %v2925_v25  ;;  %v6816_v32 = vpop.f32.mrb[87].mxu0  ;;  %v7244_v25 = vld [vmem:[%s8680_s5 + $0x18] sm:$0xff]  }
0x1a76   : > { %v2930_v33 = vrot.slane %v2929_v29, 7 }
0x1a78   : > { %v2931_v34 = vsel %vm1112_vm12, %v2930_v33, %v2928_v9  ;;  %v6200_v9 = vld [vmem:[%s8679_s4 + $0x1] ss:$0 sm:$0xff] }
0x1a79   : > { %v2932_v36 = vpack.c.b16 %v2931_v34, %v2931_v34 }
0x1a7b   : > { %6820 = vmatmul.mubr.msk.bf16.vlgmr.msra.gmra.mrb[76].mxu1 %vm666_vm8, %v2932_v36 }
0x1a7c   : > { %6835 = vmatprep.mubr.msk.bf16.mxu1 %vm7420_vm4, %v7419_v6  ;;  %6832 = vmatpush3.bf16.msra.mxu1 %v7236_v48 }
0x1a7d   : > { %6833 = vmatprep.subr.bf16.mxu1 %v7419_v6 }
0x1a80   : > { %6834 = vmatpush3.bf16.msra.mxu1 %v7238_v49 }
0x1a81   : > { %6851 = vmatprep.subr.bf16.mxu1 %v7419_v6 }
0x1b4e   : > { %v2973_v35 = vpop.f32.mrb[76].mxu1 }
0x1b4f   : > { %v2979_v37 = vadd.f32 %v2973_v35, %v8005_v56  ;;  %v6821_v39 = vpop.f32.mrb[77].mxu1  ;;  %v6187_v56 = vld [vmem:[%s8685_s10] ss:$0 sm:$0xff] }
0x1b50   : > { %v2976_v41 = vpop.f32.mrb[78].mxu1 }
0x1b51   : > { %v8032_v42 = vadd.f32 %v2979_v37, %v7794_v59  ;;  %v6822_v43 = vpop.f32.mrb[79].mxu1  ;;  %v7237_v59 = vld [vmem:[%s8686_s11 + $0x8] sm:$0xff]  }
0x1b52   : > { %6826 = vmatpush3.bf16.msra.mxu0 %v7237_v59 }
0x1b53   : > { %v2982_v44 = vmul.f32 %v8032_v42, %v8032_v42  ;;  %6839 = vmatprep.subr.bf16.mxu0 %v7419_v6 }
0x1b55   : > { %v2983_v45 = vsel %vm533_vm3, %v2982_v44, 0.0 }
0x1b56   : > { %2984 = vadd.xlane.f32.xlu1 %v2983_v45 }
0x1be3   : > { %v2985_v23 = vpop.xlane.xlu1 %2984 }
0x1be4   : > { %v2986_v50 = vmul.f32 0.03125, %v2985_v23 }
0x1be6   : > { %v2987_v54 = vadd.f32 1e-06, %v2986_v50 }
0x1be8   : > { %7329 = vrsqrt.f32 %v2987_v54 }
0x1bf2   : > { %v7330_v55 = vpop.eup %7329 }
0x1bf3   : > { %v2989_v57 = vmul.f32 %v7330_v55, %v8032_v42 }
0x1bf5   : > { %v2996_v58 = vmul.f32 %v6187_v56, %v2989_v57 }
0x1bf7   : > { %v3013_v60 = vpack.c.bf16 %v2996_v58, %v2996_v58 }
0x1bf9   : > { %6828 = vmatmul.mubr.msk.bf16.vlgmr.msra.gmra.mrb[88].mxu0 %vm566_vm5, %v3013_v60  ;;  %6836 = vmatmul.mubr.msk.bf16.vlgmr.msra.gmra.mrb[80].mxu1 %vm566_vm5, %v3013_v60 }
0x1bfa   : > { %6847 = vmatprep.mubr.msk.bf16.mxu0 %vm7420_vm4, %v7419_v6  ;;  %6855 = vmatprep.mubr.msk.bf16.mxu1 %vm7420_vm4, %v7419_v6 }
0x1bfb   : > { %6840 = vmatpush3.bf16.msra.mxu0 %v7239_v61  ;;  %6852 = vmatpush3.bf16.msra.mxu1 %v7243_v10 }
0x1bfc   : > { %6841 = vmatprep.subr.bf16.mxu0 %v7419_v6  ;;  %6853 = vmatprep.subr.bf16.mxu1 %v7419_v6 }
0x1bff   : > { %6842 = vmatpush3.bf16.msra.mxu0 %v7240_v62  ;;  %6854 = vmatpush3.bf16.msra.mxu1 %v7244_v25 }
0x1c00   : > { %6843 = vmatprep.subr.bf16.mxu0 %v7419_v6  ;;  %6859 = vmatprep.subr.bf16.mxu1 %v7419_v6 }
0x1c03   : > { %6844 = vmatpush3.bf16.msra.mxu0 %v7241_v63 }
0x1c04   : > { %6845 = vmatprep.subr.bf16.mxu0 %v7419_v6 }
0x1c07   : > { %6846 = vmatpush3.bf16.msra.mxu0 %v7242_v0 }
0x1c08   : > { %6865 = vmatprep.subr.bf16.mxu0 %v7419_v6 }
0x1ccc   : > { %v3063_v1 = vpop.f32.mrb[88].mxu0  ;;  %v3115_v3 = vpop.f32.mrb[80].mxu1 }
0x1ccd   : > { %v3121_v51 = vmul.f32 %v3063_v1, %v3063_v1  ;;  %v6829_v30 = vpop.f32.mrb[89].mxu0  ;;  %v6837_v4 = vpop.f32.mrb[81].mxu1 }
0x1cce   : > { %v3066_v53 = vpop.f32.mrb[90].mxu0  ;;  %v3118_v31 = vpop.f32.mrb[82].mxu1 }
0x1ccf   : > { %v3122_v8 = vmul.f32 %v3121_v51, %v3063_v1  ;;  %v6830_v12 = vpop.f32.mrb[91].mxu0  ;;  %v6838_v24 = vpop.f32.mrb[83].mxu1 }
0x1cd1   : > { %v3123_v21 = vmul.f32 0.044715, %v3122_v8 }
0x1cd3   : > { %v3124_v5 = vadd.f32 %v3123_v21, %v3063_v1 }
0x1cd5   : > { %v3125_v38 = vmul.f32 0.7978846, %v3124_v5 }
0x1cd7   : > { %7331 = vtanh.f32 %v3125_v38 }
0x1ce1   : > { %v7332_v7 = vpop.eup %7331 }
0x1ce2   : > { %v3127_v11 = vadd.f32 1.0, %v7332_v7 }
0x1ce4   : > { %v3128_v13 = vmul.f32 0.5, %v3127_v11 }
0x1ce6   : > { %v3129_v14 = vmul.f32 %v3128_v13, %v3063_v1 }
0x1ce8   : > { %v3130_v22 = vmul.f32 %v3129_v14, %v3115_v3 }
0x1cea   : > { %v3131_v15 = vpack.c.bf16 %v3130_v22, %v3130_v22 }
0x1cec   : > { %6848 = vmatmul.mubr.msk.bf16.vlgmr.msra.gmra.mrb[92].mxu0 %vm3156_vm15, %v3131_v15 }
0x1ced   : > { %6867 = vmatprep.mubr.msk.bf16.mxu0 %vm7420_vm4, %v7419_v6 }
0x1dbf   : > { %v3194_v16 = vpop.f32.mrb[92].mxu0 }
0x1dc0   : > { %v8083_v17 = vadd.f32 %v3194_v16, %v8032_v42  ;;  %v6849_v18 = vpop.f32.mrb[93].mxu0 }
0x1dc1   : > { %v3197_v19 = vpop.f32.mrb[94].mxu0 }
0x1dc2   : > { %v6850_v52 = vpop.f32.mrb[95].mxu0  ;;  %v3203_v2 = vmul.f32 %v8083_v17, %v8083_v17 }
0x1dc4   : > { %v3204_v20 = vsel %vm533_vm3, %v3203_v2, 0.0 }
0x1dc5   : > { %3205 = vadd.xlane.f32.xlu0 %v3204_v20 }
0x1e52   : > { %v3206_v27 = vpop.xlane.xlu0 %3205 }
0x1e53   : > { %v3207_v28 = vmul.f32 0.03125, %v3206_v27 }
0x1e55   : > { %v3208_v29 = vadd.f32 1e-06, %v3207_v28 }
0x1e57   : > { %7333 = vrsqrt.f32 %v3208_v29 }
0x1e61   : > { %v7334_v32 = vpop.eup %7333 }
0x1e62   : > { %v3210_v33 = vmul.f32 %v7334_v32, %v8083_v17 }
0x1e64   : > { %v3217_v34 = vmul.f32 %v6200_v9, %v3210_v33 }
0x1e66   : > { %v3218_v36 = vpack.c.bf16 %v3217_v34, %v3217_v34 }
0x1e68   : > { %6856 = vmatmul.mubr.msk.bf16.vlgmr.msra.gmra.mrb[84].mxu1 %vm566_vm5, %v3218_v36 }
0x1e69   : > { %6861 = vmatprep.mubr.msk.bf16.mxu1 %vm7420_vm4, %v7419_v6 }
0x1f3b   : > { %v3273_v35 = vpop.f32.mrb[84].mxu1 }
0x1f3c   : > { %3304 = vrot.lane.b32.xlu0 %v3273_v35, %s7421_s23  ;;  %v6857_v37 = vpop.f32.mrb[85].mxu1  ;;  %v3286_v43 = vrot.slane %v3273_v35, %v7569_v26  ;;  %s8700_s23 = smov 64  }
0x1f3d   : > { %v3276_v39 = vpop.f32.mrb[86].mxu1 }
0x1f3e   : > { %v6858_v41 = vpop.f32.mrb[87].mxu1  ;;  %v3287_v47 = vcombine.high %v3286_v43, %v3286_v43  ;;  %v3294_v50 = vrot.slane %v3286_v43, %v7569_v26 }
0x1f40   : > { %v3301_v54 = vrot.slane %v3287_v47, %v7569_v26  ;;  %v8125_v55 = vpack.c.bf16 %v3294_v50, %v3294_v50 }
0x1f42   : > { %v8127_v56 = vpack.c.bf16 %v3301_v54, %v3301_v54 }
0x1fae   : > { %v3305_v42 = vpop.permute.xlu0 %3304 }
0x1faf   : > { %6340 = vst.msk [vmem:[%s7563_s24 + $0xf] sm:$0x1] %vm639_vm6, %v3305_v42 }
0x1fb0   : > { %6348 = vst.msk [vmem:[%s7563_s24 + $0x16] sm:$0x2] %vm648_vm7, %v3305_v42  ;;  %s8701_s24 = smov 112  }
0x1fb7   : > { %v3322_v44 = vld [vmem:[#allocation2 + $0x18] sm:$0xff]  ;;  %v3321_v45 = vld [vmem:[#allocation2 + $0x10] sm:$0xff] }
0x1fb8   : > { %v8109_v48 = vpack.c.bf16 %v3322_v44, %v3322_v44  ;;  %v8111_v59 = vpack.c.bf16 %v3321_v45, %v3321_v45 }
0x1fba   : > { %3603 = vrot.lane.b32.xlu0 %v8109_v48, %s7423_s25  ;;  %v3341_v49 = vsel %vm666_vm8, %v8111_v59, 0  ;;  %v3387_v23 = vsel %vm666_vm8, %v8109_v48, 0 }
0x1fbb   : > { %6860 = vmatpush3.bf16.xpose.msra.mxu1 %v3341_v49  ;;  %6866 = vmatpush3.bf16.xpose.msra.mxu0 %v3387_v23 }
0x1fbc   : > { %6871 = vmatprep.subr.bf16.mxu1 %v7419_v6  ;;  %6877 = vmatprep.subr.bf16.mxu0 %v7419_v6 }
0x1fbe   : > { %3551 = vrot.lane.b32.xlu0 %v8111_v59, %s7423_s25 }
0x1fc2   : > { %6862 = vmatmul.mubr.msk.bf16.vlgmr.msra.gmra.mrb[88].mxu1 %vm666_vm8, %v8125_v55  ;;  %3600 = vrot.lane.b32.xlu0 %v8127_v56, %s7423_s25 }
0x1fc3   : > { %6868 = vmatmul.mubr.msk.bf16.vlgmr.msra.gmra.mrb[96].mxu0 %vm666_vm8, %v8127_v56  ;;  %6873 = vmatprep.mubr.msk.bf16.mxu1 %vm7420_vm4, %v7419_v6 }
0x1fc4   : > { %6879 = vmatprep.mubr.msk.bf16.mxu0 %vm7420_vm4, %v7419_v6 }
0x202c   : > { %v3604_v25 = vpop.permute.xlu0 %3603 }
0x202d   : > { %v3609_v33 = vsel %vm666_vm8, %v3604_v25, 0  ;;  %v6216_v25 = vld [vmem:[%s8681_s6 + $0x10] sm:$0xf] }
0x2030   : > { %v3552_v9 = vpop.permute.xlu0 %3551 }
0x2031   : > { %v3557_v34 = vsel %vm666_vm8, %v3552_v9, 0 }
0x2034   : > { %v3601_v36 = vpop.permute.xlu0 %3600 }
0x2095   : > { %v3377_v57 = vpop.f32.mrb[88].mxu1 }
0x2096   : > { %v3423_v58 = vpop.f32.mrb[96].mxu0  ;;  %v6863_v60 = vpop.f32.mrb[89].mxu1  ;;  %v3378_v3 = vadd.f32 %v3377_v57, %v7607_v46 }
0x2097   : > { %v3424_v61 = vadd.f32 %v3423_v58, %v7607_v46  ;;  %v6869_v62 = vpop.f32.mrb[97].mxu0  ;;  %v3380_v63 = vpop.f32.mrb[90].mxu1 }
0x2098   : > { %v3426_v0 = vpop.f32.mrb[98].mxu0  ;;  %v6864_v1 = vpop.f32.mrb[91].mxu1  ;;  %v3429_v4 = vsel %vm759_vm10, %v3378_v3, -inf }
0x2099   : > { %v6870_v51 = vpop.f32.mrb[99].mxu0  ;;  %v3432_v30 = vsel %vm759_vm10, %v3424_v61, -inf }
0x209a   : > { %3433 = vmax.xlane.f32.xlu1 %v3432_v30 }
0x209e   : > { %3430 = vmax.xlane.f32.xlu1 %v3429_v4 }
0x2127   : > { %v3434_v53 = vpop.xlane.xlu1 %3433 }
0x2128   : > { %v3436_v31 = vsub.f32 %v3424_v61, %v3434_v53 }
0x212a   : > { %v3439_v8 = vmul.f32 1.442695, %v3436_v31 }
0x212b   : > { %v3431_v12 = vpop.xlane.xlu1 %3430 }
0x212c   : > { %7335 = vpow2.f32 %v3439_v8  ;;  %v3435_v24 = vsub.f32 %v3378_v3, %v3431_v12 }
0x212e   : > { %v3437_v21 = vmul.f32 1.442695, %v3435_v24 }
0x2130   : > { %7337 = vpow2.f32 %v3437_v21 }
0x2136   : > { %v7336_v5 = vpop.eup %7335 }
0x2137   : > { %v3444_v38 = vsel %vm759_vm10, %v7336_v5, 0.0 }
0x2138   : > { %3445 = vadd.xlane.f32.xlu1 %v3444_v38 }
0x213a   : > { %v7338_v7 = vpop.eup %7337 }
0x213b   : > { %v3441_v11 = vsel %vm759_vm10, %v7338_v7, 0.0 }
0x213c   : > { %3442 = vadd.xlane.f32.xlu1 %v3441_v11 }
0x214d   : > { %3310 = vrot.lane.b32.xlu1 %v3273_v35, %s8700_s23 }
0x2151   : > { %3548 = vrot.lane.b32.xlu1 %v8125_v55, %s7423_s25 }
0x21c5   : > { %v3446_v13 = vpop.xlane.xlu1 %3445 }
0x21c6   : > { %7339 = vrcp.f32 %v3446_v13 }
0x21c9   : > { %v3443_v14 = vpop.xlane.xlu1 %3442 }
0x21ca   : > { %7341 = vrcp.f32 %v3443_v14 }
0x21cd   : > { %v3311_v22 = vpop.permute.xlu1 %3310 }
0x21ce   : > { %6344 = vst.msk [vmem:[%s7620_s26 + $0xf] sm:$0x1] %vm639_vm6, %v3311_v22 }
0x21cf   : > { %6352 = vst.msk [vmem:[%s7620_s26 + $0x16] sm:$0x2] %vm648_vm7, %v3311_v22 }
0x21d0   : > { %v7340_v15 = vpop.eup %7339 }
0x21d1   : > { %v3450_v52 = vmul.f32 %v7340_v15, %v7336_v5  ;;  %v3549_v35 = vpop.permute.xlu1 %3548 }
0x21d3   : > { %v3452_v32 = vpack.c.bf16 %v3450_v52, %v3450_v52 }
0x21d4   : > { %v7342_v16 = vpop.eup %7341 }
0x21d5   : > { %v3449_v2 = vmul.f32 %v7342_v16, %v7338_v7 }
0x21d6   : > { %v3324_v18 = vld [vmem:[#allocation3 + $0x10] sm:$0xff]  ;;  %v3325_v19 = vld [vmem:[#allocation3 + $0x18] sm:$0xff] }
0x21d7   : > { %v8152_v20 = vpack.c.bf16 %v3324_v18, %v3324_v18  ;;  %v8154_v10 = vpack.c.bf16 %v3325_v19, %v3325_v19  ;;  %v3451_v29 = vpack.c.bf16 %v3449_v2, %v3449_v2 }
0x21d9   : > { %v3457_v27 = vsel %vm787_vm11, %v8152_v20, 0  ;;  %v3503_v28 = vsel %vm787_vm11, %v8154_v10, 0 }
0x21da   : > { %6872 = vmatpush3.bf16.msra.mxu1 %v3457_v27  ;;  %6878 = vmatpush3.bf16.msra.mxu0 %v3503_v28 }
0x21db   : > { %6883 = vmatprep.subr.bf16.mxu1 %v7419_v6  ;;  %6889 = vmatprep.subr.bf16.mxu0 %v7419_v6 }
0x21dd   : > { %6874 = vmatmul.mubr.msk.bf16.vlgmr.msra.gmra.mrb[92].mxu1 %vm666_vm8, %v3451_v29  ;;  %6880 = vmatmul.mubr.msk.bf16.vlgmr.msra.gmra.mrb[100].mxu0 %vm666_vm8, %v3452_v32  ;;  %v3839_v29 = vsel %vm787_vm11, %v6216_v25, 0 }
0x21de   : > { %6885 = vmatprep.mubr.msk.bf16.mxu1 %vm7420_vm4, %v7419_v6  ;;  %6891 = vmatprep.mubr.msk.bf16.mxu0 %vm7420_vm4, %v7419_v6 }
0x21e3   : > { %6884 = vmatpush3.bf16.xpose.msra.mxu1 %v3557_v34  ;;  %6890 = vmatpush3.bf16.xpose.msra.mxu0 %v3609_v33 }
0x21e4   : > { %6895 = vmatprep.subr.bf16.mxu1 %v7419_v6  ;;  %6901 = vmatprep.subr.bf16.mxu0 %v7419_v6 }
0x21ea   : > { %6886 = vmatmul.mubr.msk.bf16.vlgmr.msra.gmra.mrb[96].mxu1 %vm666_vm8, %v3549_v35  ;;  %6892 = vmatmul.mubr.msk.bf16.vlgmr.msra.gmra.mrb[104].mxu0 %vm666_vm8, %v3601_v36 }
0x21eb   : > { %6903 = vmatprep.mubr.msk.bf16.mxu0 %vm7420_vm4, %v7419_v6  ;;  %6897 = vmatprep.mubr.msk.bf16.mxu1 %vm7420_vm4, %v7419_v6 }
0x22b0   : > { %v3493_v37 = vpop.f32.mrb[92].mxu1  ;;  %v3539_v39 = vpop.f32.mrb[100].mxu0 }
0x22b1   : > { %v3545_v41 = vpack.c.bf16 %v3493_v37, %v3493_v37  ;;  %v3546_v42 = vpack.c.bf16 %v3539_v39, %v3539_v39  ;;  %v6875_v43 = vpop.f32.mrb[93].mxu1  ;;  %v6881_v44 = vpop.f32.mrb[101].mxu0  ;;  %v6217_v39 = vld [vmem:[%s8681_s6 + $0x14] sm:$0xf] }
0x22b2   : > { %v3496_v45 = vpop.f32.mrb[94].mxu1  ;;  %v3542_v47 = vpop.f32.mrb[102].mxu0 }
0x22b3   : > { %v3831_v49 = vunpack.c.l.b16 %v3546_v42  ;;  %v6876_v23 = vpop.f32.mrb[95].mxu1  ;;  %v6882_v50 = vpop.f32.mrb[103].mxu0  ;;  %v3830_v54 = vunpack.c.l.b16 %v3545_v41  ;;  %v3786_v41 = vsel %vm787_vm11, %v6217_v39, 0 }
0x22b5   : > { %v3832_v57 = vrot.slane %v3831_v49, 7 }
0x22b7   : > { %v8179_v58 = vsel %vm1112_vm12, %v3832_v57, %v3830_v54 }
0x22b8   : > { %v3834_v34 = vpack.c.b16 %v8179_v58, %v8179_v58 }
0x22bd   : > { %v3593_v60 = vpop.f32.mrb[96].mxu1  ;;  %v3645_v61 = vpop.f32.mrb[104].mxu0 }
0x22be   : > { %v3594_v62 = vadd.f32 %v3593_v60, %v7607_v46  ;;  %v3646_v63 = vadd.f32 %v3645_v61, %v7607_v46  ;;  %v6887_v0 = vpop.f32.mrb[97].mxu1  ;;  %v6893_v1 = vpop.f32.mrb[105].mxu0 }
0x22bf   : > { %v3596_v3 = vpop.f32.mrb[98].mxu1  ;;  %v3648_v51 = vpop.f32.mrb[106].mxu0 }
0x22c0   : > { %v6888_v30 = vpop.f32.mrb[99].mxu1  ;;  %v6894_v4 = vpop.f32.mrb[107].mxu0  ;;  %v3651_v53 = vsel %vm759_vm10, %v3594_v62, -inf  ;;  %v3654_v31 = vsel %vm759_vm10, %v3646_v63, -inf }
0x22c1   : > { %3652 = vmax.xlane.f32.xlu1 %v3651_v53  ;;  %3655 = vmax.xlane.f32.xlu0 %v3654_v31 }
0x22d2   : > { %3676 = vrot.lane.b32.xlu1 %v8152_v20, %s7423_s25 }
0x22d6   : > { %3933 = vrot.lane.b32.xlu1 %v8109_v48, %s8701_s24 }
0x22da   : > { %3883 = vrot.lane.b32.xlu1 %v8111_v59, %s8701_s24 }
0x22de   : > { %3881 = vrot.lane.b32.xlu1 %v8125_v55, %s8701_s24 }
0x234e   : > { %v3653_v8 = vpop.xlane.xlu1 %3652  ;;  %v3656_v12 = vpop.xlane.xlu0 %3655 }
0x234f   : > { %v3657_v24 = vsub.f32 %v3594_v62, %v3653_v8  ;;  %v3658_v21 = vsub.f32 %v3646_v63, %v3656_v12 }
0x2351   : > { %v3661_v5 = vmul.f32 1.442695, %v3658_v21  ;;  %v3659_v38 = vmul.f32 1.442695, %v3657_v24 }
0x2352   : > { %v3677_v7 = vpop.permute.xlu1 %3676 }
0x2353   : > { %v3682_v11 = vsel %vm787_vm11, %v3677_v7, 0  ;;  %7343 = vpow2.f32 %v3661_v5 }
0x2354   : > { %6896 = vmatpush3.bf16.msra.mxu1 %v3682_v11  ;;  %7345 = vpow2.f32 %v3659_v38 }
0x2355   : > { %6907 = vmatprep.subr.bf16.mxu1 %v7419_v6 }
0x2356   : > { %v3934_v36 = vpop.permute.xlu1 %3933 }
0x2357   : > { %v3939_v35 = vsel %vm666_vm8, %v3934_v36, 0 }
0x235a   : > { %v3884_v63 = vpop.permute.xlu1 %3883 }
0x235b   : > { %v3889_v4 = vsel %vm666_vm8, %v3884_v63, 0 }
0x235d   : > { %v7344_v13 = vpop.eup %7343 }
0x235e   : > { %v3666_v14 = vsel %vm759_vm10, %v7344_v13, 0.0  ;;  %v7346_v22 = vpop.eup %7345  ;;  %v3882_v12 = vpop.permute.xlu1 %3881 }
0x235f   : > { %3667 = vadd.xlane.f32.xlu0 %v3666_v14  ;;  %v3663_v15 = vsel %vm759_vm10, %v7346_v22, 0.0 }
0x2363   : > { %3664 = vadd.xlane.f32.xlu0 %v3663_v15 }
0x2379   : > { %3725 = vrot.lane.b32.xlu0 %v8154_v10, %s7423_s25 }
0x237d   : > { %3931 = vrot.lane.b32.xlu0 %v8127_v56, %s8701_s24 }
0x23ec   : > { %v3668_v16 = vpop.xlane.xlu0 %3667 }
0x23ed   : > { %7347 = vrcp.f32 %v3668_v16 }
0x23f0   : > { %v3665_v18 = vpop.xlane.xlu0 %3664 }
0x23f1   : > { %7349 = vrcp.f32 %v3665_v18 }
0x23f4   : > { %v3726_v19 = vpop.permute.xlu0 %3725 }
0x23f5   : > { %v3731_v52 = vsel %vm787_vm11, %v3726_v19, 0 }
0x23f6   : > { %6902 = vmatpush3.bf16.msra.mxu0 %v3731_v52 }
0x23f7   : > { %v7348_v2 = vpop.eup %7347  ;;  %6913 = vmatprep.subr.bf16.mxu0 %v7419_v6 }
0x23f8   : > { %v3672_v27 = vmul.f32 %v7348_v2, %v7344_v13  ;;  %v3932_v37 = vpop.permute.xlu0 %3931 }
0x23fa   : > { %v3674_v28 = vpack.c.bf16 %v3672_v27, %v3672_v27 }
0x23fb   : > { %v7350_v32 = vpop.eup %7349 }
0x23fc   : > { %v3671_v9 = vmul.f32 %v7350_v32, %v7346_v22  ;;  %6904 = vmatmul.mubr.msk.bf16.vlgmr.msra.gmra.mrb[108].mxu0 %vm666_vm8, %v3674_v28 }
0x23fd   : > { %6914 = vmatpush3.bf16.msra.mxu0 %v3839_v29  ;;  %6915 = vmatprep.mubr.msk.bf16.mxu0 %vm7420_vm4, %v7419_v6 }
0x23fe   : > { %v3673_v33 = vpack.c.bf16 %v3671_v9, %v3671_v9  ;;  %6925 = vmatprep.subr.bf16.mxu0 %v7419_v6 }
0x2400   : > { %6898 = vmatmul.mubr.msk.bf16.vlgmr.msra.gmra.mrb[100].mxu1 %vm666_vm8, %v3673_v33 }
0x2401   : > { %6909 = vmatprep.mubr.msk.bf16.mxu1 %vm7420_vm4, %v7419_v6  ;;  %6908 = vmatpush3.bf16.msra.mxu1 %v3786_v41 }
0x2402   : > { %6919 = vmatprep.subr.bf16.mxu1 %v7419_v6 }
0x2404   : > { %6916 = vmatmul.mubr.msk.bf16.vlgmr.msra.gmra.mrb[112].mxu0 %vm666_vm8, %v3834_v34 }
0x2405   : > { %6927 = vmatprep.mubr.msk.bf16.mxu0 %vm7420_vm4, %v7419_v6 }
0x2406   : > { %6926 = vmatpush3.bf16.xpose.msra.mxu0 %v3939_v35 }
0x2407   : > { %6937 = vmatprep.subr.bf16.mxu0 %v7419_v6 }
0x240d   : > { %6928 = vmatmul.mubr.msk.bf16.vlgmr.msra.gmra.mrb[116].mxu0 %vm666_vm8, %v3932_v37 }
0x240e   : > { %6939 = vmatprep.mubr.msk.bf16.mxu0 %vm7420_vm4, %v7419_v6 }
0x24cf   : > { %v3767_v42 = vpop.f32.mrb[108].mxu0 }
0x24d0   : > { %v3774_v43 = vpack.c.bf16 %v3767_v42, %v3767_v42  ;;  %v6905_v44 = vpop.f32.mrb[109].mxu0 }
0x24d1   : > { %v3770_v45 = vpop.f32.mrb[110].mxu0 }
0x24d2   : > { %v3778_v47 = vunpack.c.l.b16 %v3774_v43  ;;  %v6906_v49 = vpop.f32.mrb[111].mxu0 }
0x24d3   : > { %v3718_v23 = vpop.f32.mrb[100].mxu1 }
0x24d4   : > { %v3773_v50 = vpack.c.bf16 %v3718_v23, %v3718_v23  ;;  %v6899_v54 = vpop.f32.mrb[101].mxu1  ;;  %v3779_v58 = vrot.slane %v3778_v47, 7 }
0x24d5   : > { %v3721_v57 = vpop.f32.mrb[102].mxu1  ;;  %v6218_v54 = vld [vmem:[%s8681_s6 + $0x18] sm:$0xf] }
0x24d6   : > { %v3777_v60 = vunpack.c.l.b16 %v3773_v50  ;;  %v6900_v61 = vpop.f32.mrb[103].mxu1  ;;  %v4114_v57 = vsel %vm787_vm11, %v6218_v54, 0 }
0x24d7   : > { %v3875_v62 = vpop.f32.mrb[112].mxu0 }
0x24d8   : > { %v3780_v0 = vsel %vm1112_vm12, %v3779_v58, %v3777_v60  ;;  %v6917_v1 = vpop.f32.mrb[113].mxu0 }
0x24d9   : > { %v3781_v3 = vpack.c.b16 %v3780_v0, %v3780_v0  ;;  %v3878_v51 = vpop.f32.mrb[114].mxu0 }
0x24da   : > { %v6918_v30 = vpop.f32.mrb[115].mxu0 }
0x24db   : > { %6910 = vmatmul.mubr.msk.bf16.vlgmr.msra.gmra.mrb[104].mxu1 %vm666_vm8, %v3781_v3 }
0x24dc   : > { %6920 = vmatpush3.bf16.xpose.msra.mxu1 %v3889_v4  ;;  %6921 = vmatprep.mubr.msk.bf16.mxu1 %vm7420_vm4, %v7419_v6 }
0x24dd   : > { %6931 = vmatprep.subr.bf16.mxu1 %v7419_v6 }
0x24e0   : > { %v3975_v53 = vpop.f32.mrb[116].mxu0 }
0x24e1   : > { %v3976_v31 = vadd.f32 %v3975_v53, %v7607_v46  ;;  %v6929_v8 = vpop.f32.mrb[117].mxu0 }
0x24e2   : > { %v3978_v24 = vpop.f32.mrb[118].mxu0 }
0x24e3   : > { %v6930_v21 = vpop.f32.mrb[119].mxu0  ;;  %6922 = vmatmul.mubr.msk.bf16.vlgmr.msra.gmra.mrb[108].mxu1 %vm666_vm8, %v3882_v12  ;;  %v3984_v5 = vsel %vm759_vm10, %v3976_v31, -inf }
0x24e4   : > { %3985 = vmax.xlane.f32.xlu0 %v3984_v5  ;;  %6933 = vmatprep.mubr.msk.bf16.mxu1 %vm7420_vm4, %v7419_v6 }
0x2571   : > { %v3986_v38 = vpop.xlane.xlu0 %3985 }
0x2572   : > { %v3988_v7 = vsub.f32 %v3976_v31, %v3986_v38 }
0x2574   : > { %v3991_v11 = vmul.f32 1.442695, %v3988_v7 }
0x2576   : > { %7351 = vpow2.f32 %v3991_v11 }
0x2580   : > { %v7352_v13 = vpop.eup %7351 }
0x2581   : > { %v3996_v14 = vsel %vm759_vm10, %v7352_v13, 0.0 }
0x2582   : > { %3997 = vadd.xlane.f32.xlu0 %v3996_v14 }
0x25ae   : > { %v3822_v22 = vpop.f32.mrb[104].mxu1 }
0x25af   : > { %v8241_v15 = vadd.f32 %v3875_v62, %v3822_v22  ;;  %v6911_v16 = vpop.f32.mrb[105].mxu1 }
0x25b0   : > { %v3825_v18 = vpop.f32.mrb[106].mxu1 }
0x25b1   : > { %v6912_v19 = vpop.f32.mrb[107].mxu1 }
0x25b6   : > { %v3925_v52 = vpop.f32.mrb[108].mxu1 }
0x25b7   : > { %v3926_v2 = vadd.f32 %v3925_v52, %v7607_v46  ;;  %v6923_v25 = vpop.f32.mrb[109].mxu1 }
0x25b8   : > { %v3928_v27 = vpop.f32.mrb[110].mxu1 }
0x25b9   : > { %v6924_v28 = vpop.f32.mrb[111].mxu1  ;;  %v3981_v29 = vsel %vm759_vm10, %v3926_v2, -inf }
0x25ba   : > { %3982 = vmax.xlane.f32.xlu1 %v3981_v29 }
0x25cb   : > { %4005 = vrot.lane.b32.xlu1 %v8152_v20, %s8701_s24 }
0x25cf   : > { %4209 = vrot.lane.b32.xlu1 %v8109_v48, %s8702_s28 }
0x25d3   : > { %4159 = vrot.lane.b32.xlu1 %v8111_v59, %s8702_s28 }
0x25d7   : > { %4157 = vrot.lane.b32.xlu1 %v8125_v55, %s8702_s28 }
0x260f   : > { %v3998_v48 = vpop.xlane.xlu0 %3997 }
0x2647   : > { %v3983_v32 = vpop.xlane.xlu1 %3982 }
0x2648   : > { %v3987_v9 = vsub.f32 %v3926_v2, %v3983_v32 }
0x264a   : > { %v3989_v33 = vmul.f32 1.442695, %v3987_v9 }
0x264b   : > { %v4006_v34 = vpop.permute.xlu1 %4005 }
0x264c   : > { %7353 = vpow2.f32 %v3989_v33  ;;  %v4011_v36 = vsel %vm787_vm11, %v4006_v34, 0 }
0x264d   : > { %6932 = vmatpush3.bf16.msra.mxu1 %v4011_v36  ;;  %7355 = vrcp.f32 %v3998_v48 }
0x264e   : > { %6943 = vmatprep.subr.bf16.mxu1 %v7419_v6 }
0x264f   : > { %v4210_v42 = vpop.permute.xlu1 %4209 }
0x2650   : > { %v4215_v38 = vsel %vm666_vm8, %v4210_v42, 0 }
0x2653   : > { %v4160_v45 = vpop.permute.xlu1 %4159 }
0x2654   : > { %v4165_v49 = vsel %vm666_vm8, %v4160_v45, 0 }
0x2656   : > { %v7354_v35 = vpop.eup %7353 }
0x2657   : > { %v3993_v37 = vsel %vm759_vm10, %v7354_v35, 0.0  ;;  %v7356_v59 = vpop.eup %7355  ;;  %v4158_v50 = vpop.permute.xlu1 %4157 }
0x2658   : > { %3994 = vadd.xlane.f32.xlu0 %v3993_v37  ;;  %v4002_v39 = vmul.f32 %v7356_v59, %v7352_v13 }
0x265a   : > { %v4004_v44 = vpack.c.bf16 %v4002_v39, %v4002_v39 }
0x266e   : > { %4053 = vrot.lane.b32.xlu0 %v8154_v10, %s8701_s24 }
0x2672   : > { %4207 = vrot.lane.b32.xlu0 %v8127_v56, %s8702_s28 }
0x26e5   : > { %v3995_v55 = vpop.xlane.xlu0 %3994 }
0x26e6   : > { %7357 = vrcp.f32 %v3995_v55 }
0x26e9   : > { %v4054_v41 = vpop.permute.xlu0 %4053 }
0x26ea   : > { %v4059_v43 = vsel %vm787_vm11, %v4054_v41, 0 }
0x26eb   : > { %6938 = vmatpush3.bf16.msra.mxu0 %v4059_v43 }
0x26ec   : > { %6949 = vmatprep.subr.bf16.mxu0 %v7419_v6 }
0x26ed   : > { %v4208_v14 = vpop.permute.xlu0 %4207 }
0x26ee   : > { %6940 = vmatmul.mubr.msk.bf16.vlgmr.msra.gmra.mrb[120].mxu0 %vm666_vm8, %v4004_v44 }
0x26ef   : > { %6951 = vmatprep.mubr.msk.bf16.mxu0 %vm7420_vm4, %v7419_v6 }
0x26f0   : > { %v7358_v56 = vpop.eup %7357 }
0x26f1   : > { %v4001_v47 = vmul.f32 %v7358_v56, %v7354_v35 }
0x26f3   : > { %v4003_v23 = vpack.c.bf16 %v4001_v47, %v4001_v47 }
0x26f4   : > { %6950 = vmatpush3.bf16.xpose.msra.mxu0 %v4165_v49 }
0x26f5   : > { %6934 = vmatmul.mubr.msk.bf16.vlgmr.msra.gmra.mrb[112].mxu1 %vm666_vm8, %v4003_v23  ;;  %6961 = vmatprep.subr.bf16.mxu0 %v7419_v6 }
0x26f6   : > { %6945 = vmatprep.mubr.msk.bf16.mxu1 %vm7420_vm4, %v7419_v6  ;;  %6944 = vmatpush3.bf16.msra.mxu1 %v4114_v57 }
0x26f7   : > { %6955 = vmatprep.subr.bf16.mxu1 %v7419_v6 }
0x26fb   : > { %6952 = vmatmul.mubr.msk.bf16.vlgmr.msra.gmra.mrb[124].mxu0 %vm666_vm8, %v4158_v50 }
0x26fc   : > { %6963 = vmatprep.mubr.msk.bf16.mxu0 %vm7420_vm4, %v7419_v6 }
0x27c1   : > { %v4095_v58 = vpop.f32.mrb[120].mxu0 }
0x27c2   : > { %v6941_v60 = vpop.f32.mrb[121].mxu0  ;;  %v4102_v61 = vpack.c.bf16 %v4095_v58, %v4095_v58  ;;  %v6219_v58 = vld [vmem:[%s8681_s6 + $0x1c] sm:$0xf] }
0x27c3   : > { %v4098_v62 = vpop.f32.mrb[122].mxu0  ;;  %v4390_v60 = vsel %vm787_vm11, %v6219_v58, 0 }
0x27c4   : > { %v6942_v63 = vpop.f32.mrb[123].mxu0  ;;  %v4106_v0 = vunpack.c.l.b16 %v4102_v61 }
0x27c6   : > { %v4107_v4 = vrot.slane %v4106_v0, 7 }
0x27c8   : > { %v4047_v1 = vpop.f32.mrb[112].mxu1 }
0x27c9   : > { %v4101_v3 = vpack.c.bf16 %v4047_v1, %v4047_v1  ;;  %v6935_v51 = vpop.f32.mrb[113].mxu1 }
0x27ca   : > { %v4050_v30 = vpop.f32.mrb[114].mxu1 }
0x27cb   : > { %v4105_v53 = vunpack.c.l.b16 %v4101_v3  ;;  %v6936_v31 = vpop.f32.mrb[115].mxu1 }
0x27cd   : > { %v4108_v8 = vsel %vm1112_vm12, %v4107_v4, %v4105_v53 }
0x27ce   : > { %v4109_v12 = vpack.c.b16 %v4108_v8, %v4108_v8  ;;  %v4201_v24 = vpop.f32.mrb[124].mxu0 }
0x27cf   : > { %v4202_v21 = vadd.f32 %v4201_v24, %v7607_v46  ;;  %v6953_v5 = vpop.f32.mrb[125].mxu0 }
0x27d0   : > { %6946 = vmatmul.mubr.msk.bf16.vlgmr.msra.gmra.mrb[116].mxu1 %vm666_vm8, %v4109_v12  ;;  %v4204_v7 = vpop.f32.mrb[126].mxu0 }
0x27d1   : > { %6956 = vmatpush3.bf16.xpose.msra.mxu1 %v4215_v38  ;;  %v6954_v11 = vpop.f32.mrb[127].mxu0  ;;  %v4257_v13 = vsel %vm759_vm10, %v4202_v21, -inf  ;;  %6957 = vmatprep.mubr.msk.bf16.mxu1 %vm7420_vm4, %v7419_v6 }
0x27d2   : > { %4258 = vmax.xlane.f32.xlu1 %v4257_v13  ;;  %6967 = vmatprep.subr.bf16.mxu1 %v7419_v6  ;;  %v7245_v13 = vld [vmem:[%s8683_s8 + $0x10] sm:$0xff]  }
0x27d8   : > { %6958 = vmatmul.mubr.msk.bf16.vlgmr.msra.gmra.mrb[120].mxu1 %vm666_vm8, %v4208_v14  ;;  %v7246_v14 = vld [vmem:[%s8683_s8 + $0x18] sm:$0xff]  }
0x27d9   : > { %6969 = vmatprep.mubr.msk.bf16.mxu1 %vm7420_vm4, %v7419_v6 }
0x27e3   : > { %4281 = vrot.lane.b32.xlu1 %v8152_v20, %s8702_s28 }
0x285f   : > { %v4259_v22 = vpop.xlane.xlu1 %4258 }
0x2860   : > { %v4263_v19 = vsub.f32 %v4202_v21, %v4259_v22 }
0x2862   : > { %v4265_v52 = vmul.f32 1.442695, %v4263_v19  ;;  %v6241_v19 = vld [vmem:[%s8682_s7 + $0x1] ss:$0 sm:$0xff] }
0x2863   : > { %v4282_v16 = vpop.permute.xlu1 %4281 }
0x2864   : > { %v4287_v18 = vsel %vm787_vm11, %v4282_v16, 0  ;;  %7359 = vpow2.f32 %v4265_v52 }
0x2865   : > { %6962 = vmatpush3.bf16.msra.mxu0 %v4287_v18 }
0x2866   : > { %6973 = vmatprep.subr.bf16.mxu0 %v7419_v6 }
0x286e   : > { %v7360_v35 = vpop.eup %7359 }
0x286f   : > { %v4269_v37 = vsel %vm759_vm10, %v7360_v35, 0.0 }
0x28a3   : > { %v4150_v2 = vpop.f32.mrb[116].mxu1 }
0x28a4   : > { %v8294_v25 = vadd.f32 %v4150_v2, %v8241_v15  ;;  %v6947_v27 = vpop.f32.mrb[117].mxu1 }
0x28a5   : > { %v4153_v28 = vpop.f32.mrb[118].mxu1  ;;  %v8344_v27 = vld [vmem:[%s8699_s19 + $0x10] sm:$0xff]  }
0x28a6   : > { %v6948_v29 = vpop.f32.mrb[119].mxu1  ;;  %v4563_v28 = vsel %vm666_vm8, %v8344_v27, 0 }
0x28a7   : > { %v8351_v29 = vld [vmem:[%s8699_s19 + $0x18] sm:$0xff]  }
0x28ab   : > { %v4251_v32 = vpop.f32.mrb[120].mxu1 }
0x28ac   : > { %v4252_v20 = vadd.f32 %v4251_v32, %v7607_v46  ;;  %v6959_v9 = vpop.f32.mrb[121].mxu1  ;;  %v4614_v32 = vsel %vm666_vm8, %v8351_v29, 0 }
0x28ad   : > { %v4254_v33 = vpop.f32.mrb[122].mxu1 }
0x28ae   : > { %v6960_v34 = vpop.f32.mrb[123].mxu1  ;;  %v4260_v36 = vsel %vm759_vm10, %v4252_v20, -inf }
0x28af   : > { %4261 = vmax.xlane.f32.xlu0 %v4260_v36 }
0x28b3   : > { %4270 = vadd.xlane.f32.xlu0 %v4269_v37 }
0x293c   : > { %v4262_v48 = vpop.xlane.xlu0 %4261 }
0x293d   : > { %v4264_v15 = vsub.f32 %v4252_v20, %v4262_v48 }
0x293f   : > { %v4267_v59 = vmul.f32 1.442695, %v4264_v15 }
0x2940   : > { %v4271_v55 = vpop.xlane.xlu0 %4270 }
0x2941   : > { %7361 = vpow2.f32 %v4267_v59 }
0x2942   : > { %7363 = vrcp.f32 %v4271_v55 }
0x294b   : > { %v7362_v39 = vpop.eup %7361 }
0x294c   : > { %v7364_v41 = vpop.eup %7363  ;;  %v4272_v46 = vsel %vm759_vm10, %v7362_v39, 0.0 }
0x294d   : > { %v4277_v42 = vmul.f32 %v7364_v41, %v7360_v35  ;;  %4273 = vadd.xlane.f32.xlu0 %v4272_v46  ;;  %v8377_v46 = vld [vmem:[%s8677_s2 + $0x1] sm:$0x1] }
0x294f   : > { %v4279_v43 = vpack.c.bf16 %v4277_v42, %v4277_v42 }
0x2951   : > { %6964 = vmatmul.mubr.msk.bf16.vlgmr.msra.gmra.mrb[128].mxu0 %vm666_vm8, %v4279_v43 }
0x2952   : > { %6975 = vmatprep.mubr.msk.bf16.mxu0 %vm7420_vm4, %v7419_v6  ;;  %6974 = vmatpush3.bf16.msra.mxu0 %v4390_v60 }
0x2953   : > { %6987 = vmatprep.subr.bf16.mxu0 %v7419_v6 }
0x2963   : > { %4329 = vrot.lane.b32.xlu0 %v8154_v10, %s8702_s28 }
0x29da   : > { %v4274_v44 = vpop.xlane.xlu0 %4273 }
0x29db   : > { %7365 = vrcp.f32 %v4274_v44 }
0x29de   : > { %v4330_v56 = vpop.permute.xlu0 %4329 }
0x29df   : > { %v4335_v45 = vsel %vm787_vm11, %v4330_v56, 0 }
0x29e0   : > { %6968 = vmatpush3.bf16.msra.mxu1 %v4335_v45  ;;  %v8383_v45 = vld [vmem:[%s8677_s2] sm:$0x1] }
0x29e1   : > { %6979 = vmatprep.subr.bf16.mxu1 %v7419_v6 }
0x29e5   : > { %v7366_v47 = vpop.eup %7365 }
0x29e6   : > { %v4278_v49 = vmul.f32 %v7366_v47, %v7362_v39 }
0x29e8   : > { %v4280_v23 = vpack.c.bf16 %v4278_v49, %v4278_v49 }
0x29ea   : > { %6970 = vmatmul.mubr.msk.bf16.vlgmr.msra.gmra.mrb[124].mxu1 %vm666_vm8, %v4280_v23 }
0x29eb   : > { %6983 = vmatprep.mubr.msk.bf16.mxu1 %vm7420_vm4, %v7419_v6  ;;  %6980 = vmatpush3.bf16.msra.mxu1 %v7245_v13 }
0x29ec   : > { %6981 = vmatprep.subr.bf16.mxu1 %v7419_v6 }
0x29ef   : > { %6982 = vmatpush3.bf16.msra.mxu1 %v7246_v14 }
0x29f0   : > { %6993 = vmatprep.subr.bf16.mxu1 %v7419_v6 }
0x2a24   : > { %v4323_v50 = vpop.f32.mrb[128].mxu0 }
0x2a25   : > { %v6965_v54 = vpop.f32.mrb[129].mxu0  ;;  %v4377_v62 = vpack.c.bf16 %v4323_v50, %v4323_v50 }
0x2a26   : > { %v4326_v57 = vpop.f32.mrb[130].mxu0 }
0x2a27   : > { %v6966_v10 = vpop.f32.mrb[131].mxu0  ;;  %v4381_v30 = vunpack.c.l.b16 %v4377_v62 }
0x2abd   : > { %v4371_v61 = vpop.f32.mrb[124].mxu1 }
0x2abe   : > { %v4378_v63 = vpack.c.bf16 %v4371_v61, %v4371_v61  ;;  %v6971_v0 = vpop.f32.mrb[125].mxu1 }
0x2abf   : > { %v4374_v1 = vpop.f32.mrb[126].mxu1 }
0x2ac0   : > { %v4382_v3 = vunpack.c.l.b16 %v4378_v63  ;;  %v6972_v51 = vpop.f32.mrb[127].mxu1 }
0x2ac1   : > { %v8404_v51 = vld [vmem:[%s8676_s1 + $0x10] sm:$0xff]  }
0x2ac2   : > { %v4383_v4 = vrot.slane %v4382_v3, 7  ;;  %v8395_v3 = vld [vmem:[%s8676_s1 + $0x18] sm:$0xff]  }
0x2ac4   : > { %v4384_v53 = vsel %vm1112_vm12, %v4383_v4, %v4381_v30 }
0x2ac5   : > { %v4385_v31 = vpack.c.b16 %v4384_v53, %v4384_v53 }
0x2ac7   : > { %6976 = vmatmul.mubr.msk.bf16.vlgmr.msra.gmra.mrb[132].mxu0 %vm666_vm8, %v4385_v31 }
0x2ac8   : > { %6989 = vmatprep.mubr.msk.bf16.mxu0 %vm7420_vm4, %v7419_v6  ;;  %6988 = vmatpush3.bf16.xpose.msra.mxu0 %v4563_v28 }
0x2ac9   : > { %6999 = vmatprep.subr.bf16.mxu0 %v7419_v6 }
0x2b9a   : > { %v4426_v8 = vpop.f32.mrb[132].mxu0 }
0x2b9b   : > { %v4432_v12 = vadd.f32 %v4426_v8, %v8294_v25  ;;  %v6977_v24 = vpop.f32.mrb[133].mxu0 }
0x2b9c   : > { %v4429_v21 = vpop.f32.mrb[134].mxu0 }
0x2b9d   : > { %v8321_v5 = vadd.f32 %v4432_v12, %v8083_v17  ;;  %v6978_v38 = vpop.f32.mrb[135].mxu0 }
0x2b9f   : > { %v4436_v7 = vmul.f32 %v8321_v5, %v8321_v5 }
0x2ba1   : > { %v4437_v11 = vsel %vm533_vm3, %v4436_v7, 0.0 }
0x2ba2   : > { %4438 = vadd.xlane.f32.xlu1 %v4437_v11 }
0x2bb3   : > { %4834 = vrot.lane.b32.xlu1 %v8351_v29, %s7423_s25 }
0x2c2f   : > { %v4439_v17 = vpop.xlane.xlu1 %4438 }
0x2c30   : > { %v4440_v22 = vmul.f32 0.03125, %v4439_v17 }
0x2c32   : > { %v4441_v16 = vadd.f32 1e-06, %v4440_v22 }
0x2c33   : > { %v4835_v30 = vpop.permute.xlu1 %4834 }
0x2c34   : > { %7367 = vrsqrt.f32 %v4441_v16  ;;  %v4840_v38 = vsel %vm666_vm8, %v4835_v30, 0 }
0x2c3e   : > { %v7368_v18 = vpop.eup %7367 }
0x2c3f   : > { %v4443_v52 = vmul.f32 %v7368_v18, %v8321_v5 }
0x2c41   : > { %v4450_v2 = vmul.f32 %v6241_v19, %v4443_v52 }
0x2c43   : > { %v4451_v25 = vpack.c.bf16 %v4450_v2, %v4450_v2 }
0x2c45   : > { %6984 = vmatmul.mubr.msk.bf16.vlgmr.msra.gmra.mrb[128].mxu1 %vm566_vm5, %v4451_v25 }
0x2c46   : > { %6995 = vmatprep.mubr.msk.bf16.mxu1 %vm7420_vm4, %v7419_v6  ;;  %6994 = vmatpush3.bf16.xpose.msra.mxu1 %v4614_v32 }
0x2c47   : > { %7005 = vmatprep.subr.bf16.mxu1 %v7419_v6 }
0x2d18   : > { %v4506_v20 = vpop.f32.mrb[128].mxu1 }
0x2d19   : > { %v4519_v9 = vrot.slane %v4506_v20, %v7569_v26  ;;  %v6985_v33 = vpop.f32.mrb[129].mxu1 }
0x2d1a   : > { %v4509_v34 = vpop.f32.mrb[130].mxu1 }
0x2d1b   : > { %v4520_v36 = vcombine.high %v4519_v9, %v4519_v9  ;;  %v4527_v35 = vrot.slane %v4519_v9, %v7569_v26  ;;  %v6986_v37 = vpop.f32.mrb[131].mxu1 }
0x2d1d   : > { %v4534_v48 = vrot.slane %v4520_v36, %v7569_v26  ;;  %v8362_v15 = vpack.c.bf16 %v4527_v35, %v4527_v35 }
0x2d1f   : > { %v8364_v59 = vpack.c.bf16 %v4534_v48, %v4534_v48  ;;  %6990 = vmatmul.mubr.msk.bf16.vlgmr.msra.gmra.mrb[136].mxu0 %vm666_vm8, %v8362_v15 }
0x2d20   : > { %7001 = vmatprep.mubr.msk.bf16.mxu0 %vm7420_vm4, %v7419_v6  ;;  %7000 = vmatpush3.bf16.msra.mxu0 %v8404_v51 }
0x2d21   : > { %6996 = vmatmul.mubr.msk.bf16.vlgmr.msra.gmra.mrb[132].mxu1 %vm666_vm8, %v8364_v59  ;;  %7011 = vmatprep.subr.bf16.mxu0 %v7419_v6 }
0x2d22   : > { %7007 = vmatprep.mubr.msk.bf16.mxu1 %vm7420_vm4, %v7419_v6  ;;  %7006 = vmatpush3.bf16.msra.mxu1 %v8395_v3 }
0x2d23   : > { %7017 = vmatprep.subr.bf16.mxu1 %v7419_v6 }
0x2df2   : > { %v4599_v55 = vpop.f32.mrb[136].mxu0 }
0x2df3   : > { %v6991_v39 = vpop.f32.mrb[137].mxu0  ;;  %v4600_v47 = vadd.f32 %v8383_v45, %v4599_v55 }
0x2df4   : > { %v4602_v41 = vpop.f32.mrb[138].mxu0  ;;  %v4650_v26 = vpop.f32.mrb[132].mxu1 }
0x2df5   : > { %v4651_v42 = vadd.f32 %v8377_v46, %v4650_v26  ;;  %v6992_v43 = vpop.f32.mrb[139].mxu0  ;;  %v6997_v44 = vpop.f32.mrb[133].mxu1  ;;  %v4656_v50 = vsel %vm1984_vm13, %v4600_v47, -inf }
0x2df6   : > { %v4653_v56 = vpop.f32.mrb[134].mxu1 }
0x2df7   : > { %v6998_v49 = vpop.f32.mrb[135].mxu1  ;;  %v4659_v23 = vsel %vm1984_vm13, %v4651_v42, -inf }
0x2df8   : > { %4660 = vmax.xlane.f32.xlu0 %v4659_v23 }
0x2dfc   : > { %4657 = vmax.xlane.f32.xlu0 %v4656_v50 }
0x2e85   : > { %v4661_v54 = vpop.xlane.xlu0 %4660 }
0x2e86   : > { %v4663_v57 = vsub.f32 %v4651_v42, %v4661_v54 }
0x2e88   : > { %v4666_v10 = vmul.f32 1.442695, %v4663_v57 }
0x2e89   : > { %v4658_v58 = vpop.xlane.xlu0 %4657 }
0x2e8a   : > { %7369 = vpow2.f32 %v4666_v10  ;;  %v4662_v60 = vsub.f32 %v4600_v47, %v4658_v58 }
0x2e8c   : > { %v4664_v61 = vmul.f32 1.442695, %v4662_v60 }
0x2e8e   : > { %7371 = vpow2.f32 %v4664_v61 }
0x2e94   : > { %v7370_v62 = vpop.eup %7369 }
0x2e95   : > { %v4671_v63 = vsel %vm1984_vm13, %v7370_v62, 0.0 }
0x2e96   : > { %4672 = vadd.xlane.f32.xlu1 %v4671_v63 }
0x2e98   : > { %v7372_v0 = vpop.eup %7371 }
0x2e99   : > { %v4668_v1 = vsel %vm1984_vm13, %v7372_v0, 0.0 }
0x2e9a   : > { %4669 = vadd.xlane.f32.xlu0 %v4668_v1 }
0x2ea7   : > { %4832 = vrot.lane.b32.xlu1 %v8364_v59, %s7423_s25 }
0x2eab   : > { %4781 = vrot.lane.b32.xlu1 %v8362_v15, %s7423_s25 }
0x2eb0   : > { %4783 = vrot.lane.b32.xlu0 %v8344_v27, %s7423_s25 }
0x2f23   : > { %v4673_v4 = vpop.xlane.xlu1 %4672 }
0x2f24   : > { %7373 = vrcp.f32 %v4673_v4 }
0x2f27   : > { %v4670_v53 = vpop.xlane.xlu0 %4669  ;;  %v4833_v14 = vpop.permute.xlu1 %4832 }
0x2f28   : > { %7375 = vrcp.f32 %v4670_v53 }
0x2f2b   : > { %v4784_v21 = vpop.permute.xlu0 %4783  ;;  %v4782_v17 = vpop.permute.xlu1 %4781 }
0x2f2c   : > { %v4789_v11 = vsel %vm666_vm8, %v4784_v21, 0 }
0x2f2e   : > { %v7374_v31 = vpop.eup %7373 }
0x2f2f   : > { %v4677_v8 = vmul.f32 %v7374_v31, %v7370_v62 }
0x2f31   : > { %v4679_v12 = vpack.c.bf16 %v4677_v8, %v4677_v8 }
0x2f32   : > { %v7376_v24 = vpop.eup %7375 }
0x2f33   : > { %v4676_v7 = vmul.f32 %v7376_v24, %v7372_v0  ;;  %7008 = vmatmul.mubr.msk.bf16.vlgmr.msra.gmra.mrb[136].mxu1 %vm2015_vm14, %v4679_v12  ;;  %v6257_v12 = vld [vmem:[%s8684_s9 + $0x10] sm:$0xf] }
0x2f34   : > { %7018 = vmatpush3.bf16.xpose.msra.mxu1 %v4840_v38  ;;  %7019 = vmatprep.mubr.msk.bf16.mxu1 %vm7420_vm4, %v7419_v6  ;;  %v5064_v38 = vsel %vm787_vm11, %v6257_v12, 0 }
0x2f35   : > { %v4678_v13 = vpack.c.bf16 %v4676_v7, %v4676_v7  ;;  %7029 = vmatprep.subr.bf16.mxu1 %v7419_v6 }
0x2f37   : > { %7002 = vmatmul.mubr.msk.bf16.vlgmr.msra.gmra.mrb[140].mxu0 %vm2015_vm14, %v4678_v13 }
0x2f38   : > { %7012 = vmatpush3.bf16.xpose.msra.mxu0 %v4789_v11  ;;  %7013 = vmatprep.mubr.msk.bf16.mxu0 %vm7420_vm4, %v7419_v6 }
0x2f39   : > { %7023 = vmatprep.subr.bf16.mxu0 %v7419_v6 }
0x2f3b   : > { %7020 = vmatmul.mubr.msk.bf16.vlgmr.msra.gmra.mrb[140].mxu1 %vm666_vm8, %v4833_v14 }
0x2f3c   : > { %7031 = vmatprep.mubr.msk.bf16.mxu1 %vm7420_vm4, %v7419_v6 }
0x2f3f   : > { %7014 = vmatmul.mubr.msk.bf16.vlgmr.msra.gmra.mrb[144].mxu0 %vm666_vm8, %v4782_v17 }
0x2f40   : > { %7025 = vmatprep.mubr.msk.bf16.mxu0 %vm7420_vm4, %v7419_v6 }
0x3006   : > { %v4772_v22 = vpop.f32.mrb[136].mxu1 }
0x3007   : > { %v4779_v16 = vpack.c.bf16 %v4772_v22, %v4772_v22  ;;  %v7009_v18 = vpop.f32.mrb[137].mxu1  ;;  %v6258_v22 = vld [vmem:[%s8684_s9 + $0x14] sm:$0xf] }
0x3008   : > { %v4775_v19 = vpop.f32.mrb[138].mxu1 }
0x3009   : > { %v5056_v52 = vunpack.c.l.b16 %v4779_v16  ;;  %v7010_v2 = vpop.f32.mrb[139].mxu1  ;;  %v5011_v16 = vsel %vm787_vm11, %v6258_v22, 0 }
0x300a   : > { %v4723_v25 = vpop.f32.mrb[140].mxu0 }
0x300b   : > { %v4778_v28 = vpack.c.bf16 %v4723_v25, %v4723_v25  ;;  %v7003_v32 = vpop.f32.mrb[141].mxu0  ;;  %v5057_v9 = vrot.slane %v5056_v52, 7 }
0x300c   : > { %v4726_v20 = vpop.f32.mrb[142].mxu0 }
0x300d   : > { %v5055_v33 = vunpack.c.l.b16 %v4778_v28  ;;  %v7004_v34 = vpop.f32.mrb[143].mxu0 }
0x300e   : > { %v4876_v36 = vpop.f32.mrb[140].mxu1 }
0x300f   : > { %v5058_v35 = vsel %vm1112_vm12, %v5057_v9, %v5055_v33  ;;  %v4877_v37 = vadd.f32 %v8377_v46, %v4876_v36  ;;  %v7021_v48 = vpop.f32.mrb[141].mxu1 }
0x3010   : > { %v4879_v55 = vpop.f32.mrb[142].mxu1  ;;  %v5059_v11 = vpack.c.b16 %v5058_v35, %v5058_v35 }
0x3011   : > { %v7022_v39 = vpop.f32.mrb[143].mxu1  ;;  %v4885_v41 = vsel %vm1984_vm13, %v4877_v37, -inf }
0x3012   : > { %4886 = vmax.xlane.f32.xlu1 %v4885_v41  ;;  %v4825_v26 = vpop.f32.mrb[144].mxu0 }
0x3013   : > { %v4826_v42 = vadd.f32 %v8383_v45, %v4825_v26  ;;  %v7015_v43 = vpop.f32.mrb[145].mxu0 }
0x3014   : > { %v4828_v44 = vpop.f32.mrb[146].mxu0 }
0x3015   : > { %v7016_v56 = vpop.f32.mrb[147].mxu0  ;;  %v4882_v47 = vsel %vm1984_vm13, %v4826_v42, -inf }
0x3016   : > { %4883 = vmax.xlane.f32.xlu0 %v4882_v47 }
0x3023   : > { %4952 = vrot.lane.b32.xlu1 %v8395_v3, %s7423_s25 }
0x3027   : > { %5158 = vrot.lane.b32.xlu1 %v8351_v29, %s8701_s24 }
0x302b   : > { %5108 = vrot.lane.b32.xlu1 %v8344_v27, %s8701_s24 }
0x302f   : > { %5156 = vrot.lane.b32.xlu1 %v8364_v59, %s8701_s24 }
0x309f   : > { %v4887_v49 = vpop.xlane.xlu1 %4886 }
0x30a0   : > { %v4889_v23 = vsub.f32 %v4877_v37, %v4887_v49 }
0x30a2   : > { %v4892_v10 = vmul.f32 1.442695, %v4889_v23 }
0x30a3   : > { %v4953_v50 = vpop.permute.xlu1 %4952  ;;  %v4884_v54 = vpop.xlane.xlu0 %4883 }
0x30a4   : > { %v4888_v57 = vsub.f32 %v4826_v42, %v4884_v54  ;;  %7030 = vmatpush3.bf16.msra.mxu1 %v4953_v50 }
0x30a5   : > { %7041 = vmatprep.subr.bf16.mxu1 %v7419_v6 }
0x30a6   : > { %v4890_v58 = vmul.f32 1.442695, %v4888_v57 }
0x30a7   : > { %v5159_v7 = vpop.permute.xlu1 %5158 }
0x30a8   : > { %7377 = vpow2.f32 %v4890_v58  ;;  %v5164_v13 = vsel %vm666_vm8, %v5159_v7, 0 }
0x30a9   : > { %7379 = vpow2.f32 %v4892_v10 }
0x30ab   : > { %v5109_v14 = vpop.permute.xlu1 %5108 }
0x30ac   : > { %v5114_v48 = vsel %vm666_vm8, %v5109_v14, 0 }
0x30af   : > { %v5157_v17 = vpop.permute.xlu1 %5156 }
0x30b2   : > { %v7378_v60 = vpop.eup %7377 }
0x30b3   : > { %v4894_v61 = vsel %vm1984_vm13, %v7378_v60, 0.0  ;;  %v7380_v62 = vpop.eup %7379 }
0x30b4   : > { %4895 = vadd.xlane.f32.xlu0 %v4894_v61  ;;  %v4897_v63 = vsel %vm1984_vm13, %v7380_v62, 0.0 }
0x30b8   : > { %4898 = vadd.xlane.f32.xlu0 %v4897_v63 }
0x30ce   : > { %4906 = vrot.lane.b32.xlu0 %v8404_v51, %s7423_s25 }
0x30d2   : > { %5106 = vrot.lane.b32.xlu0 %v8362_v15, %s8701_s24 }
0x3141   : > { %v4896_v0 = vpop.xlane.xlu0 %4895 }
0x3142   : > { %7381 = vrcp.f32 %v4896_v0 }
0x3145   : > { %v4899_v1 = vpop.xlane.xlu0 %4898 }
0x3146   : > { %7383 = vrcp.f32 %v4899_v1 }
0x3149   : > { %v4907_v30 = vpop.permute.xlu0 %4906 }
0x314a   : > { %7024 = vmatpush3.bf16.msra.mxu0 %v4907_v30 }
0x314b   : > { %7035 = vmatprep.subr.bf16.mxu0 %v7419_v6 }
0x314c   : > { %v7382_v4 = vpop.eup %7381 }
0x314d   : > { %v4902_v53 = vmul.f32 %v7382_v4, %v7378_v60  ;;  %v5107_v43 = vpop.permute.xlu0 %5106 }
0x314f   : > { %v4904_v31 = vpack.c.bf16 %v4902_v53, %v4902_v53 }
0x3150   : > { %v7384_v8 = vpop.eup %7383 }
0x3151   : > { %v4903_v24 = vmul.f32 %v7384_v8, %v7380_v62  ;;  %7026 = vmatmul.mubr.msk.bf16.vlgmr.msra.gmra.mrb[148].mxu0 %vm2015_vm14, %v4904_v31 }
0x3152   : > { %7037 = vmatprep.mubr.msk.bf16.mxu0 %vm7420_vm4, %v7419_v6  ;;  %7036 = vmatpush3.bf16.msra.mxu0 %v5011_v16 }
0x3153   : > { %v4905_v21 = vpack.c.bf16 %v4903_v24, %v4903_v24  ;;  %7047 = vmatprep.subr.bf16.mxu0 %v7419_v6 }
0x3155   : > { %7032 = vmatmul.mubr.msk.bf16.vlgmr.msra.gmra.mrb[144].mxu1 %vm2015_vm14, %v4905_v21 }
0x3156   : > { %7042 = vmatpush3.bf16.msra.mxu1 %v5064_v38  ;;  %7043 = vmatprep.mubr.msk.bf16.mxu1 %vm7420_vm4, %v7419_v6 }
0x3157   : > { %7053 = vmatprep.subr.bf16.mxu1 %v7419_v6 }
0x315d   : > { %7044 = vmatmul.mubr.msk.bf16.vlgmr.msra.gmra.mrb[148].mxu1 %vm666_vm8, %v5059_v11 }
0x315e   : > { %7055 = vmatprep.mubr.msk.bf16.mxu1 %vm7420_vm4, %v7419_v6 }
0x315f   : > { %7054 = vmatpush3.bf16.xpose.msra.mxu1 %v5164_v13 }
0x3160   : > { %7065 = vmatprep.subr.bf16.mxu1 %v7419_v6 }
0x3166   : > { %7056 = vmatmul.mubr.msk.bf16.vlgmr.msra.gmra.mrb[152].mxu1 %vm666_vm8, %v5157_v17 }
0x3167   : > { %7067 = vmatprep.mubr.msk.bf16.mxu1 %vm7420_vm4, %v7419_v6 }
0x3224   : > { %v4946_v18 = vpop.f32.mrb[148].mxu0 }
0x3225   : > { %v7027_v19 = vpop.f32.mrb[149].mxu0  ;;  %v4998_v28 = vpack.c.bf16 %v4946_v18, %v4946_v18 }
0x3226   : > { %v4949_v52 = vpop.f32.mrb[150].mxu0 }
0x3227   : > { %v7028_v2 = vpop.f32.mrb[151].mxu0  ;;  %v5002_v36 = vunpack.c.l.b16 %v4998_v28 }
0x3228   : > { %v4992_v25 = vpop.f32.mrb[144].mxu1 }
0x3229   : > { %v4999_v32 = vpack.c.bf16 %v4992_v25, %v4992_v25  ;;  %v7033_v20 = vpop.f32.mrb[145].mxu1 }
0x322a   : > { %v4995_v9 = vpop.f32.mrb[146].mxu1 }
0x322b   : > { %v5003_v33 = vunpack.c.l.b16 %v4999_v32  ;;  %v7034_v34 = vpop.f32.mrb[147].mxu1 }
0x322d   : > { %v5004_v35 = vrot.slane %v5003_v33, 7  ;;  %v6259_v33 = vld [vmem:[%s8684_s9 + $0x18] sm:$0xf] }
0x322e   : > { %v5335_v34 = vsel %vm787_vm11, %v6259_v33, 0 }
0x322f   : > { %v5005_v37 = vsel %vm1112_vm12, %v5004_v35, %v5002_v36 }
0x3230   : > { %v5006_v55 = vpack.c.b16 %v5005_v37, %v5005_v37  ;;  %v5100_v39 = vpop.f32.mrb[148].mxu1 }
0x3231   : > { %v7045_v41 = vpop.f32.mrb[149].mxu1 }
0x3232   : > { %7038 = vmatmul.mubr.msk.bf16.vlgmr.msra.gmra.mrb[152].mxu0 %vm666_vm8, %v5006_v55  ;;  %v5103_v26 = vpop.f32.mrb[150].mxu1 }
0x3233   : > { %v7046_v42 = vpop.f32.mrb[151].mxu1  ;;  %7048 = vmatpush3.bf16.xpose.msra.mxu0 %v5114_v48  ;;  %7049 = vmatprep.mubr.msk.bf16.mxu0 %vm7420_vm4, %v7419_v6 }
0x3234   : > { %7059 = vmatprep.subr.bf16.mxu0 %v7419_v6 }
0x3239   : > { %v5200_v44 = vpop.f32.mrb[152].mxu1 }
0x323a   : > { %v5201_v56 = vadd.f32 %v8377_v46, %v5200_v44  ;;  %v7057_v47 = vpop.f32.mrb[153].mxu1  ;;  %7050 = vmatmul.mubr.msk.bf16.vlgmr.msra.gmra.mrb[156].mxu0 %vm666_vm8, %v5107_v43 }
0x323b   : > { %v5203_v49 = vpop.f32.mrb[154].mxu1  ;;  %7061 = vmatprep.mubr.msk.bf16.mxu0 %vm7420_vm4, %v7419_v6 }
0x323c   : > { %v7058_v23 = vpop.f32.mrb[155].mxu1  ;;  %v5209_v50 = vsel %vm1984_vm13, %v5201_v56, -inf }
0x323d   : > { %5210 = vmax.xlane.f32.xlu1 %v5209_v50 }
0x324e   : > { %5276 = vrot.lane.b32.xlu1 %v8395_v3, %s8701_s24 }
0x3252   : > { %5430 = vrot.lane.b32.xlu1 %v8351_v29, %s8702_s28 }
0x3256   : > { %5380 = vrot.lane.b32.xlu1 %v8344_v27, %s8702_s28 }
0x325a   : > { %5428 = vrot.lane.b32.xlu1 %v8364_v59, %s8702_s28 }
0x32ca   : > { %v5211_v54 = vpop.xlane.xlu1 %5210 }
0x32cb   : > { %v5213_v10 = vsub.f32 %v5201_v56, %v5211_v54 }
0x32cd   : > { %v5216_v58 = vmul.f32 1.442695, %v5213_v10 }
0x32ce   : > { %v5277_v57 = vpop.permute.xlu1 %5276 }
0x32cf   : > { %7066 = vmatpush3.bf16.msra.mxu1 %v5277_v57  ;;  %7385 = vpow2.f32 %v5216_v58 }
0x32d0   : > { %7077 = vmatprep.subr.bf16.mxu1 %v7419_v6 }
0x32d2   : > { %v5431_v38 = vpop.permute.xlu1 %5430 }
0x32d6   : > { %v5381_v17 = vpop.permute.xlu1 %5380 }
0x32d7   : > { %v5386_v22 = vsel %vm666_vm8, %v5381_v17, 0 }
0x32d9   : > { %v7386_v53 = vpop.eup %7385 }
0x32da   : > { %v5221_v31 = vsel %vm1984_vm13, %v7386_v53, 0.0  ;;  %v5429_v57 = vpop.permute.xlu1 %5428 }
0x3305   : > { %v5047_v60 = vpop.f32.mrb[152].mxu0 }
0x3306   : > { %v8491_v61 = vadd.f32 %v5100_v39, %v5047_v60  ;;  %v7039_v62 = vpop.f32.mrb[153].mxu0 }
0x3307   : > { %v5050_v63 = vpop.f32.mrb[154].mxu0 }
0x3308   : > { %v7040_v29 = vpop.f32.mrb[155].mxu0 }
0x330d   : > { %v5150_v0 = vpop.f32.mrb[156].mxu0 }
0x330e   : > { %v5151_v27 = vadd.f32 %v8383_v45, %v5150_v0  ;;  %v7051_v1 = vpop.f32.mrb[157].mxu0 }
0x330f   : > { %v5153_v30 = vpop.f32.mrb[158].mxu0 }
0x3310   : > { %v7052_v59 = vpop.f32.mrb[159].mxu0  ;;  %v5206_v4 = vsel %vm1984_vm13, %v5151_v27, -inf }
0x3311   : > { %5207 = vmax.xlane.f32.xlu0 %v5206_v4 }
0x3315   : > { %5222 = vadd.xlane.f32.xlu0 %v5221_v31 }
0x339e   : > { %v5208_v8 = vpop.xlane.xlu0 %5207 }
0x339f   : > { %v5212_v12 = vsub.f32 %v5151_v27, %v5208_v8 }
0x33a1   : > { %v5214_v24 = vmul.f32 1.442695, %v5212_v12 }
0x33a2   : > { %v5223_v21 = vpop.xlane.xlu0 %5222 }
0x33a3   : > { %7387 = vpow2.f32 %v5214_v24 }
0x33a4   : > { %7389 = vrcp.f32 %v5223_v21 }
0x33ad   : > { %v7388_v7 = vpop.eup %7387 }
0x33ae   : > { %v7390_v11 = vpop.eup %7389  ;;  %v5218_v13 = vsel %vm1984_vm13, %v7388_v7, 0.0 }
0x33af   : > { %v5227_v14 = vmul.f32 %v7390_v11, %v7386_v53  ;;  %5219 = vadd.xlane.f32.xlu0 %v5218_v13 }
0x33b1   : > { %v5229_v16 = vpack.c.bf16 %v5227_v14, %v5227_v14 }
0x33b3   : > { %7068 = vmatmul.mubr.msk.bf16.vlgmr.msra.gmra.mrb[156].mxu1 %vm2015_vm14, %v5229_v16 }
0x33b4   : > { %7078 = vmatpush3.bf16.xpose.msra.mxu1 %v5386_v22  ;;  %7079 = vmatprep.mubr.msk.bf16.mxu1 %vm7420_vm4, %v7419_v6 }
0x33b5   : > { %7089 = vmatprep.subr.bf16.mxu1 %v7419_v6 }
0x33c5   : > { %5230 = vrot.lane.b32.xlu0 %v8404_v51, %s8701_s24 }
0x33c9   : > { %5378 = vrot.lane.b32.xlu0 %v8362_v15, %s8702_s28 }
0x343c   : > { %v5220_v18 = vpop.xlane.xlu0 %5219 }
0x343d   : > { %7391 = vrcp.f32 %v5220_v18 }
0x3440   : > { %v5231_v19 = vpop.permute.xlu0 %5230 }
0x3441   : > { %7060 = vmatpush3.bf16.msra.mxu0 %v5231_v19  ;;  %v6260_v19 = vld [vmem:[%s8684_s9 + $0x1c] sm:$0xf] }
0x3442   : > { %7071 = vmatprep.subr.bf16.mxu0 %v7419_v6 }
0x3444   : > { %v5379_v52 = vpop.permute.xlu0 %5378 }
0x3445   : > { %7080 = vmatmul.mubr.msk.bf16.vlgmr.msra.gmra.mrb[160].mxu1 %vm666_vm8, %v5379_v52  ;;  %v5607_v52 = vsel %vm787_vm11, %v6260_v19, 0 }
0x3446   : > { %7091 = vmatprep.mubr.msk.bf16.mxu1 %vm7420_vm4, %v7419_v6 }
0x3447   : > { %v7392_v2 = vpop.eup %7391 }
0x3448   : > { %v5226_v25 = vmul.f32 %v7392_v2, %v7388_v7 }
0x344a   : > { %v5228_v28 = vpack.c.bf16 %v5226_v25, %v5226_v25 }
0x344c   : > { %7062 = vmatmul.mubr.msk.bf16.vlgmr.msra.gmra.mrb[160].mxu0 %vm2015_vm14, %v5228_v28 }
0x344d   : > { %7073 = vmatprep.mubr.msk.bf16.mxu0 %vm7420_vm4, %v7419_v6  ;;  %7072 = vmatpush3.bf16.msra.mxu0 %v5335_v34 }
0x344e   : > { %7083 = vmatprep.subr.bf16.mxu0 %v7419_v6 }
0x3486   : > { %v5316_v15 = vpop.f32.mrb[156].mxu1 }
0x3487   : > { %v7069_v32 = vpop.f32.mrb[157].mxu1  ;;  %v5323_v48 = vpack.c.bf16 %v5316_v15, %v5316_v15 }
0x3488   : > { %v5319_v20 = vpop.f32.mrb[158].mxu1 }
0x3489   : > { %v7070_v9 = vpop.f32.mrb[159].mxu1  ;;  %v5327_v26 = vunpack.c.l.b16 %v5323_v48 }
0x348b   : > { %v5328_v47 = vrot.slane %v5327_v26, 7 }
0x3518   : > { %v5422_v36 = vpop.f32.mrb[160].mxu1 }
0x3519   : > { %v5423_v35 = vadd.f32 %v8383_v45, %v5422_v36  ;;  %v7081_v37 = vpop.f32.mrb[161].mxu1  ;;  %v5436_v45 = vsel %vm666_vm8, %v5431_v38, 0 }
0x351a   : > { %v5425_v55 = vpop.f32.mrb[162].mxu1 }
0x351b   : > { %v7082_v39 = vpop.f32.mrb[163].mxu1  ;;  %v5478_v41 = vsel %vm1984_vm13, %v5423_v35, -inf }
0x351c   : > { %5479 = vmax.xlane.f32.xlu0 %v5478_v41 }
0x351f   : > { %v5270_v42 = vpop.f32.mrb[160].mxu0 }
0x3520   : > { %v5322_v43 = vpack.c.bf16 %v5270_v42, %v5270_v42  ;;  %v7063_v44 = vpop.f32.mrb[161].mxu0 }
0x3521   : > { %v5273_v56 = vpop.f32.mrb[162].mxu0 }
0x3522   : > { %v5326_v49 = vunpack.c.l.b16 %v5322_v43  ;;  %v7064_v23 = vpop.f32.mrb[163].mxu0 }
0x3523   : > { %v7251_v23 = vld [vmem:[%s8686_s11 + $0x10] sm:$0xff]  }
0x3524   : > { %v5329_v50 = vsel %vm1112_vm12, %v5328_v47, %v5326_v49 }
0x3525   : > { %v5330_v54 = vpack.c.b16 %v5329_v50, %v5329_v50  ;;  %v7252_v50 = vld [vmem:[%s8687_s12 + $0x10] sm:$0xff]  }
0x3527   : > { %7074 = vmatmul.mubr.msk.bf16.vlgmr.msra.gmra.mrb[164].mxu0 %vm666_vm8, %v5330_v54  ;;  %v7254_v54 = vld [vmem:[%s8687_s12 + $0x18] sm:$0xff]  }
0x3528   : > { %7084 = vmatpush3.bf16.xpose.msra.mxu0 %v5436_v45  ;;  %7085 = vmatprep.mubr.msk.bf16.mxu0 %vm7420_vm4, %v7419_v6 }
0x3529   : > { %7095 = vmatprep.subr.bf16.mxu0 %v7419_v6 }
0x352f   : > { %7086 = vmatmul.mubr.msk.bf16.vlgmr.msra.gmra.mrb[168].mxu0 %vm666_vm8, %v5429_v57 }
0x3530   : > { %7097 = vmatprep.mubr.msk.bf16.mxu0 %vm7420_vm4, %v7419_v6 }
0x35a9   : > { %v5480_v10 = vpop.xlane.xlu0 %5479 }
0x35aa   : > { %v5484_v58 = vsub.f32 %v5423_v35, %v5480_v10 }
0x35ac   : > { %v5486_v60 = vmul.f32 1.442695, %v5484_v58 }
0x35ae   : > { %7393 = vpow2.f32 %v5486_v60  ;;  %v6286_v60 = vld [vmem:[%s8685_s10 + $0x1] ss:$0 sm:$0xff] }
0x35b8   : > { %v7394_v62 = vpop.eup %7393 }
0x35b9   : > { %v5490_v63 = vsel %vm1984_vm13, %v7394_v62, 0.0 }
0x35ba   : > { %5491 = vadd.xlane.f32.xlu0 %v5490_v63 }
0x35fa   : > { %v5371_v29 = vpop.f32.mrb[164].mxu0 }
0x35fb   : > { %v5377_v0 = vadd.f32 %v5371_v29, %v8491_v61  ;;  %v7075_v27 = vpop.f32.mrb[165].mxu0 }
0x35fc   : > { %v5374_v1 = vpop.f32.mrb[166].mxu0  ;;  %v7256_v27 = vld [vmem:[%s8688_s13 + $0x28] sm:$0xff]  }
0x35fd   : > { %v7076_v30 = vpop.f32.mrb[167].mxu0  ;;  %v7257_v1 = vld [vmem:[%s8688_s13 + $0x30] sm:$0xff]  }
0x35fe   : > { %v7258_v30 = vld [vmem:[%s8688_s13 + $0x38] sm:$0xff]  }
0x3602   : > { %v5472_v59 = vpop.f32.mrb[168].mxu0 }
0x3603   : > { %v5473_v4 = vadd.f32 %v8377_v46, %v5472_v59  ;;  %v7087_v53 = vpop.f32.mrb[169].mxu0 }
0x3604   : > { %v5475_v31 = vpop.f32.mrb[170].mxu0 }
0x3605   : > { %v7088_v8 = vpop.f32.mrb[171].mxu0  ;;  %v5481_v12 = vsel %vm1984_vm13, %v5473_v4, -inf }
0x3606   : > { %5482 = vmax.xlane.f32.xlu1 %v5481_v12 }
0x3617   : > { %5548 = vrot.lane.b32.xlu1 %v8395_v3, %s8702_s28 }
0x3647   : > { %v5492_v11 = vpop.xlane.xlu0 %5491 }
0x3693   : > { %v5483_v24 = vpop.xlane.xlu1 %5482 }
0x3694   : > { %v5485_v21 = vsub.f32 %v5473_v4, %v5483_v24 }
0x3696   : > { %v5488_v38 = vmul.f32 1.442695, %v5485_v21 }
0x3697   : > { %v5549_v46 = vpop.permute.xlu1 %5548 }
0x3698   : > { %7395 = vpow2.f32 %v5488_v38  ;;  %7096 = vmatpush3.bf16.msra.mxu0 %v5549_v46 }
0x3699   : > { %7107 = vmatprep.subr.bf16.mxu0 %v7419_v6  ;;  %7397 = vrcp.f32 %v5492_v11 }
0x36a2   : > { %v7396_v61 = vpop.eup %7395 }
0x36a3   : > { %v5493_v7 = vsel %vm1984_vm13, %v7396_v61, 0.0  ;;  %v7398_v13 = vpop.eup %7397 }
0x36a4   : > { %5494 = vadd.xlane.f32.xlu0 %v5493_v7  ;;  %v5498_v3 = vmul.f32 %v7398_v13, %v7394_v62 }
0x36a6   : > { %v5500_v22 = vpack.c.bf16 %v5498_v3, %v5498_v3 }
0x36ba   : > { %5502 = vrot.lane.b32.xlu0 %v8404_v51, %s8702_s28 }
0x3731   : > { %v5495_v14 = vpop.xlane.xlu0 %5494 }
0x3732   : > { %7399 = vrcp.f32 %v5495_v14 }
0x3735   : > { %v5503_v17 = vpop.permute.xlu0 %5502 }
0x3736   : > { %7090 = vmatpush3.bf16.msra.mxu1 %v5503_v17 }
0x3737   : > { %7101 = vmatprep.subr.bf16.mxu1 %v7419_v6 }
0x3739   : > { %7092 = vmatmul.mubr.msk.bf16.vlgmr.msra.gmra.mrb[164].mxu1 %vm2015_vm14, %v5500_v22 }
0x373a   : > { %7103 = vmatprep.mubr.msk.bf16.mxu1 %vm7420_vm4, %v7419_v6  ;;  %7102 = vmatpush3.bf16.msra.mxu1 %v5607_v52 }
0x373b   : > { %7115 = vmatprep.subr.bf16.mxu1 %v7419_v6 }
0x373c   : > { %v7400_v51 = vpop.eup %7399 }
0x373d   : > { %v5499_v16 = vmul.f32 %v7400_v51, %v7396_v61 }
0x373f   : > { %v5501_v18 = vpack.c.bf16 %v5499_v16, %v5499_v16 }
0x3741   : > { %7098 = vmatmul.mubr.msk.bf16.vlgmr.msra.gmra.mrb[172].mxu0 %vm2015_vm14, %v5501_v18 }
0x3742   : > { %7111 = vmatprep.mubr.msk.bf16.mxu0 %vm7420_vm4, %v7419_v6  ;;  %7108 = vmatpush3.bf16.msra.mxu0 %v7251_v23 }
0x3743   : > { %7109 = vmatprep.subr.bf16.mxu0 %v7419_v6 }
0x380c   : > { %v5542_v2 = vpop.f32.mrb[164].mxu1 }
0x380d   : > { %v7093_v25 = vpop.f32.mrb[165].mxu1  ;;  %v5594_v20 = vpack.c.bf16 %v5542_v2, %v5542_v2 }
0x380e   : > { %v5545_v28 = vpop.f32.mrb[166].mxu1 }
0x380f   : > { %v7094_v15 = vpop.f32.mrb[167].mxu1  ;;  %v5598_v37 = vunpack.c.l.b16 %v5594_v20 }
0x3810   : > { %v7259_v15 = vld [vmem:[%s8690_s15] sm:$0xff]  }
0x3814   : > { %v5588_v32 = vpop.f32.mrb[172].mxu0 }
0x3815   : > { %v5595_v9 = vpack.c.bf16 %v5588_v32, %v5588_v32  ;;  %v7099_v33 = vpop.f32.mrb[173].mxu0  ;;  %v7260_v32 = vld [vmem:[%s8690_s15 + $0x8] sm:$0xff]  }
0x3816   : > { %v5591_v34 = vpop.f32.mrb[174].mxu0 }
0x3817   : > { %v5599_v36 = vunpack.c.l.b16 %v5595_v9  ;;  %v7100_v35 = vpop.f32.mrb[175].mxu0 }
0x3819   : > { %v5600_v48 = vrot.slane %v5599_v36, 7  ;;  %v6314_v36 = vld [vmem:[%s8689_s14] ss:$0 sm:$0xff] }
0x381b   : > { %v5601_v55 = vsel %vm1112_vm12, %v5600_v48, %v5598_v37 }
0x381c   : > { %v5602_v39 = vpack.c.b16 %v5601_v55, %v5601_v55 }
0x381e   : > { %7104 = vmatmul.mubr.msk.bf16.vlgmr.msra.gmra.mrb[168].mxu1 %vm666_vm8, %v5602_v39 }
0x381f   : > { %7119 = vmatprep.mubr.msk.bf16.mxu1 %vm7420_vm4, %v7419_v6  ;;  %7116 = vmatpush3.bf16.msra.mxu1 %v7252_v50  ;;  %v7428_v50 = vmov 0  }
0x3820   : > { %7117 = vmatprep.subr.bf16.mxu1 %v7419_v6  ;;  %7225 = vset.pattern.permute.xlu1 %v7428_v50 }
0x3821   : > { %7226 = vset.pattern.permute.xlu0 %v7428_v50 }
0x3823   : > { %7118 = vmatpush3.bf16.msra.mxu1 %v7254_v54  ;;  %v5981_v54 = vld [vmem:[%s8678_s3 + $0x8] sm:$0xff] }
0x3824   : > { %7135 = vmatprep.subr.bf16.mxu1 %v7419_v6 }
0x38f1   : > { %v5643_v41 = vpop.f32.mrb[168].mxu1 }
0x38f2   : > { %v5649_v26 = vadd.f32 %v5643_v41, %v5377_v0  ;;  %v7105_v42 = vpop.f32.mrb[169].mxu1  ;;  %v7255_v0 = vld [vmem:[%s8688_s13 + $0x20] sm:$0xff]  }
0x38f3   : > { %v5646_v43 = vpop.f32.mrb[170].mxu1 }
0x38f4   : > { %v8556_v44 = vadd.f32 %v5649_v26, %v8321_v5  ;;  %v7106_v56 = vpop.f32.mrb[171].mxu1  ;;  %v7253_v5 = vld [vmem:[%s8686_s11 + $0x18] sm:$0xff]  }
0x38f5   : > { %7110 = vmatpush3.bf16.msra.mxu0 %v7253_v5  ;;  %v5958_v56 = vcvt.s32.f32 %v7603_v40  ;;  %v5980_v5 = vld [vmem:[%s8678_s3] sm:$0xff] }
0x38f6   : > { %v5653_v47 = vmul.f32 %v8556_v44, %v8556_v44  ;;  %7123 = vmatprep.subr.bf16.mxu0 %v7419_v6 }
0x38f8   : > { %v5654_v49 = vsel %vm533_vm3, %v5653_v47, 0.0 }
0x38f9   : > { %5655 = vadd.xlane.f32.xlu1 %v5654_v49 }
0x3986   : > { %v5656_v45 = vpop.xlane.xlu1 %5655 }
0x3987   : > { %v5657_v57 = vmul.f32 0.03125, %v5656_v45  ;;  %v5982_v45 = vld [vmem:[%s8678_s3 + $0x10] sm:$0xff] }
0x3989   : > { %v5658_v10 = vadd.f32 1e-06, %v5657_v57  ;;  %v7429_v57 = vmov 0.0|0.0  }
0x398b   : > { %7401 = vrsqrt.f32 %v5658_v10  ;;  %v7179_v10 = vpack.c.bf16 %v5981_v54, %v5980_v5 }
0x3995   : > { %v7402_v58 = vpop.eup %7401 }
0x3996   : > { %v5660_v62 = vmul.f32 %v7402_v58, %v8556_v44  ;;  %v5983_v58 = vld [vmem:[%s8678_s3 + $0x18] sm:$0xff] }
0x3998   : > { %v5667_v63 = vmul.f32 %v6286_v60, %v5660_v62  ;;  %v7182_v60 = vpack.c.bf16 %v5983_v58, %v5982_v45  ;;  %v5984_v62 = vld [vmem:[%s8678_s3 + $0x20] sm:$0xff] }
0x399a   : > { %v5687_v29 = vpack.c.bf16 %v5667_v63, %v5667_v63  ;;  %v5985_v63 = vld [vmem:[%s8678_s3 + $0x28] sm:$0xff] }
0x399c   : > { %7112 = vmatmul.mubr.msk.bf16.vlgmr.msra.gmra.mrb[176].mxu0 %vm566_vm5, %v5687_v29  ;;  %7120 = vmatmul.mubr.msk.bf16.vlgmr.msra.gmra.mrb[172].mxu1 %vm566_vm5, %v5687_v29  ;;  %v7185_v29 = vpack.c.bf16 %v5985_v63, %v5984_v62 }
0x399d   : > { %7131 = vmatprep.mubr.msk.bf16.mxu0 %vm7420_vm4, %v7419_v6  ;;  %7139 = vmatprep.mubr.msk.bf16.mxu1 %vm7420_vm4, %v7419_v6 }
0x399e   : > { %7124 = vmatpush3.bf16.msra.mxu0 %v7255_v0  ;;  %7136 = vmatpush3.bf16.msra.mxu1 %v7259_v15  ;;  %v5986_v0 = vld [vmem:[%s8678_s3 + $0x30] sm:$0xff] }
0x399f   : > { %7125 = vmatprep.subr.bf16.mxu0 %v7419_v6  ;;  %7137 = vmatprep.subr.bf16.mxu1 %v7419_v6 }
0x39a2   : > { %7126 = vmatpush3.bf16.msra.mxu0 %v7256_v27  ;;  %7138 = vmatpush3.bf16.msra.mxu1 %v7260_v32  ;;  %v5987_v27 = vld [vmem:[%s8678_s3 + $0x38] sm:$0xff] }
0x39a3   : > { %7127 = vmatprep.subr.bf16.mxu0 %v7419_v6  ;;  %7178 = vmatprep.subr.bf16.mxu1 %v7429_v57 }
0x39a6   : > { %7128 = vmatpush3.bf16.msra.mxu0 %v7257_v1  ;;  %v7188_v1 = vpack.c.bf16 %v5987_v27, %v5986_v0 }
0x39a7   : > { %7129 = vmatprep.subr.bf16.mxu0 %v7419_v6 }
0x39aa   : > { %7130 = vmatpush3.bf16.msra.mxu0 %v7258_v30  ;;  %v5988_v30 = vld [vmem:[%s8678_s3 + $0x40] sm:$0xff] }
0x3a6f   : > { %v5737_v59 = vpop.f32.mrb[176].mxu0  ;;  %v5789_v4 = vpop.f32.mrb[172].mxu1 }
0x3a70   : > { %v5795_v53 = vmul.f32 %v5737_v59, %v5737_v59  ;;  %v7113_v31 = vpop.f32.mrb[177].mxu0  ;;  %v7121_v8 = vpop.f32.mrb[173].mxu1 }
0x3a71   : > { %v5740_v12 = vpop.f32.mrb[178].mxu0  ;;  %v5792_v24 = vpop.f32.mrb[174].mxu1  ;;  %v5991_v31 = vld [vmem:[%s8678_s3 + $0x58] sm:$0xff] }
0x3a72   : > { %v5796_v21 = vmul.f32 %v5795_v53, %v5737_v59  ;;  %v7114_v38 = vpop.f32.mrb[179].mxu0  ;;  %v7122_v61 = vpop.f32.mrb[175].mxu1  ;;  %v5990_v53 = vld [vmem:[%s8678_s3 + $0x50] sm:$0xff]  ;;  %v5992_v12 = vld [vmem:[%s8678_s3 + $0x60] sm:$0xff]  ;;  %v5993_v24 = vld [vmem:[%s8678_s3 + $0x68] sm:$0xff] }
0x3a73   : > { %v7194_v8 = vpack.c.bf16 %v5991_v31, %v5990_v53  ;;  %v5994_v38 = vld [vmem:[%s8678_s3 + $0x70] sm:$0xff]  ;;  %v5995_v61 = vld [vmem:[%s8678_s3 + $0x78] sm:$0xff] }
0x3a74   : > { %v5797_v7 = vmul.f32 0.044715, %v5796_v21  ;;  %v7197_v21 = vpack.c.bf16 %v5993_v24, %v5992_v12 }
0x3a76   : > { %v5798_v46 = vadd.f32 %v5797_v7, %v5737_v59  ;;  %v7200_v7 = vpack.c.bf16 %v5995_v61, %v5994_v38 }
0x3a78   : > { %v5799_v11 = vmul.f32 0.7978846, %v5798_v46  ;;  %v5964_v46 = vld [vmem:[#allocation5] sm:$0x3] }
0x3a7a   : > { %7403 = vtanh.f32 %v5799_v11 }
0x3a84   : > { %v7404_v13 = vpop.eup %7403 }
0x3a85   : > { %v5801_v14 = vadd.f32 1.0, %v7404_v13 }
0x3a87   : > { %v5802_v3 = vmul.f32 0.5, %v5801_v14 }
0x3a89   : > { %v5803_v17 = vmul.f32 %v5802_v3, %v5737_v59  ;;  %v5989_v59 = vld [vmem:[%s8678_s3 + $0x48] sm:$0xff] }
0x3a8b   : > { %v5804_v22 = vmul.f32 %v5803_v17, %v5789_v4  ;;  %v7191_v4 = vpack.c.bf16 %v5989_v59, %v5988_v30 }
0x3a8d   : > { %v5805_v51 = vpack.c.bf16 %v5804_v22, %v5804_v22 }
0x3a8f   : > { %7132 = vmatmul.mubr.msk.bf16.vlgmr.msra.gmra.mrb[180].mxu0 %vm3156_vm15, %v5805_v51  ;;  %v7430_v51 = vmov 1.0  }
0x3b62   : > { %v5867_v16 = vpop.f32.mrb[180].mxu0 }
0x3b63   : > { %v5873_v18 = vadd.f32 %v5867_v16, %v8556_v44  ;;  %v7133_v19 = vpop.f32.mrb[181].mxu0 }
0x3b64   : > { %v5870_v52 = vpop.f32.mrb[182].mxu0 }
0x3b65   : > { %v5875_v2 = vmul.f32 %v5873_v18, %v5873_v18  ;;  %v7134_v25 = vpop.f32.mrb[183].mxu0 }
0x3b67   : > { %v5876_v28 = vsel %vm533_vm3, %v5875_v2, 0.0 }
0x3b68   : > { %5877 = vadd.xlane.f32.xlu0 %v5876_v28 }
0x3bf5   : > { %v5878_v20 = vpop.xlane.xlu0 %5877 }
0x3bf6   : > { %v5879_v9 = vmul.f32 0.03125, %v5878_v20 }
0x3bf8   : > { %v5880_v33 = vadd.f32 1e-06, %v5879_v9 }
0x3bfa   : > { %7405 = vrsqrt.f32 %v5880_v33 }
0x3c04   : > { %v7406_v34 = vpop.eup %7405 }
0x3c05   : > { %v5882_v35 = vmul.f32 %v7406_v34, %v5873_v18 }
0x3c07   : > { %v5889_v37 = vmul.f32 %v6314_v36, %v5882_v35 }
0x3c09   : > { %v5890_v48 = vmul.f32 0.17677669, %v5889_v37 }
0x3c0b   : > { %v5891_v55 = vpack.c.bf16 %v5890_v48, %v5890_v48 }
0x3c0d   : > { %7140 = vmatmul.mubr.msk.bf16.vlgmr.msra.gmra.mrb[176].mxu1 %vm566_vm5, %v5891_v55  ;;  %vm5971_vm5 = vcmask 1024  }
0x3c0e   : > { %7175 = vmatprep.mubr.msk.f32.mxu1 %vm7420_vm4, %v7419_v6  ;;  %7180 = vmatpush3.bf16.msra.mxu1 %v7179_v10  ;;  %vm5965_vm4 = vcmp.gt.f32.partialorder %v5964_v46, 0.5 }
0x3c0f   : > { %7181 = vmatprep.subr.bf16.mxu1 %v7429_v57 }
0x3c12   : > { %7183 = vmatpush3.bf16.msra.mxu1 %v7182_v60 }
0x3c13   : > { %7184 = vmatprep.subr.bf16.mxu1 %v7429_v57 }
0x3c16   : > { %7186 = vmatpush3.bf16.msra.mxu1 %v7185_v29 }
0x3c17   : > { %7187 = vmatprep.subr.bf16.mxu1 %v7429_v57 }
0x3c1a   : > { %7189 = vmatpush3.bf16.msra.mxu1 %v7188_v1 }
0x3c1b   : > { %7190 = vmatprep.subr.bf16.mxu1 %v7429_v57 }
0x3c1e   : > { %7192 = vmatpush3.bf16.msra.mxu1 %v7191_v4 }
0x3c1f   : > { %7193 = vmatprep.subr.bf16.mxu1 %v7429_v57 }
0x3c22   : > { %7195 = vmatpush3.bf16.msra.mxu1 %v7194_v8 }
0x3c23   : > { %7196 = vmatprep.subr.bf16.mxu1 %v7429_v57 }
0x3c26   : > { %7198 = vmatpush3.bf16.msra.mxu1 %v7197_v21 }
0x3c27   : > { %7199 = vmatprep.subr.bf16.mxu1 %v7429_v57 }
0x3c2a   : > { %7201 = vmatpush3.bf16.msra.mxu1 %v7200_v7 }
0x3ce0   : > { %v5945_v39 = vpop.f32.mrb[176].mxu1 }
0x3ce1   : > { %v5952_v41 = vsel %vm5951_vm0, %v5945_v39, -1e+09  ;;  %v7141_v26 = vpop.f32.mrb[177].mxu1 }
0x3ce2   : > { %v5954_v42 = vsel %vm5953_vm1, %v5952_v41, -inf  ;;  %v5948_v43 = vpop.f32.mrb[178].mxu1 }
0x3ce3   : > { %5955 = vmax.xlane.f32.xlu1 %v5954_v42  ;;  %v7142_v44 = vpop.f32.mrb[179].mxu1 }
0x3d70   : > { %v5956_v47 = vpop.xlane.xlu1 %5955 }
0x3d71   : > { %vm5957_vm2 = vcmp.eq.f32.partialorder %v5952_v41, %v5956_v47 }
0x3d72   : > { %v5959_v49 = vsel %vm5957_vm2, %v5958_v56, 128.0 }
0x3d73   : > { %v5960_v23 = vsel %vm5953_vm1, %v5959_v49, inf }
0x3d74   : > { %5961 = vmin.xlane.f32.xlu0 %v5960_v23 }
0x3e01   : > { %v5962_v11 = vpop.xlane.xlu0 %5961 }
0x3e02   : > { %v7202_v13 = vtrunc.f32 %v5962_v11 }
0x3e04   : > { %v7203_v14 = vcvt.f32.s32 %v7202_v13 }
0x3e06   : > { %v5966_v3 = vsel %vm5965_vm4, 0, %v7203_v14 }
0x3e07   : > { %vm5967_vm6 = vcmp.eq.s32.totalorder %v5966_v3, 1  ;;  %5973 = vst.msk [vmem:[%s7531_s27] sm:$0x3] %vm5971_vm5, %v5966_v3  ;;  %5975 = vperm.xlu1 %7225, %v5966_v3  }
0x3e08   : > { %vm5968_vm7 = vmor %vm5965_vm4, %vm5967_vm6 }
0x3e09   : > { %v6318_v17 = vsel %vm5968_vm7, 1.0, %v7419_v6 }
0x3e0a   : > { %5972 = vst.msk [vmem:[#allocation5] sm:$0x3] %vm5971_vm5, %v6318_v17 }
0x3e86   : > { %v5976_v22 = vpop.permute.xlu1 %5975 }
0x3e87   : > { %vm5977_vm8 = vcmp.eq.s32.totalorder %v7603_v40, %v5976_v22 }
0x3e88   : > { %7176 = vmatmul.mubr.msk.f32.vlgmr.msra.gmra.mrb[180].mxu1 %vm5977_vm8, %v7430_v51 }
0x3f5b   : > { %v6062_v16 = vpop.f32.mrb[180].mxu1 }
0x3f5c   : > { %6066 = vst.msk [vmem:[#allocation4] sm:$0x3] %vm533_vm3, %v6062_v16  ;;  %v7177_v18 = vpop.f32.mrb[181].mxu1 }
0x3f5d PF: > { %s26_s21 = sadd.s32 1, %s7416_s21  }
0x3f5e   : > { %p23_p5 = scmp.ge.s32.totalorder %s26_s21, 10  }
0x3f60   :  { %25 = sbr.rel (!%p23_p5) target bundleno = 2 (0x2), region = 137 }

</bundles_post_ra>
